<compile_context>
chip_gen: v7x
topology: tpu7x:2x2x1
jax: 0.10.0
libtpu: 0.0.40
codegen_flags: <defaults>
</compile_context>

<pallas_src>
import functools

import numpy as np
import jax
import jax.numpy as jnp
from jax.experimental import pallas as pl
from jax.experimental.pallas import tpu as pltpu


def round_up(n, m=128):
    return ((n + m - 1) // m) * m


def _pick_tile(n, cap=8):
    """Largest divisor of n that is <= cap (batch tile for the conv grid)."""
    for t in range(min(cap, n), 0, -1):
        if n % t == 0:
            return t
    return 1


CONV_CFG = [  # (cin, cout, w_in (= h_in), w_conv_out)
    (1, 16, 20, 18),
    (16, 16, 17, 15),
    (16, 16, 14, 12),
]
C_OUT = 16
FLAT_H, FLAT_WC = 11, 11 * C_OUT          # conv-stack output layout (11, 176)
FC1_OUT_PAD = round_up(2000)              # 2048
FC2_OUT_PAD = round_up(1000)              # 1024
FC3_OUT_PAD = round_up(500)               # 512
FC4_OUT_PAD = round_up(200)               # 256
FC_TAIL_DIMS = [(2000, 1000), (1000, 500), (500, 200)]   # + (200, 3*N) final


# ---------------------------------------------------------------------------
# Fused conv stack: batch-tiled grid, up to 8 samples per step; activations
# stay in vregs in an (H, W*C) lane-dense layout; each conv layer is 3
# row-Toeplitz matmuls + bias + ReLU + maxpool(2, stride=1).
# ---------------------------------------------------------------------------
def conv_stack_kernel(x_ref, t1_ref, b1_ref, t2_ref, b2_ref, t3_ref, b3_ref,
                      o_ref):
    def conv_relu_pool(a, t_ref, b_ref):
        # a: (h_in, w_in*cin)  t_ref: (3, w_in*cin, w_out*C)  b_ref: (1, w_out*C)
        h_out = a.shape[0] - 2
        acc = jnp.dot(a[0:h_out, :], t_ref[0],
                      preferred_element_type=jnp.float32)
        acc = acc + jnp.dot(a[1:h_out + 1, :], t_ref[1],
                            preferred_element_type=jnp.float32)
        acc = acc + jnp.dot(a[2:h_out + 2, :], t_ref[2],
                            preferred_element_type=jnp.float32)
        y = jnp.maximum(acc + b_ref[...], 0.0)               # conv + bias + ReLU
        yh = jnp.maximum(y[:-1, :], y[1:, :])                 # MaxPool over H
        return jnp.maximum(yh[:, :-C_OUT], yh[:, C_OUT:])     # MaxPool over W

    for s in range(x_ref.shape[0]):               # static batch-tile unroll
        a = x_ref[s]                              # (20, 20), cin = 1
        a = conv_relu_pool(a, t1_ref, b1_ref)     # (17, 17*16)
        a = conv_relu_pool(a, t2_ref, b2_ref)     # (14, 14*16)
        a = conv_relu_pool(a, t3_ref, b3_ref)     # (11, 11*16)
        o_ref[s] = a.astype(o_ref.dtype)


def conv_stack(x, params):
    n = x.shape[0]
    bt = _pick_tile(n, cap=8)
    in_specs = [pl.BlockSpec((bt, 20, 20), lambda i: (i, 0, 0))]
    operands = [x]
    for li in range(1, 4):
        t = params[f"conv{li}_t"]
        b = params[f"conv{li}_b"]
        in_specs.append(pl.BlockSpec(t.shape, lambda i: (0, 0, 0)))
        in_specs.append(pl.BlockSpec(b.shape, lambda i: (0, 0)))
        operands += [t, b]
    return pl.pallas_call(
        conv_stack_kernel,
        out_shape=jax.ShapeDtypeStruct((n, FLAT_H, FLAT_WC), jnp.float32),
        grid=(n // bt,),
        in_specs=in_specs,
        out_specs=pl.BlockSpec((bt, FLAT_H, FLAT_WC), lambda i: (i, 0, 0)),
        compiler_params=pltpu.CompilerParams(
            dimension_semantics=("parallel",)),
    )(*operands)


# ---------------------------------------------------------------------------
# Fused FC path (fc1..fc5) in ONE pallas_call.
#   grid = (M tiles "parallel", fc1-N tiles "arbitrary")
#   step j: h1_j = relu(x @ W1[:, :, j] + b1_j)        (streamed bf16 W1 tile)
#           acc2 += h1_j @ W2[j, :]                    (streamed bf16 W2 K-tile)
#   last j: fc2 bias+ReLU, then fc3/fc4/fc5 (resident bf16 weights).
# Dropout layers are identity (inference mode).
# ---------------------------------------------------------------------------
def fc_fused_kernel(x_ref, w1_ref, b1_ref, w2_ref, b2_ref, w3_ref, b3_ref,
                    w4_ref, b4_ref, w5_ref, b5_ref, o_ref, acc2_ref):
    j = pl.program_id(1)

    @pl.when(j == 0)
    def _():
        acc2_ref[...] = jnp.zeros_like(acc2_ref)

    xv = x_ref[...].astype(jnp.bfloat16)                 # (tm, 11, 176)
    acc1 = jnp.dot(xv[:, 0, :], w1_ref[0], preferred_element_type=jnp.float32)
    for h in range(1, FLAT_H):
        acc1 = acc1 + jnp.dot(xv[:, h, :], w1_ref[h],
                              preferred_element_type=jnp.float32)
    h1 = jnp.maximum(acc1 + b1_ref[...], 0.0)            # fc1 tile + ReLU (f32)
    # TODO(synk): nn.Dropout(p=0.5) is implemented as identity (eval mode).
    acc2_ref[...] += jnp.dot(h1.astype(jnp.bfloat16), w2_ref[...],
                             preferred_element_type=jnp.float32)

    @pl.when(j == pl.num_programs(1) - 1)
    def _():
        h2 = jnp.maximum(acc2_ref[...] + b2_ref[...], 0.0)
        h3 = jnp.maximum(
            jnp.dot(h2.astype(jnp.bfloat16), w3_ref[...],
                    preferred_element_type=jnp.float32) + b3_ref[...], 0.0)
        h4 = jnp.maximum(
            jnp.dot(h3.astype(jnp.bfloat16), w4_ref[...],
                    preferred_element_type=jnp.float32) + b4_ref[...], 0.0)
        o_ref[...] = (jnp.dot(h4.astype(jnp.bfloat16), w5_ref[...],
                              preferred_element_type=jnp.float32)
                      + b5_ref[...]).astype(o_ref.dtype)


def fc_fused(a, params, *, tn=512):
    m = a.shape[0]
    n5 = params["fc5_w"].shape[1]
    tm = m if m <= 128 else 128                    # M-tile (caps VMEM, feeds
    m_pad = pl.cdiv(m, tm) * tm                    # both v7x TCs when batch>1)
    if m_pad != m:
        a = jnp.pad(a, ((0, m_pad - m), (0, 0), (0, 0)))
    n_tiles = FC1_OUT_PAD // tn
    out = pl.pallas_call(
        fc_fused_kernel,
        out_shape=jax.ShapeDtypeStruct((m_pad, n5), jnp.float32),
        grid=(m_pad // tm, n_tiles),
        in_specs=[
            pl.BlockSpec((tm, FLAT_H, FLAT_WC), lambda i, j: (i, 0, 0)),
            pl.BlockSpec((FLAT_H, FLAT_WC, tn), lambda i, j: (0, 0, j)),
            pl.BlockSpec((1, tn), lambda i, j: (0, j)),
            pl.BlockSpec((tn, FC2_OUT_PAD), lambda i, j: (j, 0)),
            pl.BlockSpec((1, FC2_OUT_PAD), lambda i, j: (0, 0)),
            pl.BlockSpec((FC2_OUT_PAD, FC3_OUT_PAD), lambda i, j: (0, 0)),
            pl.BlockSpec((1, FC3_OUT_PAD), lambda i, j: (0, 0)),
            pl.BlockSpec((FC3_OUT_PAD, FC4_OUT_PAD), lambda i, j: (0, 0)),
            pl.BlockSpec((1, FC4_OUT_PAD), lambda i, j: (0, 0)),
            pl.BlockSpec((FC4_OUT_PAD, n5), lambda i, j: (0, 0)),
            pl.BlockSpec((1, n5), lambda i, j: (0, 0)),
        ],
        out_specs=pl.BlockSpec((tm, n5), lambda i, j: (i, 0)),
        scratch_shapes=[pltpu.VMEM((tm, FC2_OUT_PAD), jnp.float32)],
        compiler_params=pltpu.CompilerParams(
            dimension_semantics=("parallel", "arbitrary"),
            vmem_limit_bytes=32 * 1024 * 1024),
    )(a, params["fc1_w"], params["fc1_b"], params["fc2_w"], params["fc2_b"],
      params["fc3_w"], params["fc3_b"], params["fc4_w"], params["fc4_b"],
      params["fc5_w"], params["fc5_b"])
    return out[:m]


# ---------------------------------------------------------------------------
# Parameters (deterministic, PyTorch-default-style uniform init), converted to
# the kernel layouts host-side.  FC weights are stored in bf16.
# ---------------------------------------------------------------------------
def _toeplitz(w_oihw, w_in, w_out):
    # Row-Toeplitz form: T[ki, wi*cin + ci, wo*cout + co] = w[co, ci, ki, wi-wo]
    w_np = np.asarray(w_oihw)
    cout, cin, kh, kw = w_np.shape
    t = np.zeros((kh, w_in * cin, w_out * cout), np.float32)
    for ki in range(kh):
        for kj in range(kw):
            blk = w_np[:, :, ki, kj].T                     # (cin, cout)
            for wo in range(w_out):
                wi = wo + kj
                t[ki, wi * cin:(wi + 1) * cin, wo * cout:(wo + 1) * cout] = blk
    return jnp.asarray(t)


def make_params(key, n_dipoles):
    keys = jax.random.split(key, 16)

    def uinit(k, shape, fan_in):
        bound = float(fan_in) ** -0.5
        return jax.random.uniform(k, shape, jnp.float32, -bound, bound)

    p = {}
    # conv layers: PyTorch OIHW init -> row-Toeplitz weights + tiled bias rows.
    for li, (cin, cout, w_in, w_co) in enumerate(CONV_CFG, start=1):
        w = uinit(keys[2 * (li - 1)], (cout, cin, 3, 3), cin * 9)
        b = uinit(keys[2 * (li - 1) + 1], (cout,), cin * 9)
        p[f"conv{li}_t"] = _toeplitz(w, w_in, w_co)
        p[f"conv{li}_b"] = jnp.tile(b, (w_co,)).reshape(1, w_co * cout)

    # fc1: torch layout (2000, 1936) with inputs flattened in (C, H, W) order,
    # re-laid out as (11, 176, 2048) matching the conv (H, W*C) output layout.
    flat = FLAT_H * FLAT_H * C_OUT                      # 1936
    w1 = uinit(keys[6], (2000, flat), flat)
    b1 = uinit(keys[7], (2000,), flat)
    w1_chw = np.asarray(w1).reshape(2000, C_OUT, FLAT_H, FLAT_H)   # (n,c,h,w)
    w1_r = np.zeros((FLAT_H, FLAT_WC, FC1_OUT_PAD), np.float32)
    w1_r[:, :, :2000] = np.transpose(w1_chw, (2, 3, 1, 0)).reshape(
        FLAT_H, FLAT_WC, 2000)
    p["fc1_w"] = jnp.asarray(w1_r).astype(jnp.bfloat16)
    p["fc1_b"] = jnp.pad(b1, (0, FC1_OUT_PAD - 2000)).reshape(1, FC1_OUT_PAD)

    # fc2..fc5: (in, out) layout, zero-padded to multiples of 128, bf16.
    dims = FC_TAIL_DIMS + [(200, 3 * n_dipoles)]
    kidx = 8
    for i, (din, dout) in enumerate(dims, start=2):
        w = uinit(keys[kidx], (dout, din), din)
        b = uinit(keys[kidx + 1], (dout,), din)
        kidx += 2
        dinp, doutp = round_up(din), round_up(dout)
        wp = jnp.zeros((dinp, doutp), jnp.float32).at[:din, :dout].set(w.T)
        bp = jnp.zeros((1, doutp), jnp.float32).at[0, :dout].set(b)
        p[f"fc{i}_w"] = wp.astype(jnp.bfloat16)
        p[f"fc{i}_b"] = bp
    return p


# ---------------------------------------------------------------------------
# Full forward pass (inference; dropout = identity).
# ---------------------------------------------------------------------------
def cnn_forward(x_nchw, params, *, n_dipoles):
    n = x_nchw.shape[0]
    x = x_nchw.reshape(n, 20, 20)                  # NCHW with C=1 -> (H, W)
    a = conv_stack(x, params)                      # (n, 11, 176), (h, w*c) layout
    out = fc_fused(a, params)                      # (n, 128): fc1..fc5 fused
    return out[:, :3 * n_dipoles]


if __name__ == "__main__":
    N_DIPOLES = 2
    key = jax.random.PRNGKey(0)
    kx, kp = jax.random.split(key)

    # PyTorch-style input: (batch, 1, 20, 20)
    x = jax.random.normal(kx, (2, 1, 20, 20), dtype=jnp.float32)
    params = make_params(kp, N_DIPOLES)

    fwd = jax.jit(functools.partial(cnn_forward, n_dipoles=N_DIPOLES))
    out = jax.block_until_ready(fwd(x, params))

    assert out.shape == (2, 3 * N_DIPOLES), out.shape
    assert bool(jnp.all(jnp.isfinite(out)))
    print("KERNEL_OK")
</pallas_src>

<mosaic_0001>
module attributes {stable_mosaic.version = 11 : i64} {
  func.func @conv_stack_kernel(%arg0: i32, %arg1: memref<2x20x20xf32, #tpu.memory_space<vmem>>, %arg2: memref<3x20x288xf32, #tpu.memory_space<vmem>>, %arg3: memref<1x288xf32, #tpu.memory_space<vmem>>, %arg4: memref<3x272x240xf32, #tpu.memory_space<vmem>>, %arg5: memref<1x240xf32, #tpu.memory_space<vmem>>, %arg6: memref<3x224x192xf32, #tpu.memory_space<vmem>>, %arg7: memref<1x192xf32, #tpu.memory_space<vmem>>, %arg8: memref<2x11x176xf32, #tpu.memory_space<vmem>>) attributes {dimension_semantics = [#tpu.dimension_semantics<parallel>], iteration_bounds = array<i64: 1>, scalar_prefetch = 0 : i64, scratch_operands = 0 : i64, tpu.core_type = #tpu.core_type<tc>, window_params = [{transform_indices = @transform_0, window_bounds = array<i64: 2, 20, 20>}, {pipeline_mode = #tpu.pipeline_mode<synchronous>, transform_indices = @transform_1, window_bounds = array<i64: 3, 20, 288>}, {pipeline_mode = #tpu.pipeline_mode<synchronous>, transform_indices = @transform_2, window_bounds = array<i64: 1, 288>}, {pipeline_mode = #tpu.pipeline_mode<synchronous>, transform_indices = @transform_3, window_bounds = array<i64: 3, 272, 240>}, {pipeline_mode = #tpu.pipeline_mode<synchronous>, transform_indices = @transform_4, window_bounds = array<i64: 1, 240>}, {pipeline_mode = #tpu.pipeline_mode<synchronous>, transform_indices = @transform_5, window_bounds = array<i64: 3, 224, 192>}, {pipeline_mode = #tpu.pipeline_mode<synchronous>, transform_indices = @transform_6, window_bounds = array<i64: 1, 192>}, {transform_indices = @transform_7, window_bounds = array<i64: 2, 11, 176>}]} {
    %c0 = arith.constant 0 : index
    %c0_0 = arith.constant 0 : index
    %c0_1 = arith.constant 0 : index
    %0 = vector.load %arg1[%c0, %c0_0, %c0_1] : memref<2x20x20xf32, #tpu.memory_space<vmem>>, vector<1x20x20xf32>
    %1 = vector.shape_cast %0 : vector<1x20x20xf32> to vector<20x20xf32>
    %2 = vector.extract_strided_slice %1 {offsets = [0, 0], sizes = [18, 20], strides = [1, 1]} : vector<20x20xf32> to vector<18x20xf32>
    %c0_2 = arith.constant 0 : index
    %c0_3 = arith.constant 0 : index
    %c0_4 = arith.constant 0 : index
    %3 = vector.load %arg2[%c0_2, %c0_3, %c0_4] : memref<3x20x288xf32, #tpu.memory_space<vmem>>, vector<1x20x288xf32>
    %4 = vector.shape_cast %3 : vector<1x20x288xf32> to vector<20x288xf32>
    %cst = arith.constant dense<0.000000e+00> : vector<18x288xf32>
    %5 = tpu.matmul %2, %4, %cst {dimension_numbers = #tpu.dot_dimension_numbers<[1], [0], [0], [1], [0, 0, 1, 1], [], []>} : vector<18x20xf32>, vector<20x288xf32>, vector<18x288xf32> -> vector<18x288xf32>
    %6 = vector.extract_strided_slice %1 {offsets = [1, 0], sizes = [18, 20], strides = [1, 1]} : vector<20x20xf32> to vector<18x20xf32>
    %c1 = arith.constant 1 : index
    %c0_5 = arith.constant 0 : index
    %c0_6 = arith.constant 0 : index
    %7 = vector.load %arg2[%c1, %c0_5, %c0_6] : memref<3x20x288xf32, #tpu.memory_space<vmem>>, vector<1x20x288xf32>
    %8 = vector.shape_cast %7 : vector<1x20x288xf32> to vector<20x288xf32>
    %cst_7 = arith.constant dense<0.000000e+00> : vector<18x288xf32>
    %9 = tpu.matmul %6, %8, %cst_7 {dimension_numbers = #tpu.dot_dimension_numbers<[1], [0], [0], [1], [0, 0, 1, 1], [], []>} : vector<18x20xf32>, vector<20x288xf32>, vector<18x288xf32> -> vector<18x288xf32>
    %10 = arith.addf %5, %9 : vector<18x288xf32>
    %11 = vector.extract_strided_slice %1 {offsets = [2, 0], sizes = [18, 20], strides = [1, 1]} : vector<20x20xf32> to vector<18x20xf32>
    %c2 = arith.constant 2 : index
    %c0_8 = arith.constant 0 : index
    %c0_9 = arith.constant 0 : index
    %12 = vector.load %arg2[%c2, %c0_8, %c0_9] : memref<3x20x288xf32, #tpu.memory_space<vmem>>, vector<1x20x288xf32>
    %13 = vector.shape_cast %12 : vector<1x20x288xf32> to vector<20x288xf32>
    %cst_10 = arith.constant dense<0.000000e+00> : vector<18x288xf32>
    %14 = tpu.matmul %11, %13, %cst_10 {dimension_numbers = #tpu.dot_dimension_numbers<[1], [0], [0], [1], [0, 0, 1, 1], [], []>} : vector<18x20xf32>, vector<20x288xf32>, vector<18x288xf32> -> vector<18x288xf32>
    %15 = arith.addf %10, %14 : vector<18x288xf32>
    %c0_11 = arith.constant 0 : index
    %c0_12 = arith.constant 0 : index
    %16 = vector.load %arg3[%c0_11, %c0_12] : memref<1x288xf32, #tpu.memory_space<vmem>>, vector<1x288xf32>
    %17 = vector.broadcast %16 : vector<1x288xf32> to vector<18x288xf32>
    %18 = arith.addf %15, %17 : vector<18x288xf32>
    %cst_13 = arith.constant 0.000000e+00 : f32
    %19 = vector.broadcast %cst_13 : f32 to vector<18x288xf32>
    %20 = arith.maximumf %18, %19 : vector<18x288xf32>
    %21 = vector.extract_strided_slice %20 {offsets = [0, 0], sizes = [17, 288], strides = [1, 1]} : vector<18x288xf32> to vector<17x288xf32>
    %22 = vector.extract_strided_slice %20 {offsets = [1, 0], sizes = [17, 288], strides = [1, 1]} : vector<18x288xf32> to vector<17x288xf32>
    %23 = arith.maximumf %21, %22 : vector<17x288xf32>
    %24 = vector.extract_strided_slice %23 {offsets = [0, 0], sizes = [17, 272], strides = [1, 1]} : vector<17x288xf32> to vector<17x272xf32>
    %25 = vector.extract_strided_slice %23 {offsets = [0, 16], sizes = [17, 272], strides = [1, 1]} : vector<17x288xf32> to vector<17x272xf32>
    %26 = arith.maximumf %24, %25 : vector<17x272xf32>
    %27 = vector.extract_strided_slice %26 {offsets = [0, 0], sizes = [15, 272], strides = [1, 1]} : vector<17x272xf32> to vector<15x272xf32>
    %c0_14 = arith.constant 0 : index
    %c0_15 = arith.constant 0 : index
    %c0_16 = arith.constant 0 : index
    %28 = vector.load %arg4[%c0_14, %c0_15, %c0_16] : memref<3x272x240xf32, #tpu.memory_space<vmem>>, vector<1x272x240xf32>
    %29 = vector.shape_cast %28 : vector<1x272x240xf32> to vector<272x240xf32>
    %cst_17 = arith.constant dense<0.000000e+00> : vector<15x240xf32>
    %30 = tpu.matmul %27, %29, %cst_17 {dimension_numbers = #tpu.dot_dimension_numbers<[1], [0], [0], [1], [0, 0, 1, 1], [], []>} : vector<15x272xf32>, vector<272x240xf32>, vector<15x240xf32> -> vector<15x240xf32>
    %31 = vector.extract_strided_slice %26 {offsets = [1, 0], sizes = [15, 272], strides = [1, 1]} : vector<17x272xf32> to vector<15x272xf32>
    %c1_18 = arith.constant 1 : index
    %c0_19 = arith.constant 0 : index
    %c0_20 = arith.constant 0 : index
    %32 = vector.load %arg4[%c1_18, %c0_19, %c0_20] : memref<3x272x240xf32, #tpu.memory_space<vmem>>, vector<1x272x240xf32>
    %33 = vector.shape_cast %32 : vector<1x272x240xf32> to vector<272x240xf32>
    %cst_21 = arith.constant dense<0.000000e+00> : vector<15x240xf32>
    %34 = tpu.matmul %31, %33, %cst_21 {dimension_numbers = #tpu.dot_dimension_numbers<[1], [0], [0], [1], [0, 0, 1, 1], [], []>} : vector<15x272xf32>, vector<272x240xf32>, vector<15x240xf32> -> vector<15x240xf32>
    %35 = arith.addf %30, %34 : vector<15x240xf32>
    %36 = vector.extract_strided_slice %26 {offsets = [2, 0], sizes = [15, 272], strides = [1, 1]} : vector<17x272xf32> to vector<15x272xf32>
    %c2_22 = arith.constant 2 : index
    %c0_23 = arith.constant 0 : index
    %c0_24 = arith.constant 0 : index
    %37 = vector.load %arg4[%c2_22, %c0_23, %c0_24] : memref<3x272x240xf32, #tpu.memory_space<vmem>>, vector<1x272x240xf32>
    %38 = vector.shape_cast %37 : vector<1x272x240xf32> to vector<272x240xf32>
    %cst_25 = arith.constant dense<0.000000e+00> : vector<15x240xf32>
    %39 = tpu.matmul %36, %38, %cst_25 {dimension_numbers = #tpu.dot_dimension_numbers<[1], [0], [0], [1], [0, 0, 1, 1], [], []>} : vector<15x272xf32>, vector<272x240xf32>, vector<15x240xf32> -> vector<15x240xf32>
    %40 = arith.addf %35, %39 : vector<15x240xf32>
    %c0_26 = arith.constant 0 : index
    %c0_27 = arith.constant 0 : index
    %41 = vector.load %arg5[%c0_26, %c0_27] : memref<1x240xf32, #tpu.memory_space<vmem>>, vector<1x240xf32>
    %42 = vector.broadcast %41 : vector<1x240xf32> to vector<15x240xf32>
    %43 = arith.addf %40, %42 : vector<15x240xf32>
    %cst_28 = arith.constant 0.000000e+00 : f32
    %44 = vector.broadcast %cst_28 : f32 to vector<15x240xf32>
    %45 = arith.maximumf %43, %44 : vector<15x240xf32>
    %46 = vector.extract_strided_slice %45 {offsets = [0, 0], sizes = [14, 240], strides = [1, 1]} : vector<15x240xf32> to vector<14x240xf32>
    %47 = vector.extract_strided_slice %45 {offsets = [1, 0], sizes = [14, 240], strides = [1, 1]} : vector<15x240xf32> to vector<14x240xf32>
    %48 = arith.maximumf %46, %47 : vector<14x240xf32>
    %49 = vector.extract_strided_slice %48 {offsets = [0, 0], sizes = [14, 224], strides = [1, 1]} : vector<14x240xf32> to vector<14x224xf32>
    %50 = vector.extract_strided_slice %48 {offsets = [0, 16], sizes = [14, 224], strides = [1, 1]} : vector<14x240xf32> to vector<14x224xf32>
    %51 = arith.maximumf %49, %50 : vector<14x224xf32>
    %52 = vector.extract_strided_slice %51 {offsets = [0, 0], sizes = [12, 224], strides = [1, 1]} : vector<14x224xf32> to vector<12x224xf32>
    %c0_29 = arith.constant 0 : index
    %c0_30 = arith.constant 0 : index
    %c0_31 = arith.constant 0 : index
    %53 = vector.load %arg6[%c0_29, %c0_30, %c0_31] : memref<3x224x192xf32, #tpu.memory_space<vmem>>, vector<1x224x192xf32>
    %54 = vector.shape_cast %53 : vector<1x224x192xf32> to vector<224x192xf32>
    %cst_32 = arith.constant dense<0.000000e+00> : vector<12x192xf32>
    %55 = tpu.matmul %52, %54, %cst_32 {dimension_numbers = #tpu.dot_dimension_numbers<[1], [0], [0], [1], [0, 0, 1, 1], [], []>} : vector<12x224xf32>, vector<224x192xf32>, vector<12x192xf32> -> vector<12x192xf32>
    %56 = vector.extract_strided_slice %51 {offsets = [1, 0], sizes = [12, 224], strides = [1, 1]} : vector<14x224xf32> to vector<12x224xf32>
    %c1_33 = arith.constant 1 : index
    %c0_34 = arith.constant 0 : index
    %c0_35 = arith.constant 0 : index
    %57 = vector.load %arg6[%c1_33, %c0_34, %c0_35] : memref<3x224x192xf32, #tpu.memory_space<vmem>>, vector<1x224x192xf32>
    %58 = vector.shape_cast %57 : vector<1x224x192xf32> to vector<224x192xf32>
    %cst_36 = arith.constant dense<0.000000e+00> : vector<12x192xf32>
    %59 = tpu.matmul %56, %58, %cst_36 {dimension_numbers = #tpu.dot_dimension_numbers<[1], [0], [0], [1], [0, 0, 1, 1], [], []>} : vector<12x224xf32>, vector<224x192xf32>, vector<12x192xf32> -> vector<12x192xf32>
    %60 = arith.addf %55, %59 : vector<12x192xf32>
    %61 = vector.extract_strided_slice %51 {offsets = [2, 0], sizes = [12, 224], strides = [1, 1]} : vector<14x224xf32> to vector<12x224xf32>
    %c2_37 = arith.constant 2 : index
    %c0_38 = arith.constant 0 : index
    %c0_39 = arith.constant 0 : index
    %62 = vector.load %arg6[%c2_37, %c0_38, %c0_39] : memref<3x224x192xf32, #tpu.memory_space<vmem>>, vector<1x224x192xf32>
    %63 = vector.shape_cast %62 : vector<1x224x192xf32> to vector<224x192xf32>
    %cst_40 = arith.constant dense<0.000000e+00> : vector<12x192xf32>
    %64 = tpu.matmul %61, %63, %cst_40 {dimension_numbers = #tpu.dot_dimension_numbers<[1], [0], [0], [1], [0, 0, 1, 1], [], []>} : vector<12x224xf32>, vector<224x192xf32>, vector<12x192xf32> -> vector<12x192xf32>
    %65 = arith.addf %60, %64 : vector<12x192xf32>
    %c0_41 = arith.constant 0 : index
    %c0_42 = arith.constant 0 : index
    %66 = vector.load %arg7[%c0_41, %c0_42] : memref<1x192xf32, #tpu.memory_space<vmem>>, vector<1x192xf32>
    %67 = vector.broadcast %66 : vector<1x192xf32> to vector<12x192xf32>
    %68 = arith.addf %65, %67 : vector<12x192xf32>
    %cst_43 = arith.constant 0.000000e+00 : f32
    %69 = vector.broadcast %cst_43 : f32 to vector<12x192xf32>
    %70 = arith.maximumf %68, %69 : vector<12x192xf32>
    %71 = vector.extract_strided_slice %70 {offsets = [0, 0], sizes = [11, 192], strides = [1, 1]} : vector<12x192xf32> to vector<11x192xf32>
    %72 = vector.extract_strided_slice %70 {offsets = [1, 0], sizes = [11, 192], strides = [1, 1]} : vector<12x192xf32> to vector<11x192xf32>
    %73 = arith.maximumf %71, %72 : vector<11x192xf32>
    %74 = vector.extract_strided_slice %73 {offsets = [0, 0], sizes = [11, 176], strides = [1, 1]} : vector<11x192xf32> to vector<11x176xf32>
    %75 = vector.extract_strided_slice %73 {offsets = [0, 16], sizes = [11, 176], strides = [1, 1]} : vector<11x192xf32> to vector<11x176xf32>
    %76 = arith.maximumf %74, %75 : vector<11x176xf32>
    %c0_44 = arith.constant 0 : index
    %c0_45 = arith.constant 0 : index
    %c0_46 = arith.constant 0 : index
    %77 = vector.load %arg8[%c0_44, %c0_45, %c0_46] : memref<2x11x176xf32, #tpu.memory_space<vmem>>, vector<1x11x176xf32>
    %78 = vector.shape_cast %77 : vector<1x11x176xf32> to vector<11x176xf32>
    %79 = vector.shape_cast %76 : vector<11x176xf32> to vector<1x11x176xf32>
    tpu.vector_store %arg8[%c0_44, %c0_45, %c0_46], %79 {strides = array<i32>} : memref<2x11x176xf32, #tpu.memory_space<vmem>>, vector<1x11x176xf32>,
    %c1_47 = arith.constant 1 : index
    %c0_48 = arith.constant 0 : index
    %c0_49 = arith.constant 0 : index
    %80 = vector.load %arg1[%c1_47, %c0_48, %c0_49] : memref<2x20x20xf32, #tpu.memory_space<vmem>>, vector<1x20x20xf32>
    %81 = vector.shape_cast %80 : vector<1x20x20xf32> to vector<20x20xf32>
    %82 = vector.extract_strided_slice %81 {offsets = [0, 0], sizes = [18, 20], strides = [1, 1]} : vector<20x20xf32> to vector<18x20xf32>
    %c0_50 = arith.constant 0 : index
    %c0_51 = arith.constant 0 : index
    %c0_52 = arith.constant 0 : index
    %83 = vector.load %arg2[%c0_50, %c0_51, %c0_52] : memref<3x20x288xf32, #tpu.memory_space<vmem>>, vector<1x20x288xf32>
    %84 = vector.shape_cast %83 : vector<1x20x288xf32> to vector<20x288xf32>
    %cst_53 = arith.constant dense<0.000000e+00> : vector<18x288xf32>
    %85 = tpu.matmul %82, %84, %cst_53 {dimension_numbers = #tpu.dot_dimension_numbers<[1], [0], [0], [1], [0, 0, 1, 1], [], []>} : vector<18x20xf32>, vector<20x288xf32>, vector<18x288xf32> -> vector<18x288xf32>
    %86 = vector.extract_strided_slice %81 {offsets = [1, 0], sizes = [18, 20], strides = [1, 1]} : vector<20x20xf32> to vector<18x20xf32>
    %c1_54 = arith.constant 1 : index
    %c0_55 = arith.constant 0 : index
    %c0_56 = arith.constant 0 : index
    %87 = vector.load %arg2[%c1_54, %c0_55, %c0_56] : memref<3x20x288xf32, #tpu.memory_space<vmem>>, vector<1x20x288xf32>
    %88 = vector.shape_cast %87 : vector<1x20x288xf32> to vector<20x288xf32>
    %cst_57 = arith.constant dense<0.000000e+00> : vector<18x288xf32>
    %89 = tpu.matmul %86, %88, %cst_57 {dimension_numbers = #tpu.dot_dimension_numbers<[1], [0], [0], [1], [0, 0, 1, 1], [], []>} : vector<18x20xf32>, vector<20x288xf32>, vector<18x288xf32> -> vector<18x288xf32>
    %90 = arith.addf %85, %89 : vector<18x288xf32>
    %91 = vector.extract_strided_slice %81 {offsets = [2, 0], sizes = [18, 20], strides = [1, 1]} : vector<20x20xf32> to vector<18x20xf32>
    %c2_58 = arith.constant 2 : index
    %c0_59 = arith.constant 0 : index
    %c0_60 = arith.constant 0 : index
    %92 = vector.load %arg2[%c2_58, %c0_59, %c0_60] : memref<3x20x288xf32, #tpu.memory_space<vmem>>, vector<1x20x288xf32>
    %93 = vector.shape_cast %92 : vector<1x20x288xf32> to vector<20x288xf32>
    %cst_61 = arith.constant dense<0.000000e+00> : vector<18x288xf32>
    %94 = tpu.matmul %91, %93, %cst_61 {dimension_numbers = #tpu.dot_dimension_numbers<[1], [0], [0], [1], [0, 0, 1, 1], [], []>} : vector<18x20xf32>, vector<20x288xf32>, vector<18x288xf32> -> vector<18x288xf32>
    %95 = arith.addf %90, %94 : vector<18x288xf32>
    %c0_62 = arith.constant 0 : index
    %c0_63 = arith.constant 0 : index
    %96 = vector.load %arg3[%c0_62, %c0_63] : memref<1x288xf32, #tpu.memory_space<vmem>>, vector<1x288xf32>
    %97 = vector.broadcast %96 : vector<1x288xf32> to vector<18x288xf32>
    %98 = arith.addf %95, %97 : vector<18x288xf32>
    %cst_64 = arith.constant 0.000000e+00 : f32
    %99 = vector.broadcast %cst_64 : f32 to vector<18x288xf32>
    %100 = arith.maximumf %98, %99 : vector<18x288xf32>
    %101 = vector.extract_strided_slice %100 {offsets = [0, 0], sizes = [17, 288], strides = [1, 1]} : vector<18x288xf32> to vector<17x288xf32>
    %102 = vector.extract_strided_slice %100 {offsets = [1, 0], sizes = [17, 288], strides = [1, 1]} : vector<18x288xf32> to vector<17x288xf32>
    %103 = arith.maximumf %101, %102 : vector<17x288xf32>
    %104 = vector.extract_strided_slice %103 {offsets = [0, 0], sizes = [17, 272], strides = [1, 1]} : vector<17x288xf32> to vector<17x272xf32>
    %105 = vector.extract_strided_slice %103 {offsets = [0, 16], sizes = [17, 272], strides = [1, 1]} : vector<17x288xf32> to vector<17x272xf32>
    %106 = arith.maximumf %104, %105 : vector<17x272xf32>
    %107 = vector.extract_strided_slice %106 {offsets = [0, 0], sizes = [15, 272], strides = [1, 1]} : vector<17x272xf32> to vector<15x272xf32>
    %c0_65 = arith.constant 0 : index
    %c0_66 = arith.constant 0 : index
    %c0_67 = arith.constant 0 : index
    %108 = vector.load %arg4[%c0_65, %c0_66, %c0_67] : memref<3x272x240xf32, #tpu.memory_space<vmem>>, vector<1x272x240xf32>
    %109 = vector.shape_cast %108 : vector<1x272x240xf32> to vector<272x240xf32>
    %cst_68 = arith.constant dense<0.000000e+00> : vector<15x240xf32>
    %110 = tpu.matmul %107, %109, %cst_68 {dimension_numbers = #tpu.dot_dimension_numbers<[1], [0], [0], [1], [0, 0, 1, 1], [], []>} : vector<15x272xf32>, vector<272x240xf32>, vector<15x240xf32> -> vector<15x240xf32>
    %111 = vector.extract_strided_slice %106 {offsets = [1, 0], sizes = [15, 272], strides = [1, 1]} : vector<17x272xf32> to vector<15x272xf32>
    %c1_69 = arith.constant 1 : index
    %c0_70 = arith.constant 0 : index
    %c0_71 = arith.constant 0 : index
    %112 = vector.load %arg4[%c1_69, %c0_70, %c0_71] : memref<3x272x240xf32, #tpu.memory_space<vmem>>, vector<1x272x240xf32>
    %113 = vector.shape_cast %112 : vector<1x272x240xf32> to vector<272x240xf32>
    %cst_72 = arith.constant dense<0.000000e+00> : vector<15x240xf32>
    %114 = tpu.matmul %111, %113, %cst_72 {dimension_numbers = #tpu.dot_dimension_numbers<[1], [0], [0], [1], [0, 0, 1, 1], [], []>} : vector<15x272xf32>, vector<272x240xf32>, vector<15x240xf32> -> vector<15x240xf32>
    %115 = arith.addf %110, %114 : vector<15x240xf32>
    %116 = vector.extract_strided_slice %106 {offsets = [2, 0], sizes = [15, 272], strides = [1, 1]} : vector<17x272xf32> to vector<15x272xf32>
    %c2_73 = arith.constant 2 : index
    %c0_74 = arith.constant 0 : index
    %c0_75 = arith.constant 0 : index
    %117 = vector.load %arg4[%c2_73, %c0_74, %c0_75] : memref<3x272x240xf32, #tpu.memory_space<vmem>>, vector<1x272x240xf32>
    %118 = vector.shape_cast %117 : vector<1x272x240xf32> to vector<272x240xf32>
    %cst_76 = arith.constant dense<0.000000e+00> : vector<15x240xf32>
    %119 = tpu.matmul %116, %118, %cst_76 {dimension_numbers = #tpu.dot_dimension_numbers<[1], [0], [0], [1], [0, 0, 1, 1], [], []>} : vector<15x272xf32>, vector<272x240xf32>, vector<15x240xf32> -> vector<15x240xf32>
    %120 = arith.addf %115, %119 : vector<15x240xf32>
    %c0_77 = arith.constant 0 : index
    %c0_78 = arith.constant 0 : index
    %121 = vector.load %arg5[%c0_77, %c0_78] : memref<1x240xf32, #tpu.memory_space<vmem>>, vector<1x240xf32>
    %122 = vector.broadcast %121 : vector<1x240xf32> to vector<15x240xf32>
    %123 = arith.addf %120, %122 : vector<15x240xf32>
    %cst_79 = arith.constant 0.000000e+00 : f32
    %124 = vector.broadcast %cst_79 : f32 to vector<15x240xf32>
    %125 = arith.maximumf %123, %124 : vector<15x240xf32>
    %126 = vector.extract_strided_slice %125 {offsets = [0, 0], sizes = [14, 240], strides = [1, 1]} : vector<15x240xf32> to vector<14x240xf32>
    %127 = vector.extract_strided_slice %125 {offsets = [1, 0], sizes = [14, 240], strides = [1, 1]} : vector<15x240xf32> to vector<14x240xf32>
    %128 = arith.maximumf %126, %127 : vector<14x240xf32>
    %129 = vector.extract_strided_slice %128 {offsets = [0, 0], sizes = [14, 224], strides = [1, 1]} : vector<14x240xf32> to vector<14x224xf32>
    %130 = vector.extract_strided_slice %128 {offsets = [0, 16], sizes = [14, 224], strides = [1, 1]} : vector<14x240xf32> to vector<14x224xf32>
    %131 = arith.maximumf %129, %130 : vector<14x224xf32>
    %132 = vector.extract_strided_slice %131 {offsets = [0, 0], sizes = [12, 224], strides = [1, 1]} : vector<14x224xf32> to vector<12x224xf32>
    %c0_80 = arith.constant 0 : index
    %c0_81 = arith.constant 0 : index
    %c0_82 = arith.constant 0 : index
    %133 = vector.load %arg6[%c0_80, %c0_81, %c0_82] : memref<3x224x192xf32, #tpu.memory_space<vmem>>, vector<1x224x192xf32>
    %134 = vector.shape_cast %133 : vector<1x224x192xf32> to vector<224x192xf32>
    %cst_83 = arith.constant dense<0.000000e+00> : vector<12x192xf32>
    %135 = tpu.matmul %132, %134, %cst_83 {dimension_numbers = #tpu.dot_dimension_numbers<[1], [0], [0], [1], [0, 0, 1, 1], [], []>} : vector<12x224xf32>, vector<224x192xf32>, vector<12x192xf32> -> vector<12x192xf32>
    %136 = vector.extract_strided_slice %131 {offsets = [1, 0], sizes = [12, 224], strides = [1, 1]} : vector<14x224xf32> to vector<12x224xf32>
    %c1_84 = arith.constant 1 : index
    %c0_85 = arith.constant 0 : index
    %c0_86 = arith.constant 0 : index
    %137 = vector.load %arg6[%c1_84, %c0_85, %c0_86] : memref<3x224x192xf32, #tpu.memory_space<vmem>>, vector<1x224x192xf32>
    %138 = vector.shape_cast %137 : vector<1x224x192xf32> to vector<224x192xf32>
    %cst_87 = arith.constant dense<0.000000e+00> : vector<12x192xf32>
    %139 = tpu.matmul %136, %138, %cst_87 {dimension_numbers = #tpu.dot_dimension_numbers<[1], [0], [0], [1], [0, 0, 1, 1], [], []>} : vector<12x224xf32>, vector<224x192xf32>, vector<12x192xf32> -> vector<12x192xf32>
    %140 = arith.addf %135, %139 : vector<12x192xf32>
    %141 = vector.extract_strided_slice %131 {offsets = [2, 0], sizes = [12, 224], strides = [1, 1]} : vector<14x224xf32> to vector<12x224xf32>
    %c2_88 = arith.constant 2 : index
    %c0_89 = arith.constant 0 : index
    %c0_90 = arith.constant 0 : index
    %142 = vector.load %arg6[%c2_88, %c0_89, %c0_90] : memref<3x224x192xf32, #tpu.memory_space<vmem>>, vector<1x224x192xf32>
    %143 = vector.shape_cast %142 : vector<1x224x192xf32> to vector<224x192xf32>
    %cst_91 = arith.constant dense<0.000000e+00> : vector<12x192xf32>
    %144 = tpu.matmul %141, %143, %cst_91 {dimension_numbers = #tpu.dot_dimension_numbers<[1], [0], [0], [1], [0, 0, 1, 1], [], []>} : vector<12x224xf32>, vector<224x192xf32>, vector<12x192xf32> -> vector<12x192xf32>
    %145 = arith.addf %140, %144 : vector<12x192xf32>
    %c0_92 = arith.constant 0 : index
    %c0_93 = arith.constant 0 : index
    %146 = vector.load %arg7[%c0_92, %c0_93] : memref<1x192xf32, #tpu.memory_space<vmem>>, vector<1x192xf32>
    %147 = vector.broadcast %146 : vector<1x192xf32> to vector<12x192xf32>
    %148 = arith.addf %145, %147 : vector<12x192xf32>
    %cst_94 = arith.constant 0.000000e+00 : f32
    %149 = vector.broadcast %cst_94 : f32 to vector<12x192xf32>
    %150 = arith.maximumf %148, %149 : vector<12x192xf32>
    %151 = vector.extract_strided_slice %150 {offsets = [0, 0], sizes = [11, 192], strides = [1, 1]} : vector<12x192xf32> to vector<11x192xf32>
    %152 = vector.extract_strided_slice %150 {offsets = [1, 0], sizes = [11, 192], strides = [1, 1]} : vector<12x192xf32> to vector<11x192xf32>
    %153 = arith.maximumf %151, %152 : vector<11x192xf32>
    %154 = vector.extract_strided_slice %153 {offsets = [0, 0], sizes = [11, 176], strides = [1, 1]} : vector<11x192xf32> to vector<11x176xf32>
    %155 = vector.extract_strided_slice %153 {offsets = [0, 16], sizes = [11, 176], strides = [1, 1]} : vector<11x192xf32> to vector<11x176xf32>
    %156 = arith.maximumf %154, %155 : vector<11x176xf32>
    %c1_95 = arith.constant 1 : index
    %c0_96 = arith.constant 0 : index
    %c0_97 = arith.constant 0 : index
    %157 = vector.load %arg8[%c1_95, %c0_96, %c0_97] : memref<2x11x176xf32, #tpu.memory_space<vmem>>, vector<1x11x176xf32>
    %158 = vector.shape_cast %157 : vector<1x11x176xf32> to vector<11x176xf32>
    %159 = vector.shape_cast %156 : vector<11x176xf32> to vector<1x11x176xf32>
    tpu.vector_store %arg8[%c1_95, %c0_96, %c0_97], %159 {strides = array<i32>} : memref<2x11x176xf32, #tpu.memory_space<vmem>>, vector<1x11x176xf32>,
    return
  }
  func.func @transform_0(%arg0: i32) -> (i32, i32, i32) {
    %c0_i32 = arith.constant 0 : i32
    %c0_i32_0 = arith.constant 0 : i32
    %c0_i32_1 = arith.constant 0 : i32
    return %arg0, %c0_i32, %c0_i32_0 : i32, i32, i32
  }
  func.func @transform_1(%arg0: i32) -> (i32, i32, i32) {
    %c0_i32 = arith.constant 0 : i32
    %c0_i32_0 = arith.constant 0 : i32
    %c0_i32_1 = arith.constant 0 : i32
    %c0_i32_2 = arith.constant 0 : i32
    return %c0_i32, %c0_i32_0, %c0_i32_1 : i32, i32, i32
  }
  func.func @transform_2(%arg0: i32) -> (i32, i32) {
    %c0_i32 = arith.constant 0 : i32
    %c0_i32_0 = arith.constant 0 : i32
    %c0_i32_1 = arith.constant 0 : i32
    return %c0_i32, %c0_i32_0 : i32, i32
  }
  func.func @transform_3(%arg0: i32) -> (i32, i32, i32) {
    %c0_i32 = arith.constant 0 : i32
    %c0_i32_0 = arith.constant 0 : i32
    %c0_i32_1 = arith.constant 0 : i32
    %c0_i32_2 = arith.constant 0 : i32
    return %c0_i32, %c0_i32_0, %c0_i32_1 : i32, i32, i32
  }
  func.func @transform_4(%arg0: i32) -> (i32, i32) {
    %c0_i32 = arith.constant 0 : i32
    %c0_i32_0 = arith.constant 0 : i32
    %c0_i32_1 = arith.constant 0 : i32
    return %c0_i32, %c0_i32_0 : i32, i32
  }
  func.func @transform_5(%arg0: i32) -> (i32, i32, i32) {
    %c0_i32 = arith.constant 0 : i32
    %c0_i32_0 = arith.constant 0 : i32
    %c0_i32_1 = arith.constant 0 : i32
    %c0_i32_2 = arith.constant 0 : i32
    return %c0_i32, %c0_i32_0, %c0_i32_1 : i32, i32, i32
  }
  func.func @transform_6(%arg0: i32) -> (i32, i32) {
    %c0_i32 = arith.constant 0 : i32
    %c0_i32_0 = arith.constant 0 : i32
    %c0_i32_1 = arith.constant 0 : i32
    return %c0_i32, %c0_i32_0 : i32, i32
  }
  func.func @transform_7(%arg0: i32) -> (i32, i32, i32) {
    %c0_i32 = arith.constant 0 : i32
    %c0_i32_0 = arith.constant 0 : i32
    %c0_i32_1 = arith.constant 0 : i32
    return %arg0, %c0_i32, %c0_i32_0 : i32, i32, i32
  }
}

module attributes {stable_mosaic.version = 11 : i64} {
  func.func @fc_fused_kernel(%arg0: i32, %arg1: i32, %arg2: memref<2x11x176xf32, #tpu.memory_space<vmem>>, %arg3: memref<11x176x512xbf16, #tpu.memory_space<vmem>>, %arg4: memref<1x512xf32, #tpu.memory_space<vmem>>, %arg5: memref<512x1024xbf16, #tpu.memory_space<vmem>>, %arg6: memref<1x1024xf32, #tpu.memory_space<vmem>>, %arg7: memref<1024x512xbf16, #tpu.memory_space<vmem>>, %arg8: memref<1x512xf32, #tpu.memory_space<vmem>>, %arg9: memref<512x256xbf16, #tpu.memory_space<vmem>>, %arg10: memref<1x256xf32, #tpu.memory_space<vmem>>, %arg11: memref<256x128xbf16, #tpu.memory_space<vmem>>, %arg12: memref<1x128xf32, #tpu.memory_space<vmem>>, %arg13: memref<2x128xf32, #tpu.memory_space<vmem>>, %arg14: memref<2x1024xf32, #tpu.memory_space<vmem>>) attributes {dimension_semantics = [#tpu.dimension_semantics<parallel>, #tpu.dimension_semantics<arbitrary>], iteration_bounds = array<i64: 1, 4>, scalar_prefetch = 0 : i64, scratch_operands = 1 : i64, tpu.core_type = #tpu.core_type<tc>, window_params = [{transform_indices = @transform_0, window_bounds = array<i64: 2, 11, 176>}, {transform_indices = @transform_1, window_bounds = array<i64: 11, 176, 512>}, {transform_indices = @transform_2, window_bounds = array<i64: 1, 512>}, {transform_indices = @transform_3, window_bounds = array<i64: 512, 1024>}, {pipeline_mode = #tpu.pipeline_mode<synchronous>, transform_indices = @transform_4, window_bounds = array<i64: 1, 1024>}, {pipeline_mode = #tpu.pipeline_mode<synchronous>, transform_indices = @transform_5, window_bounds = array<i64: 1024, 512>}, {pipeline_mode = #tpu.pipeline_mode<synchronous>, transform_indices = @transform_6, window_bounds = array<i64: 1, 512>}, {pipeline_mode = #tpu.pipeline_mode<synchronous>, transform_indices = @transform_7, window_bounds = array<i64: 512, 256>}, {pipeline_mode = #tpu.pipeline_mode<synchronous>, transform_indices = @transform_8, window_bounds = array<i64: 1, 256>}, {pipeline_mode = #tpu.pipeline_mode<synchronous>, transform_indices = @transform_9, window_bounds = array<i64: 256, 128>}, {pipeline_mode = #tpu.pipeline_mode<synchronous>, transform_indices = @transform_10, window_bounds = array<i64: 1, 128>}, {transform_indices = @transform_11, window_bounds = array<i64: 2, 128>}]} {
    %c0_i32 = arith.constant 0 : i32
    %0 = arith.cmpi eq, %arg1, %c0_i32 : i32
    %1 = arith.extui %0 : i1 to i32
    %c0_i32_0 = arith.constant 0 : i32
    %2 = arith.cmpi ne, %1, %c0_i32_0 : i32
    scf.if %2 {
      %cst_47 = arith.constant 0.000000e+00 : f32
      %84 = vector.broadcast %cst_47 : f32 to vector<2x1024xf32>
      %c0_48 = arith.constant 0 : index
      %c0_49 = arith.constant 0 : index
      %85 = vector.load %arg14[%c0_48, %c0_49] : memref<2x1024xf32, #tpu.memory_space<vmem>>, vector<2x1024xf32>
      tpu.vector_store %arg14[%c0_48, %c0_49], %84 {strides = array<i32>} : memref<2x1024xf32, #tpu.memory_space<vmem>>, vector<2x1024xf32>,
    } else {
    }
    %c0 = arith.constant 0 : index
    %c0_1 = arith.constant 0 : index
    %c0_2 = arith.constant 0 : index
    %3 = vector.load %arg2[%c0, %c0_1, %c0_2] : memref<2x11x176xf32, #tpu.memory_space<vmem>>, vector<2x11x176xf32>
    %4 = arith.truncf %3 : vector<2x11x176xf32> to vector<2x11x176xbf16>
    %5 = vector.extract_strided_slice %4 {offsets = [0, 0, 0], sizes = [2, 1, 176], strides = [1, 1, 1]} : vector<2x11x176xbf16> to vector<2x1x176xbf16>
    %6 = vector.shape_cast %5 : vector<2x1x176xbf16> to vector<2x176xbf16>
    %c0_3 = arith.constant 0 : index
    %c0_4 = arith.constant 0 : index
    %c0_5 = arith.constant 0 : index
    %7 = vector.load %arg3[%c0_3, %c0_4, %c0_5] : memref<11x176x512xbf16, #tpu.memory_space<vmem>>, vector<1x176x512xbf16>
    %8 = vector.shape_cast %7 : vector<1x176x512xbf16> to vector<176x512xbf16>
    %cst = arith.constant dense<0.000000e+00> : vector<2x512xf32>
    %9 = tpu.matmul %6, %8, %cst {dimension_numbers = #tpu.dot_dimension_numbers<[1], [0], [0], [1], [0, 0, 1, 1], [], []>} : vector<2x176xbf16>, vector<176x512xbf16>, vector<2x512xf32> -> vector<2x512xf32>
    %10 = vector.extract_strided_slice %4 {offsets = [0, 1, 0], sizes = [2, 1, 176], strides = [1, 1, 1]} : vector<2x11x176xbf16> to vector<2x1x176xbf16>
    %11 = vector.shape_cast %10 : vector<2x1x176xbf16> to vector<2x176xbf16>
    %c1 = arith.constant 1 : index
    %c0_6 = arith.constant 0 : index
    %c0_7 = arith.constant 0 : index
    %12 = vector.load %arg3[%c1, %c0_6, %c0_7] : memref<11x176x512xbf16, #tpu.memory_space<vmem>>, vector<1x176x512xbf16>
    %13 = vector.shape_cast %12 : vector<1x176x512xbf16> to vector<176x512xbf16>
    %cst_8 = arith.constant dense<0.000000e+00> : vector<2x512xf32>
    %14 = tpu.matmul %11, %13, %cst_8 {dimension_numbers = #tpu.dot_dimension_numbers<[1], [0], [0], [1], [0, 0, 1, 1], [], []>} : vector<2x176xbf16>, vector<176x512xbf16>, vector<2x512xf32> -> vector<2x512xf32>
    %15 = arith.addf %9, %14 : vector<2x512xf32>
    %16 = vector.extract_strided_slice %4 {offsets = [0, 2, 0], sizes = [2, 1, 176], strides = [1, 1, 1]} : vector<2x11x176xbf16> to vector<2x1x176xbf16>
    %17 = vector.shape_cast %16 : vector<2x1x176xbf16> to vector<2x176xbf16>
    %c2 = arith.constant 2 : index
    %c0_9 = arith.constant 0 : index
    %c0_10 = arith.constant 0 : index
    %18 = vector.load %arg3[%c2, %c0_9, %c0_10] : memref<11x176x512xbf16, #tpu.memory_space<vmem>>, vector<1x176x512xbf16>
    %19 = vector.shape_cast %18 : vector<1x176x512xbf16> to vector<176x512xbf16>
    %cst_11 = arith.constant dense<0.000000e+00> : vector<2x512xf32>
    %20 = tpu.matmul %17, %19, %cst_11 {dimension_numbers = #tpu.dot_dimension_numbers<[1], [0], [0], [1], [0, 0, 1, 1], [], []>} : vector<2x176xbf16>, vector<176x512xbf16>, vector<2x512xf32> -> vector<2x512xf32>
    %21 = arith.addf %15, %20 : vector<2x512xf32>
    %22 = vector.extract_strided_slice %4 {offsets = [0, 3, 0], sizes = [2, 1, 176], strides = [1, 1, 1]} : vector<2x11x176xbf16> to vector<2x1x176xbf16>
    %23 = vector.shape_cast %22 : vector<2x1x176xbf16> to vector<2x176xbf16>
    %c3 = arith.constant 3 : index
    %c0_12 = arith.constant 0 : index
    %c0_13 = arith.constant 0 : index
    %24 = vector.load %arg3[%c3, %c0_12, %c0_13] : memref<11x176x512xbf16, #tpu.memory_space<vmem>>, vector<1x176x512xbf16>
    %25 = vector.shape_cast %24 : vector<1x176x512xbf16> to vector<176x512xbf16>
    %cst_14 = arith.constant dense<0.000000e+00> : vector<2x512xf32>
    %26 = tpu.matmul %23, %25, %cst_14 {dimension_numbers = #tpu.dot_dimension_numbers<[1], [0], [0], [1], [0, 0, 1, 1], [], []>} : vector<2x176xbf16>, vector<176x512xbf16>, vector<2x512xf32> -> vector<2x512xf32>
    %27 = arith.addf %21, %26 : vector<2x512xf32>
    %28 = vector.extract_strided_slice %4 {offsets = [0, 4, 0], sizes = [2, 1, 176], strides = [1, 1, 1]} : vector<2x11x176xbf16> to vector<2x1x176xbf16>
    %29 = vector.shape_cast %28 : vector<2x1x176xbf16> to vector<2x176xbf16>
    %c4 = arith.constant 4 : index
    %c0_15 = arith.constant 0 : index
    %c0_16 = arith.constant 0 : index
    %30 = vector.load %arg3[%c4, %c0_15, %c0_16] : memref<11x176x512xbf16, #tpu.memory_space<vmem>>, vector<1x176x512xbf16>
    %31 = vector.shape_cast %30 : vector<1x176x512xbf16> to vector<176x512xbf16>
    %cst_17 = arith.constant dense<0.000000e+00> : vector<2x512xf32>
    %32 = tpu.matmul %29, %31, %cst_17 {dimension_numbers = #tpu.dot_dimension_numbers<[1], [0], [0], [1], [0, 0, 1, 1], [], []>} : vector<2x176xbf16>, vector<176x512xbf16>, vector<2x512xf32> -> vector<2x512xf32>
    %33 = arith.addf %27, %32 : vector<2x512xf32>
    %34 = vector.extract_strided_slice %4 {offsets = [0, 5, 0], sizes = [2, 1, 176], strides = [1, 1, 1]} : vector<2x11x176xbf16> to vector<2x1x176xbf16>
    %35 = vector.shape_cast %34 : vector<2x1x176xbf16> to vector<2x176xbf16>
    %c5 = arith.constant 5 : index
    %c0_18 = arith.constant 0 : index
    %c0_19 = arith.constant 0 : index
    %36 = vector.load %arg3[%c5, %c0_18, %c0_19] : memref<11x176x512xbf16, #tpu.memory_space<vmem>>, vector<1x176x512xbf16>
    %37 = vector.shape_cast %36 : vector<1x176x512xbf16> to vector<176x512xbf16>
    %cst_20 = arith.constant dense<0.000000e+00> : vector<2x512xf32>
    %38 = tpu.matmul %35, %37, %cst_20 {dimension_numbers = #tpu.dot_dimension_numbers<[1], [0], [0], [1], [0, 0, 1, 1], [], []>} : vector<2x176xbf16>, vector<176x512xbf16>, vector<2x512xf32> -> vector<2x512xf32>
    %39 = arith.addf %33, %38 : vector<2x512xf32>
    %40 = vector.extract_strided_slice %4 {offsets = [0, 6, 0], sizes = [2, 1, 176], strides = [1, 1, 1]} : vector<2x11x176xbf16> to vector<2x1x176xbf16>
    %41 = vector.shape_cast %40 : vector<2x1x176xbf16> to vector<2x176xbf16>
    %c6 = arith.constant 6 : index
    %c0_21 = arith.constant 0 : index
    %c0_22 = arith.constant 0 : index
    %42 = vector.load %arg3[%c6, %c0_21, %c0_22] : memref<11x176x512xbf16, #tpu.memory_space<vmem>>, vector<1x176x512xbf16>
    %43 = vector.shape_cast %42 : vector<1x176x512xbf16> to vector<176x512xbf16>
    %cst_23 = arith.constant dense<0.000000e+00> : vector<2x512xf32>
    %44 = tpu.matmul %41, %43, %cst_23 {dimension_numbers = #tpu.dot_dimension_numbers<[1], [0], [0], [1], [0, 0, 1, 1], [], []>} : vector<2x176xbf16>, vector<176x512xbf16>, vector<2x512xf32> -> vector<2x512xf32>
    %45 = arith.addf %39, %44 : vector<2x512xf32>
    %46 = vector.extract_strided_slice %4 {offsets = [0, 7, 0], sizes = [2, 1, 176], strides = [1, 1, 1]} : vector<2x11x176xbf16> to vector<2x1x176xbf16>
    %47 = vector.shape_cast %46 : vector<2x1x176xbf16> to vector<2x176xbf16>
    %c7 = arith.constant 7 : index
    %c0_24 = arith.constant 0 : index
    %c0_25 = arith.constant 0 : index
    %48 = vector.load %arg3[%c7, %c0_24, %c0_25] : memref<11x176x512xbf16, #tpu.memory_space<vmem>>, vector<1x176x512xbf16>
    %49 = vector.shape_cast %48 : vector<1x176x512xbf16> to vector<176x512xbf16>
    %cst_26 = arith.constant dense<0.000000e+00> : vector<2x512xf32>
    %50 = tpu.matmul %47, %49, %cst_26 {dimension_numbers = #tpu.dot_dimension_numbers<[1], [0], [0], [1], [0, 0, 1, 1], [], []>} : vector<2x176xbf16>, vector<176x512xbf16>, vector<2x512xf32> -> vector<2x512xf32>
    %51 = arith.addf %45, %50 : vector<2x512xf32>
    %52 = vector.extract_strided_slice %4 {offsets = [0, 8, 0], sizes = [2, 1, 176], strides = [1, 1, 1]} : vector<2x11x176xbf16> to vector<2x1x176xbf16>
    %53 = vector.shape_cast %52 : vector<2x1x176xbf16> to vector<2x176xbf16>
    %c8 = arith.constant 8 : index
    %c0_27 = arith.constant 0 : index
    %c0_28 = arith.constant 0 : index
    %54 = vector.load %arg3[%c8, %c0_27, %c0_28] : memref<11x176x512xbf16, #tpu.memory_space<vmem>>, vector<1x176x512xbf16>
    %55 = vector.shape_cast %54 : vector<1x176x512xbf16> to vector<176x512xbf16>
    %cst_29 = arith.constant dense<0.000000e+00> : vector<2x512xf32>
    %56 = tpu.matmul %53, %55, %cst_29 {dimension_numbers = #tpu.dot_dimension_numbers<[1], [0], [0], [1], [0, 0, 1, 1], [], []>} : vector<2x176xbf16>, vector<176x512xbf16>, vector<2x512xf32> -> vector<2x512xf32>
    %57 = arith.addf %51, %56 : vector<2x512xf32>
    %58 = vector.extract_strided_slice %4 {offsets = [0, 9, 0], sizes = [2, 1, 176], strides = [1, 1, 1]} : vector<2x11x176xbf16> to vector<2x1x176xbf16>
    %59 = vector.shape_cast %58 : vector<2x1x176xbf16> to vector<2x176xbf16>
    %c9 = arith.constant 9 : index
    %c0_30 = arith.constant 0 : index
    %c0_31 = arith.constant 0 : index
    %60 = vector.load %arg3[%c9, %c0_30, %c0_31] : memref<11x176x512xbf16, #tpu.memory_space<vmem>>, vector<1x176x512xbf16>
    %61 = vector.shape_cast %60 : vector<1x176x512xbf16> to vector<176x512xbf16>
    %cst_32 = arith.constant dense<0.000000e+00> : vector<2x512xf32>
    %62 = tpu.matmul %59, %61, %cst_32 {dimension_numbers = #tpu.dot_dimension_numbers<[1], [0], [0], [1], [0, 0, 1, 1], [], []>} : vector<2x176xbf16>, vector<176x512xbf16>, vector<2x512xf32> -> vector<2x512xf32>
    %63 = arith.addf %57, %62 : vector<2x512xf32>
    %64 = vector.extract_strided_slice %4 {offsets = [0, 10, 0], sizes = [2, 1, 176], strides = [1, 1, 1]} : vector<2x11x176xbf16> to vector<2x1x176xbf16>
    %65 = vector.shape_cast %64 : vector<2x1x176xbf16> to vector<2x176xbf16>
    %c10 = arith.constant 10 : index
    %c0_33 = arith.constant 0 : index
    %c0_34 = arith.constant 0 : index
    %66 = vector.load %arg3[%c10, %c0_33, %c0_34] : memref<11x176x512xbf16, #tpu.memory_space<vmem>>, vector<1x176x512xbf16>
    %67 = vector.shape_cast %66 : vector<1x176x512xbf16> to vector<176x512xbf16>
    %cst_35 = arith.constant dense<0.000000e+00> : vector<2x512xf32>
    %68 = tpu.matmul %65, %67, %cst_35 {dimension_numbers = #tpu.dot_dimension_numbers<[1], [0], [0], [1], [0, 0, 1, 1], [], []>} : vector<2x176xbf16>, vector<176x512xbf16>, vector<2x512xf32> -> vector<2x512xf32>
    %69 = arith.addf %63, %68 : vector<2x512xf32>
    %c0_36 = arith.constant 0 : index
    %c0_37 = arith.constant 0 : index
    %70 = vector.load %arg4[%c0_36, %c0_37] : memref<1x512xf32, #tpu.memory_space<vmem>>, vector<1x512xf32>
    %71 = vector.broadcast %70 : vector<1x512xf32> to vector<2x512xf32>
    %72 = arith.addf %69, %71 : vector<2x512xf32>
    %cst_38 = arith.constant 0.000000e+00 : f32
    %73 = vector.broadcast %cst_38 : f32 to vector<2x512xf32>
    %74 = arith.maximumf %72, %73 : vector<2x512xf32>
    %c0_39 = arith.constant 0 : index
    %c0_40 = arith.constant 0 : index
    %75 = vector.load %arg14[%c0_39, %c0_40] : memref<2x1024xf32, #tpu.memory_space<vmem>>, vector<2x1024xf32>
    %76 = arith.truncf %74 : vector<2x512xf32> to vector<2x512xbf16>
    %c0_41 = arith.constant 0 : index
    %c0_42 = arith.constant 0 : index
    %77 = vector.load %arg5[%c0_41, %c0_42] : memref<512x1024xbf16, #tpu.memory_space<vmem>>, vector<512x1024xbf16>
    %cst_43 = arith.constant dense<0.000000e+00> : vector<2x1024xf32>
    %78 = tpu.matmul %76, %77, %cst_43 {dimension_numbers = #tpu.dot_dimension_numbers<[1], [0], [0], [1], [0, 0, 1, 1], [], []>} : vector<2x512xbf16>, vector<512x1024xbf16>, vector<2x1024xf32> -> vector<2x1024xf32>
    %79 = arith.addf %75, %78 : vector<2x1024xf32>
    %c0_44 = arith.constant 0 : index
    %c0_45 = arith.constant 0 : index
    %80 = vector.load %arg14[%c0_44, %c0_45] : memref<2x1024xf32, #tpu.memory_space<vmem>>, vector<2x1024xf32>
    tpu.vector_store %arg14[%c0_44, %c0_45], %79 {strides = array<i32>} : memref<2x1024xf32, #tpu.memory_space<vmem>>, vector<2x1024xf32>,
    %c3_i32 = arith.constant 3 : i32
    %81 = arith.cmpi eq, %arg1, %c3_i32 : i32
    %82 = arith.extui %81 : i1 to i32
    %c0_i32_46 = arith.constant 0 : i32
    %83 = arith.cmpi ne, %82, %c0_i32_46 : i32
    scf.if %83 {
      %c0_47 = arith.constant 0 : index
      %c0_48 = arith.constant 0 : index
      %84 = vector.load %arg14[%c0_47, %c0_48] : memref<2x1024xf32, #tpu.memory_space<vmem>>, vector<2x1024xf32>
      %c0_49 = arith.constant 0 : index
      %c0_50 = arith.constant 0 : index
      %85 = vector.load %arg6[%c0_49, %c0_50] : memref<1x1024xf32, #tpu.memory_space<vmem>>, vector<1x1024xf32>
      %86 = vector.broadcast %85 : vector<1x1024xf32> to vector<2x1024xf32>
      %87 = arith.addf %84, %86 : vector<2x1024xf32>
      %cst_51 = arith.constant 0.000000e+00 : f32
      %88 = vector.broadcast %cst_51 : f32 to vector<2x1024xf32>
      %89 = arith.maximumf %87, %88 : vector<2x1024xf32>
      %90 = arith.truncf %89 : vector<2x1024xf32> to vector<2x1024xbf16>
      %c0_52 = arith.constant 0 : index
      %c0_53 = arith.constant 0 : index
      %91 = vector.load %arg7[%c0_52, %c0_53] : memref<1024x512xbf16, #tpu.memory_space<vmem>>, vector<1024x512xbf16>
      %cst_54 = arith.constant dense<0.000000e+00> : vector<2x512xf32>
      %92 = tpu.matmul %90, %91, %cst_54 {dimension_numbers = #tpu.dot_dimension_numbers<[1], [0], [0], [1], [0, 0, 1, 1], [], []>} : vector<2x1024xbf16>, vector<1024x512xbf16>, vector<2x512xf32> -> vector<2x512xf32>
      %c0_55 = arith.constant 0 : index
      %c0_56 = arith.constant 0 : index
      %93 = vector.load %arg8[%c0_55, %c0_56] : memref<1x512xf32, #tpu.memory_space<vmem>>, vector<1x512xf32>
      %94 = vector.broadcast %93 : vector<1x512xf32> to vector<2x512xf32>
      %95 = arith.addf %92, %94 : vector<2x512xf32>
      %cst_57 = arith.constant 0.000000e+00 : f32
      %96 = vector.broadcast %cst_57 : f32 to vector<2x512xf32>
      %97 = arith.maximumf %95, %96 : vector<2x512xf32>
      %98 = arith.truncf %97 : vector<2x512xf32> to vector<2x512xbf16>
      %c0_58 = arith.constant 0 : index
      %c0_59 = arith.constant 0 : index
      %99 = vector.load %arg9[%c0_58, %c0_59] : memref<512x256xbf16, #tpu.memory_space<vmem>>, vector<512x256xbf16>
      %cst_60 = arith.constant dense<0.000000e+00> : vector<2x256xf32>
      %100 = tpu.matmul %98, %99, %cst_60 {dimension_numbers = #tpu.dot_dimension_numbers<[1], [0], [0], [1], [0, 0, 1, 1], [], []>} : vector<2x512xbf16>, vector<512x256xbf16>, vector<2x256xf32> -> vector<2x256xf32>
      %c0_61 = arith.constant 0 : index
      %c0_62 = arith.constant 0 : index
      %101 = vector.load %arg10[%c0_61, %c0_62] : memref<1x256xf32, #tpu.memory_space<vmem>>, vector<1x256xf32>
      %102 = vector.broadcast %101 : vector<1x256xf32> to vector<2x256xf32>
      %103 = arith.addf %100, %102 : vector<2x256xf32>
      %cst_63 = arith.constant 0.000000e+00 : f32
      %104 = vector.broadcast %cst_63 : f32 to vector<2x256xf32>
      %105 = arith.maximumf %103, %104 : vector<2x256xf32>
      %106 = arith.truncf %105 : vector<2x256xf32> to vector<2x256xbf16>
      %c0_64 = arith.constant 0 : index
      %c0_65 = arith.constant 0 : index
      %107 = vector.load %arg11[%c0_64, %c0_65] : memref<256x128xbf16, #tpu.memory_space<vmem>>, vector<256x128xbf16>
      %cst_66 = arith.constant dense<0.000000e+00> : vector<2x128xf32>
      %108 = tpu.matmul %106, %107, %cst_66 {dimension_numbers = #tpu.dot_dimension_numbers<[1], [0], [0], [1], [0, 0, 1, 1], [], []>} : vector<2x256xbf16>, vector<256x128xbf16>, vector<2x128xf32> -> vector<2x128xf32>
      %c0_67 = arith.constant 0 : index
      %c0_68 = arith.constant 0 : index
      %109 = vector.load %arg12[%c0_67, %c0_68] : memref<1x128xf32, #tpu.memory_space<vmem>>, vector<1x128xf32>
      %110 = vector.broadcast %109 : vector<1x128xf32> to vector<2x128xf32>
      %111 = arith.addf %108, %110 : vector<2x128xf32>
      %c0_69 = arith.constant 0 : index
      %c0_70 = arith.constant 0 : index
      %112 = vector.load %arg13[%c0_69, %c0_70] : memref<2x128xf32, #tpu.memory_space<vmem>>, vector<2x128xf32>
      tpu.vector_store %arg13[%c0_69, %c0_70], %111 {strides = array<i32>} : memref<2x128xf32, #tpu.memory_space<vmem>>, vector<2x128xf32>,
    } else {
    }
    return
  }
  func.func @transform_0(%arg0: i32, %arg1: i32) -> (i32, i32, i32) {
    %c0_i32 = arith.constant 0 : i32
    %c0_i32_0 = arith.constant 0 : i32
    %c0_i32_1 = arith.constant 0 : i32
    return %arg0, %c0_i32, %c0_i32_0 : i32, i32, i32
  }
  func.func @transform_1(%arg0: i32, %arg1: i32) -> (i32, i32, i32) {
    %c0_i32 = arith.constant 0 : i32
    %c0_i32_0 = arith.constant 0 : i32
    %c0_i32_1 = arith.constant 0 : i32
    return %c0_i32, %c0_i32_0, %arg1 : i32, i32, i32
  }
  func.func @transform_2(%arg0: i32, %arg1: i32) -> (i32, i32) {
    %c0_i32 = arith.constant 0 : i32
    %c0_i32_0 = arith.constant 0 : i32
    return %c0_i32, %arg1 : i32, i32
  }
  func.func @transform_3(%arg0: i32, %arg1: i32) -> (i32, i32) {
    %c0_i32 = arith.constant 0 : i32
    %c0_i32_0 = arith.constant 0 : i32
    return %arg1, %c0_i32 : i32, i32
  }
  func.func @transform_4(%arg0: i32, %arg1: i32) -> (i32, i32) {
    %c0_i32 = arith.constant 0 : i32
    %c0_i32_0 = arith.constant 0 : i32
    %c0_i32_1 = arith.constant 0 : i32
    return %c0_i32, %c0_i32_0 : i32, i32
  }
  func.func @transform_5(%arg0: i32, %arg1: i32) -> (i32, i32) {
    %c0_i32 = arith.constant 0 : i32
    %c0_i32_0 = arith.constant 0 : i32
    %c0_i32_1 = arith.constant 0 : i32
    return %c0_i32, %c0_i32_0 : i32, i32
  }
  func.func @transform_6(%arg0: i32, %arg1: i32) -> (i32, i32) {
    %c0_i32 = arith.constant 0 : i32
    %c0_i32_0 = arith.constant 0 : i32
    %c0_i32_1 = arith.constant 0 : i32
    return %c0_i32, %c0_i32_0 : i32, i32
  }
  func.func @transform_7(%arg0: i32, %arg1: i32) -> (i32, i32) {
    %c0_i32 = arith.constant 0 : i32
    %c0_i32_0 = arith.constant 0 : i32
    %c0_i32_1 = arith.constant 0 : i32
    return %c0_i32, %c0_i32_0 : i32, i32
  }
  func.func @transform_8(%arg0: i32, %arg1: i32) -> (i32, i32) {
    %c0_i32 = arith.constant 0 : i32
    %c0_i32_0 = arith.constant 0 : i32
    %c0_i32_1 = arith.constant 0 : i32
    return %c0_i32, %c0_i32_0 : i32, i32
  }
  func.func @transform_9(%arg0: i32, %arg1: i32) -> (i32, i32) {
    %c0_i32 = arith.constant 0 : i32
    %c0_i32_0 = arith.constant 0 : i32
    %c0_i32_1 = arith.constant 0 : i32
    return %c0_i32, %c0_i32_0 : i32, i32
  }
  func.func @transform_10(%arg0: i32, %arg1: i32) -> (i32, i32) {
    %c0_i32 = arith.constant 0 : i32
    %c0_i32_0 = arith.constant 0 : i32
    %c0_i32_1 = arith.constant 0 : i32
    return %c0_i32, %c0_i32_0 : i32, i32
  }
  func.func @transform_11(%arg0: i32, %arg1: i32) -> (i32, i32) {
    %c0_i32 = arith.constant 0 : i32
    %c0_i32_0 = arith.constant 0 : i32
    return %arg0, %c0_i32 : i32, i32
  }
}

</mosaic_0001>

<bundles_post_ra>
// kernel: cnn_forward.2
= control target key start
LH: loop header
LB: loop body
LE: loop exit
PB: predicated region body
PF: predicated region fallthrough
CT: control target
= control target key end

     0   :  { %12 = vsyncpa [#allocation3], 0  ;;  %s7328_s0 = inlined_call_operand.vmem [shape: f32[2,20,20], index: 0, kind: input, shape index: {}]   ;;  %s7329_s1 = inlined_call_operand.hbm [shape: f32[3,20,288], index: 1, kind: input, shape index: {}]   ;;  %s7330_s2 = inlined_call_operand.hbm [shape: f32[1,288], index: 2, kind: input, shape index: {}]   ;;  %s7331_s3 = inlined_call_operand.hbm [shape: f32[3,272,240], index: 3, kind: input, shape index: {}]   ;;  %s7332_s4 = inlined_call_operand.hbm [shape: f32[1,240], index: 4, kind: input, shape index: {}]   ;;  %s7333_s5 = inlined_call_operand.vmem [shape: f32[3,224,192], index: 5, kind: input, shape index: {}]   ;;  %s7334_s6 = inlined_call_operand.hbm [shape: f32[1,192], index: 6, kind: input, shape index: {}]   ;;  %s7335_s7 = inlined_call_operand.vmem [shape: f32[2,11,176], index: 7, kind: output, shape index: {}]  }
   0x1   :  { %13 = vsyncpa [#allocation5], 0 }
   0x2   :  { %14 = vsyncpa [#allocation8], 0  ;;  %s5574_s24 = smov [#allocation4]   ;;  %s5575_s26 = smov [#allocation7]  }
   0x3   :  { %s35_s25 = sshll.u32 %s5574_s24, 4  ;;  %s57_s27 = sshll.u32 %s5575_s26, 4  ;;  %s36_s25 = int_to_ptr.vmem [resolvable:$true] %s35_s25  ;;  %s58_s27 = int_to_ptr.vmem [resolvable:$true] %s57_s27 }
   0x4   :  { %s5458_s30 = scalar_lea.hbm %s7330_s2, 48 }
   0x5   :  { %p5459_p0 = scmp.ne.s32.totalorder %s7330_s2, %s5458_s30  ;;  %p5462_p1 = scmp.lt.u32.totalorder %s5458_s30, %s7330_s2 }
   0x7   :  { %p5464_p2 = pnand %p5462_p1, %p5459_p0 }
   0x9   :  { %5467 = shalt.err (!%p5464_p2)
}
   0xa   :  { %s5468_s12 = scalar_lea.vmem %s36_s25, 48  ;;  %s5472_s13 = scalar_lea.vmem %s36_s25, 64 }
   0xb   :  { %p5469_p3 = scmp.ne.s32.totalorder %s36_s25, %s5468_s12  ;;  %p5473_p4 = scmp.lt.s32.totalorder %s36_s25, %s36_s25 }
   0xc   :  { %p5474_p5 = scmp.lt.s32.totalorder %s5472_s13, %s5468_s12 }
   0xe   :  { %p5475_p6 = por %p5474_p5, %p5473_p4 }
  0x10   :  { %p5476_p7 = pnand %p5475_p6, %p5469_p3 }
  0x12   :  { %5479 = shalt.err (!%p5476_p7)
}
  0x13   :  { %38 = dma.hbm_to_vmem [thread:$0]  %s7330_s2, 48, %s36_s25, [#allocation5]  }
  0x14   :  { %s5480_s18 = scalar_lea.hbm %s7332_s4, 32 }
  0x15   :  { %p5481_p8 = scmp.ne.s32.totalorder %s7332_s4, %s5480_s18  ;;  %p5484_p9 = scmp.lt.u32.totalorder %s5480_s18, %s7332_s4 }
  0x17   :  { %p5486_p10 = pnand %p5484_p9, %p5481_p8 }
  0x19   :  { %5489 = shalt.err (!%p5486_p10)
}
  0x1a   :  { %s5490_s23 = scalar_lea.vmem %s58_s27, 32  ;;  %p5495_p12 = scmp.lt.s32.totalorder %s58_s27, %s58_s27 }
  0x1b   :  { %p5491_p11 = scmp.ne.s32.totalorder %s58_s27, %s5490_s23  ;;  %p5496_p13 = scmp.lt.s32.totalorder %s5490_s23, %s5490_s23 }
  0x1d   :  { %p5497_p0 = por %p5496_p13, %p5495_p12 }
  0x1f   :  { %p5498_p1 = pnand %p5497_p0, %p5491_p11 }
  0x21   :  { %5501 = shalt.err (!%p5498_p1)
}
  0x22   :  { %60 = dma.hbm_to_vmem [thread:$0]  %s7332_s4, 32, %s58_s27, [#allocation8]  }
  0x23   :  { %s5576_s25 = smov [#allocation2]   ;;  %s5502_s30 = scalar_lea.hbm %s7329_s1, 3456 }
  0x24   :  { %s22_s26 = sshll.u32 %s5576_s25, 4  ;;  %p5503_p2 = scmp.ne.s32.totalorder %s7329_s1, %s5502_s30  ;;  %s23_s26 = int_to_ptr.vmem [resolvable:$true] %s22_s26 }
  0x25   :  { %p5506_p3 = scmp.lt.u32.totalorder %s5502_s30, %s7329_s1 }
  0x27   :  { %p5508_p4 = pnand %p5506_p3, %p5503_p2 }
  0x29   :  { %5511 = shalt.err (!%p5508_p4)
}
  0x2a   :  { %s5512_s12 = scalar_lea.vmem %s23_s26, 3456  ;;  %p5517_p6 = scmp.lt.s32.totalorder %s23_s26, %s23_s26 }
  0x2b   :  { %p5513_p5 = scmp.ne.s32.totalorder %s23_s26, %s5512_s12  ;;  %p5518_p7 = scmp.lt.s32.totalorder %s5512_s12, %s5512_s12 }
  0x2d   :  { %p5519_p8 = por %p5518_p7, %p5517_p6 }
  0x2f   :  { %p5520_p9 = pnand %p5519_p8, %p5513_p5 }
  0x31   :  { %5523 = shalt.err (!%p5520_p9)
}
  0x32   :  { %s5577_s4 = smov 384   ;;  %s5578_s27 = smov 24  }
  0x33   :  { %28 = dma.hbm_to_vmem [thread:$0]  %s7329_s1, 3456, %s23_s26, [#allocation3], %s5577_s4, %s5577_s4, %s5578_s27  }
  0x34   :  { %s5579_s15 = smov [#allocation6]   ;;  %s5524_s19 = scalar_lea.hbm %s7331_s3, 26112 }
  0x35   :  { %s44_s16 = sshll.u32 %s5579_s15, 4  ;;  %p5525_p10 = scmp.ne.s32.totalorder %s7331_s3, %s5524_s19  ;;  %s45_s16 = int_to_ptr.vmem [resolvable:$true] %s44_s16 }
  0x36   :  { %p5528_p11 = scmp.lt.u32.totalorder %s5524_s19, %s7331_s3 }
  0x38   :  { %p5530_p12 = pnand %p5528_p11, %p5525_p10 }
  0x3a   :  { %5533 = shalt.err (!%p5530_p12)
}
  0x3b   :  { %s5534_s2 = scalar_lea.vmem %s45_s16, 26112  ;;  %p5539_p0 = scmp.lt.s32.totalorder %s45_s16, %s45_s16 }
  0x3c   :  { %p5535_p13 = scmp.ne.s32.totalorder %s45_s16, %s5534_s2  ;;  %p5540_p1 = scmp.lt.s32.totalorder %s5534_s2, %s5534_s2 }
  0x3e   :  { %p5541_p2 = por %p5540_p1, %p5539_p0 }
  0x40   :  { %p5542_p3 = pnand %p5541_p2, %p5535_p13 }
  0x42   :  { %5545 = shalt.err (!%p5542_p3)
}
  0x43   :  { %s5580_s1 = smov 256   ;;  %s5581_s24 = smov 16  }
  0x44   :  { %50 = dma.hbm_to_vmem [thread:$0]  %s7331_s3, 26112, %s45_s16, [#allocation5], %s5580_s1, %s5580_s1, %s5581_s24  }
  0x45   :  { %s5582_s28 = smov [#allocation9]   ;;  %s5546_s9 = scalar_lea.hbm %s7334_s6, 32 }
  0x46   :  { %s69_s29 = sshll.u32 %s5582_s28, 4  ;;  %p5547_p4 = scmp.ne.s32.totalorder %s7334_s6, %s5546_s9  ;;  %s70_s29 = int_to_ptr.vmem [resolvable:$true] %s69_s29 }
  0x47   :  { %p5550_p5 = scmp.lt.u32.totalorder %s5546_s9, %s7334_s6 }
  0x49   :  { %p5552_p6 = pnand %p5550_p5, %p5547_p4 }
  0x4b   :  { %5555 = shalt.err (!%p5552_p6)
}
  0x4c   :  { %s5556_s27 = scalar_lea.vmem %s70_s29, 32  ;;  %p5561_p8 = scmp.lt.s32.totalorder %s70_s29, %s70_s29 }
  0x4d   :  { %p5557_p7 = scmp.ne.s32.totalorder %s70_s29, %s5556_s27  ;;  %p5562_p9 = scmp.lt.s32.totalorder %s5556_s27, %s5556_s27 }
  0x4f   :  { %p5563_p10 = por %p5562_p9, %p5561_p8 }
  0x51   :  { %p5564_p11 = pnand %p5563_p10, %p5557_p7 }
  0x53   :  { %5567 = shalt.err (!%p5564_p11)
}
  0x54   :  { %72 = dma.hbm_to_vmem [thread:$0]  %s7334_s6, 32, %s70_s29, [#allocation8]  }
  0x55   :  { %5568 = dma.done.wait [#allocation3], 3456  }
  0x56   :  { %5569 = vsyncadd [#allocation3], 4294963840 }
  0x57   :  { %5570 = dma.done.wait [#allocation5], 26160  }
  0x58   :  { %5571 = vsyncadd [#allocation5], 4294941136 }
  0x59   :  { %5572 = dma.done.wait [#allocation8], 64  }
  0x5a   :  { %5573 = vsyncadd [#allocation8], 4294967232  ;;  %v5583_v0 = vmov 0.0   ;;  %v102_v1 = vld [vmem:[#allocation2 + $0x50] sm:$0xff]  ;;  %v105_v2 = vld [vmem:[#allocation2 + $0x68] sm:$0xff]  ;;  %vm126_vm0 = vcmask 1043456  }
  0x5b   :  { %200 = vmatprep.mubr.f32.mxu1 %v5583_v0  ;;  %572 = vmatprep.mubr.f32.mxu0 %v5583_v0  ;;  %v101_v3 = vld [vmem:[#allocation2 + $0x48] sm:$0xff]  ;;  %v4539_v4 = vpack.c.bf16 %v105_v2, %v102_v1  ;;  %v104_v5 = vld [vmem:[#allocation2 + $0x60] sm:$0xff]  ;;  %vm113_vm1 = vcmask 1046528   ;;  %v103_v12 = vld [vmem:[#allocation2 + $0x58] sm:$0xff]  ;;  %vm119_vm2 = vcmask 162816   ;;  %v5584_v27 = vmov 0.0|0.0  }
  0x5c   :  { %v4541_v6 = vpack.c.bf16 %v104_v5, %v101_v3  ;;  %v108_v7 = vld [vmem:[#allocation2 + $0x80] sm:$0xf]  ;;  %v5697_v9 = vld [vmem:[%s7328_s0 + $0x8] sm:$0xff]  ;;  %v106_v13 = vld [vmem:[#allocation2 + $0x70] sm:$0xff]  ;;  %vm487_vm3 = vcmask 1045504   ;;  %vm5585_vm4 = vmmov 0  }
  0x5d   :  { %v5692_v8 = vld [vmem:[%s7328_s0] sm:$0xff]  ;;  %4540 = vmatprep.subr.bf16.mxu1 %v4539_v4  ;;  %v115_v11 = vrot.slane %v5697_v9, 1  ;;  %v5704_v14 = vld [vmem:[%s7328_s0 + $0x10] sm:$0xf]  ;;  %v107_v15 = vld [vmem:[#allocation2 + $0x78] sm:$0xf]  ;;  %v4544_v18 = vpack.c.bf16 %v106_v13, %v103_v12 }
  0x5e   :  { %v114_v10 = vrot.slane %v5692_v8, 1  ;;  %4542 = vmatpush1.bf16.msra.mxu1 %v4541_v6  ;;  %v479_v16 = vld [vmem:[#allocation2 + $0x98] sm:$0xff]  ;;  %v117_v19 = vrot.slane %v5704_v14, 1  ;;  %v482_v20 = vld [vmem:[#allocation2 + $0xb0] sm:$0xff]  ;;  %v481_v23 = vld [vmem:[#allocation2 + $0xa8] sm:$0xff]  ;;  %v488_v30 = vrot.slane %v5692_v8, 2 }
  0x5f   :  { %4104 = vmatprep.subr.msk.mxu1 %vm126_vm0, %v108_v7  ;;  %v478_v21 = vld [vmem:[#allocation2 + $0x90] sm:$0xff]  ;;  %v4553_v22 = vpack.c.bf16 %v482_v20, %v479_v16  ;;  %v92_v24 = vld [vmem:[#allocation2 + $0x8] sm:$0xff]  ;;  %v95_v25 = vld [vmem:[#allocation2 + $0x20] sm:$0xff]  ;;  %v489_v31 = vrot.slane %v5697_v9, 2  ;;  %v491_v36 = vrot.slane %v5704_v14, 2  ;;  %s5586_s19 = smov 112  }
  0x60   :  { %v116_v17 = vsel %vm113_vm1, %v114_v10, %v115_v11  ;;  %v4555_v26 = vpack.c.bf16 %v481_v23, %v478_v21  ;;  %v118_v28 = vsel %vm113_vm1, %v115_v11, %v117_v19  ;;  %v485_v29 = vld [vmem:[#allocation2 + $0xc8] sm:$0xf]  ;;  %v4546_v33 = vpack.c.bf16 %v95_v25, %v92_v24  ;;  %v484_v34 = vld [vmem:[#allocation2 + $0xc0] sm:$0xf]  ;;  %v94_v38 = vld [vmem:[#allocation2 + $0x18] sm:$0xff] }
  0x61   :  { %v109_v32 = vld [vmem:[#allocation2 + $0x88] sm:$0xf]  ;;  %4554 = vmatprep.subr.bf16.mxu0 %v4553_v22  ;;  %v490_v35 = vsel %vm487_vm3, %v488_v30, %v489_v31  ;;  %v91_v37 = vld [vmem:[#allocation2] sm:$0xff]  ;;  %v492_v40 = vsel %vm487_vm3, %v489_v31, %v491_v36  ;;  %v98_v41 = vld [vmem:[#allocation2 + $0x38] sm:$0xf]  ;;  %vm784_vm5 = vcmask 916480  }
  0x62   :  { %4105 = vmatpush1.msk.msra.mxu1 %vm126_vm0, %v107_v15  ;;  %4556 = vmatpush1.bf16.msra.mxu0 %v4555_v26  ;;  %v4548_v39 = vpack.c.bf16 %v94_v38, %v91_v37  ;;  %v97_v42 = vld [vmem:[#allocation2 + $0x30] sm:$0xf]  ;;  %v96_v44 = vld [vmem:[#allocation2 + $0x28] sm:$0xff]  ;;  %v99_v46 = vld [vmem:[#allocation2 + $0x40] sm:$0xf]  ;;  %vm965_vm6 = vcmask 130048  }
  0x63   :  { %4106 = vmatmul.mubr.msk.f32.vlgmr.msra.gmra.mrb[0].mxu1 %vm119_vm2, %v116_v17  ;;  %4543 = vmatprep.subr.bf16.mxu1 %v5584_v27  ;;  %v93_v43 = vld [vmem:[#allocation2 + $0x10] sm:$0xff]  ;;  %v480_v47 = vld [vmem:[#allocation2 + $0xa0] sm:$0xff]  ;;  %v483_v48 = vld [vmem:[#allocation2 + $0xb8] sm:$0xff]  ;;  %vm1720_vm7 = vcmask 785408   ;;  %vm2094_vm8 = vcmask 392192   ;;  %vm2097_vm9 = vcmask 387072  }
  0x64   :  { %4545 = vmatpush3.bf16.msra.mxu1 %v4544_v18  ;;  %206 = vmatprep.mubr.f32.mxu1 %v5583_v0  ;;  %v4551_v45 = vpack.c.bf16 %v96_v44, %v93_v43  ;;  %v4558_v49 = vpack.c.bf16 %v483_v48, %v480_v47  ;;  %v486_v50 = vld [vmem:[#allocation2 + $0xd0] sm:$0xf]  ;;  %v879_v51 = vld [vmem:[#allocation6 + $0x228] sm:$0xff]  ;;  %v881_v52 = vld [vmem:[#allocation6 + $0x238] sm:$0xff] }
  0x65   :  { %4453 = vmatprep.subr.mxu1 %v5583_v0  ;;  %4122 = vmatprep.subr.msk.mxu0 %vm126_vm0, %v485_v29  ;;  %v878_v53 = vld [vmem:[#allocation6 + $0x220] sm:$0xff]  ;;  %v4560_v54 = vpack.c.bf16 %v881_v52, %v879_v51  ;;  %v880_v55 = vld [vmem:[#allocation6 + $0x230] sm:$0xff]  ;;  %v883_v56 = vld [vmem:[#allocation6 + $0x248] sm:$0xff] }
  0x66   :  { %4123 = vmatpush1.msk.msra.mxu0 %vm126_vm0, %v484_v34  ;;  %v885_v57 = vld [vmem:[#allocation6 + $0x258] sm:$0xff]  ;;  %v4562_v58 = vpack.c.bf16 %v880_v55, %v878_v53  ;;  %v882_v60 = vld [vmem:[#allocation6 + $0x240] sm:$0xff]  ;;  %v884_v61 = vld [vmem:[#allocation6 + $0x250] sm:$0xff] }
  0x67   :  { %4107 = vmatmul.mubr.msk.f32.gmra.mrb[2].mxu1 %vm119_vm2, %v118_v28  ;;  %4124 = vmatmul.mubr.msk.f32.vlgmr.msra.gmra.mrb[0].mxu0 %vm119_vm2, %v490_v35  ;;  %v4564_v59 = vpack.c.bf16 %v885_v57, %v883_v56  ;;  %v887_v62 = vld [vmem:[#allocation6 + $0x268] sm:$0xff]  ;;  %v889_v63 = vld [vmem:[#allocation6 + $0x278] sm:$0xff]  ;;  %v4566_v1 = vpack.c.bf16 %v884_v61, %v882_v60  ;;  %v886_v3 = vld [vmem:[#allocation6 + $0x260] sm:$0xff] }
  0x68   :  { %212 = vmatprep.mubr.f32.mxu1 %v5583_v0  ;;  %4454 = vmatpush3.msk.msra.mxu1 %vm126_vm0, %v109_v32  ;;  %v4568_v2 = vpack.c.bf16 %v889_v63, %v887_v62  ;;  %v888_v4 = vld [vmem:[#allocation6 + $0x270] sm:$0xff]  ;;  %v891_v5 = vld [vmem:[#allocation6 + $0x288] sm:$0xff]  ;;  %v893_v6 = vld [vmem:[#allocation6 + $0x298] sm:$0xff] }
  0x69   :  { %4547 = vmatprep.subr.bf16.mxu1 %v4546_v33  ;;  %578 = vmatprep.mubr.f32.mxu0 %v5583_v0  ;;  %v4570_v7 = vpack.c.bf16 %v888_v4, %v886_v3  ;;  %v892_v10 = vld [vmem:[#allocation6 + $0x290] sm:$0xff]  ;;  %v895_v11 = vld [vmem:[#allocation6 + $0x2a8] sm:$0xff]  ;;  %v897_v12 = vld [vmem:[#allocation6 + $0x2b8] sm:$0xff] }
  0x6a   :  { %4561 = vmatprep.subr.bf16.mxu0 %v4560_v54  ;;  %v894_v15 = vld [vmem:[#allocation6 + $0x2a0] sm:$0xff]  ;;  %v896_v16 = vld [vmem:[#allocation6 + $0x2b0] sm:$0xff]  ;;  %v901_v18 = vld [vmem:[#allocation6 + $0x2d8] sm:$0xff] }
  0x6b   :  { %4108 = vmatmul.mubr.msk.f32.gmra.mrb[4].mxu1 %vm119_vm2, %v117_v19  ;;  %4125 = vmatmul.mubr.msk.f32.gmra.mrb[2].mxu0 %vm119_vm2, %v492_v40  ;;  %v898_v21 = vld [vmem:[#allocation6 + $0x2c0] sm:$0xff]  ;;  %v900_v22 = vld [vmem:[#allocation6 + $0x2d0] sm:$0xff]  ;;  %v903_v23 = vld [vmem:[#allocation6 + $0x2e8] sm:$0xff] }
  0x6c   :  { %4455 = vmatprep.mubr.msk.f32.mxu1 %vm5585_vm4, %v5583_v0  ;;  %584 = vmatprep.mubr.f32.mxu0 %v5583_v0  ;;  %v905_v24 = vld [vmem:[#allocation6 + $0x2f8] sm:$0xff]  ;;  %v4582_v25 = vpack.c.bf16 %v900_v22, %v898_v21  ;;  %v904_v29 = vld [vmem:[#allocation6 + $0x2f0] sm:$0xff]  ;;  %v907_v30 = vld [vmem:[#allocation6 + $0x308] sm:$0xff] }
  0x6d   :  { %4563 = vmatpush1.bf16.msra.mxu0 %v4562_v58  ;;  %v4584_v26 = vpack.c.bf16 %v905_v24, %v903_v23  ;;  %v909_v31 = vld [vmem:[#allocation6 + $0x318] sm:$0xff]  ;;  %v906_v34 = vld [vmem:[#allocation6 + $0x300] sm:$0xff] }
  0x6e   :  { %4565 = vmatprep.subr.bf16.mxu0 %v4564_v59  ;;  %v4588_v33 = vpack.c.bf16 %v909_v31, %v907_v30  ;;  %v5787_v51 = vld [vmem:[#allocation4] sm:$0x7]  ;;  %v914_v21 = vld [vmem:[#allocation6 + $0x340] sm:$0xff] }
  0x6f   :  { %4456 = vmatmul.mubr.msk.f32.vlgmr.msra.gmra.mrb[6].mxu1 %vm119_vm2, %v116_v17  ;;  %4126 = vmatmul.mubr.msk.f32.gmra.mrb[4].mxu0 %vm119_vm2, %v491_v36  ;;  %v899_v17 = vld [vmem:[#allocation6 + $0x2c8] sm:$0xff] }
  0x70   :  { %4549 = vmatpush1.bf16.msra.mxu1 %v4548_v39  ;;  %4458 = vmatprep.mubr.msk.f32.mxu1 %vm5585_vm4, %v5583_v0  ;;  %v4580_v20 = vpack.c.bf16 %v901_v18, %v899_v17  ;;  %v682_v39 = vlaneseq }
  0x71   :  { %4113 = vmatprep.subr.msk.mxu1 %vm126_vm0, %v98_v41  ;;  %4567 = vmatpush1.bf16.msra.mxu0 %v4566_v1 }
  0x72   :  { %4569 = vmatprep.subr.bf16.mxu0 %v4568_v2  ;;  %v5778_v44 = vshrl.u32 %v682_v39, 7 }
  0x73   :  { %4459 = vmatmul.mubr.msk.f32.gmra.mrb[8].mxu1 %vm119_vm2, %v118_v28  ;;  %v902_v28 = vld [vmem:[#allocation6 + $0x2e0] sm:$0xff] }
  0x74   :  { %4461 = vmatprep.mubr.msk.f32.mxu1 %vm5585_vm4, %v5583_v0  ;;  %4114 = vmatpush1.msk.msra.mxu1 %vm126_vm0, %v97_v42  ;;  %v4586_v32 = vpack.c.bf16 %v904_v29, %v902_v28  ;;  %v5790_v52 = vsub.s32 1, %v5778_v44  ;;  %v919_v28 = vld [vmem:[#allocation6 + $0x368] sm:$0xff]  ;;  %v921_v29 = vld [vmem:[#allocation6 + $0x378] sm:$0xff] }
  0x75   :  { %4550 = vmatprep.subr.bf16.mxu1 %v5584_v27  ;;  %4571 = vmatpush1.bf16.msra.mxu0 %v4570_v7  ;;  %v4600_v39 = vpack.c.bf16 %v921_v29, %v919_v28 }
  0x76   :  { %v689_v56 = vrot.slane %v5787_v51, %v5790_v52 }
  0x77   :  { %4462 = vmatmul.mubr.msk.f32.gmra.mrb[10].mxu1 %vm119_vm2, %v117_v19  ;;  %v4578_v19 = vpack.c.bf16 %v896_v16, %v894_v15  ;;  %v912_v15 = vld [vmem:[#allocation6 + $0x330] sm:$0xff] }
  0x78   :  { %378 = vmatprep.mubr.f32.mxu1 %v5583_v0 }
  0x7b   :  { %4115 = vmatmul.mubr.msk.f32.vlgmr.msra.gmra.mrb[0].mxu1 %vm119_vm2, %v5692_v8 }
  0x7c   :  { %4552 = vmatpush3.bf16.msra.mxu1 %v4551_v45  ;;  %384 = vmatprep.mubr.f32.mxu1 %v5583_v0 }
  0x7d   :  { %4468 = vmatprep.subr.mxu1 %v5583_v0 }
  0x7f   :  { %4116 = vmatmul.mubr.msk.f32.gmra.mrb[2].mxu1 %vm119_vm2, %v5697_v9 }
  0x80   :  { %390 = vmatprep.mubr.f32.mxu1 %v5583_v0  ;;  %4469 = vmatpush3.msk.msra.mxu1 %vm126_vm0, %v99_v46 }
  0x81   :  { %4557 = vmatprep.subr.bf16.mxu1 %v5584_v27 }
  0x83   :  { %4117 = vmatmul.mubr.msk.f32.gmra.mrb[4].mxu1 %vm119_vm2, %v5704_v14 }
  0x84   :  { %4470 = vmatprep.mubr.msk.f32.mxu1 %vm5585_vm4, %v5583_v0 }
  0x87   :  { %4471 = vmatmul.mubr.msk.f32.vlgmr.msra.gmra.mrb[12].mxu1 %vm119_vm2, %v5692_v8  ;;  %v4572_v8 = vpack.c.bf16 %v893_v6, %v891_v5 }
  0x88   :  { %4559 = vmatpush3.bf16.msra.mxu1 %v4558_v49  ;;  %4473 = vmatprep.mubr.msk.f32.mxu1 %vm5585_vm4, %v5583_v0  ;;  %v5783_v49 = vsub.s32 0, %v5778_v44 }
  0x89   :  { %4483 = vmatprep.subr.mxu1 %v5583_v0  ;;  %4573 = vmatprep.subr.bf16.mxu0 %v4572_v8  ;;  %v911_v8 = vld [vmem:[#allocation6 + $0x328] sm:$0xff] }
  0x8a   :  { %v685_v54 = vrot.slane %v5787_v51, %v5783_v49 }
  0x8b   :  { %4474 = vmatmul.mubr.msk.f32.gmra.mrb[14].mxu1 %vm119_vm2, %v5697_v9  ;;  %v890_v9 = vld [vmem:[#allocation6 + $0x280] sm:$0xff] }
  0x8c   :  { %4476 = vmatprep.mubr.msk.f32.mxu1 %vm5585_vm4, %v5583_v0  ;;  %4484 = vmatpush3.msk.msra.mxu1 %vm126_vm0, %v486_v50  ;;  %v4574_v13 = vpack.c.bf16 %v892_v10, %v890_v9  ;;  %v913_v9 = vld [vmem:[#allocation6 + $0x338] sm:$0xff] }
  0x8e   :  { %4575 = vmatpush1.bf16.msra.mxu0 %v4574_v13  ;;  %v4592_v13 = vpack.c.bf16 %v913_v9, %v911_v8 }
  0x8f   :  { %4477 = vmatmul.mubr.msk.f32.gmra.mrb[16].mxu1 %vm119_vm2, %v5704_v14  ;;  %v4576_v14 = vpack.c.bf16 %v897_v12, %v895_v11 }
  0x90   :  { %4485 = vmatprep.mubr.msk.f32.mxu1 %vm5585_vm4, %v5583_v0 }
  0x91   :  { %4577 = vmatprep.subr.bf16.mxu0 %v4576_v14  ;;  %v910_v14 = vld [vmem:[#allocation6 + $0x320] sm:$0xff] }
  0x92   :  { %4579 = vmatpush1.bf16.msra.mxu0 %v4578_v19  ;;  %v4594_v18 = vpack.c.bf16 %v912_v15, %v910_v14  ;;  %v915_v19 = vld [vmem:[#allocation6 + $0x348] sm:$0xff] }
  0x93   :  { %4486 = vmatmul.mubr.msk.f32.vlgmr.msra.gmra.mrb[18].mxu1 %vm119_vm2, %v490_v35  ;;  %4581 = vmatprep.subr.bf16.mxu0 %v4580_v20  ;;  %v908_v35 = vld [vmem:[#allocation6 + $0x310] sm:$0xff]  ;;  %v917_v20 = vld [vmem:[#allocation6 + $0x358] sm:$0xff] }
  0x94   :  { %4488 = vmatprep.mubr.msk.f32.mxu1 %vm5585_vm4, %v5583_v0 }
  0x96   :  { %4583 = vmatpush1.bf16.msra.mxu0 %v4582_v25  ;;  %v4596_v25 = vpack.c.bf16 %v917_v20, %v915_v19  ;;  %v931_v20 = vld [vmem:[#allocation6 + $0x3c8] sm:$0xff] }
  0x97   :  { %4489 = vmatmul.mubr.msk.f32.gmra.mrb[20].mxu1 %vm119_vm2, %v492_v40  ;;  %4585 = vmatprep.subr.bf16.mxu0 %v4584_v26  ;;  %v916_v26 = vld [vmem:[#allocation6 + $0x350] sm:$0xff] }
  0x98   :  { %4491 = vmatprep.mubr.msk.f32.mxu1 %vm5585_vm4, %v5583_v0 }
  0x9a   :  { %4587 = vmatpush1.bf16.msra.mxu0 %v4586_v32 }
  0x9b   :  { %4492 = vmatmul.mubr.msk.f32.gmra.mrb[22].mxu1 %vm119_vm2, %v491_v36  ;;  %v4590_v36 = vpack.c.bf16 %v908_v35, %v906_v34  ;;  %4589 = vmatprep.subr.bf16.mxu0 %v4588_v33  ;;  %v4598_v34 = vpack.c.bf16 %v916_v26, %v914_v21  ;;  %v933_v21 = vld [vmem:[#allocation6 + $0x3d8] sm:$0xff]  ;;  %v932_v26 = vld [vmem:[#allocation6 + $0x3d0] sm:$0xff] }
  0x9e   :  { %4591 = vmatpush1.bf16.msra.mxu0 %v4590_v36 }
  0x9f   :  { %4593 = vmatprep.subr.bf16.mxu0 %v4592_v13 }
  0xa2   :  { %4595 = vmatpush1.bf16.msra.mxu0 %v4594_v18 }
  0xa3   :  { %4597 = vmatprep.subr.bf16.mxu0 %v4596_v25  ;;  %v4612_v25 = vpack.c.bf16 %v933_v21, %v931_v20 }
  0xa6   :  { %4599 = vmatpush1.bf16.msra.mxu0 %v4598_v34  ;;  %v937_v34 = vld [vmem:[#allocation6 + $0x3f8] sm:$0xff] }
  0xa7   :  { %4601 = vmatprep.subr.bf16.mxu0 %v4600_v39 }
 0x13a   :  { %v574_v37 = vpop.f32.mrb[0].mxu0 }
 0x13b   :  { %v576_v38 = vpop.f32.mrb[1].mxu0 }
 0x13e   :  { %v580_v41 = vpop.f32.mrb[2].mxu0 }
 0x13f   :  { %v582_v43 = vpop.f32.mrb[3].mxu0 }
 0x142   :  { %v285_v40 = vpop.f32.mrb[6].mxu1  ;;  %v586_v46 = vpop.f32.mrb[4].mxu0 }
 0x143   :  { %v4457_v42 = vpop.f32.mrb[7].mxu1  ;;  %v588_v48 = vpop.f32.mrb[5].mxu0 }
 0x144   :  { %v920_v42 = vld [vmem:[#allocation6 + $0x370] sm:$0xff] }
 0x146   :  { %v5780_v45 = vpop.f32.mrb[8].mxu1 }
 0x147   :  { %v4460_v47 = vpop.f32.mrb[9].mxu1 }
 0x14a   :  { %v5785_v50 = vpop.f32.mrb[10].mxu1 }
 0x14b   :  { %v4463_v53 = vpop.f32.mrb[11].mxu1 }
 0x14c   :  { %v925_v53 = vld [vmem:[#allocation6 + $0x398] sm:$0xff] }
 0x14e   :  { %v380_v55 = vpop.f32.mrb[0].mxu1 }
 0x14f   :  { %v5325_v57 = vadd.f32 %v574_v37, %v380_v55  ;;  %v382_v58 = vpop.f32.mrb[1].mxu1 }
 0x150   :  { %v5326_v59 = vadd.f32 %v576_v38, %v382_v58 }
 0x151   :  { %v697_v60 = vadd.f32 %v5325_v57, %v685_v54 }
 0x152   :  { %v698_v61 = vadd.f32 %v5326_v59, %v689_v56  ;;  %v386_v62 = vpop.f32.mrb[2].mxu1 }
 0x153   :  { %v5327_v63 = vadd.f32 %v580_v41, %v386_v62  ;;  %v388_v1 = vpop.f32.mrb[3].mxu1  ;;  %v706_v3 = vmax.f32 %v697_v60, 0.0  ;;  %v918_v41 = vld [vmem:[#allocation6 + $0x360] sm:$0xff] }
 0x154   :  { %v5328_v2 = vadd.f32 %v582_v43, %v388_v1  ;;  %v707_v5 = vmax.f32 %v698_v61, 0.0  ;;  %v4602_v57 = vpack.c.bf16 %v920_v42, %v918_v41  ;;  %v922_v62 = vld [vmem:[#allocation6 + $0x380] sm:$0xff]  ;;  %v936_v42 = vld [vmem:[#allocation6 + $0x3f0] sm:$0xff] }
 0x155   :  { %v700_v4 = vadd.f32 %v5327_v63, %v685_v54  ;;  %v724_v22 = vrot.slane %v706_v3, 1  ;;  %v924_v63 = vld [vmem:[#allocation6 + $0x390] sm:$0xff]  ;;  %v934_v41 = vld [vmem:[#allocation6 + $0x3e0] sm:$0xff] }
 0x156   :  { %v701_v6 = vadd.f32 %v5328_v2, %v689_v56  ;;  %v392_v7 = vpop.f32.mrb[4].mxu1  ;;  %v727_v30 = vrot.slane %v707_v5, 1  ;;  %4603 = vmatpush1.bf16.msra.mxu0 %v4602_v57  ;;  %v939_v57 = vld [vmem:[#allocation6 + $0x408] sm:$0xff] }
 0x157   :  { %v709_v10 = vmax.f32 %v700_v4, 0.0  ;;  %v5329_v11 = vadd.f32 %v586_v46, %v392_v7  ;;  %v394_v12 = vpop.f32.mrb[5].mxu1  ;;  %v692_v4 = vsub.s32 2, %v5778_v44 }
 0x158   :  { %v710_v16 = vmax.f32 %v701_v6, 0.0  ;;  %v5330_v17 = vadd.f32 %v588_v48, %v394_v12  ;;  %v923_v48 = vld [vmem:[#allocation6 + $0x388] sm:$0xff]  ;;  %v929_v12 = vld [vmem:[#allocation6 + $0x3b8] sm:$0xff] }
 0x159   :  { %v725_v23 = vrot.slane %v709_v10, 1  ;;  %v5796_v24 = vadd.f32 %v5329_v11, %v685_v54  ;;  %v4604_v61 = vpack.c.bf16 %v925_v53, %v923_v48  ;;  %v693_v9 = vrot.slane %v5787_v51, %v692_v4  ;;  %v927_v11 = vld [vmem:[#allocation6 + $0x3a8] sm:$0xff]  ;;  %v930_v51 = vld [vmem:[#allocation6 + $0x3c0] sm:$0xff] }
 0x15a   :  { %v728_v31 = vrot.slane %v710_v16, 1  ;;  %v5798_v32 = vadd.f32 %v5330_v17, %v689_v56  ;;  %v463_v33 = vpop.f32.mrb[12].mxu1  ;;  %v4608_v15 = vpack.c.bf16 %v929_v12, %v927_v11  ;;  %v4614_v28 = vpack.c.bf16 %v932_v26, %v930_v51  ;;  %v942_v51 = vld [vmem:[#allocation6 + $0x420] sm:$0xff]  ;;  %v944_v26 = vld [vmem:[#allocation6 + $0x430] sm:$0xff] }
 0x15b   :  { %v712_v35 = vmax.f32 %v5796_v24, 0.0  ;;  %v464_v36 = vadd.f32 %v463_v33, %v285_v40  ;;  %v4472_v37 = vpop.f32.mrb[13].mxu1  ;;  %v726_v38 = vsel %vm113_vm1, %v724_v22, %v725_v23  ;;  %4605 = vmatprep.subr.bf16.mxu0 %v4604_v61  ;;  %v935_v33 = vld [vmem:[#allocation6 + $0x3e8] sm:$0xff] }
 0x15c   :  { %v713_v43 = vmax.f32 %v5798_v32, 0.0  ;;  %v729_v46 = vsel %vm113_vm1, %v727_v30, %v728_v31  ;;  %v5804_v47 = vmax.f32 %v706_v3, %v726_v38  ;;  %v4616_v39 = vpack.c.bf16 %v937_v34, %v935_v33 }
 0x15d   :  { %v5808_v54 = vrot.slane %v712_v35, 1  ;;  %v5810_v40 = vmax.f32 %v707_v5, %v729_v46  ;;  %v4618_v46 = vpack.c.bf16 %v936_v42, %v934_v41  ;;  %v4626_v34 = vpack.c.bf16 %v944_v26, %v942_v51  ;;  %v814_v42 = vld [vmem:[#allocation6 + $0x28] sm:$0xff]  ;;  %v835_v51 = vld [vmem:[#allocation6 + $0xd0] sm:$0xff] }
 0x15e   :  { %v5814_v55 = vrot.slane %v713_v43, 1  ;;  %v468_v56 = vpop.f32.mrb[14].mxu1  ;;  %v838_v26 = vld [vmem:[#allocation6 + $0xe8] sm:$0xff] }
 0x15f   :  { %v469_v58 = vadd.f32 %v468_v56, %v5780_v45  ;;  %v4475_v59 = vpop.f32.mrb[15].mxu1  ;;  %v734_v60 = vsel %vm113_vm1, %v725_v23, %v5808_v54  ;;  %v4606_v45 = vpack.c.bf16 %v924_v63, %v922_v62  ;;  %v938_v62 = vld [vmem:[#allocation6 + $0x400] sm:$0xff]  ;;  %v940_v63 = vld [vmem:[#allocation6 + $0x410] sm:$0xff] }
 0x160   :  { %v736_v1 = vsel %vm113_vm1, %v728_v31, %v5814_v55  ;;  %v5821_v2 = vmax.f32 %v709_v10, %v734_v60 }
 0x161   :  { %v5823_v3 = vmax.f32 %v710_v16, %v736_v1  ;;  %4607 = vmatpush1.bf16.msra.mxu0 %v4606_v45  ;;  %v928_v16 = vld [vmem:[#allocation6 + $0x3b0] sm:$0xff]  ;;  %v5837_v1 = vmax.f32 %v712_v35, %v5808_v54  ;;  %v943_v35 = vld [vmem:[#allocation6 + $0x428] sm:$0xff]  ;;  %v945_v54 = vld [vmem:[#allocation6 + $0x438] sm:$0xff] }
 0x162   :  { %v473_v5 = vpop.f32.mrb[16].mxu1  ;;  %4609 = vmatprep.subr.bf16.mxu0 %v4608_v15  ;;  %v4624_v32 = vpack.c.bf16 %v945_v54, %v943_v35  ;;  %v821_v35 = vld [vmem:[#allocation6 + $0x60] sm:$0xff]  ;;  %v823_v54 = vld [vmem:[#allocation6 + $0x70] sm:$0xff] }
 0x163   :  { %v474_v6 = vadd.f32 %v473_v5, %v5785_v50  ;;  %v4478_v7 = vpop.f32.mrb[17].mxu1  ;;  %v5418_v8 = vpack.i.bf16 %v5823_v3, %v5810_v40  ;;  %v926_v50 = vld [vmem:[#allocation6 + $0x3a0] sm:$0xff]  ;;  %v5842_v5 = vmax.f32 %v713_v43, %v5814_v55  ;;  %v5423_v43 = vpack.i.bf16 %v5821_v2, %v5804_v47 }
 0x164   :  { %v4610_v17 = vpack.c.bf16 %v928_v16, %v926_v50 }
 0x165   :  { %5419 = vrot.lane.b32.xlu0 %v5418_v8, %s5586_s19 }
 0x166   :  { %v657_v10 = vpop.f32.mrb[18].mxu1  ;;  %4611 = vmatpush1.bf16.msra.mxu0 %v4610_v17 }
 0x167   :  { %v673_v13 = vadd.f32 %v657_v10, %v464_v36  ;;  %v4487_v14 = vpop.f32.mrb[19].mxu1  ;;  %4613 = vmatprep.subr.bf16.mxu0 %v4612_v25 }
 0x169   :  { %v699_v18 = vadd.f32 %v693_v9, %v673_v13 }
 0x16a   :  { %v662_v19 = vpop.f32.mrb[20].mxu1  ;;  %4615 = vmatpush1.bf16.msra.mxu0 %v4614_v28 }
 0x16b   :  { %v676_v22 = vadd.f32 %v662_v19, %v469_v58  ;;  %v4490_v23 = vpop.f32.mrb[21].mxu1  ;;  %v708_v29 = vmax.f32 %v699_v18, 0.0  ;;  %4617 = vmatprep.subr.bf16.mxu0 %v4616_v39  ;;  %v941_v58 = vld [vmem:[#allocation6 + $0x418] sm:$0xff] }
 0x16c   :  { %v4620_v61 = vpack.c.bf16 %v941_v58, %v939_v57  ;;  %v813_v57 = vld [vmem:[#allocation6 + $0x20] sm:$0xff]  ;;  %v815_v58 = vld [vmem:[#allocation6 + $0x30] sm:$0xff] }
 0x16d   :  { %v702_v30 = vadd.f32 %v693_v9, %v676_v22  ;;  %v730_v48 = vrot.slane %v708_v29, 1 }
 0x16e   :  { %v667_v31 = vpop.f32.mrb[22].mxu1  ;;  %4619 = vmatpush1.bf16.msra.mxu0 %v4618_v46  ;;  %v816_v46 = vld [vmem:[#allocation6 + $0x38] sm:$0xff] }
 0x16f   :  { %v711_v36 = vmax.f32 %v702_v30, 0.0  ;;  %v679_v37 = vadd.f32 %v667_v31, %v474_v6  ;;  %v4493_v38 = vpop.f32.mrb[23].mxu1  ;;  %v4622_v6 = vpack.c.bf16 %v940_v63, %v938_v62  ;;  %4621 = vmatprep.subr.bf16.mxu0 %v4620_v61  ;;  %v812_v30 = vld [vmem:[#allocation6 + $0x18] sm:$0xff]  ;;  %v4634_v62 = vpack.c.bf16 %v815_v58, %v813_v57  ;;  %v845_v57 = vld [vmem:[#allocation6 + $0x120] sm:$0xff]  ;;  %v847_v58 = vld [vmem:[#allocation6 + $0x130] sm:$0xff] }
 0x170   :  { %v820_v61 = vld [vmem:[#allocation6 + $0x58] sm:$0xff] }
 0x171   :  { %v731_v53 = vrot.slane %v711_v36, 1  ;;  %v705_v56 = vadd.f32 %v693_v9, %v679_v37  ;;  %v5428_v9 = vpack.i.bf16 %v5837_v1, %v5842_v5 }
 0x172   :  { %4623 = vmatpush1.bf16.msra.mxu0 %v4622_v6  ;;  %v819_v6 = vld [vmem:[#allocation6 + $0x50] sm:$0xff] }
 0x173   :  { %v714_v59 = vmax.f32 %v705_v56, 0.0  ;;  %v732_v60 = vsel %vm113_vm1, %v730_v48, %v731_v53  ;;  %4625 = vmatprep.subr.bf16.mxu0 %v4624_v32  ;;  %v4632_v56 = vpack.c.bf16 %v816_v46, %v814_v42  ;;  %v826_v32 = vld [vmem:[#allocation6 + $0x88] sm:$0xff]  ;;  %v843_v42 = vld [vmem:[#allocation6 + $0x110] sm:$0xff] }
 0x174   :  { %v750_v45 = vmax.f32 %v708_v29, %v732_v60  ;;  %v810_v29 = vld [vmem:[#allocation6 + $0x8] sm:$0xff] }
 0x175   :  { %v737_v7 = vrot.slane %v714_v59, 1  ;;  %v818_v60 = vld [vmem:[#allocation6 + $0x48] sm:$0xff] }
 0x176   :  { %770 = vrot.lane.b32.xlu0 %v750_v45, %s5586_s19  ;;  %v4636_v63 = vpack.c.bf16 %v820_v61, %v818_v60  ;;  %v846_v46 = vld [vmem:[#allocation6 + $0x128] sm:$0xff]  ;;  %v852_v60 = vld [vmem:[#allocation6 + $0x158] sm:$0xff]  ;;  %v4666_v61 = vpack.c.bf16 %v847_v58, %v845_v57  ;;  %v1285_v57 = vld [vmem:[#allocation6 + $0x450] sm:$0xff] }
 0x177   :  { %v738_v8 = vsel %vm113_vm1, %v731_v53, %v737_v7  ;;  %v5853_v55 = vmax.f32 %v714_v59, %v737_v7  ;;  %v822_v7 = vld [vmem:[#allocation6 + $0x68] sm:$0xff] }
 0x178   :  { %v753_v24 = vmax.f32 %v711_v36, %v738_v8  ;;  %v4628_v36 = vpack.c.bf16 %v812_v30, %v810_v29  ;;  %v824_v8 = vld [vmem:[#allocation6 + $0x78] sm:$0xff]  ;;  %v1288_v58 = vld [vmem:[#allocation6 + $0x468] sm:$0xff] }
 0x179   :  { %v840_v29 = vld [vmem:[#allocation6 + $0xf8] sm:$0xff] }
 0x17a   :  { %5429 = vrot.lane.b32.xlu0 %v5428_v9, %s5586_s19  ;;  %776 = vrot.lane.b32.xlu1 %v753_v24, %s5586_s19 }
 0x17e   :  { %5424 = vrot.lane.b32.xlu1 %v5423_v43, %s5586_s19  ;;  %v828_v43 = vld [vmem:[#allocation6 + $0x98] sm:$0xff] }
 0x182   :  { %782 = vrot.lane.b32.xlu1 %v5853_v55, %s5586_s19 }
 0x1d7   :  { %v5420_v10 = vpop.permute.xlu0 %5419 }
 0x1d8   :  { %v5421_v11 = vunpack.i.l.bf16 %v5420_v10  ;;  %v5422_v14 = vunpack.i.h.bf16 %v5420_v10  ;;  %v4642_v10 = vpack.c.bf16 %v823_v54, %v821_v35  ;;  %v855_v35 = vld [vmem:[#allocation6 + $0x170] sm:$0xff]  ;;  %v858_v54 = vld [vmem:[#allocation6 + $0x188] sm:$0xff] }
 0x1e8   :  { %v771_v12 = vpop.permute.xlu0 %770 }
 0x1e9   :  { %v786_v13 = vsel %vm784_vm5, %v5421_v11, %v771_v12  ;;  %v5881_v39 = vmax.f32 %v750_v45, %v771_v12  ;;  %v817_v45 = vld [vmem:[#allocation6 + $0x40] sm:$0xff] }
 0x1ea   :  { %v5859_v15 = vmax.f32 %v5810_v40, %v786_v13  ;;  %v4638_v9 = vpack.c.bf16 %v819_v6, %v817_v45  ;;  %v825_v12 = vld [vmem:[#allocation6 + $0x80] sm:$0xff]  ;;  %v827_v13 = vld [vmem:[#allocation6 + $0x90] sm:$0xff]  ;;  %v854_v6 = vld [vmem:[#allocation6 + $0x168] sm:$0xff] }
 0x1eb   :  { %v958_v48 = vrot.slane %v5881_v39, 1  ;;  %v851_v45 = vld [vmem:[#allocation6 + $0x150] sm:$0xff] }
 0x1ec   :  { %v777_v50 = vpop.permute.xlu1 %776  ;;  %v955_v19 = vrot.slane %v5859_v15, 1 }
 0x1ed   :  { %v788_v16 = vsel %vm784_vm5, %v5422_v14, %v777_v50  ;;  %v5878_v37 = vmax.f32 %v753_v24, %v777_v50  ;;  %v4640_v24 = vpack.c.bf16 %v824_v8, %v822_v7  ;;  %v832_v50 = vld [vmem:[#allocation6 + $0xb8] sm:$0xff] }
 0x1ee   :  { %v5863_v17 = vmax.f32 %v5823_v3, %v788_v16  ;;  %v4646_v16 = vpack.c.bf16 %v827_v13, %v825_v12  ;;  %v856_v7 = vld [vmem:[#allocation6 + $0x178] sm:$0xff]  ;;  %v859_v12 = vld [vmem:[#allocation6 + $0x190] sm:$0xff]  ;;  %v862_v13 = vld [vmem:[#allocation6 + $0x1a8] sm:$0xff] }
 0x1ef   :  { %v959_v41 = vrot.slane %v5878_v37, 1 }
 0x1f0   :  { %v5425_v18 = vpop.permute.xlu1 %5424  ;;  %v956_v20 = vrot.slane %v5863_v17, 1 }
 0x1f1   :  { %v5427_v21 = vunpack.i.h.bf16 %v5425_v18  ;;  %v5426_v22 = vunpack.i.l.bf16 %v5425_v18  ;;  %v960_v59 = vsel %vm113_vm1, %v958_v48, %v959_v41  ;;  %v848_v48 = vld [vmem:[#allocation6 + $0x138] sm:$0xff] }
 0x1f2   :  { %v957_v23 = vsel %vm113_vm1, %v955_v19, %v956_v20  ;;  %v829_v19 = vld [vmem:[#allocation6 + $0xa0] sm:$0xff] }
 0x1f3   :  { %v787_v25 = vsel %vm784_vm5, %v5427_v21, %v5422_v14  ;;  %v785_v40 = vsel %vm784_vm5, %v5426_v22, %v5421_v11  ;;  %1034 = vmatprep.mubr.f32.mxu0 %v957_v23  ;;  %v4644_v11 = vpack.c.bf16 %v828_v43, %v826_v32  ;;  %v830_v14 = vld [vmem:[#allocation6 + $0xa8] sm:$0xff]  ;;  %v836_v22 = vld [vmem:[#allocation6 + $0xd8] sm:$0xff] }
 0x1f4   :  { %v5871_v28 = vmax.f32 %v5821_v2, %v787_v25  ;;  %v5874_v3 = vmax.f32 %v5804_v47, %v785_v40  ;;  %v809_v47 = vld [vmem:[#allocation6] sm:$0xff]  ;;  %v811_v2 = vld [vmem:[#allocation6 + $0x10] sm:$0xff]  ;;  %v4648_v18 = vpack.c.bf16 %v832_v50, %v830_v14  ;;  %v834_v21 = vld [vmem:[#allocation6 + $0xc8] sm:$0xff] }
 0x1f5   :  { %v4630_v53 = vpack.c.bf16 %v811_v2, %v809_v47  ;;  %v4652_v25 = vpack.c.bf16 %v836_v22, %v834_v21  ;;  %v833_v40 = vld [vmem:[#allocation6 + $0xc0] sm:$0xff]  ;;  %v860_v32 = vld [vmem:[#allocation6 + $0x198] sm:$0xff] }
 0x1f6   :  { %v952_v31 = vrot.slane %v5874_v3, 1  ;;  %v953_v33 = vrot.slane %v5871_v28, 1  ;;  %v4654_v30 = vpack.c.bf16 %v835_v51, %v833_v40  ;;  %v864_v14 = vld [vmem:[#allocation6 + $0x1b8] sm:$0xff]  ;;  %v867_v40 = vld [vmem:[#allocation6 + $0x1d0] sm:$0xff]  ;;  %v870_v51 = vld [vmem:[#allocation6 + $0x1e8] sm:$0xff] }
 0x1f7   :  { %v868_v21 = vld [vmem:[#allocation6 + $0x1d8] sm:$0xff] }
 0x1f8   :  { %v954_v38 = vsel %vm113_vm1, %v952_v31, %v953_v33  ;;  %v4656_v31 = vpack.c.bf16 %v840_v29, %v838_v26  ;;  %v872_v26 = vld [vmem:[#allocation6 + $0x1f8] sm:$0xff] }
 0x1f9   :  { %1035 = vmatmul.mubr.f32.vlgmr.msra.gmra.mrb[6].mxu0 %v954_v38  ;;  %v844_v38 = vld [vmem:[#allocation6 + $0x118] sm:$0xff] }
 0x1fa   :  { %1040 = vmatprep.mubr.f32.mxu0 %v956_v20  ;;  %4627 = vmatpush1.bf16.msra.mxu0 %v4626_v34  ;;  %v831_v20 = vld [vmem:[#allocation6 + $0xb0] sm:$0xff] }
 0x1fb   :  { %4629 = vmatprep.subr.bf16.mxu0 %v4628_v36  ;;  %v4650_v23 = vpack.c.bf16 %v831_v20, %v829_v19  ;;  %v839_v34 = vld [vmem:[#allocation6 + $0xf0] sm:$0xff]  ;;  %v842_v36 = vld [vmem:[#allocation6 + $0x108] sm:$0xff] }
 0x1fc   :  { %v4660_v2 = vpack.c.bf16 %v844_v38, %v842_v36  ;;  %v863_v19 = vld [vmem:[#allocation6 + $0x1b0] sm:$0xff]  ;;  %v866_v20 = vld [vmem:[#allocation6 + $0x1c8] sm:$0xff]  ;;  %v876_v36 = vld [vmem:[#allocation6 + $0x218] sm:$0xff] }
 0x1fd   :  { %1041 = vmatmul.mubr.f32.gmra.mrb[8].mxu0 %v953_v33  ;;  %v837_v33 = vld [vmem:[#allocation6 + $0xe0] sm:$0xff] }
 0x1fe   :  { %1111 = vmatprep.mubr.f32.mxu0 %v5583_v0  ;;  %v4658_v47 = vpack.c.bf16 %v839_v34, %v837_v33  ;;  %v871_v33 = vld [vmem:[#allocation6 + $0x1f0] sm:$0xff]  ;;  %v874_v34 = vld [vmem:[#allocation6 + $0x208] sm:$0xff] }
 0x201   :  { %4131 = vmatmul.mubr.msk.f32.vlgmr.msra.gmra.mrb[6].mxu0 %vm965_vm6, %v960_v59  ;;  %v850_v59 = vld [vmem:[#allocation6 + $0x148] sm:$0xff] }
 0x202   :  { %4631 = vmatpush1.bf16.msra.mxu0 %v4630_v53  ;;  %1117 = vmatprep.mubr.f32.mxu0 %v5583_v0 }
 0x203   :  { %4633 = vmatprep.subr.bf16.mxu0 %v4632_v56  ;;  %v4664_v56 = vpack.c.bf16 %v848_v48, %v846_v46  ;;  %v1286_v46 = vld [vmem:[#allocation6 + $0x458] sm:$0xff] }
 0x205   :  { %4132 = vmatmul.mubr.msk.f32.gmra.mrb[8].mxu0 %vm965_vm6, %v959_v41  ;;  %v841_v41 = vld [vmem:[#allocation6 + $0x100] sm:$0xff] }
 0x206   :  { %4635 = vmatpush1.bf16.msra.mxu0 %v4634_v62  ;;  %1192 = vmatprep.mubr.f32.mxu0 %v5859_v15  ;;  %v4662_v53 = vpack.c.bf16 %v843_v42, %v841_v41  ;;  %v4668_v62 = vpack.c.bf16 %v852_v60, %v850_v59  ;;  %v875_v41 = vld [vmem:[#allocation6 + $0x210] sm:$0xff]  ;;  %v1284_v42 = vld [vmem:[#allocation6 + $0x448] sm:$0xff]  ;;  %v1290_v59 = vld [vmem:[#allocation6 + $0x478] sm:$0xff] }
 0x207   :  { %4637 = vmatprep.subr.bf16.mxu0 %v4636_v63  ;;  %v849_v63 = vld [vmem:[#allocation6 + $0x140] sm:$0xff] }
 0x208   :  { %v4670_v8 = vpack.c.bf16 %v851_v45, %v849_v63  ;;  %v1289_v63 = vld [vmem:[#allocation6 + $0x470] sm:$0xff]  ;;  %v1292_v45 = vld [vmem:[#allocation6 + $0x488] sm:$0xff] }
 0x20a   :  { %4639 = vmatpush1.bf16.msra.mxu0 %v4638_v9  ;;  %v4672_v9 = vpack.c.bf16 %v856_v7, %v854_v6  ;;  %v1294_v6 = vld [vmem:[#allocation6 + $0x498] sm:$0xff]  ;;  %v1358_v7 = vrot.slane %v5863_v17, 2 }
 0x20b   :  { %4641 = vmatprep.subr.bf16.mxu0 %v4640_v24  ;;  %v853_v24 = vld [vmem:[#allocation6 + $0x160] sm:$0xff] }
 0x20c   :  { %v4674_v43 = vpack.c.bf16 %v855_v35, %v853_v24  ;;  %v4704_v24 = vpack.c.bf16 %v1294_v6, %v1292_v45  ;;  %v1291_v35 = vld [vmem:[#allocation6 + $0x480] sm:$0xff]  ;;  %v1321_v45 = vld [vmem:[#allocation6 + $0x570] sm:$0xff]  ;;  %v1324_v6 = vld [vmem:[#allocation6 + $0x588] sm:$0xff] }
 0x20e   :  { %4643 = vmatpush1.bf16.msra.mxu0 %v4642_v10  ;;  %v4676_v10 = vpack.c.bf16 %v860_v32, %v858_v54  ;;  %v1293_v54 = vld [vmem:[#allocation6 + $0x490] sm:$0xff]  ;;  %v1296_v32 = vld [vmem:[#allocation6 + $0x4a8] sm:$0xff] }
 0x20f   :  { %4645 = vmatprep.subr.bf16.mxu0 %v4644_v11  ;;  %v857_v11 = vld [vmem:[#allocation6 + $0x180] sm:$0xff] }
 0x210   :  { %v4678_v50 = vpack.c.bf16 %v859_v12, %v857_v11  ;;  %v4706_v11 = vpack.c.bf16 %v1293_v54, %v1291_v35  ;;  %v1323_v35 = vld [vmem:[#allocation6 + $0x580] sm:$0xff]  ;;  %v1325_v54 = vld [vmem:[#allocation6 + $0x590] sm:$0xff] }
 0x212   :  { %4647 = vmatpush1.bf16.msra.mxu0 %v4646_v16  ;;  %v4680_v16 = vpack.c.bf16 %v864_v14, %v862_v13  ;;  %v1295_v13 = vld [vmem:[#allocation6 + $0x4a0] sm:$0xff]  ;;  %v1297_v14 = vld [vmem:[#allocation6 + $0x4b0] sm:$0xff] }
 0x213   :  { %4649 = vmatprep.subr.bf16.mxu0 %v4648_v18  ;;  %v861_v18 = vld [vmem:[#allocation6 + $0x1a0] sm:$0xff] }
 0x214   :  { %v4682_v22 = vpack.c.bf16 %v863_v19, %v861_v18  ;;  %v1299_v19 = vld [vmem:[#allocation6 + $0x4c0] sm:$0xff] }
 0x216   :  { %4651 = vmatpush1.bf16.msra.mxu0 %v4650_v23  ;;  %v4684_v23 = vpack.c.bf16 %v868_v21, %v866_v20  ;;  %v1301_v20 = vld [vmem:[#allocation6 + $0x4d0] sm:$0xff]  ;;  %v1304_v21 = vld [vmem:[#allocation6 + $0x4e8] sm:$0xff] }
 0x217   :  { %4653 = vmatprep.subr.bf16.mxu0 %v4652_v25  ;;  %v865_v25 = vld [vmem:[#allocation6 + $0x1c0] sm:$0xff] }
 0x218   :  { %v4686_v29 = vpack.c.bf16 %v867_v40, %v865_v25  ;;  %v1303_v40 = vld [vmem:[#allocation6 + $0x4e0] sm:$0xff] }
 0x21a   :  { %4655 = vmatpush1.bf16.msra.mxu0 %v4654_v30  ;;  %v4688_v30 = vpack.c.bf16 %v872_v26, %v870_v51  ;;  %v1305_v51 = vld [vmem:[#allocation6 + $0x4f0] sm:$0xff]  ;;  %v1308_v26 = vld [vmem:[#allocation6 + $0x508] sm:$0xff] }
 0x21b   :  { %4657 = vmatprep.subr.bf16.mxu0 %v4656_v31  ;;  %v869_v31 = vld [vmem:[#allocation6 + $0x1e0] sm:$0xff] }
 0x21c   :  { %v4690_v38 = vpack.c.bf16 %v871_v33, %v869_v31  ;;  %v1307_v33 = vld [vmem:[#allocation6 + $0x500] sm:$0xff] }
 0x21e   :  { %4659 = vmatpush1.bf16.msra.mxu0 %v4658_v47  ;;  %v4692_v47 = vpack.c.bf16 %v876_v36, %v874_v34  ;;  %v1309_v34 = vld [vmem:[#allocation6 + $0x510] sm:$0xff]  ;;  %v1312_v36 = vld [vmem:[#allocation6 + $0x528] sm:$0xff] }
 0x21f   :  { %4661 = vmatprep.subr.bf16.mxu0 %v4660_v2  ;;  %v873_v2 = vld [vmem:[#allocation6 + $0x200] sm:$0xff] }
 0x220   :  { %v4694_v48 = vpack.c.bf16 %v875_v41, %v873_v2  ;;  %v1311_v41 = vld [vmem:[#allocation6 + $0x520] sm:$0xff] }
 0x222   :  { %4663 = vmatpush1.bf16.msra.mxu0 %v4662_v53  ;;  %v4696_v53 = vpack.c.bf16 %v1286_v46, %v1284_v42  ;;  %v1313_v42 = vld [vmem:[#allocation6 + $0x530] sm:$0xff]  ;;  %v1316_v46 = vld [vmem:[#allocation6 + $0x548] sm:$0xff] }
 0x223   :  { %4665 = vmatprep.subr.bf16.mxu0 %v4664_v56  ;;  %v1283_v56 = vld [vmem:[#allocation6 + $0x440] sm:$0xff] }
 0x224   :  { %v4698_v60 = vpack.c.bf16 %v1285_v57, %v1283_v56  ;;  %v1315_v57 = vld [vmem:[#allocation6 + $0x540] sm:$0xff] }
 0x226   :  { %4667 = vmatpush1.bf16.msra.mxu0 %v4666_v61  ;;  %v4700_v61 = vpack.c.bf16 %v1290_v59, %v1288_v58  ;;  %v1317_v58 = vld [vmem:[#allocation6 + $0x550] sm:$0xff]  ;;  %v1320_v59 = vld [vmem:[#allocation6 + $0x568] sm:$0xff] }
 0x227   :  { %4669 = vmatprep.subr.bf16.mxu0 %v4668_v62  ;;  %v1287_v62 = vld [vmem:[#allocation6 + $0x460] sm:$0xff] }
 0x22a   :  { %4671 = vmatpush1.bf16.msra.mxu0 %v4670_v8  ;;  %v4702_v8 = vpack.c.bf16 %v1289_v63, %v1287_v62  ;;  %v1319_v63 = vld [vmem:[#allocation6 + $0x560] sm:$0xff] }
 0x22b   :  { %4673 = vmatprep.subr.bf16.mxu0 %v4672_v9  ;;  %v1357_v9 = vrot.slane %v5859_v15, 2  ;;  %v1300_v15 = vld [vmem:[#allocation6 + $0x4c8] sm:$0xff] }
 0x22e   :  { %4675 = vmatpush1.bf16.msra.mxu0 %v4674_v43  ;;  %v1298_v43 = vld [vmem:[#allocation6 + $0x4b8] sm:$0xff] }
 0x22f   :  { %4677 = vmatprep.subr.bf16.mxu0 %v4676_v10  ;;  %v1359_v10 = vsel %vm487_vm3, %v1357_v9, %v1358_v7  ;;  %v4708_v12 = vpack.c.bf16 %v1298_v43, %v1296_v32  ;;  %v4734_v9 = vpack.c.bf16 %v1321_v45, %v1319_v63  ;;  %v1328_v32 = vld [vmem:[#allocation6 + $0x5a8] sm:$0xff]  ;;  %v1330_v43 = vld [vmem:[#allocation6 + $0x5b8] sm:$0xff]  ;;  %v1347_v63 = vld [vmem:[#allocation6 + $0x640] sm:$0xff] }
 0x230   :  { %v1349_v45 = vld [vmem:[#allocation6 + $0x650] sm:$0xff] }
 0x232   :  { %4679 = vmatpush1.bf16.msra.mxu0 %v4678_v50  ;;  %v1302_v50 = vld [vmem:[#allocation6 + $0x4d8] sm:$0xff] }
 0x233   :  { %4681 = vmatprep.subr.bf16.mxu0 %v4680_v16  ;;  %v4710_v16 = vpack.c.bf16 %v1297_v14, %v1295_v13  ;;  %v4712_v18 = vpack.c.bf16 %v1302_v50, %v1300_v15  ;;  %v1329_v13 = vld [vmem:[#allocation6 + $0x5b0] sm:$0xff]  ;;  %v1332_v14 = vld [vmem:[#allocation6 + $0x5c8] sm:$0xff]  ;;  %v1334_v15 = vld [vmem:[#allocation6 + $0x5d8] sm:$0xff] }
 0x236   :  { %4683 = vmatpush1.bf16.msra.mxu0 %v4682_v22  ;;  %v1306_v22 = vld [vmem:[#allocation6 + $0x4f8] sm:$0xff] }
 0x237   :  { %4685 = vmatprep.subr.bf16.mxu0 %v4684_v23  ;;  %v4714_v23 = vpack.c.bf16 %v1301_v20, %v1299_v19  ;;  %v4716_v25 = vpack.c.bf16 %v1306_v22, %v1304_v21  ;;  %v1333_v19 = vld [vmem:[#allocation6 + $0x5d0] sm:$0xff]  ;;  %v1336_v20 = vld [vmem:[#allocation6 + $0x5e8] sm:$0xff]  ;;  %v1338_v21 = vld [vmem:[#allocation6 + $0x5f8] sm:$0xff] }
 0x23a   :  { %4687 = vmatpush1.bf16.msra.mxu0 %v4686_v29  ;;  %v1310_v29 = vld [vmem:[#allocation6 + $0x518] sm:$0xff] }
 0x23b   :  { %4689 = vmatprep.subr.bf16.mxu0 %v4688_v30  ;;  %v4718_v30 = vpack.c.bf16 %v1305_v51, %v1303_v40  ;;  %v4720_v31 = vpack.c.bf16 %v1310_v29, %v1308_v26  ;;  %v1337_v40 = vld [vmem:[#allocation6 + $0x5f0] sm:$0xff]  ;;  %v1340_v51 = vld [vmem:[#allocation6 + $0x608] sm:$0xff]  ;;  %v1342_v26 = vld [vmem:[#allocation6 + $0x618] sm:$0xff]  ;;  %v5430_v29 = vpop.permute.xlu0 %5429 }
 0x23e   :  { %4691 = vmatpush1.bf16.msra.mxu0 %v4690_v38  ;;  %v1314_v38 = vld [vmem:[#allocation6 + $0x538] sm:$0xff] }
 0x23f   :  { %4693 = vmatprep.subr.bf16.mxu0 %v4692_v47  ;;  %v4722_v47 = vpack.c.bf16 %v1309_v34, %v1307_v33  ;;  %v4724_v2 = vpack.c.bf16 %v1314_v38, %v1312_v36  ;;  %v4752_v33 = vpack.c.bf16 %v1342_v26, %v1340_v51  ;;  %v1339_v34 = vld [vmem:[#allocation6 + $0x600] sm:$0xff]  ;;  %v1341_v36 = vld [vmem:[#allocation6 + $0x610] sm:$0xff]  ;;  %v5431_v38 = vunpack.i.l.bf16 %v5430_v29 }
 0x240   :  { %v4152_v51 = vld [vmem:[%s7333_s5 + $0x238] sm:$0xff] }
 0x241   :  { %1193 = vmatmul.mubr.f32.vlgmr.msra.gmra.mrb[6].mxu0 %v5874_v3 }
 0x242   :  { %1198 = vmatprep.mubr.f32.mxu0 %v5863_v17  ;;  %4695 = vmatpush1.bf16.msra.mxu0 %v4694_v48  ;;  %v1318_v48 = vld [vmem:[#allocation6 + $0x558] sm:$0xff] }
 0x243   :  { %4697 = vmatprep.subr.bf16.mxu0 %v4696_v53  ;;  %v4726_v53 = vpack.c.bf16 %v1313_v42, %v1311_v41  ;;  %v4728_v56 = vpack.c.bf16 %v1318_v48, %v1316_v46  ;;  %v4754_v42 = vpack.c.bf16 %v1341_v36, %v1339_v34  ;;  %v5432_v46 = vunpack.i.h.bf16 %v5430_v29  ;;  %v4156_v34 = vld [vmem:[%s7333_s5 + $0x258] sm:$0xff] }
 0x245   :  { %1199 = vmatmul.mubr.f32.gmra.mrb[8].mxu0 %v5871_v28 }
 0x246   :  { %1269 = vmatprep.mubr.f32.mxu0 %v5583_v0 }
 0x249   :  { %4133 = vmatmul.mubr.msk.f32.vlgmr.msra.gmra.mrb[6].mxu0 %vm965_vm6, %v5881_v39 }
 0x24a   :  { %4699 = vmatpush1.bf16.msra.mxu0 %v4698_v60  ;;  %1275 = vmatprep.mubr.f32.mxu0 %v5583_v0  ;;  %v1322_v60 = vld [vmem:[#allocation6 + $0x578] sm:$0xff] }
 0x24b   :  { %4701 = vmatprep.subr.bf16.mxu0 %v4700_v61  ;;  %v4730_v61 = vpack.c.bf16 %v1317_v58, %v1315_v57  ;;  %v4732_v62 = vpack.c.bf16 %v1322_v60, %v1320_v59  ;;  %v1348_v57 = vld [vmem:[#allocation6 + $0x648] sm:$0xff]  ;;  %v1350_v58 = vld [vmem:[#allocation6 + $0x658] sm:$0xff] }
 0x24d   :  { %4134 = vmatmul.mubr.msk.f32.gmra.mrb[8].mxu0 %vm965_vm6, %v5878_v37 }
 0x24e   :  { %4703 = vmatpush1.bf16.msra.mxu0 %v4702_v8  ;;  %1441 = vmatprep.mubr.f32.mxu0 %v1359_v10  ;;  %v1326_v8 = vld [vmem:[#allocation6 + $0x598] sm:$0xff]  ;;  %v4738_v10 = vpack.c.bf16 %v1325_v54, %v1323_v35 }
 0x24f   :  { %4705 = vmatprep.subr.bf16.mxu0 %v4704_v24  ;;  %v4736_v24 = vpack.c.bf16 %v1326_v8, %v1324_v6  ;;  %v1354_v6 = vrot.slane %v5874_v3, 2  ;;  %v1355_v8 = vrot.slane %v5871_v28, 2  ;;  %v1361_v28 = vrot.slane %v5878_v37, 2  ;;  %v4140_v37 = vld [vmem:[%s7333_s5 + $0x1d8] sm:$0xff] }
 0x252   :  { %4707 = vmatpush1.bf16.msra.mxu0 %v4706_v11  ;;  %v4740_v11 = vpack.c.bf16 %v1330_v43, %v1328_v32 }
 0x253   :  { %4709 = vmatprep.subr.bf16.mxu0 %v4708_v12  ;;  %v1327_v12 = vld [vmem:[#allocation6 + $0x5a0] sm:$0xff] }
 0x254   :  { %v4742_v50 = vpack.c.bf16 %v1329_v13, %v1327_v12  ;;  %v4139_v12 = vld [vmem:[%s7333_s5 + $0x1d0] sm:$0xff]  ;;  %v4142_v13 = vld [vmem:[%s7333_s5 + $0x1e8] sm:$0xff] }
 0x256   :  { %4711 = vmatpush1.bf16.msra.mxu0 %v4710_v16  ;;  %v4744_v16 = vpack.c.bf16 %v1334_v15, %v1332_v14  ;;  %v4144_v14 = vld [vmem:[%s7333_s5 + $0x1f8] sm:$0xff] }
 0x257   :  { %4713 = vmatprep.subr.bf16.mxu0 %v4712_v18  ;;  %v1331_v18 = vld [vmem:[#allocation6 + $0x5c0] sm:$0xff] }
 0x258   :  { %v4746_v22 = vpack.c.bf16 %v1333_v19, %v1331_v18  ;;  %v4143_v18 = vld [vmem:[%s7333_s5 + $0x1f0] sm:$0xff]  ;;  %v4146_v19 = vld [vmem:[%s7333_s5 + $0x208] sm:$0xff] }
 0x25a   :  { %4715 = vmatpush1.bf16.msra.mxu0 %v4714_v23  ;;  %v4748_v23 = vpack.c.bf16 %v1338_v21, %v1336_v20  ;;  %v4148_v20 = vld [vmem:[%s7333_s5 + $0x218] sm:$0xff] }
 0x25b   :  { %4717 = vmatprep.subr.bf16.mxu0 %v4716_v25  ;;  %v1335_v25 = vld [vmem:[#allocation6 + $0x5e0] sm:$0xff] }
 0x25e   :  { %4719 = vmatpush1.bf16.msra.mxu0 %v4718_v30  ;;  %v4750_v30 = vpack.c.bf16 %v1337_v40, %v1335_v25  ;;  %v4147_v25 = vld [vmem:[%s7333_s5 + $0x210] sm:$0xff]  ;;  %v4150_v40 = vld [vmem:[%s7333_s5 + $0x228] sm:$0xff] }
 0x25f   :  { %4721 = vmatprep.subr.bf16.mxu0 %v4720_v31  ;;  %v783_v31 = vpop.permute.xlu1 %782  ;;  %v4776_v29 = vpack.c.bf16 %v4152_v51, %v4150_v40 }
 0x260   :  { %v790_v41 = vsel %vm784_vm5, %v5431_v38, %v783_v31  ;;  %v808_v3 = vmax.f32 %v5853_v55, %v783_v31  ;;  %v4138_v55 = vld [vmem:[%s7333_s5 + $0x1c8] sm:$0xff]  ;;  %v4151_v31 = vld [vmem:[%s7333_s5 + $0x230] sm:$0xff] }
 0x261   :  { %v807_v59 = vmax.f32 %v5842_v5, %v790_v41  ;;  %v1356_v5 = vsel %vm487_vm3, %v1354_v6, %v1355_v8  ;;  %v4158_v41 = vld [vmem:[%s7333_s5 + $0x268] sm:$0xff] }
 0x262   :  { %4723 = vmatpush1.bf16.msra.mxu0 %v4722_v47  ;;  %v1344_v47 = vld [vmem:[#allocation6 + $0x628] sm:$0xff] }
 0x263   :  { %4725 = vmatprep.subr.bf16.mxu0 %v4724_v2  ;;  %v1346_v2 = vld [vmem:[#allocation6 + $0x638] sm:$0xff] }
 0x264   :  { %v4756_v48 = vpack.c.bf16 %v1346_v2, %v1344_v47  ;;  %v4153_v47 = vld [vmem:[%s7333_s5 + $0x240] sm:$0xff]  ;;  %v4155_v2 = vld [vmem:[%s7333_s5 + $0x250] sm:$0xff] }
 0x266   :  { %4727 = vmatpush1.bf16.msra.mxu0 %v4726_v53  ;;  %v1343_v53 = vld [vmem:[#allocation6 + $0x620] sm:$0xff] }
 0x267   :  { %4729 = vmatprep.subr.bf16.mxu0 %v4728_v56  ;;  %v1345_v56 = vld [vmem:[#allocation6 + $0x630] sm:$0xff] }
 0x268   :  { %v4758_v60 = vpack.c.bf16 %v1345_v56, %v1343_v53  ;;  %v4157_v53 = vld [vmem:[%s7333_s5 + $0x260] sm:$0xff]  ;;  %v4159_v56 = vld [vmem:[%s7333_s5 + $0x270] sm:$0xff] }
 0x26a   :  { %4731 = vmatpush1.bf16.msra.mxu0 %v4730_v61  ;;  %v789_v61 = vsel %vm784_vm5, %v5432_v46, %v5431_v38  ;;  %v4782_v46 = vpack.c.bf16 %v4155_v2, %v4153_v47 }
 0x26b   :  { %4733 = vmatprep.subr.bf16.mxu0 %v4732_v62  ;;  %v4760_v62 = vpack.c.bf16 %v1350_v58, %v1348_v57  ;;  %v806_v35 = vmax.f32 %v5837_v1, %v789_v61  ;;  %v1360_v1 = vrot.slane %v5881_v39, 2  ;;  %v4137_v39 = vld [vmem:[%s7333_s5 + $0x1c0] sm:$0xff]  ;;  %v4162_v57 = vld [vmem:[%s7333_s5 + $0x288] sm:$0xff]  ;;  %v4164_v58 = vld [vmem:[%s7333_s5 + $0x298] sm:$0xff] }
 0x26c   :  { %v4766_v15 = vpack.c.bf16 %v4139_v12, %v4137_v39  ;;  %v4161_v61 = vld [vmem:[%s7333_s5 + $0x280] sm:$0xff]  ;;  %v4180_v39 = vld [vmem:[%s7333_s5 + $0x318] sm:$0xff] }
 0x26d   :  { %v1363_v32 = vrot.slane %v806_v35, 2  ;;  %v1362_v17 = vsel %vm487_vm3, %v1360_v1, %v1361_v28  ;;  %v4170_v35 = vld [vmem:[%s7333_s5 + $0x2c8] sm:$0xff]  ;;  %v4176_v1 = vld [vmem:[%s7333_s5 + $0x2f8] sm:$0xff] }
 0x26e   :  { %4735 = vmatpush1.bf16.msra.mxu0 %v4734_v9  ;;  %v1365_v9 = vrot.slane %v807_v59, 2  ;;  %v4786_v59 = vpack.c.bf16 %v4159_v56, %v4157_v53 }
 0x26f   :  { %4737 = vmatprep.subr.bf16.mxu0 %v4736_v24  ;;  %v4762_v24 = vpack.c.bf16 %v1349_v45, %v1347_v63  ;;  %v1364_v43 = vsel %vm487_vm3, %v1355_v8, %v1363_v32  ;;  %v4166_v63 = vld [vmem:[%s7333_s5 + $0x2a8] sm:$0xff]  ;;  %v4168_v45 = vld [vmem:[%s7333_s5 + $0x2b8] sm:$0xff] }
 0x270   :  { %v1366_v54 = vsel %vm487_vm3, %v1358_v7, %v1365_v9  ;;  %v4792_v8 = vpack.c.bf16 %v4168_v45, %v4166_v63  ;;  %v4165_v9 = vld [vmem:[%s7333_s5 + $0x2a0] sm:$0xff] }
 0x272   :  { %4739 = vmatpush1.bf16.msra.mxu0 %v4738_v10  ;;  %v1367_v10 = vrot.slane %v808_v3, 2  ;;  %v4171_v3 = vld [vmem:[%s7333_s5 + $0x2d0] sm:$0xff] }
 0x273   :  { %4741 = vmatprep.subr.bf16.mxu0 %v4740_v11  ;;  %v4764_v11 = vpack.c.bf16 %v4140_v37, %v4138_v55  ;;  %v4175_v55 = vld [vmem:[%s7333_s5 + $0x2f0] sm:$0xff]  ;;  %v4178_v37 = vld [vmem:[%s7333_s5 + $0x308] sm:$0xff] }
 0x274   :  { %v1368_v7 = vsel %vm487_vm3, %v1361_v28, %v1367_v10  ;;  %v4169_v28 = vld [vmem:[%s7333_s5 + $0x2c0] sm:$0xff]  ;;  %v4804_v12 = vpack.c.bf16 %v4180_v39, %v4178_v37 }
 0x275   :  { %4765 = vmatprep.subr.bf16.mxu1 %v4764_v11  ;;  %v4798_v10 = vpack.c.bf16 %v4171_v3, %v4169_v28 }
 0x276   :  { %4743 = vmatpush1.bf16.msra.mxu0 %v4742_v50  ;;  %v4768_v50 = vpack.c.bf16 %v4144_v14, %v4142_v13  ;;  %4767 = vmatpush1.bf16.msra.mxu1 %v4766_v15  ;;  %v4177_v13 = vld [vmem:[%s7333_s5 + $0x300] sm:$0xff]  ;;  %v4179_v14 = vld [vmem:[%s7333_s5 + $0x310] sm:$0xff]  ;;  %v4182_v15 = vld [vmem:[%s7333_s5 + $0x328] sm:$0xff] }
 0x277   :  { %4745 = vmatprep.subr.bf16.mxu0 %v4744_v16  ;;  %v4141_v16 = vld [vmem:[%s7333_s5 + $0x1e0] sm:$0xff] }
 0x278   :  { %v4770_v21 = vpack.c.bf16 %v4143_v18, %v4141_v16  ;;  %4769 = vmatprep.subr.bf16.mxu1 %v4768_v50  ;;  %v4184_v50 = vld [vmem:[%s7333_s5 + $0x338] sm:$0xff]  ;;  %v4806_v16 = vpack.c.bf16 %v4179_v14, %v4177_v13  ;;  %v1595_v13 = vld [vmem:[%s7333_s5] sm:$0xff]  ;;  %v1597_v14 = vld [vmem:[%s7333_s5 + $0x10] sm:$0xff] }
 0x279   :  { %v4808_v18 = vpack.c.bf16 %v4184_v50, %v4182_v15 }
 0x27a   :  { %4747 = vmatpush1.bf16.msra.mxu0 %v4746_v22  ;;  %v4772_v22 = vpack.c.bf16 %v4148_v20, %v4146_v19  ;;  %4771 = vmatpush1.bf16.msra.mxu1 %v4770_v21  ;;  %v4181_v19 = vld [vmem:[%s7333_s5 + $0x320] sm:$0xff]  ;;  %v4183_v20 = vld [vmem:[%s7333_s5 + $0x330] sm:$0xff] }
 0x27b   :  { %4749 = vmatprep.subr.bf16.mxu0 %v4748_v23  ;;  %v4145_v23 = vld [vmem:[%s7333_s5 + $0x200] sm:$0xff]  ;;  %v4810_v21 = vpack.c.bf16 %v4183_v20, %v4181_v19  ;;  %v1602_v19 = vld [vmem:[%s7333_s5 + $0x38] sm:$0xff] }
 0x27c   :  { %v4774_v26 = vpack.c.bf16 %v4147_v25, %v4145_v23  ;;  %4773 = vmatprep.subr.bf16.mxu1 %v4772_v22  ;;  %v1535_v22 = vld [vmem:[#allocation7] sm:$0x3] }
 0x27d   :  { %v1540_v23 = vrot.slane %v1535_v22, %v5783_v49  ;;  %v1544_v25 = vrot.slane %v1535_v22, %v5790_v52  ;;  %v4822_v22 = vpack.c.bf16 %v1597_v14, %v1595_v13  ;;  %v2487_v13 = vld [vmem:[#allocation2 + $0xa0] sm:$0xff]  ;;  %v2490_v14 = vld [vmem:[#allocation2 + $0xb8] sm:$0xff] }
 0x27e   :  { %4751 = vmatpush1.bf16.msra.mxu0 %v4750_v30  ;;  %v4149_v30 = vld [vmem:[%s7333_s5 + $0x220] sm:$0xff]  ;;  %4775 = vmatpush1.bf16.msra.mxu1 %v4774_v26 }
 0x27f   :  { %4753 = vmatprep.subr.bf16.mxu0 %v4752_v33  ;;  %v4154_v33 = vld [vmem:[%s7333_s5 + $0x248] sm:$0xff]  ;;  %v4778_v36 = vpack.c.bf16 %v4151_v31, %v4149_v30  ;;  %4777 = vmatprep.subr.bf16.mxu1 %v4776_v29  ;;  %v4188_v30 = vld [vmem:[%s7333_s5 + $0x358] sm:$0xff] }
 0x280   :  { %v4780_v38 = vpack.c.bf16 %v4156_v34, %v4154_v33  ;;  %v4186_v29 = vld [vmem:[%s7333_s5 + $0x348] sm:$0xff]  ;;  %v4185_v34 = vld [vmem:[%s7333_s5 + $0x340] sm:$0xff] }
 0x281   :  { %v4812_v33 = vpack.c.bf16 %v4188_v30, %v4186_v29  ;;  %v1599_v30 = vld [vmem:[%s7333_s5 + $0x20] sm:$0xff] }
 0x282   :  { %4755 = vmatpush1.bf16.msra.mxu0 %v4754_v42  ;;  %v4160_v42 = vld [vmem:[%s7333_s5 + $0x278] sm:$0xff]  ;;  %4779 = vmatpush1.bf16.msra.mxu1 %v4778_v36  ;;  %v4187_v36 = vld [vmem:[%s7333_s5 + $0x350] sm:$0xff] }
 0x283   :  { %4757 = vmatprep.subr.bf16.mxu0 %v4756_v48  ;;  %4781 = vmatprep.subr.bf16.mxu1 %v4780_v38  ;;  %v4784_v48 = vpack.c.bf16 %v4160_v42, %v4158_v41  ;;  %v4814_v38 = vpack.c.bf16 %v4187_v36, %v4185_v34  ;;  %v1604_v34 = vld [vmem:[%s7333_s5 + $0x48] sm:$0xff]  ;;  %v1606_v36 = vld [vmem:[%s7333_s5 + $0x58] sm:$0xff] }
 0x286   :  { %4759 = vmatpush1.bf16.msra.mxu0 %v4758_v60  ;;  %4783 = vmatpush1.bf16.msra.mxu1 %v4782_v46  ;;  %v4788_v60 = vpack.c.bf16 %v4164_v58, %v4162_v57  ;;  %v4190_v46 = vld [vmem:[%s7333_s5 + $0x368] sm:$0xff]  ;;  %v4189_v58 = vld [vmem:[%s7333_s5 + $0x360] sm:$0xff] }
 0x287   :  { %4761 = vmatprep.subr.bf16.mxu0 %v4760_v62  ;;  %4785 = vmatprep.subr.bf16.mxu1 %v4784_v48  ;;  %v4163_v62 = vld [vmem:[%s7333_s5 + $0x290] sm:$0xff]  ;;  %v4192_v48 = vld [vmem:[%s7333_s5 + $0x378] sm:$0xff] }
 0x288   :  { %v4790_v6 = vpack.c.bf16 %v4163_v62, %v4161_v61  ;;  %v4816_v57 = vpack.c.bf16 %v4192_v48, %v4190_v46  ;;  %v1608_v46 = vld [vmem:[%s7333_s5 + $0x68] sm:$0xff]  ;;  %v1610_v48 = vld [vmem:[%s7333_s5 + $0x78] sm:$0xff] }
 0x289   :  { %1442 = vmatmul.mubr.f32.vlgmr.msra.gmra.mrb[6].mxu0 %v1356_v5  ;;  %v4172_v5 = vld [vmem:[%s7333_s5 + $0x2d8] sm:$0xff] }
 0x28a   :  { %1447 = vmatprep.mubr.f32.mxu0 %v1366_v54  ;;  %4763 = vmatpush1.bf16.msra.mxu0 %v4762_v24  ;;  %v4167_v24 = vld [vmem:[%s7333_s5 + $0x2b0] sm:$0xff]  ;;  %v4796_v32 = vpack.c.bf16 %v4172_v5, %v4170_v35 }
 0x28b   :  { %4950 = vmatprep.subr.bf16.mxu0 %v5584_v27  ;;  %4787 = vmatpush1.bf16.msra.mxu1 %v4786_v59  ;;  %v4794_v54 = vpack.c.bf16 %v4167_v24, %v4165_v9  ;;  %v4191_v59 = vld [vmem:[%s7333_s5 + $0x370] sm:$0xff] }
 0x28c   :  { %4789 = vmatprep.subr.bf16.mxu1 %v4788_v60  ;;  %v4818_v61 = vpack.c.bf16 %v4191_v59, %v4189_v58  ;;  %v1609_v58 = vld [vmem:[%s7333_s5 + $0x70] sm:$0xff]  ;;  %v1612_v59 = vld [vmem:[%s7333_s5 + $0x88] sm:$0xff] }
 0x28d   :  { %1448 = vmatmul.mubr.f32.gmra.mrb[8].mxu0 %v1364_v43  ;;  %v4174_v43 = vld [vmem:[%s7333_s5 + $0x2e8] sm:$0xff] }
 0x28e   :  { %1518 = vmatprep.mubr.f32.mxu0 %v5583_v0 }
 0x28f   :  { %4791 = vmatpush1.bf16.msra.mxu1 %v4790_v6  ;;  %v1596_v6 = vld [vmem:[%s7333_s5 + $0x8] sm:$0xff] }
 0x290   :  { %4793 = vmatprep.subr.bf16.mxu1 %v4792_v8  ;;  %v1598_v8 = vld [vmem:[%s7333_s5 + $0x18] sm:$0xff] }
 0x291   :  { %4135 = vmatmul.mubr.msk.f32.vlgmr.msra.gmra.mrb[6].mxu0 %vm965_vm6, %v1362_v17  ;;  %v4800_v17 = vpack.c.bf16 %v4176_v1, %v4174_v43  ;;  %v4820_v35 = vpack.c.bf16 %v1598_v8, %v1596_v6  ;;  %v1616_v6 = vld [vmem:[%s7333_s5 + $0xa8] sm:$0xff]  ;;  %v1618_v8 = vld [vmem:[%s7333_s5 + $0xb8] sm:$0xff] }
 0x292   :  { %1524 = vmatprep.mubr.f32.mxu0 %v5583_v0 }
 0x293   :  { %4795 = vmatpush1.bf16.msra.mxu1 %v4794_v54 }
 0x294   :  { %4797 = vmatprep.subr.bf16.mxu1 %v4796_v32 }
 0x295   :  { %4136 = vmatmul.mubr.msk.f32.gmra.mrb[8].mxu0 %vm965_vm6, %v1368_v7  ;;  %v4173_v7 = vld [vmem:[%s7333_s5 + $0x2e0] sm:$0xff] }
 0x296   :  { %4530 = vmatprep.mubr.msk.f32.mxu0 %vm5585_vm4, %v5583_v0  ;;  %v4802_v11 = vpack.c.bf16 %v4175_v55, %v4173_v7 }
 0x297   :  { %4799 = vmatpush1.bf16.msra.mxu1 %v4798_v10 }
 0x298   :  { %4801 = vmatprep.subr.bf16.mxu1 %v4800_v17 }
 0x29b   :  { %4803 = vmatpush1.bf16.msra.mxu1 %v4802_v11 }
 0x29c   :  { %4805 = vmatprep.subr.bf16.mxu1 %v4804_v12 }
 0x29f   :  { %4807 = vmatpush1.bf16.msra.mxu1 %v4806_v16 }
 0x2a0   :  { %4809 = vmatprep.subr.bf16.mxu1 %v4808_v18  ;;  %v1600_v18 = vld [vmem:[%s7333_s5 + $0x28] sm:$0xff] }
 0x2a1   :  { %v4824_v29 = vpack.c.bf16 %v1602_v19, %v1600_v18  ;;  %v1630_v18 = vld [vmem:[%s7333_s5 + $0x118] sm:$0xff]  ;;  %v4951_v19 = vpack.c.bf16 %v2490_v14, %v2487_v13  ;;  %v4197_v13 = vld [vmem:[%s7333_s5 + $0x380] sm:$0xff]  ;;  %v4199_v14 = vld [vmem:[%s7333_s5 + $0x390] sm:$0xff] }
 0x2a3   :  { %4811 = vmatpush1.bf16.msra.mxu1 %v4810_v21  ;;  %4952 = vmatpush3.bf16.msra.mxu0 %v4951_v19  ;;  %v4878_v19 = vpack.c.bf16 %v4199_v14, %v4197_v13  ;;  %v4232_v13 = vld [vmem:[%s7333_s5 + $0x498] sm:$0xff] }
 0x2a4   :  { %4813 = vmatprep.subr.bf16.mxu1 %v4812_v33  ;;  %4528 = vmatprep.subr.mxu0 %v5583_v0 }
 0x2a7   :  { %4815 = vmatpush1.bf16.msra.mxu1 %v4814_v38 }
 0x2a8   :  { %4817 = vmatprep.subr.bf16.mxu1 %v4816_v57  ;;  %v1607_v57 = vld [vmem:[%s7333_s5 + $0x60] sm:$0xff] }
 0x2ab   :  { %4819 = vmatpush1.bf16.msra.mxu1 %v4818_v61  ;;  %v4834_v61 = vpack.c.bf16 %v1609_v58, %v1607_v57 }
 0x2ac   :  { %4821 = vmatprep.subr.bf16.mxu1 %v4820_v35  ;;  %v1615_v35 = vld [vmem:[%s7333_s5 + $0xa0] sm:$0xff] }
 0x364   :  { %v1520_v40 = vpop.f32.mrb[6].mxu0 }
 0x365   :  { %v1547_v51 = vadd.f32 %v1540_v23, %v1520_v40  ;;  %v1522_v26 = vpop.f32.mrb[7].mxu0 }
 0x366   :  { %v1548_v31 = vadd.f32 %v1544_v25, %v1522_v26 }
 0x367   :  { %v1551_v2 = vmax.f32 %v1547_v51, 0.0 }
 0x368   :  { %v1526_v47 = vpop.f32.mrb[8].mxu0  ;;  %v1552_v53 = vmax.f32 %v1548_v31, 0.0  ;;  %v1601_v31 = vld [vmem:[%s7333_s5 + $0x30] sm:$0xff] }
 0x369   :  { %v1549_v41 = vadd.f32 %v1540_v23, %v1526_v47  ;;  %v1528_v42 = vpop.f32.mrb[9].mxu0  ;;  %v1559_v63 = vrot.slane %v1551_v2, 1  ;;  %v4826_v47 = vpack.c.bf16 %v1601_v31, %v1599_v30 }
 0x36a   :  { %v1550_v56 = vadd.f32 %v1544_v25, %v1528_v42  ;;  %v1562_v9 = vrot.slane %v1552_v53, 1  ;;  %v1605_v42 = vld [vmem:[%s7333_s5 + $0x50] sm:$0xff] }
 0x36b   :  { %v1553_v60 = vmax.f32 %v1549_v41, 0.0  ;;  %v1603_v41 = vld [vmem:[%s7333_s5 + $0x40] sm:$0xff] }
 0x36c   :  { %v1554_v62 = vmax.f32 %v1550_v56, 0.0  ;;  %v4832_v56 = vpack.c.bf16 %v1610_v48, %v1608_v46  ;;  %v1636_v46 = vld [vmem:[%s7333_s5 + $0x148] sm:$0xff]  ;;  %v1638_v48 = vld [vmem:[%s7333_s5 + $0x158] sm:$0xff] }
 0x36d   :  { %v1560_v45 = vrot.slane %v1553_v60, 1  ;;  %v4860_v58 = vpack.c.bf16 %v1638_v48, %v1636_v46  ;;  %v4209_v48 = vld [vmem:[%s7333_s5 + $0x3e0] sm:$0xff] }
 0x36e   :  { %v1563_v24 = vrot.slane %v1554_v62, 1 }
 0x36f   :  { %v1571_v5 = vmax.f32 %v1553_v60, %v1560_v45  ;;  %v1561_v54 = vsel %vm113_vm1, %v1559_v63, %v1560_v45  ;;  %v1614_v60 = vld [vmem:[%s7333_s5 + $0x98] sm:$0xff]  ;;  %v1611_v63 = vld [vmem:[%s7333_s5 + $0x80] sm:$0xff]  ;;  %v1613_v45 = vld [vmem:[%s7333_s5 + $0x90] sm:$0xff] }
 0x370   :  { %v1564_v32 = vsel %vm113_vm1, %v1562_v9, %v1563_v24  ;;  %v1569_v28 = vmax.f32 %v1551_v2, %v1561_v54  ;;  %v1572_v1 = vmax.f32 %v1554_v62, %v1563_v24  ;;  %v4828_v2 = vpack.c.bf16 %v1606_v36, %v1604_v34  ;;  %v1620_v54 = vld [vmem:[%s7333_s5 + $0xc8] sm:$0xff]  ;;  %v2493_v34 = vld [vmem:[#allocation2 + $0xd0] sm:$0xf] }
 0x371   :  { %v1570_v3 = vmax.f32 %v1552_v53, %v1564_v32  ;;  %v4830_v53 = vpack.c.bf16 %v1605_v42, %v1603_v41  ;;  %v4836_v62 = vpack.c.bf16 %v1614_v60, %v1612_v59  ;;  %v4838_v9 = vpack.c.bf16 %v1613_v45, %v1611_v63  ;;  %v1622_v32 = vld [vmem:[%s7333_s5 + $0xd8] sm:$0xff]  ;;  %v1633_v41 = vld [vmem:[%s7333_s5 + $0x130] sm:$0xff]  ;;  %v6269_v42 = vld [vmem:[%s7328_s0 + $0x28] sm:$0xf]  ;;  %4529 = vmatpush3.msk.msra.mxu0 %vm126_vm0, %v2493_v34 }
 0x372   :  { %v5433_v43 = vpack.i.bf16 %v1571_v5, %v1569_v28  ;;  %v4840_v24 = vpack.c.bf16 %v1618_v8, %v1616_v6  ;;  %v1635_v59 = vld [vmem:[%s7333_s5 + $0x140] sm:$0xff]  ;;  %v1637_v60 = vld [vmem:[%s7333_s5 + $0x150] sm:$0xff] }
 0x373   :  { %1579 = vrot.lane.b32.xlu1 %v1570_v3, %s5586_s19  ;;  %v4862_v63 = vpack.c.bf16 %v1637_v60, %v1635_v59  ;;  %v1639_v6 = vld [vmem:[%s7333_s5 + $0x160] sm:$0xff]  ;;  %v1641_v8 = vld [vmem:[%s7333_s5 + $0x170] sm:$0xff]  ;;  %v4216_v59 = vld [vmem:[%s7333_s5 + $0x418] sm:$0xff] }
 0x374   :  { %5434 = vrot.lane.b32.xlu0 %v5433_v43, %s5586_s19  ;;  %v1619_v43 = vld [vmem:[%s7333_s5 + $0xc0] sm:$0xff] }
 0x375   :  { %v4205_v34 = vld [vmem:[%s7333_s5 + $0x3c0] sm:$0xff] }
 0x378   :  { %1583 = vrot.lane.b32.xlu0 %v1572_v1, %s5586_s19 }
 0x3e5   :  { %v1580_v10 = vpop.permute.xlu1 %1579 }
 0x3e6   :  { %v5435_v17 = vpop.permute.xlu0 %5434  ;;  %v6109_v55 = vmax.f32 %v1570_v3, %v1580_v10  ;;  %v4844_v3 = vpack.c.bf16 %v1622_v32, %v1620_v54  ;;  %v1643_v54 = vld [vmem:[%s7333_s5 + $0x180] sm:$0xff]  ;;  %v1645_v32 = vld [vmem:[%s7333_s5 + $0x190] sm:$0xff] }
 0x3e7   :  { %v5436_v7 = vunpack.i.l.bf16 %v5435_v17  ;;  %v5437_v37 = vunpack.i.h.bf16 %v5435_v17  ;;  %v1626_v17 = vld [vmem:[%s7333_s5 + $0xf8] sm:$0xff] }
 0x3e8   :  { %v1715_v20 = vrot.slane %v6109_v55, 1 }
 0x3e9   :  { %v1585_v39 = vsel %vm784_vm5, %v5436_v7, %v1580_v10  ;;  %v1624_v10 = vld [vmem:[%s7333_s5 + $0xe8] sm:$0xff] }
 0x3ea   :  { %v6112_v11 = vmax.f32 %v1569_v28, %v1585_v39  ;;  %v1584_v12 = vpop.permute.xlu0 %1583  ;;  %v4848_v39 = vpack.c.bf16 %v1626_v17, %v1624_v10  ;;  %v1647_v10 = vld [vmem:[%s7333_s5 + $0x1a0] sm:$0xff]  ;;  %v1649_v17 = vld [vmem:[%s7333_s5 + $0x1b0] sm:$0xff] }
 0x3eb   :  { %v1586_v15 = vsel %vm784_vm5, %v5437_v37, %v1584_v12  ;;  %v6121_v50 = vmax.f32 %v1572_v1, %v1584_v12  ;;  %v1621_v1 = vld [vmem:[%s7333_s5 + $0xd0] sm:$0xff]  ;;  %v1623_v37 = vld [vmem:[%s7333_s5 + $0xe0] sm:$0xff] }
 0x3ec   :  { %v6123_v16 = vmax.f32 %v1571_v5, %v1586_v15  ;;  %v1712_v40 = vrot.slane %v6112_v11, 1  ;;  %v1940_v51 = vrot.slane %v6112_v11, 2  ;;  %v1617_v5 = vld [vmem:[%s7333_s5 + $0xb0] sm:$0xff]  ;;  %v4846_v7 = vpack.c.bf16 %v1621_v1, %v1619_v43  ;;  %v1628_v15 = vld [vmem:[%s7333_s5 + $0x108] sm:$0xff] }
 0x3ed   :  { %v1716_v21 = vrot.slane %v6121_v50, 1  ;;  %v4842_v28 = vpack.c.bf16 %v1617_v5, %v1615_v35  ;;  %v1625_v12 = vld [vmem:[%s7333_s5 + $0xf0] sm:$0xff]  ;;  %v4866_v35 = vpack.c.bf16 %v1641_v8, %v1639_v6  ;;  %v4870_v43 = vpack.c.bf16 %v1645_v32, %v1643_v54  ;;  %v4220_v6 = vld [vmem:[%s7333_s5 + $0x438] sm:$0xff] }
 0x3ee   :  { %v1713_v23 = vrot.slane %v6123_v16, 1  ;;  %v1941_v25 = vrot.slane %v6123_v16, 2  ;;  %v4224_v54 = vld [vmem:[%s7333_s5 + $0x458] sm:$0xff] }
 0x3ef   :  { %v1717_v26 = vsel %vm113_vm1, %v1715_v20, %v1716_v21  ;;  %v4850_v20 = vpack.c.bf16 %v1625_v12, %v1623_v37  ;;  %v4200_v37 = vld [vmem:[%s7333_s5 + $0x398] sm:$0xff] }
 0x3f0   :  { %4193 = vmatprep.mubr.msk.f32.mxu1 %vm1720_vm7, %v1717_v26  ;;  %v1714_v33 = vsel %vm113_vm1, %v1712_v40, %v1713_v23  ;;  %v6155_v38 = vsel %vm487_vm3, %v1940_v51, %v1941_v25  ;;  %v6241_v40 = vld [vmem:[%s7328_s0 + $0x18] sm:$0xff]  ;;  %v6246_v51 = vld [vmem:[%s7328_s0 + $0x20] sm:$0xff]  ;;  %v1632_v26 = vld [vmem:[%s7333_s5 + $0x128] sm:$0xff] }
 0x3f1   :  { %1790 = vmatmul.mubr.f32.vlgmr.msra.gmra.mrb[24].mxu1 %v1714_v33  ;;  %v2494_v30 = vrot.slane %v6241_v40, 2  ;;  %v2495_v31 = vrot.slane %v6246_v51, 2 }
 0x3f2   :  { %4823 = vmatpush1.bf16.msra.mxu1 %v4822_v22  ;;  %4194 = vmatprep.mubr.msk.f32.mxu1 %vm1720_vm7, %v1716_v21  ;;  %v1627_v21 = vld [vmem:[%s7333_s5 + $0x100] sm:$0xff]  ;;  %v4852_v22 = vpack.c.bf16 %v1630_v18, %v1628_v15  ;;  %v4202_v15 = vld [vmem:[%s7333_s5 + $0x3a8] sm:$0xff]  ;;  %v4204_v18 = vld [vmem:[%s7333_s5 + $0x3b8] sm:$0xff] }
 0x3f3   :  { %4825 = vmatprep.subr.bf16.mxu1 %v4824_v29  ;;  %v1634_v29 = vld [vmem:[%s7333_s5 + $0x138] sm:$0xff]  ;;  %v6258_v36 = vsel %vm487_vm3, %v2494_v30, %v2495_v31 }
 0x3f4   :  { %4531 = vmatmul.mubr.msk.f32.vlgmr.msra.gmra.mrb[10].mxu0 %vm119_vm2, %v6258_v36 }
 0x3f5   :  { %1796 = vmatmul.mubr.f32.gmra.mrb[26].mxu1 %v1713_v23  ;;  %v1629_v23 = vld [vmem:[%s7333_s5 + $0x110] sm:$0xff]  ;;  %4533 = vmatprep.mubr.msk.f32.mxu0 %vm5585_vm4, %v5583_v0 }
 0x3f6   :  { %4827 = vmatpush1.bf16.msra.mxu1 %v4826_v47  ;;  %4195 = vmatprep.mubr.msk.f32.mxu1 %vm1720_vm7, %v6109_v55  ;;  %v4854_v33 = vpack.c.bf16 %v1629_v23, %v1627_v21  ;;  %v4856_v47 = vpack.c.bf16 %v1634_v29, %v1632_v26  ;;  %v4201_v21 = vld [vmem:[%s7333_s5 + $0x3a0] sm:$0xff]  ;;  %v4206_v23 = vld [vmem:[%s7333_s5 + $0x3c8] sm:$0xff]  ;;  %v4208_v26 = vld [vmem:[%s7333_s5 + $0x3d8] sm:$0xff]  ;;  %v1944_v29 = vrot.slane %v6121_v50, 2 }
 0x3f7   :  { %4829 = vmatprep.subr.bf16.mxu1 %v4828_v2  ;;  %v1631_v2 = vld [vmem:[%s7333_s5 + $0x120] sm:$0xff] }
 0x3fa   :  { %4831 = vmatpush1.bf16.msra.mxu1 %v4830_v53  ;;  %v6281_v53 = vrot.slane %v6269_v42, 2 }
 0x3fb   :  { %4833 = vmatprep.subr.bf16.mxu1 %v4832_v56  ;;  %v4858_v56 = vpack.c.bf16 %v1633_v41, %v1631_v2  ;;  %v4212_v2 = vld [vmem:[%s7333_s5 + $0x3f8] sm:$0xff] }
 0x3fc   :  { %v6287_v57 = vsel %vm487_vm3, %v2495_v31, %v6281_v53  ;;  %v1943_v31 = vrot.slane %v6109_v55, 2 }
 0x3fd   :  { %4534 = vmatmul.mubr.msk.f32.gmra.mrb[12].mxu0 %vm119_vm2, %v6287_v57 }
 0x3fe   :  { %4835 = vmatpush1.bf16.msra.mxu1 %v4834_v61  ;;  %v1640_v61 = vld [vmem:[%s7333_s5 + $0x168] sm:$0xff]  ;;  %4536 = vmatprep.mubr.msk.f32.mxu0 %vm5585_vm4, %v5583_v0  ;;  %v1945_v55 = vsel %vm487_vm3, %v1943_v31, %v1944_v29 }
 0x3ff   :  { %4837 = vmatprep.subr.bf16.mxu1 %v4836_v62  ;;  %v1642_v62 = vld [vmem:[%s7333_s5 + $0x178] sm:$0xff]  ;;  %v4238_v31 = vld [vmem:[%s7333_s5 + $0x4c8] sm:$0xff] }
 0x400   :  { %v4864_v45 = vpack.c.bf16 %v1642_v62, %v1640_v61  ;;  %v4213_v62 = vld [vmem:[%s7333_s5 + $0x400] sm:$0xff] }
 0x401   :  { %4537 = vmatmul.mubr.msk.f32.gmra.mrb[14].mxu0 %vm119_vm2, %v6281_v53 }
 0x402   :  { %4839 = vmatpush1.bf16.msra.mxu1 %v4838_v9  ;;  %v1644_v9 = vld [vmem:[%s7333_s5 + $0x188] sm:$0xff] }
 0x403   :  { %4841 = vmatprep.subr.bf16.mxu1 %v4840_v24  ;;  %v1646_v24 = vld [vmem:[%s7333_s5 + $0x198] sm:$0xff] }
 0x404   :  { %v4868_v5 = vpack.c.bf16 %v1646_v24, %v1644_v9  ;;  %v4217_v24 = vld [vmem:[%s7333_s5 + $0x420] sm:$0xff] }
 0x406   :  { %4843 = vmatpush1.bf16.msra.mxu1 %v4842_v28  ;;  %v1648_v28 = vld [vmem:[%s7333_s5 + $0x1a8] sm:$0xff] }
 0x407   :  { %4845 = vmatprep.subr.bf16.mxu1 %v4844_v3  ;;  %v1650_v3 = vld [vmem:[%s7333_s5 + $0x1b8] sm:$0xff] }
 0x408   :  { %v4872_v1 = vpack.c.bf16 %v1650_v3, %v1648_v28  ;;  %v4221_v3 = vld [vmem:[%s7333_s5 + $0x440] sm:$0xff] }
 0x40a   :  { %4847 = vmatpush1.bf16.msra.mxu1 %v4846_v7  ;;  %v4198_v7 = vld [vmem:[%s7333_s5 + $0x388] sm:$0xff] }
 0x40b   :  { %4849 = vmatprep.subr.bf16.mxu1 %v4848_v39  ;;  %v4874_v39 = vpack.c.bf16 %v1649_v17, %v1647_v10  ;;  %v4876_v12 = vpack.c.bf16 %v4200_v37, %v4198_v7  ;;  %v4228_v10 = vld [vmem:[%s7333_s5 + $0x478] sm:$0xff]  ;;  %v4225_v37 = vld [vmem:[%s7333_s5 + $0x460] sm:$0xff] }
 0x40e   :  { %4851 = vmatpush1.bf16.msra.mxu1 %v4850_v20  ;;  %v4880_v20 = vpack.c.bf16 %v4204_v18, %v4202_v15  ;;  %v4229_v18 = vld [vmem:[%s7333_s5 + $0x480] sm:$0xff] }
 0x40f   :  { %4853 = vmatprep.subr.bf16.mxu1 %v4852_v22  ;;  %v4203_v22 = vld [vmem:[%s7333_s5 + $0x3b0] sm:$0xff] }
 0x410   :  { %v4882_v30 = vpack.c.bf16 %v4203_v22, %v4201_v21  ;;  %v4236_v21 = vld [vmem:[%s7333_s5 + $0x4b8] sm:$0xff] }
 0x412   :  { %4855 = vmatpush1.bf16.msra.mxu1 %v4854_v33  ;;  %v4884_v33 = vpack.c.bf16 %v4208_v26, %v4206_v23  ;;  %v4233_v26 = vld [vmem:[%s7333_s5 + $0x4a0] sm:$0xff] }
 0x413   :  { %4857 = vmatprep.subr.bf16.mxu1 %v4856_v47  ;;  %v4207_v47 = vld [vmem:[%s7333_s5 + $0x3d0] sm:$0xff] }
 0x414   :  { %v4886_v41 = vpack.c.bf16 %v4207_v47, %v4205_v34 }
 0x416   :  { %4859 = vmatpush1.bf16.msra.mxu1 %v4858_v56  ;;  %v4211_v56 = vld [vmem:[%s7333_s5 + $0x3f0] sm:$0xff] }
 0x417   :  { %4861 = vmatprep.subr.bf16.mxu1 %v4860_v58  ;;  %v4214_v58 = vld [vmem:[%s7333_s5 + $0x408] sm:$0xff]  ;;  %v4890_v60 = vpack.c.bf16 %v4211_v56, %v4209_v48  ;;  %v4241_v56 = vld [vmem:[%s7333_s5 + $0x4e0] sm:$0xff] }
 0x418   :  { %v4892_v61 = vpack.c.bf16 %v4216_v59, %v4214_v58  ;;  %v4243_v58 = vld [vmem:[%s7333_s5 + $0x4f0] sm:$0xff]  ;;  %v4246_v59 = vld [vmem:[%s7333_s5 + $0x508] sm:$0xff] }
 0x41a   :  { %4863 = vmatpush1.bf16.msra.mxu1 %v4862_v63  ;;  %v4215_v63 = vld [vmem:[%s7333_s5 + $0x410] sm:$0xff] }
 0x41b   :  { %4865 = vmatprep.subr.bf16.mxu1 %v4864_v45  ;;  %v4218_v45 = vld [vmem:[%s7333_s5 + $0x428] sm:$0xff]  ;;  %v4894_v8 = vpack.c.bf16 %v4215_v63, %v4213_v62  ;;  %v4245_v63 = vld [vmem:[%s7333_s5 + $0x500] sm:$0xff] }
 0x41c   :  { %v4896_v9 = vpack.c.bf16 %v4220_v6, %v4218_v45  ;;  %v4247_v45 = vld [vmem:[%s7333_s5 + $0x510] sm:$0xff]  ;;  %v4250_v6 = vld [vmem:[%s7333_s5 + $0x528] sm:$0xff] }
 0x41e   :  { %4867 = vmatpush1.bf16.msra.mxu1 %v4866_v35  ;;  %v4219_v35 = vld [vmem:[%s7333_s5 + $0x430] sm:$0xff] }
 0x41f   :  { %4869 = vmatprep.subr.bf16.mxu1 %v4868_v5  ;;  %v4222_v5 = vld [vmem:[%s7333_s5 + $0x448] sm:$0xff]  ;;  %v4898_v32 = vpack.c.bf16 %v4219_v35, %v4217_v24  ;;  %v4249_v35 = vld [vmem:[%s7333_s5 + $0x520] sm:$0xff] }
 0x420   :  { %v4900_v28 = vpack.c.bf16 %v4224_v54, %v4222_v5  ;;  %v4251_v5 = vld [vmem:[%s7333_s5 + $0x530] sm:$0xff] }
 0x421   :  { %v2113_v54 = vld [vmem:[#allocation2 + $0x50] sm:$0xff] }
 0x422   :  { %4871 = vmatpush1.bf16.msra.mxu1 %v4870_v43  ;;  %v4223_v43 = vld [vmem:[%s7333_s5 + $0x450] sm:$0xff] }
 0x423   :  { %4873 = vmatprep.subr.bf16.mxu1 %v4872_v1  ;;  %v4226_v1 = vld [vmem:[%s7333_s5 + $0x468] sm:$0xff]  ;;  %v4902_v17 = vpack.c.bf16 %v4223_v43, %v4221_v3 }
 0x424   :  { %v4904_v7 = vpack.c.bf16 %v4228_v10, %v4226_v1  ;;  %v2112_v43 = vld [vmem:[#allocation2 + $0x48] sm:$0xff]  ;;  %v2115_v1 = vld [vmem:[#allocation2 + $0x60] sm:$0xff] }
 0x425   :  { %v4934_v10 = vpack.c.bf16 %v2115_v1, %v2112_v43 }
 0x426   :  { %4875 = vmatpush1.bf16.msra.mxu1 %v4874_v39  ;;  %v4227_v39 = vld [vmem:[%s7333_s5 + $0x470] sm:$0xff] }
 0x427   :  { %4877 = vmatprep.subr.bf16.mxu1 %v4876_v12  ;;  %v4230_v12 = vld [vmem:[%s7333_s5 + $0x488] sm:$0xff]  ;;  %v4906_v14 = vpack.c.bf16 %v4227_v39, %v4225_v37  ;;  %v2125_v37 = vrot.slane %v6246_v51, 1  ;;  %v2118_v39 = vld [vmem:[#allocation2 + $0x78] sm:$0xf] }
 0x428   :  { %v4908_v15 = vpack.c.bf16 %v4232_v13, %v4230_v12  ;;  %v2114_v12 = vld [vmem:[#allocation2 + $0x58] sm:$0xff]  ;;  %v2117_v13 = vld [vmem:[#allocation2 + $0x70] sm:$0xff] }
 0x429   :  { %1871 = vmatmul.mubr.f32.vlgmr.msra.gmra.mrb[24].mxu1 %v6112_v11  ;;  %v4210_v11 = vld [vmem:[%s7333_s5 + $0x3e8] sm:$0xff] }
 0x42a   :  { %4196 = vmatprep.mubr.msk.f32.mxu1 %vm1720_vm7, %v6121_v50  ;;  %4879 = vmatpush1.bf16.msra.mxu1 %v4878_v19  ;;  %v4888_v46 = vpack.c.bf16 %v4212_v2, %v4210_v11  ;;  %v4231_v19 = vld [vmem:[%s7333_s5 + $0x490] sm:$0xff]  ;;  %v4237_v11 = vld [vmem:[%s7333_s5 + $0x4c0] sm:$0xff] }
 0x42b   :  { %4881 = vmatprep.subr.bf16.mxu1 %v4880_v20  ;;  %v4234_v20 = vld [vmem:[%s7333_s5 + $0x4a8] sm:$0xff]  ;;  %v4910_v22 = vpack.c.bf16 %v4231_v19, %v4229_v18  ;;  %v4239_v2 = vld [vmem:[%s7333_s5 + $0x4d0] sm:$0xff]  ;;  %v2103_v19 = vld [vmem:[#allocation2] sm:$0xff] }
 0x42c   :  { %v4912_v23 = vpack.c.bf16 %v4236_v21, %v4234_v20  ;;  %v2106_v20 = vld [vmem:[#allocation2 + $0x18] sm:$0xff] }
 0x42d   :  { %1877 = vmatmul.mubr.f32.gmra.mrb[26].mxu1 %v6123_v16  ;;  %v4941_v21 = vpack.c.bf16 %v2106_v20, %v2103_v19  ;;  %v2909_v19 = vld [vmem:[#allocation6 + $0x2f8] sm:$0xff] }
 0x42e   :  { %4883 = vmatpush1.bf16.msra.mxu1 %v4882_v30  ;;  %4253 = vmatprep.mubr.msk.f32.mxu1 %vm1720_vm7, %v1945_v55  ;;  %v4235_v30 = vld [vmem:[%s7333_s5 + $0x4b0] sm:$0xff]  ;;  %v4242_v55 = vld [vmem:[%s7333_s5 + $0x4e8] sm:$0xff] }
 0x42f   :  { %4885 = vmatprep.subr.bf16.mxu1 %v4884_v33  ;;  %v4240_v33 = vld [vmem:[%s7333_s5 + $0x4d8] sm:$0xff]  ;;  %v4914_v34 = vpack.c.bf16 %v4235_v30, %v4233_v26  ;;  %v2105_v26 = vld [vmem:[#allocation2 + $0x10] sm:$0xff]  ;;  %v2108_v30 = vld [vmem:[#allocation2 + $0x28] sm:$0xff] }
 0x430   :  { %v4916_v47 = vpack.c.bf16 %v4240_v33, %v4238_v31  ;;  %v4944_v31 = vpack.c.bf16 %v2108_v30, %v2105_v26  ;;  %v2486_v33 = vld [vmem:[#allocation2 + $0x98] sm:$0xff]  ;;  %v2911_v26 = vld [vmem:[#allocation6 + $0x308] sm:$0xff] }
 0x431   :  { %v2913_v30 = vld [vmem:[#allocation6 + $0x318] sm:$0xff] }
 0x432   :  { %4887 = vmatpush1.bf16.msra.mxu1 %v4886_v41  ;;  %v4244_v41 = vld [vmem:[%s7333_s5 + $0x4f8] sm:$0xff] }
 0x433   :  { %4889 = vmatprep.subr.bf16.mxu1 %v4888_v46  ;;  %v4918_v46 = vpack.c.bf16 %v4239_v2, %v4237_v11  ;;  %v4920_v48 = vpack.c.bf16 %v4244_v41, %v4242_v55  ;;  %v2488_v2 = vld [vmem:[#allocation2 + $0xa8] sm:$0xff] }
 0x434   :  { %v2492_v41 = vld [vmem:[#allocation2 + $0xc8] sm:$0xf] }
 0x436   :  { %4891 = vmatpush1.bf16.msra.mxu1 %v4890_v60  ;;  %v4248_v60 = vld [vmem:[%s7333_s5 + $0x518] sm:$0xff] }
 0x437   :  { %4893 = vmatprep.subr.bf16.mxu1 %v4892_v61  ;;  %v4922_v61 = vpack.c.bf16 %v4243_v58, %v4241_v56  ;;  %v4924_v62 = vpack.c.bf16 %v4248_v60, %v4246_v59  ;;  %v2885_v59 = vld [vmem:[#allocation6 + $0x238] sm:$0xff]  ;;  %v2882_v60 = vld [vmem:[#allocation6 + $0x220] sm:$0xff] }
 0x43a   :  { %4895 = vmatpush1.bf16.msra.mxu1 %v4894_v8  ;;  %v4252_v8 = vld [vmem:[%s7333_s5 + $0x538] sm:$0xff] }
 0x43b   :  { %4897 = vmatprep.subr.bf16.mxu1 %v4896_v9  ;;  %v4926_v9 = vpack.c.bf16 %v4247_v45, %v4245_v63  ;;  %v4928_v24 = vpack.c.bf16 %v4252_v8, %v4250_v6  ;;  %v2889_v63 = vld [vmem:[#allocation6 + $0x258] sm:$0xff]  ;;  %v2886_v8 = vld [vmem:[#allocation6 + $0x240] sm:$0xff] }
 0x43e   :  { %4899 = vmatpush1.bf16.msra.mxu1 %v4898_v32  ;;  %v2116_v32 = vld [vmem:[#allocation2 + $0x68] sm:$0xff] }
 0x43f   :  { %4901 = vmatprep.subr.bf16.mxu1 %v4900_v28  ;;  %v4930_v28 = vpack.c.bf16 %v4251_v5, %v4249_v35  ;;  %v4932_v3 = vpack.c.bf16 %v2116_v32, %v2113_v54  ;;  %v2890_v54 = vld [vmem:[#allocation6 + $0x260] sm:$0xff]  ;;  %v2892_v32 = vld [vmem:[#allocation6 + $0x270] sm:$0xff] }
 0x440   :  { %v4963_v43 = vpack.c.bf16 %v2892_v32, %v2890_v54 }
 0x442   :  { %4903 = vmatpush1.bf16.msra.mxu1 %v4902_v17  ;;  %v2119_v17 = vld [vmem:[#allocation2 + $0x80] sm:$0xf] }
 0x443   :  { %4905 = vmatprep.subr.bf16.mxu1 %v4904_v7  ;;  %v2124_v7 = vrot.slane %v6241_v40, 1 }
 0x445   :  { %v2126_v50 = vsel %vm113_vm1, %v2124_v7, %v2125_v37  ;;  %v2899_v7 = vld [vmem:[#allocation6 + $0x2a8] sm:$0xff] }
 0x446   :  { %4907 = vmatpush1.bf16.msra.mxu1 %v4906_v14  ;;  %v2104_v14 = vld [vmem:[#allocation2 + $0x8] sm:$0xff] }
 0x447   :  { %4909 = vmatprep.subr.bf16.mxu1 %v4908_v15  ;;  %v2107_v15 = vld [vmem:[#allocation2 + $0x20] sm:$0xff] }
 0x448   :  { %v4939_v18 = vpack.c.bf16 %v2107_v15, %v2104_v14 }
 0x44a   :  { %4911 = vmatpush1.bf16.msra.mxu1 %v4910_v22  ;;  %v2110_v22 = vld [vmem:[#allocation2 + $0x38] sm:$0xf] }
 0x44b   :  { %4913 = vmatprep.subr.bf16.mxu1 %v4912_v23  ;;  %v2109_v23 = vld [vmem:[#allocation2 + $0x30] sm:$0xf] }
 0x44e   :  { %4915 = vmatpush1.bf16.msra.mxu1 %v4914_v34  ;;  %v2489_v34 = vld [vmem:[#allocation2 + $0xb0] sm:$0xff] }
 0x44f   :  { %4917 = vmatprep.subr.bf16.mxu1 %v4916_v47  ;;  %v2111_v47 = vld [vmem:[#allocation2 + $0x40] sm:$0xf]  ;;  %v4946_v11 = vpack.c.bf16 %v2489_v34, %v2486_v33  ;;  %v4981_v33 = vpack.c.bf16 %v2913_v30, %v2911_v26  ;;  %v2925_v26 = vld [vmem:[#allocation6 + $0x378] sm:$0xff] }
 0x450   :  { %v2910_v34 = vld [vmem:[#allocation6 + $0x300] sm:$0xff] }
 0x452   :  { %4919 = vmatpush1.bf16.msra.mxu1 %v4918_v46  ;;  %v2491_v46 = vld [vmem:[#allocation2 + $0xc0] sm:$0xf] }
 0x453   :  { %4921 = vmatprep.subr.bf16.mxu1 %v4920_v48 }
 0x456   :  { %4923 = vmatpush1.bf16.msra.mxu1 %v4922_v61 }
 0x457   :  { %4925 = vmatprep.subr.bf16.mxu1 %v4924_v62  ;;  %v2884_v62 = vld [vmem:[#allocation6 + $0x230] sm:$0xff] }
 0x458   :  { %v4955_v45 = vpack.c.bf16 %v2884_v62, %v2882_v60  ;;  %v2920_v60 = vld [vmem:[#allocation6 + $0x350] sm:$0xff]  ;;  %v2033_v62 = vld [vmem:[#allocation9] sm:$0x3] }
 0x45a   :  { %4927 = vmatpush1.bf16.msra.mxu1 %v4926_v9  ;;  %v2891_v9 = vld [vmem:[#allocation6 + $0x268] sm:$0xff] }
 0x45b   :  { %4929 = vmatprep.subr.bf16.mxu1 %v4928_v24  ;;  %v2893_v24 = vld [vmem:[#allocation6 + $0x278] sm:$0xff] }
 0x45c   :  { %v4961_v5 = vpack.c.bf16 %v2893_v24, %v2891_v9 }
 0x45e   :  { %4931 = vmatpush1.bf16.msra.mxu1 %v4930_v28  ;;  %v2895_v28 = vld [vmem:[#allocation6 + $0x288] sm:$0xff] }
 0x45f   :  { %4933 = vmatprep.subr.bf16.mxu1 %v4932_v3  ;;  %v2897_v3 = vld [vmem:[#allocation6 + $0x298] sm:$0xff] }
 0x460   :  { %v4965_v1 = vpack.c.bf16 %v2897_v3, %v2895_v28 }
 0x461   :  { %2017 = vmatmul.mubr.f32.vlgmr.msra.gmra.mrb[24].mxu1 %v6155_v38  ;;  %v4937_v38 = vpack.c.bf16 %v2117_v13, %v2114_v12  ;;  %v2898_v13 = vld [vmem:[#allocation6 + $0x2a0] sm:$0xff] }
 0x462   :  { %4254 = vmatprep.mubr.msk.f32.mxu1 %vm1720_vm7, %v1944_v29  ;;  %4935 = vmatpush1.bf16.msra.mxu1 %v4934_v10  ;;  %v2127_v29 = vrot.slane %v6269_v42, 1  ;;  %v2894_v10 = vld [vmem:[#allocation6 + $0x280] sm:$0xff] }
 0x463   :  { %4258 = vmatprep.subr.msk.mxu1 %vm126_vm0, %v2119_v17  ;;  %v2896_v17 = vld [vmem:[#allocation6 + $0x290] sm:$0xff] }
 0x464   :  { %v2128_v16 = vsel %vm113_vm1, %v2125_v37, %v2127_v29  ;;  %v2901_v37 = vld [vmem:[#allocation6 + $0x2b8] sm:$0xff] }
 0x465   :  { %2023 = vmatmul.mubr.f32.gmra.mrb[26].mxu1 %v1941_v25  ;;  %v2120_v25 = vld [vmem:[#allocation2 + $0x88] sm:$0xf]  ;;  %v4969_v12 = vpack.c.bf16 %v2901_v37, %v2899_v7 }
 0x466   :  { %4259 = vmatpush1.msk.msra.mxu1 %vm126_vm0, %v2118_v39  ;;  %2208 = vmatprep.mubr.f32.mxu1 %v5583_v0  ;;  %v4967_v39 = vpack.c.bf16 %v2896_v17, %v2894_v10 }
 0x467   :  { %4936 = vmatprep.subr.bf16.mxu1 %v5584_v27 }
 0x469   :  { %4260 = vmatmul.mubr.msk.f32.vlgmr.msra.gmra.mrb[28].mxu1 %vm119_vm2, %v2126_v50 }
 0x46a   :  { %4938 = vmatpush3.bf16.msra.mxu1 %v4937_v38  ;;  %2214 = vmatprep.mubr.f32.mxu1 %v5583_v0  ;;  %v2903_v38 = vld [vmem:[#allocation6 + $0x2c8] sm:$0xff] }
 0x46b   :  { %4498 = vmatprep.subr.mxu1 %v5583_v0 }
 0x46d   :  { %4261 = vmatmul.mubr.msk.f32.gmra.mrb[30].mxu1 %vm119_vm2, %v2128_v16 }
 0x46e   :  { %2220 = vmatprep.mubr.f32.mxu1 %v5583_v0  ;;  %4499 = vmatpush3.msk.msra.mxu1 %vm126_vm0, %v2120_v25  ;;  %v2904_v25 = vld [vmem:[#allocation6 + $0x2d0] sm:$0xff] }
 0x46f   :  { %4940 = vmatprep.subr.bf16.mxu1 %v4939_v18  ;;  %v2907_v18 = vld [vmem:[#allocation6 + $0x2e8] sm:$0xff] }
 0x471   :  { %4262 = vmatmul.mubr.msk.f32.gmra.mrb[32].mxu1 %vm119_vm2, %v2127_v29 }
 0x472   :  { %4500 = vmatprep.mubr.msk.f32.mxu1 %vm5585_vm4, %v5583_v0 }
 0x475   :  { %4501 = vmatmul.mubr.msk.f32.vlgmr.msra.gmra.mrb[34].mxu1 %vm119_vm2, %v2126_v50  ;;  %v2900_v50 = vld [vmem:[#allocation6 + $0x2b0] sm:$0xff] }
 0x476   :  { %4942 = vmatpush1.bf16.msra.mxu1 %v4941_v21  ;;  %4503 = vmatprep.mubr.msk.f32.mxu1 %vm5585_vm4, %v5583_v0  ;;  %v4971_v14 = vpack.c.bf16 %v2900_v50, %v2898_v13  ;;  %v4977_v21 = vpack.c.bf16 %v2909_v19, %v2907_v18 }
 0x477   :  { %4267 = vmatprep.subr.msk.mxu1 %vm126_vm0, %v2110_v22  ;;  %v2906_v22 = vld [vmem:[#allocation6 + $0x2e0] sm:$0xff] }
 0x479   :  { %4504 = vmatmul.mubr.msk.f32.gmra.mrb[36].mxu1 %vm119_vm2, %v2128_v16  ;;  %v2902_v16 = vld [vmem:[#allocation6 + $0x2c0] sm:$0xff] }
 0x47a   :  { %4506 = vmatprep.mubr.msk.f32.mxu1 %vm5585_vm4, %v5583_v0  ;;  %4268 = vmatpush1.msk.msra.mxu1 %vm126_vm0, %v2109_v23  ;;  %v4975_v20 = vpack.c.bf16 %v2904_v25, %v2902_v16  ;;  %v2908_v23 = vld [vmem:[#allocation6 + $0x2f0] sm:$0xff]  ;;  %v2686_v16 = vld [vmem:[#allocation4] sm:$0x7] }
 0x47b   :  { %4943 = vmatprep.subr.bf16.mxu1 %v5584_v27  ;;  %v2485_v27 = vld [vmem:[#allocation2 + $0x90] sm:$0xff] }
 0x47c   :  { %v4948_v55 = vpack.c.bf16 %v2488_v2, %v2485_v27  ;;  %v2917_v27 = vld [vmem:[#allocation6 + $0x338] sm:$0xff] }
 0x47d   :  { %4507 = vmatmul.mubr.msk.f32.gmra.mrb[38].mxu1 %vm119_vm2, %v2127_v29  ;;  %v2905_v29 = vld [vmem:[#allocation6 + $0x2d8] sm:$0xff] }
 0x47e   :  { %2386 = vmatprep.mubr.f32.mxu1 %v5583_v0  ;;  %v4973_v15 = vpack.c.bf16 %v2905_v29, %v2903_v38 }
 0x481   :  { %4269 = vmatmul.mubr.msk.f32.vlgmr.msra.gmra.mrb[28].mxu1 %vm119_vm2, %v6241_v40 }
 0x482   :  { %4945 = vmatpush3.bf16.msra.mxu1 %v4944_v31  ;;  %2392 = vmatprep.mubr.f32.mxu1 %v5583_v0  ;;  %v4979_v31 = vpack.c.bf16 %v2908_v23, %v2906_v22  ;;  %v2923_v23 = vld [vmem:[#allocation6 + $0x368] sm:$0xff] }
 0x483   :  { %4513 = vmatprep.subr.mxu1 %v5583_v0 }
 0x485   :  { %4270 = vmatmul.mubr.msk.f32.gmra.mrb[30].mxu1 %vm119_vm2, %v6246_v51 }
 0x486   :  { %2398 = vmatprep.mubr.f32.mxu1 %v5583_v0  ;;  %4514 = vmatpush3.msk.msra.mxu1 %vm126_vm0, %v2111_v47  ;;  %v2912_v47 = vld [vmem:[#allocation6 + $0x310] sm:$0xff] }
 0x487   :  { %4947 = vmatprep.subr.bf16.mxu1 %v4946_v11  ;;  %v2915_v11 = vld [vmem:[#allocation6 + $0x328] sm:$0xff]  ;;  %v4983_v2 = vpack.c.bf16 %v2912_v47, %v2910_v34  ;;  %v4993_v34 = vpack.c.bf16 %v2925_v26, %v2923_v23  ;;  %v2922_v47 = vld [vmem:[#allocation6 + $0x360] sm:$0xff] }
 0x489   :  { %4271 = vmatmul.mubr.msk.f32.gmra.mrb[32].mxu1 %vm119_vm2, %v6269_v42 }
 0x48a   :  { %4515 = vmatprep.mubr.msk.f32.mxu1 %vm5585_vm4, %v5583_v0 }
 0x48d   :  { %4516 = vmatmul.mubr.msk.f32.vlgmr.msra.gmra.mrb[40].mxu1 %vm119_vm2, %v6241_v40 }
 0x48e   :  { %4949 = vmatpush1.bf16.msra.mxu1 %v4948_v55  ;;  %4518 = vmatprep.mubr.msk.f32.mxu1 %vm5585_vm4, %v5583_v0  ;;  %v4985_v55 = vpack.c.bf16 %v2917_v27, %v2915_v11  ;;  %v2924_v11 = vld [vmem:[#allocation6 + $0x370] sm:$0xff] }
 0x48f   :  { %4276 = vmatprep.subr.msk.mxu1 %vm126_vm0, %v2492_v41  ;;  %v2914_v41 = vld [vmem:[#allocation6 + $0x320] sm:$0xff]  ;;  %v4995_v27 = vpack.c.bf16 %v2924_v11, %v2922_v47  ;;  %v2939_v47 = vld [vmem:[#allocation6 + $0x3e8] sm:$0xff]  ;;  %v2941_v11 = vld [vmem:[#allocation6 + $0x3f8] sm:$0xff] }
 0x491   :  { %4519 = vmatmul.mubr.msk.f32.gmra.mrb[42].mxu1 %vm119_vm2, %v6246_v51 }
 0x492   :  { %4521 = vmatprep.mubr.msk.f32.mxu1 %vm5585_vm4, %v5583_v0  ;;  %4277 = vmatpush1.msk.msra.mxu1 %vm126_vm0, %v2491_v46  ;;  %v2916_v46 = vld [vmem:[#allocation6 + $0x330] sm:$0xff] }
 0x495   :  { %4522 = vmatmul.mubr.msk.f32.gmra.mrb[44].mxu1 %vm119_vm2, %v6269_v42 }
 0x496   :  { %2578 = vmatprep.mubr.f32.mxu1 %v5583_v0 }
 0x499   :  { %4278 = vmatmul.mubr.msk.f32.vlgmr.msra.gmra.mrb[28].mxu1 %vm119_vm2, %v6258_v36  ;;  %v2883_v36 = vld [vmem:[#allocation6 + $0x228] sm:$0xff] }
 0x49a   :  { %2584 = vmatprep.mubr.f32.mxu1 %v5583_v0  ;;  %v4953_v61 = vpack.c.bf16 %v2885_v59, %v2883_v36  ;;  %v2918_v59 = vld [vmem:[#allocation6 + $0x340] sm:$0xff] }
 0x49c   :  { %4954 = vmatprep.subr.bf16.mxu0 %v4953_v61  ;;  %v4991_v61 = vpack.c.bf16 %v2920_v60, %v2918_v59 }
 0x49d   :  { %4279 = vmatmul.mubr.msk.f32.gmra.mrb[30].mxu1 %vm119_vm2, %v6287_v57  ;;  %v2887_v57 = vld [vmem:[#allocation6 + $0x248] sm:$0xff]  ;;  %4956 = vmatpush1.bf16.msra.mxu0 %v4955_v45 }
 0x49e   :  { %2590 = vmatprep.mubr.f32.mxu1 %v5583_v0  ;;  %v4957_v6 = vpack.c.bf16 %v2889_v63, %v2887_v57  ;;  %v2038_v57 = vrot.slane %v2033_v62, %v5783_v49  ;;  %v2042_v63 = vrot.slane %v2033_v62, %v5790_v52 }
 0x4a0   :  { %4958 = vmatprep.subr.bf16.mxu0 %v4957_v6 }
 0x4a1   :  { %4280 = vmatmul.mubr.msk.f32.gmra.mrb[32].mxu1 %vm119_vm2, %v6281_v53  ;;  %v2888_v53 = vld [vmem:[#allocation6 + $0x250] sm:$0xff] }
 0x4a2   :  { %v4959_v35 = vpack.c.bf16 %v2888_v53, %v2886_v8 }
 0x4a4   :  { %4960 = vmatpush1.bf16.msra.mxu0 %v4959_v35 }
 0x4a5   :  { %4962 = vmatprep.subr.bf16.mxu0 %v4961_v5 }
 0x4a8   :  { %4964 = vmatpush1.bf16.msra.mxu0 %v4963_v43 }
 0x4a9   :  { %4966 = vmatprep.subr.bf16.mxu0 %v4965_v1 }
 0x4ac   :  { %4968 = vmatpush1.bf16.msra.mxu0 %v4967_v39 }
 0x4ad   :  { %4970 = vmatprep.subr.bf16.mxu0 %v4969_v12 }
 0x4b0   :  { %4972 = vmatpush1.bf16.msra.mxu0 %v4971_v14 }
 0x4b1   :  { %4974 = vmatprep.subr.bf16.mxu0 %v4973_v15 }
 0x4b4   :  { %4976 = vmatpush1.bf16.msra.mxu0 %v4975_v20  ;;  %v2699_v20 = vrot.slane %v2686_v16, %v692_v4  ;;  %v2691_v4 = vrot.slane %v2686_v16, %v5783_v49 }
 0x4b5   :  { %4978 = vmatprep.subr.bf16.mxu0 %v4977_v21 }
 0x4b8   :  { %4980 = vmatpush1.bf16.msra.mxu0 %v4979_v31 }
 0x4b9   :  { %4982 = vmatprep.subr.bf16.mxu0 %v4981_v33 }
 0x4bc   :  { %4984 = vmatpush1.bf16.msra.mxu0 %v4983_v2 }
 0x4bd   :  { %4986 = vmatprep.subr.bf16.mxu0 %v4985_v55  ;;  %v2927_v55 = vld [vmem:[#allocation6 + $0x388] sm:$0xff] }
 0x4c7   :  { %v6583_v40 = vpop.f32.mrb[10].mxu0 }
 0x4c8   :  { %v4532_v51 = vpop.f32.mrb[11].mxu0 }
 0x4c9   :  { %v2919_v51 = vld [vmem:[#allocation6 + $0x348] sm:$0xff] }
 0x4d0   :  { %v6585_v48 = vpop.f32.mrb[12].mxu0 }
 0x4d1   :  { %v4535_v42 = vpop.f32.mrb[13].mxu0 }
 0x4d2   :  { %v2921_v42 = vld [vmem:[#allocation6 + $0x358] sm:$0xff] }
 0x4d3   :  { %v4989_v36 = vpack.c.bf16 %v2921_v42, %v2919_v51  ;;  %v2928_v51 = vld [vmem:[#allocation6 + $0x390] sm:$0xff]  ;;  %v2931_v42 = vld [vmem:[#allocation6 + $0x3a8] sm:$0xff] }
 0x4d4   :  { %v6587_v56 = vpop.f32.mrb[14].mxu0 }
 0x4d5   :  { %v4538_v58 = vpop.f32.mrb[15].mxu0 }
 0x4d6   :  { %v4987_v58 = vpack.c.bf16 %v2916_v46, %v2914_v41  ;;  %v2929_v41 = vld [vmem:[#allocation6 + $0x398] sm:$0xff]  ;;  %v2926_v46 = vld [vmem:[#allocation6 + $0x380] sm:$0xff] }
 0x4d7   :  { %v4999_v62 = vpack.c.bf16 %v2928_v51, %v2926_v46  ;;  %v5009_v46 = vpack.c.bf16 %v2941_v11, %v2939_v47 }
 0x4d8   :  { %4988 = vmatpush1.bf16.msra.mxu0 %v4987_v58  ;;  %v2933_v58 = vld [vmem:[#allocation6 + $0x3b8] sm:$0xff] }
 0x4d9   :  { %4990 = vmatprep.subr.bf16.mxu0 %v4989_v36 }
 0x4dc   :  { %4992 = vmatpush1.bf16.msra.mxu0 %v4991_v61 }
 0x4dd   :  { %4994 = vmatprep.subr.bf16.mxu0 %v4993_v34 }
 0x4e0   :  { %4996 = vmatpush1.bf16.msra.mxu0 %v4995_v27 }
 0x534   :  { %v2018_v45 = vpop.f32.mrb[24].mxu1 }
 0x535   :  { %v2045_v6 = vadd.f32 %v2038_v57, %v2018_v45  ;;  %v2020_v8 = vpop.f32.mrb[25].mxu1  ;;  %v5001_v45 = vpack.c.bf16 %v2933_v58, %v2931_v42 }
 0x536   :  { %v2046_v53 = vadd.f32 %v2042_v63, %v2020_v8 }
 0x537   :  { %v2049_v24 = vmax.f32 %v2045_v6, 0.0 }
 0x538   :  { %v2024_v9 = vpop.f32.mrb[26].mxu1  ;;  %v2050_v54 = vmax.f32 %v2046_v53, 0.0 }
 0x539   :  { %v6591_v35 = vadd.f32 %v2038_v57, %v2024_v9  ;;  %v2026_v5 = vpop.f32.mrb[27].mxu1  ;;  %v2057_v43 = vrot.slane %v2049_v24, 1  ;;  %v2930_v57 = vld [vmem:[#allocation6 + $0x3a0] sm:$0xff] }
 0x53a   :  { %v6593_v32 = vadd.f32 %v2042_v63, %v2026_v5  ;;  %v2060_v10 = vrot.slane %v2050_v54, 1  ;;  %v2932_v63 = vld [vmem:[#allocation6 + $0x3b0] sm:$0xff] }
 0x53b   :  { %v2051_v28 = vmax.f32 %v6591_v35, 0.0  ;;  %v5003_v9 = vpack.c.bf16 %v2932_v63, %v2930_v57  ;;  %v2943_v63 = vld [vmem:[#allocation6 + $0x408] sm:$0xff] }
 0x53c   :  { %v2052_v3 = vmax.f32 %v6593_v32, 0.0  ;;  %v3599_v32 = vld [vmem:[%s7333_s5 + $0x10] sm:$0xff] }
 0x53d   :  { %v6599_v1 = vrot.slane %v2051_v28, 1 }
 0x53e   :  { %v6603_v17 = vrot.slane %v2052_v3, 1 }
 0x53f   :  { %v2059_v7 = vsel %vm113_vm1, %v2057_v43, %v6599_v1 }
 0x540   :  { %v6607_v37 = vmax.f32 %v2049_v24, %v2059_v7  ;;  %v2062_v39 = vsel %vm113_vm1, %v2060_v10, %v6603_v17 }
 0x541   :  { %v6611_v12 = vmax.f32 %v2050_v54, %v2062_v39 }
 0x548   :  { %v2293_v13 = vpop.f32.mrb[34].mxu1 }
 0x549   :  { %v4502_v50 = vpop.f32.mrb[35].mxu1 }
 0x54c   :  { %v2298_v38 = vpop.f32.mrb[36].mxu1 }
 0x54d   :  { %v4505_v29 = vpop.f32.mrb[37].mxu1 }
 0x54e   :  { %v2937_v29 = vld [vmem:[#allocation6 + $0x3d8] sm:$0xff] }
 0x550   :  { %v2303_v14 = vpop.f32.mrb[38].mxu1 }
 0x551   :  { %v4508_v15 = vpop.f32.mrb[39].mxu1 }
 0x560   :  { %v2471_v25 = vpop.f32.mrb[40].mxu1 }
 0x561   :  { %v2472_v18 = vadd.f32 %v2471_v25, %v2293_v13  ;;  %v4517_v19 = vpop.f32.mrb[41].mxu1 }
 0x562   :  { %v2934_v19 = vld [vmem:[#allocation6 + $0x3c0] sm:$0xff] }
 0x563   :  { %v2679_v21 = vadd.f32 %v6583_v40, %v2472_v18  ;;  %v4997_v40 = vpack.c.bf16 %v2929_v41, %v2927_v55 }
 0x564   :  { %v2476_v22 = vpop.f32.mrb[42].mxu1 }
 0x565   :  { %v2705_v30 = vadd.f32 %v2699_v20, %v2679_v21  ;;  %v2477_v31 = vadd.f32 %v2476_v22, %v2298_v38  ;;  %v4520_v33 = vpop.f32.mrb[43].mxu1  ;;  %4998 = vmatprep.subr.bf16.mxu0 %v4997_v40  ;;  %v2940_v40 = vld [vmem:[#allocation6 + $0x3f0] sm:$0xff] }
 0x566   :  { %5000 = vmatpush1.bf16.msra.mxu0 %v4999_v62 }
 0x567   :  { %v2682_v2 = vadd.f32 %v6585_v48, %v2477_v31  ;;  %v2714_v36 = vmax.f32 %v2705_v30, 0.0  ;;  %v2695_v48 = vrot.slane %v2686_v16, %v5790_v52  ;;  %5002 = vmatprep.subr.bf16.mxu0 %v5001_v45  ;;  %v2945_v45 = vld [vmem:[#allocation6 + $0x418] sm:$0xff] }
 0x568   :  { %v2481_v44 = vpop.f32.mrb[44].mxu1 }
 0x569   :  { %v2708_v59 = vadd.f32 %v2699_v20, %v2682_v2  ;;  %v2482_v60 = vadd.f32 %v2481_v44, %v2303_v14  ;;  %v4523_v61 = vpop.f32.mrb[45].mxu1  ;;  %v2736_v24 = vrot.slane %v2714_v36, 1  ;;  %v2938_v44 = vld [vmem:[#allocation6 + $0x3e0] sm:$0xff] }
 0x56a   :  { %5004 = vmatpush1.bf16.msra.mxu0 %v5003_v9  ;;  %v2944_v9 = vld [vmem:[#allocation6 + $0x410] sm:$0xff] }
 0x56b   :  { %v2717_v6 = vmax.f32 %v2708_v59, 0.0  ;;  %v2685_v8 = vadd.f32 %v6587_v56, %v2482_v60  ;;  %v2935_v56 = vld [vmem:[#allocation6 + $0x3c8] sm:$0xff] }
 0x56c   :  { %v2580_v53 = vpop.f32.mrb[28].mxu1  ;;  %v5005_v18 = vpack.c.bf16 %v2937_v29, %v2935_v56  ;;  %v2947_v56 = vld [vmem:[#allocation6 + $0x428] sm:$0xff]  ;;  %v2949_v29 = vld [vmem:[#allocation6 + $0x438] sm:$0xff] }
 0x56d   :  { %v2737_v5 = vrot.slane %v2717_v6, 1  ;;  %v6620_v54 = vadd.f32 %v2699_v20, %v2685_v8  ;;  %v2703_v43 = vadd.f32 %v2691_v4, %v2580_v53  ;;  %v2582_v10 = vpop.f32.mrb[29].mxu1  ;;  %v2936_v20 = vld [vmem:[#allocation6 + $0x3d0] sm:$0xff]  ;;  %v5013_v8 = vpack.c.bf16 %v2945_v45, %v2943_v63  ;;  %v2942_v53 = vld [vmem:[#allocation6 + $0x400] sm:$0xff] }
 0x56e   :  { %v2704_v7 = vadd.f32 %v2695_v48, %v2582_v10  ;;  %v5007_v23 = vpack.c.bf16 %v2936_v20, %v2934_v19  ;;  %5006 = vmatprep.subr.bf16.mxu0 %v5005_v18  ;;  %v2814_v45 = vld [vmem:[#allocation6] sm:$0xff] }
 0x56f   :  { %v2720_v39 = vmax.f32 %v6620_v54, 0.0  ;;  %v2738_v13 = vsel %vm113_vm1, %v2736_v24, %v2737_v5  ;;  %v2712_v15 = vmax.f32 %v2703_v43, 0.0 }
 0x570   :  { %v2586_v50 = vpop.f32.mrb[30].mxu1  ;;  %v6624_v38 = vmax.f32 %v2714_v36, %v2738_v13  ;;  %v2713_v21 = vmax.f32 %v2704_v7, 0.0  ;;  %5008 = vmatpush1.bf16.msra.mxu0 %v5007_v23  ;;  %v5011_v36 = vpack.c.bf16 %v2940_v40, %v2938_v44 }
 0x571   :  { %v2743_v14 = vrot.slane %v2720_v39, 1  ;;  %v2706_v16 = vadd.f32 %v2691_v4, %v2586_v50  ;;  %v2588_v25 = vpop.f32.mrb[31].mxu1  ;;  %v2730_v27 = vrot.slane %v2712_v15, 1  ;;  %5010 = vmatprep.subr.bf16.mxu0 %v5009_v46  ;;  %v2948_v46 = vld [vmem:[#allocation6 + $0x430] sm:$0xff] }
 0x572   :  { %v2707_v22 = vadd.f32 %v2695_v48, %v2588_v25  ;;  %2776 = vrot.lane.b32.xlu0 %v6624_v38, %s5586_s19  ;;  %v2733_v51 = vrot.slane %v2713_v21, 1 }
 0x573   :  { %v2715_v26 = vmax.f32 %v2706_v16, 0.0  ;;  %v2744_v30 = vsel %vm113_vm1, %v2737_v5, %v2743_v14  ;;  %v5015_v5 = vpack.c.bf16 %v2944_v9, %v2942_v53  ;;  %v6641_v16 = vmax.f32 %v2720_v39, %v2743_v14  ;;  %v2821_v53 = vld [vmem:[#allocation6 + $0x38] sm:$0xff] }
 0x574   :  { %v2716_v31 = vmax.f32 %v2707_v22, 0.0  ;;  %v2592_v33 = vpop.f32.mrb[32].mxu1  ;;  %v6631_v34 = vmax.f32 %v2717_v6, %v2744_v30  ;;  %5012 = vmatpush1.bf16.msra.mxu0 %v5011_v36 }
 0x575   :  { %v2731_v2 = vrot.slane %v2715_v26, 1  ;;  %v2709_v55 = vadd.f32 %v2691_v4, %v2592_v33  ;;  %v2594_v41 = vpop.f32.mrb[33].mxu1  ;;  %5014 = vmatprep.subr.bf16.mxu0 %v5013_v8  ;;  %v2819_v8 = vld [vmem:[#allocation6 + $0x28] sm:$0xff] }
 0x576   :  { %v2734_v42 = vrot.slane %v2716_v31, 1  ;;  %v2710_v58 = vadd.f32 %v2695_v48, %v2594_v41  ;;  %v2946_v41 = vld [vmem:[#allocation6 + $0x420] sm:$0xff] }
 0x577   :  { %v2718_v59 = vmax.f32 %v2709_v55, 0.0  ;;  %v2732_v60 = vsel %vm113_vm1, %v2730_v27, %v2731_v2 }
 0x578   :  { %v2719_v61 = vmax.f32 %v2710_v58, 0.0  ;;  %v2754_v62 = vmax.f32 %v2712_v15, %v2732_v60  ;;  %v2735_v57 = vsel %vm113_vm1, %v2733_v51, %v2734_v42  ;;  %5016 = vmatpush1.bf16.msra.mxu0 %v5015_v5  ;;  %v5017_v15 = vpack.c.bf16 %v2949_v29, %v2947_v56  ;;  %v2815_v51 = vld [vmem:[#allocation6 + $0x8] sm:$0xff]  ;;  %v2818_v5 = vld [vmem:[#allocation6 + $0x20] sm:$0xff]  ;;  %v2824_v56 = vld [vmem:[#allocation6 + $0x50] sm:$0xff] }
 0x579   :  { %v2739_v4 = vrot.slane %v2718_v59, 1  ;;  %v2755_v6 = vmax.f32 %v2713_v21, %v2735_v57  ;;  %v2827_v29 = vld [vmem:[#allocation6 + $0x68] sm:$0xff] }
 0x57a   :  { %v2741_v24 = vrot.slane %v2719_v61, 1  ;;  %5018 = vmatprep.subr.bf16.mxu0 %v5017_v15  ;;  %v2829_v15 = vld [vmem:[#allocation6 + $0x78] sm:$0xff] }
 0x57b   :  { %v2740_v48 = vsel %vm113_vm1, %v2731_v2, %v2739_v4  ;;  %v6643_v25 = vmax.f32 %v2718_v59, %v2739_v4  ;;  %v5019_v59 = vpack.c.bf16 %v2948_v46, %v2946_v41  ;;  %v2816_v4 = vld [vmem:[#allocation6 + $0x10] sm:$0xff]  ;;  %v2834_v46 = vld [vmem:[#allocation6 + $0xa0] sm:$0xff] }
 0x57c   :  { %v2757_v43 = vmax.f32 %v2715_v26, %v2740_v48  ;;  %v2742_v10 = vsel %vm113_vm1, %v2734_v42, %v2741_v24  ;;  %v6645_v18 = vmax.f32 %v2719_v61, %v2741_v24  ;;  %v2817_v42 = vld [vmem:[#allocation6 + $0x18] sm:$0xff]  ;;  %v5023_v9 = vpack.c.bf16 %v2816_v4, %v2814_v45  ;;  %v2820_v48 = vld [vmem:[#allocation6 + $0x30] sm:$0xff]  ;;  %v2842_v4 = vld [vmem:[#allocation6 + $0xe0] sm:$0xff] }
 0x57d   :  { %v2758_v7 = vmax.f32 %v2716_v31, %v2742_v10  ;;  %v5021_v61 = vpack.c.bf16 %v2817_v42, %v2815_v51  ;;  %v5025_v24 = vpack.c.bf16 %v2821_v53, %v2819_v8  ;;  %v2825_v10 = vld [vmem:[#allocation6 + $0x58] sm:$0xff]  ;;  %v2847_v8 = vld [vmem:[#allocation6 + $0x108] sm:$0xff] }
 0x57e   :  { %v5443_v13 = vpack.i.bf16 %v2757_v43, %v2754_v62  ;;  %v5448_v19 = vpack.i.bf16 %v6643_v25, %v6645_v18  ;;  %v2841_v51 = vld [vmem:[#allocation6 + $0xd8] sm:$0xff] }
 0x57f   :  { %v5438_v50 = vpack.i.bf16 %v2758_v7, %v2755_v6  ;;  %v2849_v53 = vld [vmem:[#allocation6 + $0x118] sm:$0xff] }
 0x580   :  { %5444 = vrot.lane.b32.xlu0 %v5443_v13, %s5586_s19 }
 0x581   :  { %5439 = vrot.lane.b32.xlu1 %v5438_v50, %s5586_s19  ;;  %v2822_v50 = vld [vmem:[#allocation6 + $0x40] sm:$0xff] }
 0x584   :  { %2788 = vrot.lane.b32.xlu0 %v6641_v16, %s5586_s19 }
 0x585   :  { %2782 = vrot.lane.b32.xlu1 %v6631_v34, %s5586_s19 }
 0x589   :  { %5449 = vrot.lane.b32.xlu1 %v5448_v19, %s5586_s19  ;;  %v5031_v19 = vpack.c.bf16 %v2824_v56, %v2822_v50  ;;  %v2855_v50 = vld [vmem:[#allocation6 + $0x148] sm:$0xff]  ;;  %v2857_v56 = vld [vmem:[#allocation6 + $0x158] sm:$0xff] }
 0x5e4   :  { %v2777_v20 = vpop.permute.xlu0 %2776 }
 0x5e5   :  { %v6676_v63 = vmax.f32 %v6624_v38, %v2777_v20 }
 0x5f2   :  { %v5445_v54 = vpop.permute.xlu0 %5444 }
 0x5f3   :  { %v5447_v39 = vunpack.i.h.bf16 %v5445_v54  ;;  %v5446_v14 = vunpack.i.l.bf16 %v5445_v54  ;;  %v5440_v21 = vpop.permute.xlu1 %5439  ;;  %v2826_v54 = vld [vmem:[#allocation6 + $0x60] sm:$0xff] }
 0x5f4   :  { %v5442_v22 = vunpack.i.h.bf16 %v5440_v21  ;;  %v5441_v23 = vunpack.i.l.bf16 %v5440_v21  ;;  %v2833_v21 = vld [vmem:[#allocation6 + $0x98] sm:$0xff] }
 0x5f6   :  { %v2792_v26 = vsel %vm784_vm5, %v5447_v39, %v5442_v22  ;;  %v2790_v30 = vsel %vm784_vm5, %v5446_v14, %v5441_v23  ;;  %v2791_v31 = vsel %vm784_vm5, %v5441_v23, %v2777_v20  ;;  %v5033_v20 = vpack.c.bf16 %v2829_v15, %v2827_v29  ;;  %v2828_v39 = vld [vmem:[#allocation6 + $0x70] sm:$0xff]  ;;  %v2831_v14 = vld [vmem:[#allocation6 + $0x88] sm:$0xff] }
 0x5f7   :  { %v6657_v33 = vmax.f32 %v2757_v43, %v2792_v26  ;;  %v6659_v47 = vmax.f32 %v2754_v62, %v2790_v30  ;;  %v6661_v11 = vmax.f32 %v2755_v6, %v2791_v31  ;;  %v2783_v27 = vpop.permute.xlu1 %2782  ;;  %v2823_v43 = vld [vmem:[#allocation6 + $0x48] sm:$0xff]  ;;  %v5037_v23 = vpack.c.bf16 %v2833_v21, %v2831_v14  ;;  %v2830_v26 = vld [vmem:[#allocation6 + $0x80] sm:$0xff]  ;;  %v2832_v30 = vld [vmem:[#allocation6 + $0x90] sm:$0xff] }
 0x5f8   :  { %v2793_v2 = vsel %vm784_vm5, %v5442_v22, %v2783_v27  ;;  %v6672_v62 = vmax.f32 %v6631_v34, %v2783_v27  ;;  %v2962_v34 = vrot.slane %v6676_v63, 1  ;;  %v5029_v13 = vpack.c.bf16 %v2825_v10, %v2823_v43  ;;  %v2835_v31 = vld [vmem:[#allocation6 + $0xa8] sm:$0xff]  ;;  %v2837_v27 = vld [vmem:[#allocation6 + $0xb8] sm:$0xff] }
 0x5f9   :  { %v6664_v55 = vmax.f32 %v2758_v7, %v2793_v2  ;;  %v2956_v44 = vrot.slane %v6659_v47, 1  ;;  %v2957_v40 = vrot.slane %v6657_v33, 1  ;;  %v2959_v58 = vrot.slane %v6661_v11, 1 }
 0x5fa   :  { %v2963_v6 = vrot.slane %v6672_v62, 1  ;;  %v5027_v7 = vpack.c.bf16 %v2820_v48, %v2818_v5  ;;  %v5035_v22 = vpack.c.bf16 %v2828_v39, %v2826_v54  ;;  %v5039_v2 = vpack.c.bf16 %v2832_v30, %v2830_v26  ;;  %v2848_v5 = vld [vmem:[#allocation6 + $0x110] sm:$0xff]  ;;  %v2851_v48 = vld [vmem:[#allocation6 + $0x128] sm:$0xff]  ;;  %v2861_v39 = vld [vmem:[#allocation6 + $0x178] sm:$0xff] }
 0x5fb   :  { %v2960_v36 = vrot.slane %v6664_v55, 1  ;;  %v2958_v57 = vsel %vm113_vm1, %v2956_v44, %v2957_v40  ;;  %v5041_v41 = vpack.c.bf16 %v2837_v27, %v2835_v31  ;;  %v2836_v44 = vld [vmem:[#allocation6 + $0xb0] sm:$0xff]  ;;  %v5061_v15 = vpack.c.bf16 %v2857_v56, %v2855_v50  ;;  %v2859_v54 = vld [vmem:[#allocation6 + $0x168] sm:$0xff]  ;;  %v2865_v30 = vld [vmem:[#allocation6 + $0x198] sm:$0xff] }
 0x5fc   :  { %v2964_v38 = vsel %vm113_vm1, %v2962_v34, %v2963_v6  ;;  %v5043_v42 = vpack.c.bf16 %v2836_v44, %v2834_v46  ;;  %v5065_v21 = vpack.c.bf16 %v2861_v39, %v2859_v54  ;;  %v2863_v26 = vld [vmem:[#allocation6 + $0x188] sm:$0xff]  ;;  %v2869_v44 = vld [vmem:[#allocation6 + $0x1b8] sm:$0xff] }
 0x5fd   :  { %v2961_v60 = vsel %vm113_vm1, %v2959_v58, %v2960_v36  ;;  %v5069_v27 = vpack.c.bf16 %v2865_v30, %v2863_v26  ;;  %v2867_v46 = vld [vmem:[#allocation6 + $0x1a8] sm:$0xff]  ;;  %v3360_v26 = vrot.slane %v6664_v55, 2 }
 0x5fe   :  { %3037 = vmatprep.mubr.f32.mxu0 %v2961_v60  ;;  %v2843_v60 = vld [vmem:[#allocation6 + $0xe8] sm:$0xff] }
 0x5ff   :  { %3038 = vmatmul.mubr.f32.vlgmr.msra.gmra.mrb[16].mxu0 %v2958_v57 }
 0x600   :  { %3043 = vmatprep.mubr.f32.mxu0 %v2960_v36  ;;  %5020 = vmatpush1.bf16.msra.mxu0 %v5019_v59  ;;  %v2838_v36 = vld [vmem:[#allocation6 + $0xc0] sm:$0xff]  ;;  %v2840_v59 = vld [vmem:[#allocation6 + $0xd0] sm:$0xff] }
 0x601   :  { %5022 = vmatprep.subr.bf16.mxu0 %v5021_v61  ;;  %v2845_v61 = vld [vmem:[#allocation6 + $0xf8] sm:$0xff]  ;;  %v5047_v57 = vpack.c.bf16 %v2840_v59, %v2838_v36  ;;  %v2871_v36 = vld [vmem:[#allocation6 + $0x1c8] sm:$0xff] }
 0x602   :  { %v5049_v45 = vpack.c.bf16 %v2845_v61, %v2843_v60  ;;  %v2873_v59 = vld [vmem:[#allocation6 + $0x1d8] sm:$0xff] }
 0x603   :  { %3044 = vmatmul.mubr.f32.gmra.mrb[18].mxu0 %v2957_v40  ;;  %v2839_v40 = vld [vmem:[#allocation6 + $0xc8] sm:$0xff]  ;;  %v5077_v61 = vpack.c.bf16 %v2873_v59, %v2871_v36  ;;  %v3299_v36 = vld [vmem:[#allocation6 + $0x4b0] sm:$0xff]  ;;  %v3304_v59 = vld [vmem:[#allocation6 + $0x4d8] sm:$0xff] }
 0x604   :  { %3114 = vmatprep.mubr.f32.mxu0 %v5583_v0  ;;  %v5045_v58 = vpack.c.bf16 %v2841_v51, %v2839_v40  ;;  %v5073_v51 = vpack.c.bf16 %v2869_v44, %v2867_v46  ;;  %v3298_v46 = vld [vmem:[#allocation6 + $0x4a8] sm:$0xff]  ;;  %v3300_v44 = vld [vmem:[#allocation6 + $0x4b8] sm:$0xff] }
 0x607   :  { %4285 = vmatmul.mubr.msk.f32.vlgmr.msra.gmra.mrb[16].mxu0 %vm965_vm6, %v2964_v38  ;;  %v2853_v38 = vld [vmem:[#allocation6 + $0x138] sm:$0xff] }
 0x608   :  { %5024 = vmatpush1.bf16.msra.mxu0 %v5023_v9  ;;  %3120 = vmatprep.mubr.f32.mxu0 %v5583_v0  ;;  %v5053_v9 = vpack.c.bf16 %v2849_v53, %v2847_v8  ;;  %v5057_v10 = vpack.c.bf16 %v2853_v38, %v2851_v48 }
 0x609   :  { %5026 = vmatprep.subr.bf16.mxu0 %v5025_v24  ;;  %v2846_v24 = vld [vmem:[#allocation6 + $0x100] sm:$0xff] }
 0x60a   :  { %v5055_v43 = vpack.c.bf16 %v2848_v5, %v2846_v24  ;;  %v2879_v24 = vld [vmem:[#allocation6 + $0x208] sm:$0xff]  ;;  %v2881_v5 = vld [vmem:[#allocation6 + $0x218] sm:$0xff] }
 0x60b   :  { %4286 = vmatmul.mubr.msk.f32.gmra.mrb[18].mxu0 %vm965_vm6, %v2963_v6  ;;  %v2844_v6 = vld [vmem:[#allocation6 + $0xf0] sm:$0xff]  ;;  %v5085_v38 = vpack.c.bf16 %v2881_v5, %v2879_v24  ;;  %v3310_v24 = vld [vmem:[#allocation6 + $0x508] sm:$0xff]  ;;  %v3312_v5 = vld [vmem:[#allocation6 + $0x518] sm:$0xff] }
 0x60c   :  { %5028 = vmatpush1.bf16.msra.mxu0 %v5027_v7  ;;  %3195 = vmatprep.mubr.f32.mxu0 %v6661_v11  ;;  %v5051_v34 = vpack.c.bf16 %v2844_v6, %v2842_v4  ;;  %v2850_v7 = vld [vmem:[#allocation6 + $0x120] sm:$0xff]  ;;  %v2875_v4 = vld [vmem:[#allocation6 + $0x1e8] sm:$0xff]  ;;  %v2877_v6 = vld [vmem:[#allocation6 + $0x1f8] sm:$0xff] }
 0x60d   :  { %5030 = vmatprep.subr.bf16.mxu0 %v5029_v13  ;;  %v2852_v13 = vld [vmem:[#allocation6 + $0x130] sm:$0xff]  ;;  %v5081_v53 = vpack.c.bf16 %v2877_v6, %v2875_v4  ;;  %v3306_v4 = vld [vmem:[#allocation6 + $0x4e8] sm:$0xff]  ;;  %v3308_v6 = vld [vmem:[#allocation6 + $0x4f8] sm:$0xff] }
 0x60e   :  { %v5059_v29 = vpack.c.bf16 %v2852_v13, %v2850_v7  ;;  %v3286_v7 = vld [vmem:[#allocation6 + $0x448] sm:$0xff]  ;;  %v3288_v13 = vld [vmem:[#allocation6 + $0x458] sm:$0xff] }
 0x60f   :  { %v5089_v56 = vpack.c.bf16 %v3288_v13, %v3286_v7  ;;  %v3314_v7 = vld [vmem:[#allocation6 + $0x528] sm:$0xff]  ;;  %v3316_v13 = vld [vmem:[#allocation6 + $0x538] sm:$0xff] }
 0x610   :  { %5032 = vmatpush1.bf16.msra.mxu0 %v5031_v19  ;;  %v2854_v19 = vld [vmem:[#allocation6 + $0x140] sm:$0xff] }
 0x611   :  { %5034 = vmatprep.subr.bf16.mxu0 %v5033_v20  ;;  %v2856_v20 = vld [vmem:[#allocation6 + $0x150] sm:$0xff] }
 0x612   :  { %v5063_v14 = vpack.c.bf16 %v2856_v20, %v2854_v19  ;;  %v3290_v19 = vld [vmem:[#allocation6 + $0x468] sm:$0xff]  ;;  %v3292_v20 = vld [vmem:[#allocation6 + $0x478] sm:$0xff] }
 0x613   :  { %v5093_v39 = vpack.c.bf16 %v3292_v20, %v3290_v19  ;;  %v3318_v19 = vld [vmem:[#allocation6 + $0x548] sm:$0xff]  ;;  %v3320_v20 = vld [vmem:[#allocation6 + $0x558] sm:$0xff] }
 0x614   :  { %5036 = vmatpush1.bf16.msra.mxu0 %v5035_v22  ;;  %v2858_v22 = vld [vmem:[#allocation6 + $0x160] sm:$0xff] }
 0x615   :  { %5038 = vmatprep.subr.bf16.mxu0 %v5037_v23  ;;  %v2860_v23 = vld [vmem:[#allocation6 + $0x170] sm:$0xff] }
 0x616   :  { %v5067_v31 = vpack.c.bf16 %v2860_v23, %v2858_v22  ;;  %v3294_v22 = vld [vmem:[#allocation6 + $0x488] sm:$0xff]  ;;  %v3296_v23 = vld [vmem:[#allocation6 + $0x498] sm:$0xff] }
 0x618   :  { %5040 = vmatpush1.bf16.msra.mxu0 %v5039_v2  ;;  %v2862_v2 = vld [vmem:[#allocation6 + $0x180] sm:$0xff] }
 0x619   :  { %5042 = vmatprep.subr.bf16.mxu0 %v5041_v41  ;;  %v2864_v41 = vld [vmem:[#allocation6 + $0x190] sm:$0xff] }
 0x61a   :  { %v5071_v40 = vpack.c.bf16 %v2864_v41, %v2862_v2  ;;  %v3293_v2 = vld [vmem:[#allocation6 + $0x480] sm:$0xff]  ;;  %v3295_v41 = vld [vmem:[#allocation6 + $0x490] sm:$0xff] }
 0x61c   :  { %5044 = vmatpush1.bf16.msra.mxu0 %v5043_v42  ;;  %v2866_v42 = vld [vmem:[#allocation6 + $0x1a0] sm:$0xff] }
 0x61d   :  { %5046 = vmatprep.subr.bf16.mxu0 %v5045_v58  ;;  %v2868_v58 = vld [vmem:[#allocation6 + $0x1b0] sm:$0xff] }
 0x61e   :  { %v5075_v60 = vpack.c.bf16 %v2868_v58, %v2866_v42  ;;  %v5101_v42 = vpack.c.bf16 %v3300_v44, %v3298_v46  ;;  %v3297_v58 = vld [vmem:[#allocation6 + $0x4a0] sm:$0xff]  ;;  %v3328_v46 = vld [vmem:[#allocation6 + $0x598] sm:$0xff] }
 0x620   :  { %5048 = vmatpush1.bf16.msra.mxu0 %v5047_v57  ;;  %v2870_v57 = vld [vmem:[#allocation6 + $0x1c0] sm:$0xff] }
 0x621   :  { %5050 = vmatprep.subr.bf16.mxu0 %v5049_v45  ;;  %v2872_v45 = vld [vmem:[#allocation6 + $0x1d0] sm:$0xff] }
 0x622   :  { %v5079_v8 = vpack.c.bf16 %v2872_v45, %v2870_v57  ;;  %v3301_v57 = vld [vmem:[#allocation6 + $0x4c0] sm:$0xff]  ;;  %v3303_v45 = vld [vmem:[#allocation6 + $0x4d0] sm:$0xff] }
 0x624   :  { %5052 = vmatpush1.bf16.msra.mxu0 %v5051_v34  ;;  %v2874_v34 = vld [vmem:[#allocation6 + $0x1e0] sm:$0xff] }
 0x625   :  { %5054 = vmatprep.subr.bf16.mxu0 %v5053_v9  ;;  %v2876_v9 = vld [vmem:[#allocation6 + $0x1f0] sm:$0xff] }
 0x626   :  { %v5083_v48 = vpack.c.bf16 %v2876_v9, %v2874_v34  ;;  %v3305_v34 = vld [vmem:[#allocation6 + $0x4e0] sm:$0xff]  ;;  %v3307_v9 = vld [vmem:[#allocation6 + $0x4f0] sm:$0xff] }
 0x628   :  { %5056 = vmatpush1.bf16.msra.mxu0 %v5055_v43  ;;  %v2878_v43 = vld [vmem:[#allocation6 + $0x200] sm:$0xff] }
 0x629   :  { %5058 = vmatprep.subr.bf16.mxu0 %v5057_v10  ;;  %v2880_v10 = vld [vmem:[#allocation6 + $0x210] sm:$0xff] }
 0x62a   :  { %v5087_v50 = vpack.c.bf16 %v2880_v10, %v2878_v43  ;;  %v3309_v43 = vld [vmem:[#allocation6 + $0x500] sm:$0xff]  ;;  %v3311_v10 = vld [vmem:[#allocation6 + $0x510] sm:$0xff] }
 0x62c   :  { %5060 = vmatpush1.bf16.msra.mxu0 %v5059_v29  ;;  %v3285_v29 = vld [vmem:[#allocation6 + $0x440] sm:$0xff] }
 0x62d   :  { %5062 = vmatprep.subr.bf16.mxu0 %v5061_v15  ;;  %v3287_v15 = vld [vmem:[#allocation6 + $0x450] sm:$0xff] }
 0x62e   :  { %v5091_v54 = vpack.c.bf16 %v3287_v15, %v3285_v29  ;;  %v3313_v29 = vld [vmem:[#allocation6 + $0x520] sm:$0xff]  ;;  %v3315_v15 = vld [vmem:[#allocation6 + $0x530] sm:$0xff] }
 0x630   :  { %5064 = vmatpush1.bf16.msra.mxu0 %v5063_v14  ;;  %v3289_v14 = vld [vmem:[#allocation6 + $0x460] sm:$0xff] }
 0x631   :  { %5066 = vmatprep.subr.bf16.mxu0 %v5065_v21  ;;  %v3291_v21 = vld [vmem:[#allocation6 + $0x470] sm:$0xff] }
 0x632   :  { %v5095_v30 = vpack.c.bf16 %v3291_v21, %v3289_v14  ;;  %v3317_v14 = vld [vmem:[#allocation6 + $0x540] sm:$0xff]  ;;  %v3319_v21 = vld [vmem:[#allocation6 + $0x550] sm:$0xff] }
 0x634   :  { %5068 = vmatpush1.bf16.msra.mxu0 %v5067_v31  ;;  %v3359_v31 = vrot.slane %v6661_v11, 2  ;;  %v3302_v11 = vld [vmem:[#allocation6 + $0x4c8] sm:$0xff] }
 0x635   :  { %5070 = vmatprep.subr.bf16.mxu0 %v5069_v27  ;;  %v5097_v27 = vpack.c.bf16 %v3296_v23, %v3294_v22  ;;  %v3322_v22 = vld [vmem:[#allocation6 + $0x568] sm:$0xff]  ;;  %v3324_v23 = vld [vmem:[#allocation6 + $0x578] sm:$0xff] }
 0x638   :  { %5072 = vmatpush1.bf16.msra.mxu0 %v5071_v40  ;;  %v3361_v40 = vsel %vm487_vm3, %v3359_v31, %v3360_v26  ;;  %v5125_v31 = vpack.c.bf16 %v3324_v23, %v3322_v22  ;;  %v3345_v23 = vld [vmem:[#allocation6 + $0x620] sm:$0xff] }
 0x639   :  { %5074 = vmatprep.subr.bf16.mxu0 %v5073_v51  ;;  %v5099_v51 = vpack.c.bf16 %v3295_v41, %v3293_v2  ;;  %v3323_v2 = vld [vmem:[#allocation6 + $0x570] sm:$0xff]  ;;  %v3326_v41 = vld [vmem:[#allocation6 + $0x588] sm:$0xff] }
 0x63c   :  { %5076 = vmatpush1.bf16.msra.mxu0 %v5075_v60  ;;  %v5103_v60 = vpack.c.bf16 %v3299_v36, %v3297_v58  ;;  %v3330_v58 = vld [vmem:[#allocation6 + $0x5a8] sm:$0xff]  ;;  %v3332_v36 = vld [vmem:[#allocation6 + $0x5b8] sm:$0xff] }
 0x63d   :  { %5078 = vmatprep.subr.bf16.mxu0 %v5077_v61  ;;  %v5105_v61 = vpack.c.bf16 %v3304_v59, %v3302_v11  ;;  %v5133_v59 = vpack.c.bf16 %v3332_v36, %v3330_v58  ;;  %v3357_v58 = vrot.slane %v6657_v33, 2 }
 0x640   :  { %5080 = vmatpush1.bf16.msra.mxu0 %v5079_v8  ;;  %v5107_v8 = vpack.c.bf16 %v3303_v45, %v3301_v57  ;;  %v3334_v57 = vld [vmem:[#allocation6 + $0x5c8] sm:$0xff]  ;;  %v3336_v45 = vld [vmem:[#allocation6 + $0x5d8] sm:$0xff] }
 0x641   :  { %5082 = vmatprep.subr.bf16.mxu0 %v5081_v53  ;;  %v5109_v53 = vpack.c.bf16 %v3308_v6, %v3306_v4  ;;  %v5137_v6 = vpack.c.bf16 %v3336_v45, %v3334_v57  ;;  %v3362_v57 = vrot.slane %v6676_v63, 2 }
 0x644   :  { %5084 = vmatpush1.bf16.msra.mxu0 %v5083_v48  ;;  %v5111_v48 = vpack.c.bf16 %v3307_v9, %v3305_v34  ;;  %v3338_v34 = vld [vmem:[#allocation6 + $0x5e8] sm:$0xff]  ;;  %v3340_v9 = vld [vmem:[#allocation6 + $0x5f8] sm:$0xff] }
 0x645   :  { %5086 = vmatprep.subr.bf16.mxu0 %v5085_v38  ;;  %v5113_v38 = vpack.c.bf16 %v3312_v5, %v3310_v24  ;;  %v5450_v5 = vpop.permute.xlu1 %5449 }
 0x647   :  { %3196 = vmatmul.mubr.f32.vlgmr.msra.gmra.mrb[16].mxu0 %v6659_v47 }
 0x648   :  { %3201 = vmatprep.mubr.f32.mxu0 %v6664_v55  ;;  %5088 = vmatpush1.bf16.msra.mxu0 %v5087_v50  ;;  %v5115_v50 = vpack.c.bf16 %v3311_v10, %v3309_v43  ;;  %v3339_v43 = vld [vmem:[#allocation6 + $0x5f0] sm:$0xff]  ;;  %v3342_v10 = vld [vmem:[#allocation6 + $0x608] sm:$0xff] }
 0x649   :  { %5090 = vmatprep.subr.bf16.mxu0 %v5089_v56  ;;  %v5117_v56 = vpack.c.bf16 %v3316_v13, %v3314_v7  ;;  %v3344_v7 = vld [vmem:[#allocation6 + $0x618] sm:$0xff]  ;;  %v5451_v13 = vunpack.i.l.bf16 %v5450_v5 }
 0x64b   :  { %3202 = vmatmul.mubr.f32.gmra.mrb[18].mxu0 %v6657_v33  ;;  %v3363_v33 = vrot.slane %v6672_v62, 2 }
 0x64c   :  { %3272 = vmatprep.mubr.f32.mxu0 %v5583_v0 }
 0x64f   :  { %4287 = vmatmul.mubr.msk.f32.vlgmr.msra.gmra.mrb[16].mxu0 %vm965_vm6, %v6676_v63  ;;  %v4291_v63 = vld [vmem:[%s7333_s5 + $0x1c0] sm:$0xff] }
 0x650   :  { %5092 = vmatpush1.bf16.msra.mxu0 %v5091_v54  ;;  %3278 = vmatprep.mubr.f32.mxu0 %v5583_v0  ;;  %v5119_v54 = vpack.c.bf16 %v3315_v15, %v3313_v29  ;;  %v3341_v29 = vld [vmem:[#allocation6 + $0x600] sm:$0xff]  ;;  %v3343_v15 = vld [vmem:[#allocation6 + $0x610] sm:$0xff] }
 0x651   :  { %5094 = vmatprep.subr.bf16.mxu0 %v5093_v39  ;;  %v5121_v39 = vpack.c.bf16 %v3320_v20, %v3318_v19  ;;  %v3346_v19 = vld [vmem:[#allocation6 + $0x628] sm:$0xff]  ;;  %v3348_v20 = vld [vmem:[#allocation6 + $0x638] sm:$0xff] }
 0x652   :  { %v5149_v22 = vpack.c.bf16 %v3348_v20, %v3346_v19  ;;  %v4305_v19 = vld [vmem:[%s7333_s5 + $0x230] sm:$0xff]  ;;  %v4308_v20 = vld [vmem:[%s7333_s5 + $0x248] sm:$0xff] }
 0x653   :  { %4288 = vmatmul.mubr.msk.f32.gmra.mrb[18].mxu0 %vm965_vm6, %v6672_v62  ;;  %v4294_v62 = vld [vmem:[%s7333_s5 + $0x1d8] sm:$0xff] }
 0x654   :  { %5096 = vmatpush1.bf16.msra.mxu0 %v5095_v30  ;;  %3443 = vmatprep.mubr.f32.mxu0 %v3361_v40  ;;  %v5123_v30 = vpack.c.bf16 %v3319_v21, %v3317_v14  ;;  %v5129_v40 = vpack.c.bf16 %v3328_v46, %v3326_v41  ;;  %v5147_v21 = vpack.c.bf16 %v3343_v15, %v3341_v29  ;;  %v4303_v15 = vld [vmem:[%s7333_s5 + $0x220] sm:$0xff] }
 0x655   :  { %5098 = vmatprep.subr.bf16.mxu0 %v5097_v27  ;;  %v3321_v27 = vld [vmem:[#allocation6 + $0x560] sm:$0xff] }
 0x656   :  { %v5127_v44 = vpack.c.bf16 %v3323_v2, %v3321_v27  ;;  %v3352_v27 = vld [vmem:[#allocation6 + $0x658] sm:$0xff] }
 0x658   :  { %5100 = vmatpush1.bf16.msra.mxu0 %v5099_v51  ;;  %v3325_v51 = vld [vmem:[#allocation6 + $0x580] sm:$0xff] }
 0x659   :  { %5102 = vmatprep.subr.bf16.mxu0 %v5101_v42  ;;  %v3327_v42 = vld [vmem:[#allocation6 + $0x590] sm:$0xff] }
 0x65a   :  { %v5131_v11 = vpack.c.bf16 %v3327_v42, %v3325_v51  ;;  %v3351_v51 = vld [vmem:[#allocation6 + $0x650] sm:$0xff]  ;;  %v3356_v42 = vrot.slane %v6659_v47, 2 }
 0x65c   :  { %5104 = vmatpush1.bf16.msra.mxu0 %v5103_v60  ;;  %v3329_v60 = vld [vmem:[#allocation6 + $0x5a0] sm:$0xff] }
 0x65d   :  { %5106 = vmatprep.subr.bf16.mxu0 %v5105_v61  ;;  %v3331_v61 = vld [vmem:[#allocation6 + $0x5b0] sm:$0xff] }
 0x65e   :  { %v5135_v4 = vpack.c.bf16 %v3331_v61, %v3329_v60  ;;  %v3358_v60 = vsel %vm487_vm3, %v3356_v42, %v3357_v58  ;;  %v4315_v42 = vld [vmem:[%s7333_s5 + $0x280] sm:$0xff] }
 0x660   :  { %5108 = vmatpush1.bf16.msra.mxu0 %v5107_v8  ;;  %v3333_v8 = vld [vmem:[#allocation6 + $0x5c0] sm:$0xff] }
 0x661   :  { %5110 = vmatprep.subr.bf16.mxu0 %v5109_v53  ;;  %v3335_v53 = vld [vmem:[#allocation6 + $0x5d0] sm:$0xff] }
 0x662   :  { %v5139_v24 = vpack.c.bf16 %v3335_v53, %v3333_v8  ;;  %v4298_v8 = vld [vmem:[%s7333_s5 + $0x1f8] sm:$0xff] }
 0x664   :  { %5112 = vmatpush1.bf16.msra.mxu0 %v5111_v48  ;;  %v5141_v48 = vpack.c.bf16 %v3340_v9, %v3338_v34  ;;  %v4295_v9 = vld [vmem:[%s7333_s5 + $0x1e0] sm:$0xff] }
 0x665   :  { %5114 = vmatprep.subr.bf16.mxu0 %v5113_v38  ;;  %v3337_v38 = vld [vmem:[#allocation6 + $0x5e0] sm:$0xff] }
 0x668   :  { %5116 = vmatpush1.bf16.msra.mxu0 %v5115_v50  ;;  %v5143_v50 = vpack.c.bf16 %v3339_v43, %v3337_v38 }
 0x669   :  { %5118 = vmatprep.subr.bf16.mxu0 %v5117_v56  ;;  %v5145_v56 = vpack.c.bf16 %v3344_v7, %v3342_v10  ;;  %v4299_v10 = vld [vmem:[%s7333_s5 + $0x200] sm:$0xff]  ;;  %v4301_v7 = vld [vmem:[%s7333_s5 + $0x210] sm:$0xff] }
 0x66c   :  { %5120 = vmatpush1.bf16.msra.mxu0 %v5119_v54  ;;  %v2789_v54 = vpop.permute.xlu0 %2788 }
 0x66d   :  { %5122 = vmatprep.subr.bf16.mxu0 %v5121_v39  ;;  %v5452_v39 = vunpack.i.h.bf16 %v5450_v5  ;;  %v2795_v14 = vsel %vm784_vm5, %v5451_v13, %v2789_v54  ;;  %v2813_v47 = vmax.f32 %v6641_v16, %v2789_v54  ;;  %v4292_v16 = vld [vmem:[%s7333_s5 + $0x1c8] sm:$0xff]  ;;  %v4310_v54 = vld [vmem:[%s7333_s5 + $0x258] sm:$0xff] }
 0x66e   :  { %v2812_v41 = vmax.f32 %v6645_v18, %v2795_v14  ;;  %v4300_v5 = vld [vmem:[%s7333_s5 + $0x208] sm:$0xff]  ;;  %v5173_v14 = vpack.c.bf16 %v4310_v54, %v4308_v20 }
 0x66f   :  { %v2794_v2 = vsel %vm784_vm5, %v5452_v39, %v5451_v13  ;;  %v3369_v45 = vrot.slane %v2813_v47, 2  ;;  %v4304_v13 = vld [vmem:[%s7333_s5 + $0x228] sm:$0xff]  ;;  %v5171_v39 = vpack.c.bf16 %v4305_v19, %v4303_v15 }
 0x670   :  { %5124 = vmatpush1.bf16.msra.mxu0 %v5123_v30  ;;  %v3347_v30 = vld [vmem:[#allocation6 + $0x630] sm:$0xff]  ;;  %v2811_v36 = vmax.f32 %v6643_v25, %v2794_v2  ;;  %v4311_v2 = vld [vmem:[%s7333_s5 + $0x260] sm:$0xff] }
 0x671   :  { %5126 = vmatprep.subr.bf16.mxu0 %v5125_v31  ;;  %v3350_v31 = vld [vmem:[#allocation6 + $0x648] sm:$0xff]  ;;  %v5151_v46 = vpack.c.bf16 %v3347_v30, %v3345_v23  ;;  %v3370_v55 = vsel %vm487_vm3, %v3363_v33, %v3369_v45  ;;  %v4314_v30 = vld [vmem:[%s7333_s5 + $0x278] sm:$0xff] }
 0x672   :  { %v3365_v61 = vrot.slane %v2811_v36, 2  ;;  %v4312_v23 = vld [vmem:[%s7333_s5 + $0x268] sm:$0xff]  ;;  %v4323_v45 = vld [vmem:[%s7333_s5 + $0x2c0] sm:$0xff] }
 0x673   :  { %v4320_v36 = vld [vmem:[%s7333_s5 + $0x2a8] sm:$0xff] }
 0x674   :  { %5128 = vmatpush1.bf16.msra.mxu0 %v5127_v44  ;;  %v5153_v44 = vpack.c.bf16 %v3352_v27, %v3350_v31  ;;  %v3366_v25 = vsel %vm487_vm3, %v3357_v58, %v3365_v61  ;;  %v5177_v27 = vpack.c.bf16 %v4314_v30, %v4312_v23  ;;  %v4317_v58 = vld [vmem:[%s7333_s5 + $0x290] sm:$0xff]  ;;  %v4319_v61 = vld [vmem:[%s7333_s5 + $0x2a0] sm:$0xff]  ;;  %v4324_v47 = vld [vmem:[%s7333_s5 + $0x2c8] sm:$0xff] }
 0x675   :  { %5130 = vmatprep.subr.bf16.mxu0 %v5129_v40  ;;  %v3349_v40 = vld [vmem:[#allocation6 + $0x640] sm:$0xff] }
 0x678   :  { %5132 = vmatpush1.bf16.msra.mxu0 %v5131_v11  ;;  %v3367_v11 = vrot.slane %v2812_v41, 2  ;;  %v4313_v41 = vld [vmem:[%s7333_s5 + $0x270] sm:$0xff] }
 0x679   :  { %5134 = vmatprep.subr.bf16.mxu0 %v5133_v59  ;;  %v5155_v59 = vpack.c.bf16 %v3351_v51, %v3349_v40  ;;  %v5179_v40 = vpack.c.bf16 %v4313_v41, %v4311_v2  ;;  %v4341_v2 = vld [vmem:[%s7333_s5 + $0x350] sm:$0xff] }
 0x67a   :  { %v3368_v18 = vsel %vm487_vm3, %v3360_v26, %v3367_v11  ;;  %v5157_v26 = vpack.c.bf16 %v4294_v62, %v4292_v16  ;;  %v4322_v11 = vld [vmem:[%s7333_s5 + $0x2b8] sm:$0xff] }
 0x67b   :  { %v4330_v16 = vld [vmem:[%s7333_s5 + $0x2f8] sm:$0xff] }
 0x67c   :  { %5136 = vmatpush1.bf16.msra.mxu0 %v5135_v4  ;;  %v3364_v4 = vsel %vm487_vm3, %v3362_v57, %v3363_v33  ;;  %5158 = vmatprep.subr.bf16.mxu1 %v5157_v26  ;;  %v4326_v33 = vld [vmem:[%s7333_s5 + $0x2d8] sm:$0xff]  ;;  %v4327_v26 = vld [vmem:[%s7333_s5 + $0x2e0] sm:$0xff] }
 0x67d   :  { %5138 = vmatprep.subr.bf16.mxu0 %v5137_v6  ;;  %v4296_v6 = vld [vmem:[%s7333_s5 + $0x1e8] sm:$0xff]  ;;  %v5189_v57 = vpack.c.bf16 %v4326_v33, %v4324_v47 }
 0x67e   :  { %v5161_v34 = vpack.c.bf16 %v4298_v8, %v4296_v6  ;;  %v4332_v6 = vld [vmem:[%s7333_s5 + $0x308] sm:$0xff]  ;;  %v4334_v8 = vld [vmem:[%s7333_s5 + $0x318] sm:$0xff] }
 0x680   :  { %5140 = vmatpush1.bf16.msra.mxu0 %v5139_v24  ;;  %v4297_v24 = vld [vmem:[%s7333_s5 + $0x1f0] sm:$0xff] }
 0x681   :  { %5142 = vmatprep.subr.bf16.mxu0 %v5141_v48  ;;  %v4302_v48 = vld [vmem:[%s7333_s5 + $0x218] sm:$0xff]  ;;  %v5163_v38 = vpack.c.bf16 %v4297_v24, %v4295_v9  ;;  %v4331_v9 = vld [vmem:[%s7333_s5 + $0x300] sm:$0xff]  ;;  %v4333_v24 = vld [vmem:[%s7333_s5 + $0x310] sm:$0xff] }
 0x682   :  { %v5165_v43 = vpack.c.bf16 %v4302_v48, %v4300_v5  ;;  %v4336_v5 = vld [vmem:[%s7333_s5 + $0x328] sm:$0xff]  ;;  %v4338_v48 = vld [vmem:[%s7333_s5 + $0x338] sm:$0xff] }
 0x684   :  { %5144 = vmatpush1.bf16.msra.mxu0 %v5143_v50  ;;  %v4306_v50 = vld [vmem:[%s7333_s5 + $0x238] sm:$0xff] }
 0x685   :  { %5146 = vmatprep.subr.bf16.mxu0 %v5145_v56  ;;  %v5167_v56 = vpack.c.bf16 %v4301_v7, %v4299_v10  ;;  %v5169_v29 = vpack.c.bf16 %v4306_v50, %v4304_v13  ;;  %v4335_v10 = vld [vmem:[%s7333_s5 + $0x320] sm:$0xff]  ;;  %v4337_v7 = vld [vmem:[%s7333_s5 + $0x330] sm:$0xff]  ;;  %v3537_v50 = vld [vmem:[#allocation7] sm:$0x3] }
 0x686   :  { %v5203_v13 = vpack.c.bf16 %v4337_v7, %v4335_v10  ;;  %v3602_v10 = vld [vmem:[%s7333_s5 + $0x28] sm:$0xff]  ;;  %v3604_v7 = vld [vmem:[%s7333_s5 + $0x38] sm:$0xff] }
 0x688   :  { %5148 = vmatpush1.bf16.msra.mxu0 %v5147_v21  ;;  %v4307_v21 = vld [vmem:[%s7333_s5 + $0x240] sm:$0xff] }
 0x689   :  { %5150 = vmatprep.subr.bf16.mxu0 %v5149_v22  ;;  %v4309_v22 = vld [vmem:[%s7333_s5 + $0x250] sm:$0xff] }
 0x68a   :  { %v5175_v31 = vpack.c.bf16 %v4309_v22, %v4307_v21  ;;  %v4342_v21 = vld [vmem:[%s7333_s5 + $0x358] sm:$0xff] }
 0x68c   :  { %5152 = vmatpush1.bf16.msra.mxu0 %v5151_v46  ;;  %v4316_v46 = vld [vmem:[%s7333_s5 + $0x288] sm:$0xff] }
 0x68d   :  { %5154 = vmatprep.subr.bf16.mxu0 %v5153_v44  ;;  %v4318_v44 = vld [vmem:[%s7333_s5 + $0x298] sm:$0xff] }
 0x68e   :  { %v5181_v51 = vpack.c.bf16 %v4318_v44, %v4316_v46 }
 0x68f   :  { %3444 = vmatmul.mubr.f32.vlgmr.msra.gmra.mrb[16].mxu0 %v3358_v60  ;;  %v5185_v60 = vpack.c.bf16 %v4322_v11, %v4320_v36 }
 0x690   :  { %3449 = vmatprep.mubr.f32.mxu0 %v3368_v18  ;;  %5156 = vmatpush1.bf16.msra.mxu0 %v5155_v59  ;;  %v5183_v59 = vpack.c.bf16 %v4317_v58, %v4315_v42  ;;  %v4321_v18 = vld [vmem:[%s7333_s5 + $0x2b0] sm:$0xff]  ;;  %v4344_v42 = vld [vmem:[%s7333_s5 + $0x368] sm:$0xff]  ;;  %v4346_v58 = vld [vmem:[%s7333_s5 + $0x378] sm:$0xff] }
 0x693   :  { %3450 = vmatmul.mubr.f32.gmra.mrb[18].mxu0 %v3366_v25  ;;  %v5187_v25 = vpack.c.bf16 %v4321_v18, %v4319_v61  ;;  %v4345_v61 = vld [vmem:[%s7333_s5 + $0x370] sm:$0xff] }
 0x694   :  { %3520 = vmatprep.mubr.f32.mxu0 %v5583_v0 }
 0x697   :  { %4289 = vmatmul.mubr.msk.f32.vlgmr.msra.gmra.mrb[16].mxu0 %vm965_vm6, %v3364_v4  ;;  %v4325_v4 = vld [vmem:[%s7333_s5 + $0x2d0] sm:$0xff] }
 0x698   :  { %3526 = vmatprep.mubr.f32.mxu0 %v5583_v0  ;;  %v4293_v0 = vld [vmem:[%s7333_s5 + $0x1d0] sm:$0xff]  ;;  %v5191_v62 = vpack.c.bf16 %v4325_v4, %v4323_v45 }
 0x699   :  { %v5159_v53 = vpack.c.bf16 %v4293_v0, %v4291_v63  ;;  %v4329_v0 = vld [vmem:[%s7333_s5 + $0x2f0] sm:$0xff] }
 0x69b   :  { %4290 = vmatmul.mubr.msk.f32.gmra.mrb[18].mxu0 %vm965_vm6, %v3370_v55  ;;  %5160 = vmatpush1.bf16.msra.mxu1 %v5159_v53  ;;  %v4328_v55 = vld [vmem:[%s7333_s5 + $0x2e8] sm:$0xff]  ;;  %v5195_v53 = vpack.c.bf16 %v4329_v0, %v4327_v26 }
 0x69c   :  { %5162 = vmatprep.subr.bf16.mxu1 %v5161_v34  ;;  %v5193_v63 = vpack.c.bf16 %v4330_v16, %v4328_v55  ;;  %v5197_v34 = vpack.c.bf16 %v4334_v8, %v4332_v6  ;;  %v3598_v55 = vld [vmem:[%s7333_s5 + $0x8] sm:$0xff]  ;;  %v3600_v16 = vld [vmem:[%s7333_s5 + $0x18] sm:$0xff]  ;;  %v2069_v6 = vmax.f32 %v2051_v28, %v6599_v1  ;;  %v2070_v8 = vmax.f32 %v2052_v3, %v6603_v17 }
 0x69f   :  { %5164 = vmatpush1.bf16.msra.mxu1 %v5163_v38  ;;  %v5199_v38 = vpack.c.bf16 %v4333_v24, %v4331_v9 }
 0x6a0   :  { %5166 = vmatprep.subr.bf16.mxu1 %v5165_v43  ;;  %v5201_v43 = vpack.c.bf16 %v4338_v48, %v4336_v5  ;;  %v3597_v48 = vld [vmem:[%s7333_s5] sm:$0xff] }
 0x6a3   :  { %5168 = vmatpush1.bf16.msra.mxu1 %v5167_v56  ;;  %v3542_v56 = vrot.slane %v3537_v50, %v5783_v49 }
 0x6a4   :  { %5170 = vmatprep.subr.bf16.mxu1 %v5169_v29  ;;  %v3546_v29 = vrot.slane %v3537_v50, %v5790_v52 }
 0x6a7   :  { %5172 = vmatpush1.bf16.msra.mxu1 %v5171_v39 }
 0x6a8   :  { %5174 = vmatprep.subr.bf16.mxu1 %v5173_v14  ;;  %v4340_v14 = vld [vmem:[%s7333_s5 + $0x348] sm:$0xff] }
 0x6ab   :  { %5176 = vmatpush1.bf16.msra.mxu1 %v5175_v31  ;;  %v5205_v31 = vpack.c.bf16 %v4342_v21, %v4340_v14 }
 0x6ac   :  { %5178 = vmatprep.subr.bf16.mxu1 %v5177_v27  ;;  %v4339_v27 = vld [vmem:[%s7333_s5 + $0x340] sm:$0xff] }
 0x6ad   :  { %v5207_v44 = vpack.c.bf16 %v4341_v2, %v4339_v27  ;;  %v3608_v2 = vld [vmem:[%s7333_s5 + $0x58] sm:$0xff] }
 0x6af   :  { %5180 = vmatpush1.bf16.msra.mxu1 %v5179_v40 }
 0x6b0   :  { %5182 = vmatprep.subr.bf16.mxu1 %v5181_v51 }
 0x6b3   :  { %5184 = vmatpush1.bf16.msra.mxu1 %v5183_v59  ;;  %v5209_v59 = vpack.c.bf16 %v4346_v58, %v4344_v42  ;;  %v3605_v58 = vld [vmem:[%s7333_s5 + $0x40] sm:$0xff] }
 0x6b4   :  { %5186 = vmatprep.subr.bf16.mxu1 %v5185_v60  ;;  %v4343_v60 = vld [vmem:[%s7333_s5 + $0x360] sm:$0xff] }
 0x6b5   :  { %v5211_v33 = vpack.c.bf16 %v4345_v61, %v4343_v60  ;;  %v3612_v60 = vld [vmem:[%s7333_s5 + $0x78] sm:$0xff] }
 0x6b7   :  { %5188 = vmatpush1.bf16.msra.mxu1 %v5187_v25 }
 0x6b8   :  { %5190 = vmatprep.subr.bf16.mxu1 %v5189_v57 }
 0x6bb   :  { %5192 = vmatpush1.bf16.msra.mxu1 %v5191_v62 }
 0x6bc   :  { %5194 = vmatprep.subr.bf16.mxu1 %v5193_v63  ;;  %v5213_v63 = vpack.c.bf16 %v3600_v16, %v3598_v55  ;;  %v3613_v55 = vld [vmem:[%s7333_s5 + $0x80] sm:$0xff]  ;;  %v3615_v16 = vld [vmem:[%s7333_s5 + $0x90] sm:$0xff] }
 0x6bf   :  { %5196 = vmatpush1.bf16.msra.mxu1 %v5195_v53 }
 0x6c0   :  { %5198 = vmatprep.subr.bf16.mxu1 %v5197_v34 }
 0x6c3   :  { %5200 = vmatpush1.bf16.msra.mxu1 %v5199_v38 }
 0x6c4   :  { %5202 = vmatprep.subr.bf16.mxu1 %v5201_v43 }
 0x6c7   :  { %5204 = vmatpush1.bf16.msra.mxu1 %v5203_v13 }
 0x6c8   :  { %5206 = vmatprep.subr.bf16.mxu1 %v5205_v31 }
 0x6cb   :  { %5208 = vmatpush1.bf16.msra.mxu1 %v5207_v44 }
 0x6cc   :  { %5210 = vmatprep.subr.bf16.mxu1 %v5209_v59  ;;  %v3610_v59 = vld [vmem:[%s7333_s5 + $0x68] sm:$0xff] }
 0x6cf   :  { %5212 = vmatpush1.bf16.msra.mxu1 %v5211_v33  ;;  %v3611_v33 = vld [vmem:[%s7333_s5 + $0x70] sm:$0xff] }
 0x6d0   :  { %5214 = vmatprep.subr.bf16.mxu1 %v5213_v63  ;;  %v3620_v63 = vld [vmem:[%s7333_s5 + $0xb8] sm:$0xff] }
 0x76a   :  { %v3522_v15 = vpop.f32.mrb[16].mxu0 }
 0x76b   :  { %v3549_v19 = vadd.f32 %v3542_v56, %v3522_v15  ;;  %v3524_v20 = vpop.f32.mrb[17].mxu0 }
 0x76c   :  { %v3550_v54 = vadd.f32 %v3546_v29, %v3524_v20 }
 0x76d   :  { %v3553_v22 = vmax.f32 %v3549_v19, 0.0 }
 0x76e   :  { %v3528_v39 = vpop.f32.mrb[18].mxu0  ;;  %v3554_v41 = vmax.f32 %v3550_v54, 0.0 }
 0x76f   :  { %v3551_v23 = vadd.f32 %v3542_v56, %v3528_v39  ;;  %v3530_v30 = vpop.f32.mrb[19].mxu0  ;;  %v3561_v36 = vrot.slane %v3553_v22, 1  ;;  %v5215_v56 = vpack.c.bf16 %v3599_v32, %v3597_v48  ;;  %v3626_v48 = vld [vmem:[%s7333_s5 + $0xe8] sm:$0xff]  ;;  %v3628_v32 = vld [vmem:[%s7333_s5 + $0xf8] sm:$0xff] }
 0x770   :  { %v3552_v46 = vadd.f32 %v3546_v29, %v3530_v30  ;;  %v3564_v18 = vrot.slane %v3554_v41, 1  ;;  %v3603_v30 = vld [vmem:[%s7333_s5 + $0x30] sm:$0xff] }
 0x771   :  { %v3555_v40 = vmax.f32 %v3551_v23, 0.0  ;;  %v3601_v23 = vld [vmem:[%s7333_s5 + $0x20] sm:$0xff] }
 0x772   :  { %v3556_v51 = vmax.f32 %v3552_v46, 0.0  ;;  %v5219_v44 = vpack.c.bf16 %v3603_v30, %v3601_v23  ;;  %v3635_v23 = vld [vmem:[%s7333_s5 + $0x130] sm:$0xff]  ;;  %v3638_v30 = vld [vmem:[%s7333_s5 + $0x148] sm:$0xff] }
 0x773   :  { %v3562_v11 = vrot.slane %v3555_v40, 1 }
 0x774   :  { %v3565_v47 = vrot.slane %v3556_v51, 1 }
 0x775   :  { %v3573_v25 = vmax.f32 %v3555_v40, %v3562_v11  ;;  %v3563_v57 = vsel %vm113_vm1, %v3561_v36, %v3562_v11  ;;  %v3607_v36 = vld [vmem:[%s7333_s5 + $0x50] sm:$0xff] }
 0x776   :  { %v3566_v45 = vsel %vm113_vm1, %v3564_v18, %v3565_v47  ;;  %v3571_v4 = vmax.f32 %v3553_v22, %v3563_v57  ;;  %v3574_v0 = vmax.f32 %v3556_v51, %v3565_v47  ;;  %v5217_v22 = vpack.c.bf16 %v3604_v7, %v3602_v10  ;;  %v3609_v47 = vld [vmem:[%s7333_s5 + $0x60] sm:$0xff]  ;;  %v3616_v57 = vld [vmem:[%s7333_s5 + $0x98] sm:$0xff]  ;;  %v3627_v7 = vld [vmem:[%s7333_s5 + $0xf0] sm:$0xff] }
 0x777   :  { %v3572_v62 = vmax.f32 %v3554_v41, %v3566_v45  ;;  %v5223_v61 = vpack.c.bf16 %v3607_v36, %v3605_v58  ;;  %v5225_v18 = vpack.c.bf16 %v3612_v60, %v3610_v59  ;;  %v5227_v45 = vpack.c.bf16 %v3611_v33, %v3609_v47  ;;  %v3625_v10 = vld [vmem:[%s7333_s5 + $0xe0] sm:$0xff]  ;;  %v3643_v58 = vld [vmem:[%s7333_s5 + $0x170] sm:$0xff]  ;;  %v3646_v36 = vld [vmem:[%s7333_s5 + $0x188] sm:$0xff] }
 0x778   :  { %v5453_v26 = vpack.i.bf16 %v3573_v25, %v3571_v4  ;;  %v3650_v47 = vld [vmem:[%s7333_s5 + $0x1a8] sm:$0xff]  ;;  %v3652_v33 = vld [vmem:[%s7333_s5 + $0x1b8] sm:$0xff] }
 0x779   :  { %3581 = vrot.lane.b32.xlu0 %v3572_v62, %s5586_s19 }
 0x77a   :  { %5454 = vrot.lane.b32.xlu1 %v5453_v26, %s5586_s19  ;;  %v5231_v26 = vpack.c.bf16 %v3615_v16, %v3613_v55  ;;  %v4352_v55 = vld [vmem:[%s7333_s5 + $0x388] sm:$0xff]  ;;  %v4354_v16 = vld [vmem:[%s7333_s5 + $0x398] sm:$0xff] }
 0x77d   :  { %2075 = vrot.lane.b32.xlu0 %v6607_v37, %s5586_s19 }
 0x77e   :  { %3585 = vrot.lane.b32.xlu1 %v3574_v0, %s5586_s19 }
 0x781   :  { %2079 = vrot.lane.b32.xlu0 %v2069_v6, %s5586_s19 }
 0x782   :  { %2077 = vrot.lane.b32.xlu1 %v6611_v12, %s5586_s19 }
 0x786   :  { %2081 = vrot.lane.b32.xlu1 %v2070_v8, %s5586_s19 }
 0x7eb   :  { %v3582_v53 = vpop.permute.xlu0 %3581 }
 0x7ec   :  { %v5455_v34 = vpop.permute.xlu1 %5454  ;;  %v6913_v24 = vmax.f32 %v3572_v62, %v3582_v53  ;;  %v3618_v62 = vld [vmem:[%s7333_s5 + $0xa8] sm:$0xff] }
 0x7ed   :  { %v5456_v9 = vunpack.i.l.bf16 %v5455_v34  ;;  %v5457_v5 = vunpack.i.h.bf16 %v5455_v34  ;;  %v3624_v34 = vld [vmem:[%s7333_s5 + $0xd8] sm:$0xff] }
 0x7ee   :  { %v3716_v13 = vrot.slane %v6913_v24, 1 }
 0x7ef   :  { %v3587_v35 = vsel %vm784_vm5, %v5456_v9, %v3582_v53  ;;  %v2076_v38 = vpop.permute.xlu0 %2075  ;;  %v3622_v53 = vld [vmem:[%s7333_s5 + $0xc8] sm:$0xff] }
 0x7f0   :  { %v6916_v28 = vmax.f32 %v3571_v4, %v3587_v35  ;;  %v3586_v1 = vpop.permute.xlu1 %3585  ;;  %v3621_v35 = vld [vmem:[%s7333_s5 + $0xc0] sm:$0xff] }
 0x7f1   :  { %v3588_v3 = vsel %vm784_vm5, %v5457_v5, %v3586_v1  ;;  %v6925_v17 = vmax.f32 %v3574_v0, %v3586_v1  ;;  %v5233_v0 = vpack.c.bf16 %v3620_v63, %v3618_v62  ;;  %v5237_v5 = vpack.c.bf16 %v3624_v34, %v3622_v53  ;;  %v3623_v1 = vld [vmem:[%s7333_s5 + $0xd0] sm:$0xff] }
 0x7f2   :  { %v6927_v43 = vmax.f32 %v3573_v25, %v3588_v3  ;;  %v3713_v20 = vrot.slane %v6916_v28, 1  ;;  %v3939_v54 = vrot.slane %v6916_v28, 2  ;;  %v3614_v25 = vld [vmem:[%s7333_s5 + $0x88] sm:$0xff]  ;;  %v5239_v3 = vpack.c.bf16 %v3623_v1, %v3621_v35  ;;  %v4362_v1 = vld [vmem:[%s7333_s5 + $0x3d8] sm:$0xff] }
 0x7f3   :  { %v3717_v50 = vrot.slane %v6925_v17, 1  ;;  %v5229_v4 = vpack.c.bf16 %v3616_v57, %v3614_v25  ;;  %v5265_v57 = vpack.c.bf16 %v3652_v33, %v3650_v47  ;;  %v5269_v63 = vpack.c.bf16 %v4354_v16, %v4352_v55  ;;  %v4360_v35 = vld [vmem:[%s7333_s5 + $0x3c8] sm:$0xff]  ;;  %v4386_v47 = vld [vmem:[%s7333_s5 + $0x498] sm:$0xff] }
 0x7f4   :  { %v3714_v29 = vrot.slane %v6927_v43, 1  ;;  %v3940_v15 = vrot.slane %v6927_v43, 2  ;;  %v2078_v19 = vpop.permute.xlu1 %2077  ;;  %v4390_v55 = vld [vmem:[%s7333_s5 + $0x4b8] sm:$0xff] }
 0x7f5   :  { %v2083_v39 = vsel %vm784_vm5, %v2076_v38, %v2078_v19  ;;  %v2090_v14 = vmax.f32 %v6611_v12, %v2078_v19  ;;  %v3718_v21 = vsel %vm113_vm1, %v3716_v13, %v3717_v50  ;;  %v3606_v12 = vld [vmem:[%s7333_s5 + $0x48] sm:$0xff]  ;;  %v5241_v38 = vpack.c.bf16 %v3628_v32, %v3626_v48  ;;  %v3629_v19 = vld [vmem:[%s7333_s5 + $0x100] sm:$0xff] }
 0x7f6   :  { %v2089_v31 = vmax.f32 %v6607_v37, %v2083_v39  ;;  %4347 = vmatprep.mubr.msk.f32.mxu1 %vm1720_vm7, %v3718_v21  ;;  %v3715_v27 = vsel %vm113_vm1, %v3713_v20, %v3714_v29  ;;  %v6962_v41 = vsel %vm487_vm3, %v3939_v54, %v3940_v15  ;;  %v2080_v37 = vpop.permute.xlu0 %2079  ;;  %v5221_v42 = vpack.c.bf16 %v3608_v2, %v3606_v12  ;;  %v3630_v13 = vld [vmem:[%s7333_s5 + $0x108] sm:$0xff]  ;;  %v3631_v20 = vld [vmem:[%s7333_s5 + $0x110] sm:$0xff]  ;;  %v3636_v39 = vld [vmem:[%s7333_s5 + $0x138] sm:$0xff] }
 0x7f7   :  { %2095 = vst.msk [vmem:[%s7335_s7 + $0x8] sm:$0xff] %vm2094_vm8, %v2090_v14  ;;  %3790 = vmatmul.mubr.f32.vlgmr.msra.gmra.mrb[46].mxu1 %v3715_v27  ;;  %v3634_v54 = vld [vmem:[%s7333_s5 + $0x128] sm:$0xff]  ;;  %v5247_v14 = vpack.c.bf16 %v3631_v20, %v3629_v19  ;;  %v3637_v2 = vld [vmem:[%s7333_s5 + $0x140] sm:$0xff]  ;;  %v3943_v48 = vrot.slane %v6925_v17, 2  ;;  %v4365_v19 = vld [vmem:[%s7333_s5 + $0x3f0] sm:$0xff] }
 0x7f8   :  { %2093 = vst [vmem:[%s7335_s7] sm:$0xff] %v2089_v31  ;;  %5216 = vmatpush1.bf16.msra.mxu1 %v5215_v56  ;;  %4348 = vmatprep.mubr.msk.f32.mxu1 %vm1720_vm7, %v3717_v50  ;;  %v2082_v46 = vpop.permute.xlu1 %2081  ;;  %v3632_v50 = vld [vmem:[%s7333_s5 + $0x118] sm:$0xff]  ;;  %v5243_v56 = vpack.c.bf16 %v3627_v7, %v3625_v10  ;;  %v5249_v21 = vpack.c.bf16 %v3636_v39, %v3634_v54  ;;  %v4359_v10 = vld [vmem:[%s7333_s5 + $0x3c0] sm:$0xff]  ;;  %v4361_v7 = vld [vmem:[%s7333_s5 + $0x3d0] sm:$0xff] }
 0x7f9   :  { %v2084_v40 = vsel %vm784_vm5, %v2080_v37, %v2082_v46  ;;  %v2092_v51 = vmax.f32 %v2070_v8, %v2082_v46  ;;  %5218 = vmatprep.subr.bf16.mxu1 %v5217_v22  ;;  %v3619_v8 = vld [vmem:[%s7333_s5 + $0xb0] sm:$0xff]  ;;  %v3633_v22 = vld [vmem:[%s7333_s5 + $0x120] sm:$0xff]  ;;  %v3640_v31 = vld [vmem:[%s7333_s5 + $0x158] sm:$0xff] }
 0x7fa   :  { %v2091_v11 = vmax.f32 %v2069_v6, %v2084_v40  ;;  %v3617_v6 = vld [vmem:[%s7333_s5 + $0xa0] sm:$0xff]  ;;  %v5251_v27 = vpack.c.bf16 %v3635_v23, %v3633_v22  ;;  %v5253_v12 = vpack.c.bf16 %v3640_v31, %v3638_v30  ;;  %v3639_v37 = vld [vmem:[%s7333_s5 + $0x150] sm:$0xff]  ;;  %v3642_v46 = vld [vmem:[%s7333_s5 + $0x168] sm:$0xff] }
 0x7fb   :  { %2098 = vst.msk [vmem:[%s7335_s7 + $0x18] sm:$0x7] %vm2097_vm9, %v2092_v51  ;;  %3796 = vmatmul.mubr.f32.gmra.mrb[48].mxu1 %v3714_v29  ;;  %v5235_v9 = vpack.c.bf16 %v3619_v8, %v3617_v6  ;;  %v5245_v29 = vpack.c.bf16 %v3632_v50, %v3630_v13  ;;  %v5255_v40 = vpack.c.bf16 %v3639_v37, %v3637_v2  ;;  %v4356_v6 = vld [vmem:[%s7333_s5 + $0x3a8] sm:$0xff]  ;;  %v4358_v8 = vld [vmem:[%s7333_s5 + $0x3b8] sm:$0xff]  ;;  %v4369_v22 = vld [vmem:[%s7333_s5 + $0x410] sm:$0xff] }
 0x7fc   :  { %2096 = vst [vmem:[%s7335_s7 + $0x10] sm:$0x7] %v2091_v11  ;;  %5220 = vmatpush1.bf16.msra.mxu1 %v5219_v44  ;;  %4349 = vmatprep.mubr.msk.f32.mxu1 %vm1720_vm7, %v6913_v24  ;;  %v3644_v44 = vld [vmem:[%s7333_s5 + $0x178] sm:$0xff]  ;;  %v5273_v34 = vpack.c.bf16 %v4358_v8, %v4356_v6  ;;  %v5279_v50 = vpack.c.bf16 %v4361_v7, %v4359_v10  ;;  %v4368_v20 = vld [vmem:[%s7333_s5 + $0x408] sm:$0xff]  ;;  %v4373_v2 = vld [vmem:[%s7333_s5 + $0x430] sm:$0xff] }
 0x7fd   :  { %5222 = vmatprep.subr.bf16.mxu1 %v5221_v42  ;;  %v5257_v51 = vpack.c.bf16 %v3644_v44, %v3642_v46  ;;  %v3641_v42 = vld [vmem:[%s7333_s5 + $0x160] sm:$0xff]  ;;  %v3648_v11 = vld [vmem:[%s7333_s5 + $0x198] sm:$0xff]  ;;  %v4372_v23 = vld [vmem:[%s7333_s5 + $0x428] sm:$0xff] }
 0x7fe   :  { %v5259_v59 = vpack.c.bf16 %v3643_v58, %v3641_v42  ;;  %v5261_v60 = vpack.c.bf16 %v3648_v11, %v3646_v36  ;;  %v4366_v13 = vld [vmem:[%s7333_s5 + $0x3f8] sm:$0xff]  ;;  %v4376_v37 = vld [vmem:[%s7333_s5 + $0x448] sm:$0xff]  ;;  %v4377_v42 = vld [vmem:[%s7333_s5 + $0x450] sm:$0xff] }
 0x7ff   :  { %v4370_v54 = vld [vmem:[%s7333_s5 + $0x418] sm:$0xff]  ;;  %v4380_v58 = vld [vmem:[%s7333_s5 + $0x468] sm:$0xff] }
 0x800   :  { %5224 = vmatpush1.bf16.msra.mxu1 %v5223_v61  ;;  %v3645_v61 = vld [vmem:[%s7333_s5 + $0x180] sm:$0xff]  ;;  %v4374_v30 = vld [vmem:[%s7333_s5 + $0x438] sm:$0xff]  ;;  %v4400_v10 = vld [vmem:[%s7333_s5 + $0x508] sm:$0xff] }
 0x801   :  { %5226 = vmatprep.subr.bf16.mxu1 %v5225_v18  ;;  %v3647_v18 = vld [vmem:[%s7333_s5 + $0x190] sm:$0xff]  ;;  %v4378_v46 = vld [vmem:[%s7333_s5 + $0x458] sm:$0xff] }
 0x802   :  { %v5263_v25 = vpack.c.bf16 %v3647_v18, %v3645_v61  ;;  %v4382_v36 = vld [vmem:[%s7333_s5 + $0x478] sm:$0xff]  ;;  %v4381_v61 = vld [vmem:[%s7333_s5 + $0x470] sm:$0xff]  ;;  %v4384_v18 = vld [vmem:[%s7333_s5 + $0x488] sm:$0xff] }
 0x803   :  { %v4394_v6 = vld [vmem:[%s7333_s5 + $0x4d8] sm:$0xff] }
 0x804   :  { %5228 = vmatpush1.bf16.msra.mxu1 %v5227_v45  ;;  %v3649_v45 = vld [vmem:[%s7333_s5 + $0x1a0] sm:$0xff]  ;;  %v4402_v7 = vld [vmem:[%s7333_s5 + $0x518] sm:$0xff] }
 0x805   :  { %5230 = vmatprep.subr.bf16.mxu1 %v5229_v4  ;;  %v3651_v4 = vld [vmem:[%s7333_s5 + $0x1b0] sm:$0xff] }
 0x806   :  { %v5267_v62 = vpack.c.bf16 %v3651_v4, %v3649_v45  ;;  %v4385_v45 = vld [vmem:[%s7333_s5 + $0x490] sm:$0xff]  ;;  %v4388_v4 = vld [vmem:[%s7333_s5 + $0x4a8] sm:$0xff] }
 0x808   :  { %5232 = vmatpush1.bf16.msra.mxu1 %v5231_v26  ;;  %v4351_v26 = vld [vmem:[%s7333_s5 + $0x380] sm:$0xff] }
 0x809   :  { %5234 = vmatprep.subr.bf16.mxu1 %v5233_v0  ;;  %v4353_v0 = vld [vmem:[%s7333_s5 + $0x390] sm:$0xff] }
 0x80a   :  { %v5271_v53 = vpack.c.bf16 %v4353_v0, %v4351_v26  ;;  %v4389_v26 = vld [vmem:[%s7333_s5 + $0x4b0] sm:$0xff]  ;;  %v4392_v0 = vld [vmem:[%s7333_s5 + $0x4c8] sm:$0xff] }
 0x80c   :  { %5236 = vmatpush1.bf16.msra.mxu1 %v5235_v9  ;;  %v4355_v9 = vld [vmem:[%s7333_s5 + $0x3a0] sm:$0xff] }
 0x80d   :  { %5238 = vmatprep.subr.bf16.mxu1 %v5237_v5  ;;  %v4357_v5 = vld [vmem:[%s7333_s5 + $0x3b0] sm:$0xff] }
 0x80e   :  { %v5275_v32 = vpack.c.bf16 %v4357_v5, %v4355_v9  ;;  %v4393_v9 = vld [vmem:[%s7333_s5 + $0x4d0] sm:$0xff]  ;;  %v4396_v5 = vld [vmem:[%s7333_s5 + $0x4e8] sm:$0xff] }
 0x810   :  { %5240 = vmatpush1.bf16.msra.mxu1 %v5239_v3  ;;  %v3942_v3 = vrot.slane %v6913_v24, 2 }
 0x811   :  { %5242 = vmatprep.subr.bf16.mxu1 %v5241_v38  ;;  %v5277_v38 = vpack.c.bf16 %v4362_v1, %v4360_v35  ;;  %v4398_v35 = vld [vmem:[%s7333_s5 + $0x4f8] sm:$0xff] }
 0x812   :  { %v3944_v24 = vsel %vm487_vm3, %v3942_v3, %v3943_v48  ;;  %v4395_v3 = vld [vmem:[%s7333_s5 + $0x4e0] sm:$0xff] }
 0x814   :  { %5244 = vmatpush1.bf16.msra.mxu1 %v5243_v56 }
 0x815   :  { %5246 = vmatprep.subr.bf16.mxu1 %v5245_v29  ;;  %v4363_v29 = vld [vmem:[%s7333_s5 + $0x3e0] sm:$0xff] }
 0x816   :  { %v5283_v39 = vpack.c.bf16 %v4365_v19, %v4363_v29  ;;  %v4406_v29 = vld [vmem:[%s7333_s5 + $0x538] sm:$0xff] }
 0x818   :  { %5248 = vmatpush1.bf16.msra.mxu1 %v5247_v14  ;;  %v5285_v14 = vpack.c.bf16 %v4370_v54, %v4368_v20  ;;  %v4403_v54 = vld [vmem:[%s7333_s5 + $0x520] sm:$0xff] }
 0x819   :  { %5250 = vmatprep.subr.bf16.mxu1 %v5249_v21  ;;  %v4367_v21 = vld [vmem:[%s7333_s5 + $0x400] sm:$0xff] }
 0x81a   :  { %v5287_v31 = vpack.c.bf16 %v4369_v22, %v4367_v21  ;;  %v4032_v21 = vld [vmem:[#allocation9] sm:$0x3] }
 0x81b   :  { %v4037_v22 = vrot.slane %v4032_v21, %v5783_v49 }
 0x81c   :  { %5252 = vmatpush1.bf16.msra.mxu1 %v5251_v27  ;;  %v5289_v27 = vpack.c.bf16 %v4374_v30, %v4372_v23  ;;  %v4041_v23 = vrot.slane %v4032_v21, %v5790_v52 }
 0x81d   :  { %5254 = vmatprep.subr.bf16.mxu1 %v5253_v12  ;;  %v4371_v12 = vld [vmem:[%s7333_s5 + $0x420] sm:$0xff] }
 0x81e   :  { %v5291_v44 = vpack.c.bf16 %v4373_v2, %v4371_v12 }
 0x820   :  { %5256 = vmatpush1.bf16.msra.mxu1 %v5255_v40  ;;  %v5293_v40 = vpack.c.bf16 %v4378_v46, %v4376_v37 }
 0x821   :  { %5258 = vmatprep.subr.bf16.mxu1 %v5257_v51  ;;  %v4375_v51 = vld [vmem:[%s7333_s5 + $0x440] sm:$0xff] }
 0x822   :  { %v5295_v11 = vpack.c.bf16 %v4377_v42, %v4375_v51 }
 0x824   :  { %5260 = vmatpush1.bf16.msra.mxu1 %v5259_v59  ;;  %v5297_v59 = vpack.c.bf16 %v4382_v36, %v4380_v58 }
 0x825   :  { %5262 = vmatprep.subr.bf16.mxu1 %v5261_v60  ;;  %v4379_v60 = vld [vmem:[%s7333_s5 + $0x460] sm:$0xff] }
 0x826   :  { %v5299_v33 = vpack.c.bf16 %v4381_v61, %v4379_v60 }
 0x828   :  { %5264 = vmatpush1.bf16.msra.mxu1 %v5263_v25  ;;  %v5301_v25 = vpack.c.bf16 %v4386_v47, %v4384_v18 }
 0x829   :  { %5266 = vmatprep.subr.bf16.mxu1 %v5265_v57  ;;  %v4383_v57 = vld [vmem:[%s7333_s5 + $0x480] sm:$0xff] }
 0x82a   :  { %v5303_v16 = vpack.c.bf16 %v4385_v45, %v4383_v57 }
 0x82c   :  { %5268 = vmatpush1.bf16.msra.mxu1 %v5267_v62  ;;  %v5305_v62 = vpack.c.bf16 %v4390_v55, %v4388_v4 }
 0x82d   :  { %5270 = vmatprep.subr.bf16.mxu1 %v5269_v63  ;;  %v4387_v63 = vld [vmem:[%s7333_s5 + $0x4a0] sm:$0xff] }
 0x82e   :  { %v5307_v8 = vpack.c.bf16 %v4389_v26, %v4387_v63 }
 0x82f   :  { %3871 = vmatmul.mubr.f32.vlgmr.msra.gmra.mrb[46].mxu1 %v6916_v28  ;;  %v4364_v28 = vld [vmem:[%s7333_s5 + $0x3e8] sm:$0xff] }
 0x830   :  { %4350 = vmatprep.mubr.msk.f32.mxu1 %vm1720_vm7, %v6925_v17  ;;  %5272 = vmatpush1.bf16.msra.mxu1 %v5271_v53  ;;  %v5281_v56 = vpack.c.bf16 %v4366_v13, %v4364_v28  ;;  %v5309_v53 = vpack.c.bf16 %v4394_v6, %v4392_v0  ;;  %v5317_v13 = vpack.c.bf16 %v4402_v7, %v4400_v10 }
 0x831   :  { %5274 = vmatprep.subr.bf16.mxu1 %v5273_v34  ;;  %v4391_v34 = vld [vmem:[%s7333_s5 + $0x4c0] sm:$0xff] }
 0x832   :  { %v5311_v1 = vpack.c.bf16 %v4393_v9, %v4391_v34 }
 0x833   :  { %3877 = vmatmul.mubr.f32.gmra.mrb[48].mxu1 %v6927_v43 }
 0x834   :  { %5276 = vmatpush1.bf16.msra.mxu1 %v5275_v32  ;;  %4407 = vmatprep.mubr.msk.f32.mxu1 %vm1720_vm7, %v3944_v24  ;;  %v5313_v32 = vpack.c.bf16 %v4398_v35, %v4396_v5  ;;  %v4399_v24 = vld [vmem:[%s7333_s5 + $0x500] sm:$0xff] }
 0x835   :  { %5278 = vmatprep.subr.bf16.mxu1 %v5277_v38  ;;  %v4397_v38 = vld [vmem:[%s7333_s5 + $0x4f0] sm:$0xff] }
 0x836   :  { %v5315_v28 = vpack.c.bf16 %v4397_v38, %v4395_v3 }
 0x838   :  { %5280 = vmatpush1.bf16.msra.mxu1 %v5279_v50  ;;  %v4401_v50 = vld [vmem:[%s7333_s5 + $0x510] sm:$0xff] }
 0x839   :  { %5282 = vmatprep.subr.bf16.mxu1 %v5281_v56  ;;  %v4404_v56 = vld [vmem:[%s7333_s5 + $0x528] sm:$0xff]  ;;  %v5319_v19 = vpack.c.bf16 %v4401_v50, %v4399_v24 }
 0x83a   :  { %v5321_v20 = vpack.c.bf16 %v4406_v29, %v4404_v56 }
 0x83c   :  { %5284 = vmatpush1.bf16.msra.mxu1 %v5283_v39  ;;  %v4405_v39 = vld [vmem:[%s7333_s5 + $0x530] sm:$0xff] }
 0x83d   :  { %5286 = vmatprep.subr.bf16.mxu1 %v5285_v14  ;;  %v5323_v14 = vpack.c.bf16 %v4405_v39, %v4403_v54 }
 0x840   :  { %5288 = vmatpush1.bf16.msra.mxu1 %v5287_v31 }
 0x841   :  { %5290 = vmatprep.subr.bf16.mxu1 %v5289_v27 }
 0x844   :  { %5292 = vmatpush1.bf16.msra.mxu1 %v5291_v44 }
 0x845   :  { %5294 = vmatprep.subr.bf16.mxu1 %v5293_v40 }
 0x848   :  { %5296 = vmatpush1.bf16.msra.mxu1 %v5295_v11 }
 0x849   :  { %5298 = vmatprep.subr.bf16.mxu1 %v5297_v59 }
 0x84c   :  { %5300 = vmatpush1.bf16.msra.mxu1 %v5299_v33 }
 0x84d   :  { %5302 = vmatprep.subr.bf16.mxu1 %v5301_v25 }
 0x850   :  { %5304 = vmatpush1.bf16.msra.mxu1 %v5303_v16 }
 0x851   :  { %5306 = vmatprep.subr.bf16.mxu1 %v5305_v62 }
 0x854   :  { %5308 = vmatpush1.bf16.msra.mxu1 %v5307_v8 }
 0x855   :  { %5310 = vmatprep.subr.bf16.mxu1 %v5309_v53 }
 0x858   :  { %5312 = vmatpush1.bf16.msra.mxu1 %v5311_v1 }
 0x859   :  { %5314 = vmatprep.subr.bf16.mxu1 %v5313_v32 }
 0x85c   :  { %5316 = vmatpush1.bf16.msra.mxu1 %v5315_v28 }
 0x85d   :  { %5318 = vmatprep.subr.bf16.mxu1 %v5317_v13 }
 0x860   :  { %5320 = vmatpush1.bf16.msra.mxu1 %v5319_v19 }
 0x861   :  { %5322 = vmatprep.subr.bf16.mxu1 %v5321_v20 }
 0x864   :  { %5324 = vmatpush1.bf16.msra.mxu1 %v5323_v14 }
 0x867   :  { %4016 = vmatmul.mubr.f32.vlgmr.msra.gmra.mrb[46].mxu1 %v6962_v41 }
 0x868   :  { %4408 = vmatprep.mubr.msk.f32.mxu1 %vm1720_vm7, %v3943_v48 }
 0x86b   :  { %4022 = vmatmul.mubr.f32.gmra.mrb[48].mxu1 %v3940_v15 }
 0x93a   :  { %v4017_v30 = vpop.f32.mrb[46].mxu1 }
 0x93b   :  { %v4044_v31 = vadd.f32 %v4037_v22, %v4017_v30  ;;  %v4019_v27 = vpop.f32.mrb[47].mxu1 }
 0x93c   :  { %v4045_v12 = vadd.f32 %v4041_v23, %v4019_v27 }
 0x93d   :  { %v4048_v37 = vmax.f32 %v4044_v31, 0.0 }
 0x93e   :  { %v4023_v2 = vpop.f32.mrb[48].mxu1  ;;  %v4049_v44 = vmax.f32 %v4045_v12, 0.0 }
 0x93f   :  { %v4046_v46 = vadd.f32 %v4037_v22, %v4023_v2  ;;  %v4025_v41 = vpop.f32.mrb[49].mxu1  ;;  %v4056_v51 = vrot.slane %v4048_v37, 1 }
 0x940   :  { %v4047_v17 = vadd.f32 %v4041_v23, %v4025_v41  ;;  %v4059_v15 = vrot.slane %v4049_v44, 1 }
 0x941   :  { %v4050_v40 = vmax.f32 %v4046_v46, 0.0 }
 0x942   :  { %v4051_v48 = vmax.f32 %v4047_v17, 0.0 }
 0x943   :  { %v4057_v43 = vrot.slane %v4050_v40, 1 }
 0x944   :  { %v4060_v42 = vrot.slane %v4051_v48, 1 }
 0x945   :  { %v4058_v49 = vsel %vm113_vm1, %v4056_v51, %v4057_v43  ;;  %v4068_v11 = vmax.f32 %v4050_v40, %v4057_v43 }
 0x946   :  { %v4066_v58 = vmax.f32 %v4048_v37, %v4058_v49  ;;  %v4061_v52 = vsel %vm113_vm1, %v4059_v15, %v4060_v42  ;;  %v4069_v59 = vmax.f32 %v4051_v48, %v4060_v42 }
 0x947   :  { %v4067_v36 = vmax.f32 %v4049_v44, %v4061_v52 }
 0x948   :  { %4074 = vrot.lane.b32.xlu0 %v4066_v58, %s5586_s19 }
 0x949   :  { %4076 = vrot.lane.b32.xlu1 %v4067_v36, %s5586_s19 }
 0x94c   :  { %4078 = vrot.lane.b32.xlu0 %v4068_v11, %s5586_s19 }
 0x94d   :  { %4080 = vrot.lane.b32.xlu1 %v4069_v59, %s5586_s19 }
 0x9ba   :  { %v4075_v60 = vpop.permute.xlu0 %4074 }
 0x9bb   :  { %v4077_v61 = vpop.permute.xlu1 %4076 }
 0x9bc   :  { %v4082_v18 = vsel %vm784_vm5, %v4075_v60, %v4077_v61  ;;  %v4089_v47 = vmax.f32 %v4067_v36, %v4077_v61 }
 0x9bd   :  { %v4088_v33 = vmax.f32 %v4066_v58, %v4082_v18 }
 0x9be   :  { %4410 = vst.msk [vmem:[%s7335_s7 + $0x28] sm:$0xff] %vm2094_vm8, %v4089_v47  ;;  %v4079_v25 = vpop.permute.xlu0 %4078 }
 0x9bf   :  { %4409 = vst [vmem:[%s7335_s7 + $0x20] sm:$0xff] %v4088_v33  ;;  %v4081_v57 = vpop.permute.xlu1 %4080 }
 0x9c0   :  { %v4083_v45 = vsel %vm784_vm5, %v4079_v25, %v4081_v57  ;;  %v4091_v4 = vmax.f32 %v4069_v59, %v4081_v57 }
 0x9c1   :  { %v4090_v55 = vmax.f32 %v4068_v11, %v4083_v45 }
 0x9c2   :  { %4412 = vst.msk [vmem:[%s7335_s7 + $0x38] sm:$0x7] %vm2097_vm9, %v4091_v4 }
 0x9c3   :  { %4411 = vst [vmem:[%s7335_s7 + $0x30] sm:$0x7] %v4090_v55 }
 0x9c4   :  { %4101 = vsyncpa [#allocation3], 1 }
 0x9c5   :  { %4102 = vsyncpa [#allocation5], 1 }
 0x9c6   :  { %4103 = vsyncpa [#allocation8], 1 }

// kernel: cnn_forward.3
= control target key start
LH: loop header
LB: loop body
LE: loop exit
PB: predicated region body
PF: predicated region fallthrough
CT: control target
= control target key end

     0   :  { %s14467_s0 = inlined_call_operand.vmem [shape: f32[2,11,176], index: 0, kind: input, shape index: {}]   ;;  %s14468_s1 = inlined_call_operand.hbm [shape: bf16[11,176,2048], index: 1, kind: input, shape index: {}]   ;;  %s14469_s2 = inlined_call_operand.hbm [shape: f32[1,2048], index: 2, kind: input, shape index: {}]   ;;  %s14470_s3 = inlined_call_operand.hbm [shape: bf16[2048,1024], index: 3, kind: input, shape index: {}]   ;;  %s14471_s4 = inlined_call_operand.hbm [shape: f32[1,1024], index: 4, kind: input, shape index: {}]   ;;  %s14472_s5 = inlined_call_operand.hbm [shape: bf16[1024,512], index: 5, kind: input, shape index: {}]   ;;  %s14473_s6 = inlined_call_operand.hbm [shape: f32[1,512], index: 6, kind: input, shape index: {}]   ;;  %s14474_s7 = inlined_call_operand.hbm [shape: bf16[512,256], index: 7, kind: input, shape index: {}]   ;;  %s14475_s8 = inlined_call_operand.hbm [shape: f32[1,256], index: 8, kind: input, shape index: {}]   ;;  %s14476_s9 = inlined_call_operand.hbm [shape: bf16[256,128], index: 9, kind: input, shape index: {}]   ;;  %s14477_s10 = inlined_call_operand.hbm [shape: f32[1,128], index: 10, kind: input, shape index: {}]   ;;  %s14478_s11 = inlined_call_operand.hbm [shape: f32[2,128], index: 11, kind: output, shape index: {}]  }
   0x1   :  { %14497 = sst [smem:[#allocation33_spill]] %s14467_s0 }
   0x2   :  { %14498 = sst [smem:[#allocation34_spill]] %s14469_s2 }
   0x3   :  { %14499 = sst [smem:[#allocation35_spill]] %s14471_s4 }
   0x4   :  { %14500 = sst [smem:[#allocation36_spill]] %s14472_s5 }
   0x5   :  { %14501 = sst [smem:[#allocation37_spill]] %s14473_s6 }
   0x6   :  { %14502 = sst [smem:[#allocation38_spill]] %s14475_s8 }
   0x7   :  { %14503 = sst [smem:[#allocation39_spill]] %s14478_s11 }
   0x8   :  { %16 = vsyncpa [#allocation4], 0 }
   0x9   :  { %18 = vsyncpa [#allocation4 + $0x1], 0 }
   0xa   :  { %19 = vsyncpa [#allocation7], 0 }
   0xb   :  { %21 = vsyncpa [#allocation7 + $0x1], 0 }
   0xc   :  { %22 = vsyncpa [#allocation10], 0 }
   0xd   :  { %23 = vsyncpa [#allocation13], 0 }
   0xe   :  { %24 = vsyncpa [#allocation16], 0 }
   0xf   :  { %25 = vsyncpa [#allocation19], 0 }
  0x10   :  { %26 = vsyncpa [#allocation5], 0  ;;  %s12941_s17 = smov 0   ;;  %s12943_s18 = smov 0  }
  0x11   :  { %s12945_s19 = smov 0   ;;  %s12947_s20 = smov 0  }
  0x12   :  { %s12949_s21 = smov 0   ;;  %s12951_s22 = smov 0  }
  0x13 LB: > { %14504 = sst [smem:[#allocation28_spill]] %s12845_s19  ;;  %s12972_s23 = sadd.s32 4294967295, %s12857_s22   ;;  %s12857_s22 = sphi %s12951_s22, %s32_s22   ;;  %s12853_s21 = sphi %s12949_s21, %s14551_s21   ;;  %s12849_s20 = sphi %s12947_s20, %s14550_s20   ;;  %s12845_s19 = sphi %s12945_s19, %s14549_s19   ;;  %s12841_s18 = sphi %s12943_s18, %s14548_s18   ;;  %s12837_s17 = sphi %s12941_s17, %s14547_s17  }
  0x14   : > { %14505 = sst [smem:[#allocation29_spill]] %s12849_s20  ;;  %p9445_p0 = scmp.ge.s32.totalorder %s12857_s22, 1 }
  0x15   : > { %14506 = sst [smem:[#allocation30_spill]] %s12857_s22  ;;  %p14480_p1 = scmp.eq.s32.totalorder %s12972_s23, 0 }
  0x16   : > { %p326_p2 = scmp.lt.s32.totalorder %s12857_s22, 5  ;;  %s12859_s25 = smov [#allocation9]  }
  0x17   : > { %s349_s26 = sshll.u32 %s12859_s25, 4  ;;  %s12860_s27 = smov [#allocation12]   ;;  %s350_s26 = int_to_ptr.vmem [resolvable:$true] %s349_s26 }
  0x18   : > { %p12977_p3 = pnand %p9445_p0, %p326_p2  ;;  %s373_s28 = sshll.u32 %s12860_s27, 4  ;;  %s12989_s28 = int_to_ptr.vmem [resolvable:$true] %s373_s28 }
  0x19   : > { %s12861_s30 = smov [#allocation15]   ;;  %s14509_s4 = sld [smem:[#allocation35_spill]] }
  0x1a   : > { %s14507_s24 = scalar_select %p12977_p3, 1, 0 }
  0x1b   : > { %p11133_p4 = pneg %p12977_p3  ;;  %s397_s12 = sshll.u32 %s12861_s30, 4  ;;  %s12991_s12 = int_to_ptr.vmem [resolvable:$true] %s397_s12 }
  0x1d   : > { %p12985_p5 = pnand %p11133_p4, %p14480_p1 }
  0x1f   : > { %s14508_s29 = scalar_select %p12985_p5, 1, 0 }
  0x20   : > { %s12471_s15 = scalar_lea.hbm %s14509_s4, 128  ;;  %p13001_p7 = pneg %p12985_p5 }
  0x21   : > { %p12472_p6 = scmp.ne.s32.totalorder %s14509_s4, %s12471_s15  ;;  %p12478_p10 = scmp.lt.u32.totalorder %s12471_s15, %s14509_s4 }
  0x22   : > { %s14510_s27 = scalar_select %p13001_p7, 1, 0 }
  0x23   : > { %p12474_p8 = pnand %p13001_p7, %p12472_p6 }
  0x25   : > { %p12475_p9 = pneg %p12474_p8 }
  0x27   : > { %p12480_p11 = pnand %p12478_p10, %p12475_p9 }
  0x29   : > { %12483 = shalt.err (!%p12480_p11)
}
  0x2a   : > { %s12484_s13 = scalar_lea.vmem %s350_s26, 128  ;;  %p12492_p2 = scmp.lt.s32.totalorder %s350_s26, %s350_s26 }
  0x2b   : > { %p12485_p12 = scmp.ne.s32.totalorder %s350_s26, %s12484_s13  ;;  %p12493_p4 = scmp.lt.s32.totalorder %s12484_s13, %s12484_s13 }
  0x2d   : > { %p12487_p13 = pnand %p12485_p12, %p13001_p7  ;;  %p12494_p1 = por %p12493_p4, %p12492_p2 }
  0x2f   : > { %p12488_p0 = pneg %p12487_p13 }
  0x31   : > { %p12495_p3 = pnand %p12494_p1, %p12488_p0 }
  0x33   : > { %12498 = shalt.err (!%p12495_p3)
}
  0x34   : > { %11136 = dma.hbm_to_vmem [thread:$0]  (!%p12985_p5), %s14509_s4, 128, %s350_s26, [#allocation10]  }
  0x35   : > { %s14511_s6 = sld [smem:[#allocation37_spill]] }
  0x3b   : > { %s12499_s25 = scalar_lea.hbm %s14511_s6, 64 }
  0x3c   : > { %p12500_p6 = scmp.ne.s32.totalorder %s14511_s6, %s12499_s25  ;;  %p12506_p1 = scmp.lt.u32.totalorder %s12499_s25, %s14511_s6 }
  0x3e   : > { %p12502_p8 = pnand %p12500_p6, %p13001_p7 }
  0x40   : > { %p12503_p9 = pneg %p12502_p8 }
  0x42   : > { %p12508_p3 = pnand %p12506_p1, %p12503_p9 }
  0x44   : > { %12511 = shalt.err (!%p12508_p3)
}
  0x45   : > { %s12512_s26 = scalar_lea.vmem %s12989_s28, 64  ;;  %p12520_p13 = scmp.lt.s32.totalorder %s12989_s28, %s12989_s28 }
  0x46   : > { %p12513_p10 = scmp.ne.s32.totalorder %s12989_s28, %s12512_s26  ;;  %p12521_p0 = scmp.lt.s32.totalorder %s12512_s26, %s12512_s26 }
  0x48   : > { %p12515_p11 = pnand %p12513_p10, %p13001_p7  ;;  %p12522_p2 = por %p12521_p0, %p12520_p13 }
  0x4a   : > { %p12516_p12 = pneg %p12515_p11 }
  0x4c   : > { %p12523_p4 = pnand %p12522_p2, %p12516_p12 }
  0x4e   : > { %12526 = shalt.err (!%p12523_p4)
}
  0x4f   : > { %11142 = dma.hbm_to_vmem [thread:$0]  (!%p12985_p5), %s14511_s6, 64, %s12989_s28, [#allocation13]  }
  0x50   : > { %s14512_s8 = sld [smem:[#allocation38_spill]] }
  0x56   : > { %s12527_s11 = scalar_lea.hbm %s14512_s8, 32 }
  0x57   : > { %p12528_p6 = scmp.ne.s32.totalorder %s14512_s8, %s12527_s11  ;;  %p12534_p1 = scmp.lt.u32.totalorder %s12527_s11, %s14512_s8 }
  0x59   : > { %p12530_p8 = pnand %p12528_p6, %p13001_p7 }
  0x5b   : > { %p12531_p9 = pneg %p12530_p8 }
  0x5d   : > { %p12536_p3 = pnand %p12534_p1, %p12531_p9 }
  0x5f   : > { %12539 = shalt.err (!%p12536_p3)
}
  0x60   : > { %s12540_s28 = scalar_lea.vmem %s12991_s12, 32  ;;  %p12548_p13 = scmp.lt.s32.totalorder %s12991_s12, %s12991_s12 }
  0x61   : > { %p12541_p10 = scmp.ne.s32.totalorder %s12991_s12, %s12540_s28  ;;  %p12549_p0 = scmp.lt.s32.totalorder %s12540_s28, %s12540_s28 }
  0x63   : > { %p12543_p11 = pnand %p12541_p10, %p13001_p7  ;;  %p12550_p2 = por %p12549_p0, %p12548_p13 }
  0x65   : > { %p12544_p12 = pneg %p12543_p11 }
  0x67   : > { %p12551_p4 = pnand %p12550_p2, %p12544_p12 }
  0x69   : > { %12554 = shalt.err (!%p12551_p4)
}
  0x6a   : > { %11148 = dma.hbm_to_vmem [thread:$0]  (!%p12985_p5), %s14512_s8, 32, %s12991_s12, [#allocation16]  }
  0x6b   : > { %s41_s20 = sadd.s32 1, %s12853_s21  ;;  %s77_s14 = sadd.s32 1, %s12845_s19 }
  0x6c   : > { %p42_p6 = scmp.ge.s32.totalorder %s41_s20, 4  ;;  %p84_p8 = scmp.ne.s32.totalorder %s12845_s19, %s12841_s18 }
  0x6d   : > { %p85_p9 = scmp.eq.s32.totalorder %s12857_s22, 0  ;;  %p90_p3 = scmp.ne.s32.totalorder %s12841_s18, %s12837_s17 }
  0x6e   : > { %s14553_s20 = smov (%p42_p6, %s41_s20), 0  ;;  %p11172_p10 = scmp.lt.s32.totalorder %s12857_s22, 4 }
  0x6f   : > { %14513 = sst [smem:[#allocation31_spill]] %s14553_s20  ;;  %p86_p1 = por %p85_p9, %p84_p8 }
  0x70   : > { %s74_s16 = ssub.s32 %s12853_s21, %s14553_s20  ;;  %p14514_p12 = scmp.eq.s32.totalorder %s12972_s23, 0 }
  0x71   : > { %p75_p11 = scmp.eq.s32.totalorder %s74_s16, 0  ;;  %s13082_s12 = sand.u32 1, %s12845_s19  }
  0x72   : > { %p13077_p13 = por %p14514_p12, %p90_p3  ;;  %p13084_p0 = pnand %p11172_p10, %p86_p1 }
  0x73   : > { %s13089_s25 = scalar_select %p75_p11, %s12845_s19, %s77_s14  }
  0x74   : > { %s14515_s11 = scalar_select %p13077_p13, 1, 0 }
  0x75   : > { %s14516_s15 = scalar_select %p13084_p0, 1, 0 }
  0x76   : > { %14517 = sst [smem:[#allocation32_spill]] %s13089_s25  ;;  %s453_s30 = sand.u32 1, %s12857_s22  }
  0x77   : > { %s9457_s13 = sshll.u32 %s13082_s12, 2  ;;  %s11020_s28 = sshll.u32 %s12853_s21, 6 }
  0x78   : > { %s457_s26 = scalar_lea.vmem [#allocation6], %s9457_s13  ;;  %s14518_s2 = sld [smem:[#allocation34_spill]] }
  0x79   : > { %s465_s0 = sshll.u32 %s457_s26, 4  ;;  %s13102_s8 = scalar_lea.sflag [#allocation7], %s453_s30  ;;  %s13100_s0 = int_to_ptr.vmem [resolvable:$true] %s465_s0 }
  0x7a   : > { %p13108_p4 = pneg %p13084_p0 }
  0x7c   : > { %s14519_s17 = scalar_select %p13108_p4, 1, 0 }
  0x7e   : > { %s13098_s6 = scalar_lea.hbm %s14518_s2, %s11020_s28  ;;  %s12560_s28 = scalar_lea.hbm %s14518_s2, 256 }
  0x7f   : > { %s12555_s14 = scalar_lea.hbm %s13098_s6, 64  ;;  %p12561_p9 = scmp.lt.u32.totalorder %s13098_s6, %s14518_s2 }
  0x80   : > { %p12556_p2 = scmp.ne.s32.totalorder %s13098_s6, %s12555_s14  ;;  %p12562_p1 = scmp.lt.u32.totalorder %s12560_s28, %s12555_s14 }
  0x81   : > { %p12564_p10 = scmp.lt.u32.totalorder %s12555_s14, %s13098_s6 }
  0x82   : > { %p12558_p6 = pnand %p13108_p4, %p12556_p2  ;;  %p12563_p3 = por %p12562_p1, %p12561_p9 }
  0x84   : > { %p12559_p8 = pneg %p12558_p6  ;;  %p12565_p11 = por %p12564_p10, %p12563_p3 }
  0x86   : > { %p12566_p12 = pnand %p12565_p11, %p12559_p8 }
  0x88   : > { %12569 = shalt.err (!%p12566_p12)
}
  0x89   : > { %s12570_s30 = scalar_lea.vmem %s13100_s0, 64  ;;  %s12862_s4 = smov [#allocation6]  }
  0x8a   : > { %p12571_p2 = scmp.ne.s32.totalorder %s13100_s0, %s12570_s30  ;;  %s12575_s13 = sshll.u32 %s12862_s4, 4  ;;  %s12576_s13 = int_to_ptr.vmem [resolvable:$false] %s12575_s13 }
  0x8b   : > { %s12577_s26 = scalar_lea.vmem %s12576_s13, 128  ;;  %p12578_p5 = scmp.lt.s32.totalorder %s13100_s0, %s12576_s13 }
  0x8c   : > { %p12573_p6 = pnand %p12571_p2, %p13108_p4  ;;  %p12579_p7 = scmp.lt.s32.totalorder %s12577_s26, %s12570_s30 }
  0x8e   : > { %p12574_p13 = pneg %p12573_p6  ;;  %p12580_p9 = por %p12579_p7, %p12578_p5 }
  0x90   : > { %p12581_p1 = pnand %p12580_p9, %p12574_p13 }
  0x92   : > { %12584 = shalt.err (!%p12581_p1)
}
  0x93   : > { %11161 = dma.hbm_to_vmem [thread:$0]  (!%p13084_p0), %s13098_s6, 64, %s13100_s0, %s13102_s8  }
  0x94   : > { %s12863_s28 = smov [#allocation11]   ;;  %s14520_s5 = sld [smem:[#allocation36_spill]] }
  0x95   : > { %s359_s16 = sshll.u32 %s12863_s28, 4  ;;  %p14521_p7 = scmp.ne.s32.totalorder %s14510_s27, 0  ;;  %s360_s16 = int_to_ptr.vmem [resolvable:$true] %s359_s16 }
  0x9a   : > { %s12585_s13 = scalar_lea.hbm %s14520_s5, 32768 }
  0x9b   : > { %p12586_p5 = scmp.ne.s32.totalorder %s14520_s5, %s12585_s13  ;;  %p12592_p3 = scmp.lt.u32.totalorder %s12585_s13, %s14520_s5 }
  0x9d   : > { %p12588_p13 = pnand %p12586_p5, %p14521_p7 }
  0x9f   : > { %p12589_p8 = pneg %p12588_p13 }
  0xa1   : > { %p12594_p10 = pnand %p12592_p3, %p12589_p8 }
  0xa3   : > { %12597 = shalt.err (!%p12594_p10)
}
  0xa4   : > { %s12598_s6 = scalar_lea.vmem %s360_s16, 32768  ;;  %p12606_p6 = scmp.lt.s32.totalorder %s360_s16, %s360_s16 }
  0xa5   : > { %p12599_p11 = scmp.ne.s32.totalorder %s360_s16, %s12598_s6  ;;  %p12607_p9 = scmp.lt.s32.totalorder %s12598_s6, %s12598_s6 }
  0xa7   : > { %p12601_p12 = pnand %p12599_p11, %p14521_p7  ;;  %p12608_p1 = por %p12607_p9, %p12606_p6 }
  0xa9   : > { %p12602_p2 = pneg %p12601_p12 }
  0xab   : > { %p12609_p0 = pnand %p12608_p1, %p12602_p2 }
  0xad   : > { %12612 = shalt.err (!%p12609_p0)
}
  0xae   : > { %s14495_s2 = smov 256   ;;  %s14496_s0 = smov 16  }
  0xaf   : > { %p14522_p5 = scmp.ne.s32.totalorder %s14508_s29, 0  ;;  %s12866_s28 = smov [#allocation14]  }
  0xb0   : > { %s383_s4 = sshll.u32 %s12866_s28, 4  ;;  %s12613_s26 = scalar_lea.hbm %s14474_s7, 8192  ;;  %s384_s4 = int_to_ptr.vmem [resolvable:$true] %s383_s4 }
  0xb1   : > { %11139 = dma.hbm_to_vmem [thread:$0]  (!%p14522_p5), %s14520_s5, 32768, %s360_s16, [#allocation10], %s14495_s2, %s14495_s2, %s14496_s0  }
  0xb2   : > { %p12614_p0 = scmp.ne.s32.totalorder %s14474_s7, %s12613_s26  ;;  %p12620_p3 = scmp.lt.u32.totalorder %s12613_s26, %s14474_s7 }
  0xb4   : > { %p12616_p13 = pnand %p12614_p0, %p14521_p7 }
  0xb6   : > { %p12617_p8 = pneg %p12616_p13 }
  0xb8   : > { %p12622_p10 = pnand %p12620_p3, %p12617_p8 }
  0xba   : > { %12625 = shalt.err (!%p12622_p10)
}
  0xbb   : > { %s12626_s16 = scalar_lea.vmem %s384_s4, 8192  ;;  %p12634_p6 = scmp.lt.s32.totalorder %s384_s4, %s384_s4 }
  0xbc   : > { %p12627_p11 = scmp.ne.s32.totalorder %s384_s4, %s12626_s16  ;;  %p12635_p9 = scmp.lt.s32.totalorder %s12626_s16, %s12626_s16 }
  0xbe   : > { %p12629_p12 = pnand %p12627_p11, %p14521_p7  ;;  %p12636_p1 = por %p12635_p9, %p12634_p6 }
  0xc0   : > { %p12630_p2 = pneg %p12629_p12 }
  0xc2   : > { %p12637_p4 = pnand %p12636_p1, %p12630_p2 }
  0xc4   : > { %12640 = shalt.err (!%p12637_p4)
}
  0xc5   : > { %s12867_s14 = smov 128   ;;  %s12868_s20 = smov 8  }
  0xc6   : > { %11145 = dma.hbm_to_vmem [thread:$0]  (!%p14522_p5), %s14474_s7, 8192, %s384_s4, [#allocation13], %s12867_s14, %s12867_s14, %s12868_s20  }
  0xc7   : > { %s12869_s25 = smov [#allocation17]   ;;  %s12641_s26 = scalar_lea.hbm %s14476_s9, 2048 }
  0xc8   : > { %s407_s28 = sshll.u32 %s12869_s25, 4  ;;  %p12642_p4 = scmp.ne.s32.totalorder %s14476_s9, %s12641_s26  ;;  %s408_s28 = int_to_ptr.vmem [resolvable:$true] %s407_s28 }
  0xc9   : > { %p12648_p8 = scmp.lt.u32.totalorder %s12641_s26, %s14476_s9 }
  0xca   : > { %p12644_p0 = pnand %p12642_p4, %p14521_p7 }
  0xcc   : > { %p12645_p13 = pneg %p12644_p0 }
  0xce   : > { %p12650_p3 = pnand %p12648_p8, %p12645_p13 }
  0xd0   : > { %12653 = shalt.err (!%p12650_p3)
}
  0xd1   : > { %s12654_s4 = scalar_lea.vmem %s408_s28, 2048  ;;  %p12662_p2 = scmp.lt.s32.totalorder %s408_s28, %s408_s28 }
  0xd2   : > { %p12655_p10 = scmp.ne.s32.totalorder %s408_s28, %s12654_s4  ;;  %p12663_p6 = scmp.lt.s32.totalorder %s12654_s4, %s12654_s4 }
  0xd4   : > { %p12657_p11 = pnand %p12655_p10, %p14521_p7  ;;  %p12664_p9 = por %p12663_p6, %p12662_p2 }
  0xd6   : > { %p12658_p12 = pneg %p12657_p11 }
  0xd8   : > { %p12665_p1 = pnand %p12664_p9, %p12658_p12 }
  0xda   : > { %12668 = shalt.err (!%p12665_p1)
}
  0xdb   : > { %s12870_s14 = smov 64   ;;  %s12871_s20 = smov 4  }
  0xdc   : > { %11151 = dma.hbm_to_vmem [thread:$0]  (!%p14522_p5), %s14476_s9, 2048, %s408_s28, [#allocation16], %s12870_s14, %s12870_s14, %s12871_s20  }
  0xdd   : > { %s12872_s19 = smov [#allocation18]   ;;  %s11019_s25 = sshll.u32 %s12853_s21, 8 }
  0xde   : > { %s421_s22 = sshll.u32 %s12872_s19, 4  ;;  %s12669_s26 = scalar_lea.hbm %s14477_s10, 16  ;;  %s422_s22 = int_to_ptr.vmem [resolvable:$true] %s421_s22 }
  0xdf   : > { %p12670_p4 = scmp.ne.s32.totalorder %s14477_s10, %s12669_s26  ;;  %p12676_p8 = scmp.lt.u32.totalorder %s12669_s26, %s14477_s10 }
  0xe1   : > { %p12672_p0 = pnand %p12670_p4, %p14521_p7 }
  0xe3   : > { %p12673_p13 = pneg %p12672_p0 }
  0xe5   : > { %p12678_p3 = pnand %p12676_p8, %p12673_p13 }
  0xe7   : > { %12681 = shalt.err (!%p12678_p3)
}
  0xe8   : > { %s12682_s28 = scalar_lea.vmem %s422_s22, 16  ;;  %s12689_s14 = scalar_lea.vmem %s422_s22, 32 }
  0xe9   : > { %p12683_p10 = scmp.ne.s32.totalorder %s422_s22, %s12682_s28  ;;  %p12690_p2 = scmp.lt.s32.totalorder %s422_s22, %s422_s22 }
  0xea   : > { %p12691_p6 = scmp.lt.s32.totalorder %s12689_s14, %s12682_s28 }
  0xeb   : > { %p12685_p11 = pnand %p12683_p10, %p14521_p7 }
  0xec   : > { %p12692_p9 = por %p12691_p6, %p12690_p2 }
  0xed   : > { %p12686_p12 = pneg %p12685_p11 }
  0xef   : > { %p12693_p1 = pnand %p12692_p9, %p12686_p12 }
  0xf1   : > { %12696 = shalt.err (!%p12693_p1)
}
  0xf2   : > { %11154 = dma.hbm_to_vmem [thread:$0]  (!%p14522_p5), %s14477_s10, 16, %s422_s22, [#allocation19]  }
  0xf3   : > { %s13212_s27 = scalar_lea.hbm %s14468_s1, %s11019_s25  ;;  %s14523_s19 = smul.u32 3872, %s13082_s12 }
  0xf4   : > { %s433_s29 = scalar_lea.sflag [#allocation4], %s13082_s12  ;;  %s12697_s26 = scalar_lea.hbm %s13212_s27, 61952 }
  0xf5   : > { %s436_s13 = scalar_lea.vmem [#allocation3], %s14523_s19  ;;  %p12698_p7 = scmp.ne.s32.totalorder %s13212_s27, %s12697_s26 }
  0xf6   : > { %s443_s30 = sshll.u32 %s436_s13, 4  ;;  %p14524_p4 = scmp.ne.s32.totalorder %s14519_s17, 0  ;;  %s13216_s30 = int_to_ptr.vmem [resolvable:$true] %s443_s30 }
  0xf7   : > { %s12702_s25 = scalar_lea.hbm %s14468_s1, 247808  ;;  %p12703_p13 = scmp.lt.u32.totalorder %s13212_s27, %s14468_s1 }
  0xf8   : > { %p12700_p0 = pnand %p12698_p7, %p14524_p4  ;;  %p12704_p8 = scmp.lt.u32.totalorder %s12702_s25, %s12697_s26 }
  0xf9   : > { %p12706_p10 = scmp.lt.u32.totalorder %s12697_s26, %s13212_s27 }
  0xfa   : > { %p12701_p5 = pneg %p12700_p0  ;;  %p12705_p3 = por %p12704_p8, %p12703_p13 }
  0xfc   : > { %p12707_p11 = por %p12706_p10, %p12705_p3 }
  0xfe   : > { %p12708_p12 = pnand %p12707_p11, %p12701_p5 }
 0x100   : > { %12711 = shalt.err (!%p12708_p12)
}
 0x101   : > { %s12712_s28 = scalar_lea.vmem %s13216_s30, 61952  ;;  %s12873_s14 = smov [#allocation3]  }
 0x102   : > { %p12713_p2 = scmp.ne.s32.totalorder %s13216_s30, %s12712_s28  ;;  %s12717_s20 = sshll.u32 %s12873_s14, 4  ;;  %s12718_s20 = int_to_ptr.vmem [resolvable:$false] %s12717_s20 }
 0x103   : > { %s12719_s2 = scalar_lea.vmem %s12718_s20, 123904  ;;  %p12720_p1 = scmp.lt.s32.totalorder %s13216_s30, %s12718_s20 }
 0x104   : > { %p12715_p6 = pnand %p12713_p2, %p14524_p4  ;;  %p12721_p7 = scmp.lt.s32.totalorder %s12719_s2, %s12712_s28 }
 0x106   : > { %p12716_p9 = pneg %p12715_p6  ;;  %p12722_p0 = por %p12721_p7, %p12720_p1 }
 0x108   : > { %p12723_p13 = pnand %p12722_p0, %p12716_p9 }
 0x10a   : > { %12726 = shalt.err (!%p12723_p13)
}
 0x10b   : > { %s12874_s5 = smov 1024   ;;  %p14525_p5 = scmp.ne.s32.totalorder %s14516_s15, 0 }
 0x10c   : > { %s14526_s0 = smov 16   ;;  %s14527_s19 = smov 256  }
 0x10d   : > { %11158 = dma.hbm_to_vmem [thread:$0]  (!%p14525_p5), %s13212_s27, 61952, %s13216_s30, %s433_s29, %s12874_s5, %s14527_s19, %s14526_s0  }
 0x10e   : > { %s11022_s13 = sshll.u32 %s12853_s21, 15  ;;  %s14528_s25 = sshll.u32 %s13082_s12, 11 }
 0x10f   : > { %s13248_s6 = scalar_lea.hbm %s14470_s3, %s11022_s13  ;;  %s476_s16 = scalar_lea.vmem [#allocation8], %s14528_s25 }
 0x110   : > { %s484_s4 = sshll.u32 %s476_s16, 4  ;;  %s12727_s28 = scalar_lea.hbm %s13248_s6, 32768  ;;  %s13252_s4 = int_to_ptr.vmem [resolvable:$true] %s484_s4 }
 0x111   : > { %p12728_p8 = scmp.ne.s32.totalorder %s13248_s6, %s12727_s28  ;;  %s12732_s29 = scalar_lea.hbm %s14470_s3, 131072 }
 0x112   : > { %p12733_p11 = scmp.lt.u32.totalorder %s13248_s6, %s14470_s3  ;;  %p12734_p12 = scmp.lt.u32.totalorder %s12732_s29, %s12727_s28 }
 0x113   : > { %p12730_p3 = pnand %p12728_p8, %p14524_p4  ;;  %p12736_p6 = scmp.lt.u32.totalorder %s12727_s28, %s13248_s6 }
 0x114   : > { %p12735_p2 = por %p12734_p12, %p12733_p11 }
 0x115   : > { %p12731_p10 = pneg %p12730_p3 }
 0x116   : > { %p12737_p9 = por %p12736_p6, %p12735_p2 }
 0x118   : > { %p12738_p1 = pnand %p12737_p9, %p12731_p10 }
 0x11a   : > { %12741 = shalt.err (!%p12738_p1)
}
 0x11b   : > { %s12742_s12 = scalar_lea.vmem %s13252_s4, 32768  ;;  %s12875_s2 = smov [#allocation8]  }
 0x11c   : > { %p12743_p7 = scmp.ne.s32.totalorder %s13252_s4, %s12742_s12  ;;  %s12747_s5 = sshll.u32 %s12875_s2, 4  ;;  %s12748_s5 = int_to_ptr.vmem [resolvable:$false] %s12747_s5 }
 0x11d   : > { %s12749_s0 = scalar_lea.vmem %s12748_s5, 65536  ;;  %p12750_p8 = scmp.lt.s32.totalorder %s13252_s4, %s12748_s5 }
 0x11e   : > { %p12745_p0 = pnand %p12743_p7, %p14524_p4  ;;  %p12751_p3 = scmp.lt.s32.totalorder %s12749_s0, %s12742_s12 }
 0x120   : > { %p12746_p13 = pneg %p12745_p0  ;;  %p12752_p11 = por %p12751_p3, %p12750_p8 }
 0x122   : > { %p12753_p12 = pnand %p12752_p11, %p12746_p13 }
 0x124   : > { %12756 = shalt.err (!%p12753_p12)
}
 0x125   : > { %s12876_s19 = smov 512   ;;  %s12877_s13 = smov 32  }
 0x126   : > { %11164 = dma.hbm_to_vmem [thread:$0]  (!%p14525_p5), %s13248_s6, 32768, %s13252_s4, %s13102_s8, %s12876_s19, %s12876_s19, %s12877_s13  }
 0x127   : > { %p14529_p4 = scmp.ne.s32.totalorder %s14507_s24, 0 }
 0x128   : > { %s498_s17 = sand.u32 (!%p14529_p4), 1, %s12841_s18   ;;  %p14530_p10 = scmp.ne.s32.totalorder (!%p14529_p4), %s14515_s11, 0 }
 0x129   : > { %496 = sbr.rel (%p14529_p4) target bundleno = 2418 (0x972), region = 64  ;;  %s499_s22 = scalar_lea.sflag (!%p14529_p4), [#allocation4], %s498_s17 }
 0x12a   : > { %s11094_s26 = smul.u32 (!%p14529_p4), 3872, %s498_s17 }
 0x12c   : > { %s13279_s25 = scalar_lea.vmem (!%p14529_p4), [#allocation3], %s11094_s26 }
 0x130   : > { %12808 = dma.done.wait (%p14530_p10), %s499_s22, 61952  }
 0x131   : > { %12810 = vsyncadd (%p14530_p10), %s499_s22, 4294905344  ;;  %s507_s16 = sand.u32 1, %s12972_s23   ;;  %s9465_s15 = sshll.u32 %s498_s17, 2 }
 0x132   : > { %s508_s8 = scalar_lea.sflag [#allocation7], %s507_s16  ;;  %s13286_s6 = scalar_lea.vmem [#allocation6], %s9465_s15 }
 0x133   : > { %12812 = dma.done.wait (%p14530_p10), %s508_s8, 32832  }
 0x134   : > { %12814 = vsyncadd (%p14530_p10), %s508_s8, 4294934464  ;;  %s9466_s24 = sshll.u32 %s498_s17, 11  ;;  %p14531_p5 = scmp.eq.s32.totalorder %s12972_s23, 0 }
 0x135   : > { %s13292_s4 = scalar_lea.vmem [#allocation8], %s9466_s24 }
 0x136   : > { %12816 = dma.done.wait (%p14531_p5), [#allocation10], 32896   ;;  %p14532_p2 = pmov %p14531_p5 }
 0x138   : > { %12818 = vsyncadd (%p14532_p2), [#allocation10], 4294934400  ;;  %p14533_p6 = pmov %p14532_p2 }
 0x139   : > { %p14534_p9 = pmov %p14532_p2 }
 0x13a   : > { %12820 = dma.done.wait (%p14533_p6), [#allocation13], 8256  }
 0x13b   : > { %12822 = vsyncadd (%p14534_p9), [#allocation13], 4294959040  ;;  %p14535_p1 = pmov %p14532_p2 }
 0x13d   : > { %12824 = dma.done.wait (%p14535_p1), [#allocation16], 2080   ;;  %p14536_p7 = pmov %p14535_p1 }
 0x13e   : > { %p14537_p0 = pmov %p14535_p1 }
 0x13f   : > { %12826 = vsyncadd (%p14536_p7), [#allocation16], 4294965216 }
 0x140   : > { %12828 = dma.done.wait (%p14537_p0), [#allocation19], 16   ;;  %p14538_p13 = pmov %p14537_p0 }
 0x141   : > { %s14539_s11 = sld [smem:[#allocation29_spill]] }
 0x142   : > { %12830 = vsyncadd (%p14538_p13), [#allocation19], 4294967280 }
 0x147   : > { %p9474_p8 = scmp.ne.s32.totalorder %s14539_s11, 0 }
 0x148   : > { %v12878_v0 = vmov (!%p9474_p8), 0.0  }
 0x149   : > { %612 = sbr.rel (%p9474_p8) target bundleno = 336 (0x150), region = 108  ;;  %613 = vst [vmem:[#allocation2] sm:$0xff] (!%p9474_p8), %v12878_v0  ;;  %614 = vst [vmem:[#allocation2 + $0x8] sm:$0xff] (!%p9474_p8), %v12878_v0 }
 0x150 PF: > { %v11249_v1 = vld [vmem:[%s13279_s25 + $0x164] ss:$16 sps:$4 sm:$0xff]   ;;  %v11251_v2 = vld [vmem:[%s13279_s25 + $0x16c] ss:$16 sps:$4 sm:$0xff]   ;;  %v11253_v3 = vld [vmem:[%s13279_s25 + $0x160] ss:$16 sps:$4 sm:$0xff]  }
 0x151   : > { %956 = vmatprep.subr.bf16.mxu0 %v11249_v1  ;;  %v11254_v4 = vld [vmem:[%s13279_s25 + $0x168] ss:$16 sps:$4 sm:$0xff]   ;;  %997 = vmatprep.subr.bf16.mxu1 %v11251_v2  ;;  %v11255_v5 = vld [vmem:[%s13279_s25 + $0x184] ss:$16 sps:$4 sm:$0xff]   ;;  %v11257_v6 = vld [vmem:[%s13279_s25 + $0x18c] ss:$16 sps:$4 sm:$0xff]  }
 0x152   : > { %957 = vmatpush1.bf16.msra.mxu0 %v11253_v3  ;;  %998 = vmatpush1.bf16.msra.mxu1 %v11254_v4  ;;  %v11259_v7 = vld [vmem:[%s13279_s25 + $0x180] ss:$16 sps:$4 sm:$0xff]   ;;  %v11260_v8 = vld [vmem:[%s13279_s25 + $0x188] ss:$16 sps:$4 sm:$0xff]   ;;  %v11261_v9 = vld [vmem:[%s13279_s25 + $0x1a4] ss:$16 sps:$4 sm:$0xff]  }
 0x153   : > { %958 = vmatprep.subr.bf16.mxu0 %v11255_v5  ;;  %999 = vmatprep.subr.bf16.mxu1 %v11257_v6  ;;  %v11263_v10 = vld [vmem:[%s13279_s25 + $0x1ac] ss:$16 sps:$4 sm:$0xff]   ;;  %v11265_v11 = vld [vmem:[%s13279_s25 + $0x1a0] ss:$16 sps:$4 sm:$0xff]   ;;  %v11266_v12 = vld [vmem:[%s13279_s25 + $0x1a8] ss:$16 sps:$4 sm:$0xff]  }
 0x154   : > { %v11267_v13 = vld [vmem:[%s13279_s25 + $0x1c4] ss:$16 sps:$4 sm:$0xff]   ;;  %v11269_v14 = vld [vmem:[%s13279_s25 + $0x1cc] ss:$16 sps:$4 sm:$0xff]   ;;  %v11271_v15 = vld [vmem:[%s13279_s25 + $0x1c0] ss:$16 sps:$4 sm:$0xff]  }
 0x155   : > { %v11272_v16 = vld [vmem:[%s13279_s25 + $0x1c8] ss:$16 sps:$4 sm:$0xff]   ;;  %v11273_v17 = vld [vmem:[%s13279_s25 + $0x1e4] ss:$16 sps:$4 sm:$0xff]   ;;  %v11275_v18 = vld [vmem:[%s13279_s25 + $0x1ec] ss:$16 sps:$4 sm:$0xff]  }
 0x156   : > { %959 = vmatpush1.bf16.msra.mxu0 %v11259_v7  ;;  %1000 = vmatpush1.bf16.msra.mxu1 %v11260_v8  ;;  %v11277_v19 = vld [vmem:[%s13279_s25 + $0x1e0] ss:$16 sps:$4 sm:$0xff]   ;;  %v11278_v20 = vld [vmem:[%s13279_s25 + $0x1e8] ss:$16 sps:$4 sm:$0xff]   ;;  %v11279_v21 = vld [vmem:[%s13279_s25 + $0x204] ss:$16 sps:$4 sm:$0xff]  }
 0x157   : > { %960 = vmatprep.subr.bf16.mxu0 %v11261_v9  ;;  %1001 = vmatprep.subr.bf16.mxu1 %v11263_v10  ;;  %v11281_v22 = vld [vmem:[%s13279_s25 + $0x20c] ss:$16 sps:$4 sm:$0xff]   ;;  %v11283_v23 = vld [vmem:[%s13279_s25 + $0x200] ss:$16 sps:$4 sm:$0xff]   ;;  %v11284_v24 = vld [vmem:[%s13279_s25 + $0x208] ss:$16 sps:$4 sm:$0xff]  }
 0x158   : > { %v11285_v25 = vld [vmem:[%s13279_s25 + $0x224] ss:$16 sps:$4 sm:$0xff]   ;;  %v11287_v26 = vld [vmem:[%s13279_s25 + $0x22c] ss:$16 sps:$4 sm:$0xff]   ;;  %v11289_v27 = vld [vmem:[%s13279_s25 + $0x220] ss:$16 sps:$4 sm:$0xff]  }
 0x159   : > { %v11290_v28 = vld [vmem:[%s13279_s25 + $0x228] ss:$16 sps:$4 sm:$0xff]   ;;  %v11291_v29 = vld [vmem:[%s13279_s25 + $0x244] ss:$16 sps:$4 sm:$0xff]   ;;  %v11293_v30 = vld [vmem:[%s13279_s25 + $0x24c] ss:$16 sps:$4 sm:$0xff]  }
 0x15a   : > { %961 = vmatpush1.bf16.msra.mxu0 %v11265_v11  ;;  %1002 = vmatpush1.bf16.msra.mxu1 %v11266_v12  ;;  %v11295_v31 = vld [vmem:[%s13279_s25 + $0x240] ss:$16 sps:$4 sm:$0xff]   ;;  %v11296_v32 = vld [vmem:[%s13279_s25 + $0x248] ss:$16 sps:$4 sm:$0xff]   ;;  %v11297_v33 = vld [vmem:[%s13279_s25 + $0x264] ss:$16 sps:$4 sm:$0xff]  }
 0x15b   : > { %962 = vmatprep.subr.bf16.mxu0 %v11267_v13  ;;  %1003 = vmatprep.subr.bf16.mxu1 %v11269_v14  ;;  %v11299_v34 = vld [vmem:[%s13279_s25 + $0x26c] ss:$16 sps:$4 sm:$0xff]   ;;  %s14540_s30 = sld [smem:[#allocation33_spill]]  ;;  %v11301_v37 = vld [vmem:[%s13279_s25 + $0x260] ss:$16 sps:$4 sm:$0xff]   ;;  %vm725_vm0 = vcmask 1041409  }
 0x15c   : > { %v11302_v38 = vld [vmem:[%s13279_s25 + $0x268] ss:$16 sps:$4 sm:$0xff]   ;;  %v11303_v47 = vld [vmem:[%s13279_s25 + $0x284] ss:$16 sps:$4 sm:$0xff]   ;;  %v11305_v51 = vld [vmem:[%s13279_s25 + $0x28c] ss:$16 sps:$4 sm:$0xff]  }
 0x15d   : > { %v11307_v55 = vld [vmem:[%s13279_s25 + $0x280] ss:$16 sps:$4 sm:$0xff]   ;;  %v11308_v56 = vld [vmem:[%s13279_s25 + $0x288] ss:$16 sps:$4 sm:$0xff]   ;;  %v11309_v57 = vld [vmem:[%s13279_s25 + $0x2a4] ss:$16 sps:$4 sm:$0xff]  }
 0x15e   : > { %963 = vmatpush1.bf16.msra.mxu0 %v11271_v15  ;;  %1004 = vmatpush1.bf16.msra.mxu1 %v11272_v16  ;;  %vm952_vm1 = vcmask 392192   ;;  %v11311_v61 = vld [vmem:[%s13279_s25 + $0x2ac] ss:$16 sps:$4 sm:$0xff]   ;;  %v11313_v63 = vld [vmem:[%s13279_s25 + $0x2a0] ss:$16 sps:$4 sm:$0xff]  }
 0x15f   : > { %964 = vmatprep.subr.bf16.mxu0 %v11273_v17  ;;  %1005 = vmatprep.subr.bf16.mxu1 %v11275_v18  ;;  %v11314_v0 = vld [vmem:[%s13279_s25 + $0x2a8] ss:$16 sps:$4 sm:$0xff]   ;;  %v11317_v3 = vld [vmem:[%s13279_s25 + $0x4] ss:$16 sps:$4 sm:$0xff]   ;;  %v11320_v4 = vld [vmem:[%s13279_s25 + $0xc] ss:$16 sps:$4 sm:$0xff]  }
 0x160   : > { %v11315_v6 = vld [vmem:[%s13279_s25] ss:$16 sps:$4 sm:$0xff]   ;;  %v11318_v7 = vld [vmem:[%s13279_s25 + $0x8] ss:$16 sps:$4 sm:$0xff]   ;;  %v11323_v9 = vld [vmem:[%s13279_s25 + $0x24] ss:$16 sps:$4 sm:$0xff]  }
 0x161   : > { %v616_v35 = vld [vmem:[%s14540_s30 + $0x8] sm:$0xff]  ;;  %v618_v36 = vld [vmem:[%s14540_s30 + $0x18] sm:$0x7]  ;;  %v615_v42 = vld [vmem:[%s14540_s30] sm:$0xff] }
 0x162   : > { %965 = vmatpush1.bf16.msra.mxu0 %v11277_v19  ;;  %1006 = vmatpush1.bf16.msra.mxu1 %v11278_v20  ;;  %v620_v39 = vld [vmem:[%s14540_s30 + $0x28] sm:$0xff]  ;;  %v622_v40 = vld [vmem:[%s14540_s30 + $0x38] sm:$0x7]  ;;  %v13359_v41 = vpack.c.bf16 %v618_v36, %v616_v35  ;;  %v617_v44 = vld [vmem:[%s14540_s30 + $0x10] sm:$0x7] }
 0x163   : > { %966 = vmatprep.subr.bf16.mxu0 %v11279_v21  ;;  %1007 = vmatprep.subr.bf16.mxu1 %v11281_v22  ;;  %v13364_v43 = vpack.c.bf16 %v622_v40, %v620_v39  ;;  %v619_v45 = vld [vmem:[%s14540_s30 + $0x20] sm:$0xff]  ;;  %v621_v46 = vld [vmem:[%s14540_s30 + $0x30] sm:$0x7]  ;;  %v13379_v49 = vpack.c.bf16 %v617_v44, %v615_v42  ;;  %v11326_v10 = vld [vmem:[%s13279_s25 + $0x2c] ss:$16 sps:$4 sm:$0xff]  }
 0x164   : > { %v13377_v48 = vunpack.c.l.b16 %v13359_v41  ;;  %v13381_v50 = vpack.c.bf16 %v621_v46, %v619_v45  ;;  %v11321_v12 = vld [vmem:[%s13279_s25 + $0x20] ss:$16 sps:$4 sm:$0xff]   ;;  %v11324_v13 = vld [vmem:[%s13279_s25 + $0x28] ss:$16 sps:$4 sm:$0xff]   ;;  %v11329_v14 = vld [vmem:[%s13279_s25 + $0x44] ss:$16 sps:$4 sm:$0xff]  }
 0x165   : > { %v13385_v52 = vunpack.c.l.b16 %v13364_v43  ;;  %v13389_v54 = vunpack.c.l.b16 %v13379_v49  ;;  %v11332_v15 = vld [vmem:[%s13279_s25 + $0x4c] ss:$16 sps:$4 sm:$0xff]   ;;  %v11327_v16 = vld [vmem:[%s13279_s25 + $0x40] ss:$16 sps:$4 sm:$0xff]   ;;  %v11330_v17 = vld [vmem:[%s13279_s25 + $0x48] ss:$16 sps:$4 sm:$0xff]  }
 0x166   : > { %967 = vmatpush1.bf16.msra.mxu0 %v11283_v23  ;;  %1008 = vmatpush1.bf16.msra.mxu1 %v11284_v24  ;;  %v727_v53 = vrot.slane %v13377_v48, 1  ;;  %v13397_v59 = vunpack.c.l.b16 %v13381_v50  ;;  %v11335_v18 = vld [vmem:[%s13279_s25 + $0x64] ss:$16 sps:$4 sm:$0xff]   ;;  %v11338_v19 = vld [vmem:[%s13279_s25 + $0x6c] ss:$16 sps:$4 sm:$0xff]  }
 0x167   : > { %968 = vmatprep.subr.bf16.mxu0 %v11285_v25  ;;  %1009 = vmatprep.subr.bf16.mxu1 %v11287_v26  ;;  %v724_v60 = vrot.slane %v13389_v54, 1  ;;  %v1040_v1 = vrot.slane %v13385_v52, 7  ;;  %v11333_v20 = vld [vmem:[%s13279_s25 + $0x60] ss:$16 sps:$4 sm:$0xff]   ;;  %v11336_v21 = vld [vmem:[%s13279_s25 + $0x68] ss:$16 sps:$4 sm:$0xff]  }
 0x168   : > { %v728_v58 = vsel %vm725_vm0, %v13385_v52, %v727_v53  ;;  %v11341_v22 = vld [vmem:[%s13279_s25 + $0x84] ss:$16 sps:$4 sm:$0xff]   ;;  %v11344_v23 = vld [vmem:[%s13279_s25 + $0x8c] ss:$16 sps:$4 sm:$0xff]   ;;  %v11339_v24 = vld [vmem:[%s13279_s25 + $0x80] ss:$16 sps:$4 sm:$0xff]  }
 0x169   : > { %v730_v62 = vpack.c.b16 %v728_v58, %v728_v58  ;;  %v726_v2 = vsel %vm725_vm0, %v13397_v59, %v724_v60  ;;  %v1041_v8 = vsel %vm725_vm0, %v1040_v1, %v13377_v48  ;;  %v11342_v25 = vld [vmem:[%s13279_s25 + $0x88] ss:$16 sps:$4 sm:$0xff]   ;;  %v11347_v26 = vld [vmem:[%s13279_s25 + $0xa4] ss:$16 sps:$4 sm:$0xff]   ;;  %v11362_v35 = vld [vmem:[%s13279_s25 + $0xec] ss:$16 sps:$4 sm:$0xff]  }
 0x16a   : > { %969 = vmatpush1.bf16.msra.mxu0 %v11289_v27  ;;  %1010 = vmatpush1.bf16.msra.mxu1 %v11290_v28  ;;  %v729_v5 = vpack.c.b16 %v726_v2, %v726_v2  ;;  %v1043_v11 = vpack.c.b16 %v1041_v8, %v1041_v8  ;;  %v11350_v27 = vld [vmem:[%s13279_s25 + $0xac] ss:$16 sps:$4 sm:$0xff]   ;;  %v11345_v28 = vld [vmem:[%s13279_s25 + $0xa0] ss:$16 sps:$4 sm:$0xff]   ;;  %v11366_v42 = vld [vmem:[%s13279_s25 + $0x108] ss:$16 sps:$4 sm:$0xff]  }
 0x16b   : > { %970 = vmatprep.subr.bf16.mxu0 %v11291_v29  ;;  %1011 = vmatprep.subr.bf16.mxu1 %v11293_v30  ;;  %v11348_v29 = vld [vmem:[%s13279_s25 + $0xa8] ss:$16 sps:$4 sm:$0xff]   ;;  %v11353_v30 = vld [vmem:[%s13279_s25 + $0xc4] ss:$16 sps:$4 sm:$0xff]   ;;  %v11357_v36 = vld [vmem:[%s13279_s25 + $0xe0] ss:$16 sps:$4 sm:$0xff]  }
 0x16c   : > { %9563 = vmatprep.mubr.msk.bf16.mxu0 %vm952_vm1, %v730_v62  ;;  %9564 = vmatprep.mubr.msk.bf16.mxu1 %vm952_vm1, %v730_v62  ;;  %v11368_v39 = vld [vmem:[%s13279_s25 + $0x10c] ss:$16 sps:$4 sm:$0xff]   ;;  %v11363_v40 = vld [vmem:[%s13279_s25 + $0x100] ss:$16 sps:$4 sm:$0xff]   ;;  %v11371_v44 = vld [vmem:[%s13279_s25 + $0x124] ss:$16 sps:$4 sm:$0xff]  }
 0x16d   : > { %v11374_v45 = vld [vmem:[%s13279_s25 + $0x12c] ss:$16 sps:$4 sm:$0xff]   ;;  %v11369_v46 = vld [vmem:[%s13279_s25 + $0x120] ss:$16 sps:$4 sm:$0xff]   ;;  %v1038_v53 = vrot.slane %v13397_v59, 7  ;;  %v1399_v60 = vrot.slane %v13385_v52, 1 }
 0x16e   : > { %971 = vmatpush1.bf16.msra.mxu0 %v11295_v31  ;;  %1012 = vmatpush1.bf16.msra.mxu1 %v11296_v32  ;;  %v11356_v31 = vld [vmem:[%s13279_s25 + $0xcc] ss:$16 sps:$4 sm:$0xff]   ;;  %v11351_v32 = vld [vmem:[%s13279_s25 + $0xc0] ss:$16 sps:$4 sm:$0xff]   ;;  %v11378_v58 = vld [vmem:[%s13279_s25 + $0x148] ss:$16 sps:$4 sm:$0xff]  }
 0x16f   : > { %972 = vmatprep.subr.bf16.mxu0 %v11297_v33  ;;  %1013 = vmatprep.subr.bf16.mxu1 %v11299_v34  ;;  %v11354_v33 = vld [vmem:[%s13279_s25 + $0xc8] ss:$16 sps:$4 sm:$0xff]   ;;  %v11359_v34 = vld [vmem:[%s13279_s25 + $0xe4] ss:$16 sps:$4 sm:$0xff]   ;;  %v11381_v1 = vld [vmem:[%s13279_s25 + $0x2c0] ss:$16 sps:$4 sm:$0xff]  }
 0x170   : > { %v11383_v62 = vld [vmem:[%s13279_s25 + $0x2c4] ss:$16 sps:$4 sm:$0xff]   ;;  %v11384_v2 = vld [vmem:[%s13279_s25 + $0x2c8] ss:$16 sps:$4 sm:$0xff]  }
 0x171   : > { %v11390_v8 = vld [vmem:[%s13279_s25 + $0x2e8] ss:$16 sps:$4 sm:$0xff]  }
 0x172   : > { %973 = vmatpush1.bf16.msra.mxu0 %v11301_v37  ;;  %1014 = vmatpush1.bf16.msra.mxu1 %v11302_v38  ;;  %v11360_v37 = vld [vmem:[%s13279_s25 + $0xe8] ss:$16 sps:$4 sm:$0xff]   ;;  %v11365_v38 = vld [vmem:[%s13279_s25 + $0x104] ss:$16 sps:$4 sm:$0xff]  }
 0x173   : > { %974 = vmatprep.subr.bf16.mxu0 %v11303_v47  ;;  %1015 = vmatprep.subr.bf16.mxu1 %v11305_v51  ;;  %v11372_v47 = vld [vmem:[%s13279_s25 + $0x128] ss:$16 sps:$4 sm:$0xff]   ;;  %v11377_v51 = vld [vmem:[%s13279_s25 + $0x144] ss:$16 sps:$4 sm:$0xff]  }
 0x176   : > { %975 = vmatpush1.bf16.msra.mxu0 %v11307_v55  ;;  %1016 = vmatpush1.bf16.msra.mxu1 %v11308_v56  ;;  %v11380_v55 = vld [vmem:[%s13279_s25 + $0x14c] ss:$16 sps:$4 sm:$0xff]   ;;  %v1398_v56 = vrot.slane %v13377_v48, 2 }
 0x177   : > { %976 = vmatprep.subr.bf16.mxu0 %v11309_v57  ;;  %1017 = vmatprep.subr.bf16.mxu1 %v11311_v61  ;;  %v11375_v57 = vld [vmem:[%s13279_s25 + $0x140] ss:$16 sps:$4 sm:$0xff]   ;;  %v1039_v61 = vsel %vm725_vm0, %v1038_v53, %v13389_v54  ;;  %v11444_v53 = vld [vmem:[%s13279_s25 + $0x408] ss:$16 sps:$4 sm:$0xff]  }
 0x17a   : > { %977 = vmatpush1.bf16.msra.mxu0 %v11313_v63  ;;  %1018 = vmatpush1.bf16.msra.mxu1 %v11314_v0  ;;  %v11386_v63 = vld [vmem:[%s13279_s25 + $0x2cc] ss:$16 sps:$4 sm:$0xff]   ;;  %v1042_v0 = vpack.c.b16 %v1039_v61, %v1039_v61  ;;  %v11447_v61 = vld [vmem:[%s13279_s25 + $0x420] ss:$16 sps:$4 sm:$0xff]  }
 0x17b   : > { %1268 = vmatprep.subr.bf16.mxu0 %v11317_v3  ;;  %1309 = vmatprep.subr.bf16.mxu1 %v11320_v4  ;;  %v1400_v3 = vsel %vm725_vm0, %v1399_v60, %v1398_v56  ;;  %v11389_v4 = vld [vmem:[%s13279_s25 + $0x2e4] ss:$16 sps:$4 sm:$0xff]  }
 0x17d   : > { %989 = vmatmul.mubr.bf16.vlgmr.msra.gmra.mrb[0].mxu0 %v729_v5  ;;  %1030 = vmatmul.mubr.bf16.vlgmr.msra.gmra.mrb[0].mxu1 %v729_v5  ;;  %v11392_v5 = vld [vmem:[%s13279_s25 + $0x2ec] ss:$16 sps:$4 sm:$0xff]  }
 0x17e   : > { %1269 = vmatpush1.bf16.msra.mxu0 %v11315_v6  ;;  %1310 = vmatpush1.bf16.msra.mxu1 %v11318_v7  ;;  %v1402_v6 = vpack.c.b16 %v1400_v3, %v1400_v3  ;;  %v11387_v7 = vld [vmem:[%s13279_s25 + $0x2e0] ss:$16 sps:$4 sm:$0xff]  }
 0x17f   : > { %1270 = vmatprep.subr.bf16.mxu0 %v11323_v9  ;;  %1311 = vmatprep.subr.bf16.mxu1 %v11326_v10  ;;  %v11395_v9 = vld [vmem:[%s13279_s25 + $0x304] ss:$16 sps:$4 sm:$0xff]   ;;  %v11398_v10 = vld [vmem:[%s13279_s25 + $0x30c] ss:$16 sps:$4 sm:$0xff]   ;;  %v11453_v3 = vld [vmem:[%s13279_s25 + $0x440] ss:$16 sps:$4 sm:$0xff]  }
 0x180   : > { %9609 = vmatprep.mubr.msk.bf16.mxu0 %vm952_vm1, %v1043_v11  ;;  %9610 = vmatprep.mubr.msk.bf16.mxu1 %vm952_vm1, %v1043_v11  ;;  %v11393_v11 = vld [vmem:[%s13279_s25 + $0x300] ss:$16 sps:$4 sm:$0xff]  }
 0x182   : > { %1271 = vmatpush1.bf16.msra.mxu0 %v11321_v12  ;;  %1312 = vmatpush1.bf16.msra.mxu1 %v11324_v13  ;;  %v11396_v12 = vld [vmem:[%s13279_s25 + $0x308] ss:$16 sps:$4 sm:$0xff]   ;;  %v11401_v13 = vld [vmem:[%s13279_s25 + $0x324] ss:$16 sps:$4 sm:$0xff]  }
 0x183   : > { %1272 = vmatprep.subr.bf16.mxu0 %v11329_v14  ;;  %1313 = vmatprep.subr.bf16.mxu1 %v11332_v15  ;;  %v11404_v14 = vld [vmem:[%s13279_s25 + $0x32c] ss:$16 sps:$4 sm:$0xff]   ;;  %v11399_v15 = vld [vmem:[%s13279_s25 + $0x320] ss:$16 sps:$4 sm:$0xff]  }
 0x186   : > { %1273 = vmatpush1.bf16.msra.mxu0 %v11327_v16  ;;  %1314 = vmatpush1.bf16.msra.mxu1 %v11330_v17  ;;  %v11402_v16 = vld [vmem:[%s13279_s25 + $0x328] ss:$16 sps:$4 sm:$0xff]   ;;  %v11407_v17 = vld [vmem:[%s13279_s25 + $0x344] ss:$16 sps:$4 sm:$0xff]  }
 0x187   : > { %1274 = vmatprep.subr.bf16.mxu0 %v11335_v18  ;;  %1315 = vmatprep.subr.bf16.mxu1 %v11338_v19  ;;  %v11410_v18 = vld [vmem:[%s13279_s25 + $0x34c] ss:$16 sps:$4 sm:$0xff]   ;;  %v11405_v19 = vld [vmem:[%s13279_s25 + $0x340] ss:$16 sps:$4 sm:$0xff]  }
 0x18a   : > { %1275 = vmatpush1.bf16.msra.mxu0 %v11333_v20  ;;  %1316 = vmatpush1.bf16.msra.mxu1 %v11336_v21  ;;  %v11408_v20 = vld [vmem:[%s13279_s25 + $0x348] ss:$16 sps:$4 sm:$0xff]   ;;  %v11413_v21 = vld [vmem:[%s13279_s25 + $0x364] ss:$16 sps:$4 sm:$0xff]  }
 0x18b   : > { %1276 = vmatprep.subr.bf16.mxu0 %v11341_v22  ;;  %1317 = vmatprep.subr.bf16.mxu1 %v11344_v23  ;;  %v11416_v22 = vld [vmem:[%s13279_s25 + $0x36c] ss:$16 sps:$4 sm:$0xff]   ;;  %v11411_v23 = vld [vmem:[%s13279_s25 + $0x360] ss:$16 sps:$4 sm:$0xff]  }
 0x18e   : > { %1277 = vmatpush1.bf16.msra.mxu0 %v11339_v24  ;;  %1318 = vmatpush1.bf16.msra.mxu1 %v11342_v25  ;;  %v11414_v24 = vld [vmem:[%s13279_s25 + $0x368] ss:$16 sps:$4 sm:$0xff]   ;;  %v11419_v25 = vld [vmem:[%s13279_s25 + $0x384] ss:$16 sps:$4 sm:$0xff]  }
 0x18f   : > { %1278 = vmatprep.subr.bf16.mxu0 %v11347_v26  ;;  %1319 = vmatprep.subr.bf16.mxu1 %v11350_v27  ;;  %v11422_v26 = vld [vmem:[%s13279_s25 + $0x38c] ss:$16 sps:$4 sm:$0xff]   ;;  %v11417_v27 = vld [vmem:[%s13279_s25 + $0x380] ss:$16 sps:$4 sm:$0xff]  }
 0x192   : > { %1279 = vmatpush1.bf16.msra.mxu0 %v11345_v28  ;;  %1320 = vmatpush1.bf16.msra.mxu1 %v11348_v29  ;;  %v11420_v28 = vld [vmem:[%s13279_s25 + $0x388] ss:$16 sps:$4 sm:$0xff]   ;;  %v11425_v29 = vld [vmem:[%s13279_s25 + $0x3a4] ss:$16 sps:$4 sm:$0xff]  }
 0x193   : > { %1280 = vmatprep.subr.bf16.mxu0 %v11353_v30  ;;  %1321 = vmatprep.subr.bf16.mxu1 %v11356_v31  ;;  %v11428_v30 = vld [vmem:[%s13279_s25 + $0x3ac] ss:$16 sps:$4 sm:$0xff]   ;;  %v11423_v31 = vld [vmem:[%s13279_s25 + $0x3a0] ss:$16 sps:$4 sm:$0xff]  }
 0x196   : > { %1281 = vmatpush1.bf16.msra.mxu0 %v11351_v32  ;;  %1322 = vmatpush1.bf16.msra.mxu1 %v11354_v33  ;;  %v11426_v32 = vld [vmem:[%s13279_s25 + $0x3a8] ss:$16 sps:$4 sm:$0xff]   ;;  %v11431_v33 = vld [vmem:[%s13279_s25 + $0x3c4] ss:$16 sps:$4 sm:$0xff]  }
 0x197   : > { %1282 = vmatprep.subr.bf16.mxu0 %v11359_v34  ;;  %1323 = vmatprep.subr.bf16.mxu1 %v11362_v35  ;;  %v11434_v34 = vld [vmem:[%s13279_s25 + $0x3cc] ss:$16 sps:$4 sm:$0xff]   ;;  %v11429_v35 = vld [vmem:[%s13279_s25 + $0x3c0] ss:$16 sps:$4 sm:$0xff]  }
 0x19a   : > { %1283 = vmatpush1.bf16.msra.mxu0 %v11357_v36  ;;  %1324 = vmatpush1.bf16.msra.mxu1 %v11360_v37  ;;  %v11432_v36 = vld [vmem:[%s13279_s25 + $0x3c8] ss:$16 sps:$4 sm:$0xff]   ;;  %v11437_v37 = vld [vmem:[%s13279_s25 + $0x3e4] ss:$16 sps:$4 sm:$0xff]  }
 0x19b   : > { %1284 = vmatprep.subr.bf16.mxu0 %v11365_v38  ;;  %1325 = vmatprep.subr.bf16.mxu1 %v11368_v39  ;;  %v11440_v38 = vld [vmem:[%s13279_s25 + $0x3ec] ss:$16 sps:$4 sm:$0xff]   ;;  %v11435_v39 = vld [vmem:[%s13279_s25 + $0x3e0] ss:$16 sps:$4 sm:$0xff]  }
 0x19e   : > { %1285 = vmatpush1.bf16.msra.mxu0 %v11363_v40  ;;  %1326 = vmatpush1.bf16.msra.mxu1 %v11366_v42  ;;  %v11438_v40 = vld [vmem:[%s13279_s25 + $0x3e8] ss:$16 sps:$4 sm:$0xff]   ;;  %v11443_v42 = vld [vmem:[%s13279_s25 + $0x404] ss:$16 sps:$4 sm:$0xff]  }
 0x19f   : > { %1286 = vmatprep.subr.bf16.mxu0 %v11371_v44  ;;  %1327 = vmatprep.subr.bf16.mxu1 %v11374_v45  ;;  %v1395_v44 = vrot.slane %v13389_v54, 2  ;;  %v1396_v45 = vrot.slane %v13397_v59, 1 }
 0x1a1   : > { %v1397_v56 = vsel %vm725_vm0, %v1396_v45, %v1395_v44  ;;  %v11507_v44 = vld [vmem:[%s13279_s25 + $0x560] ss:$16 sps:$4 sm:$0xff]   ;;  %v11510_v45 = vld [vmem:[%s13279_s25 + $0x568] ss:$16 sps:$4 sm:$0xff]  }
 0x1a2   : > { %1287 = vmatpush1.bf16.msra.mxu0 %v11369_v46  ;;  %1328 = vmatpush1.bf16.msra.mxu1 %v11372_v47  ;;  %v11446_v46 = vld [vmem:[%s13279_s25 + $0x40c] ss:$16 sps:$4 sm:$0xff]   ;;  %v1761_v47 = vrot.slane %v13377_v48, 3  ;;  %v1401_v60 = vpack.c.b16 %v1397_v56, %v1397_v56  ;;  %v11513_v56 = vld [vmem:[%s13279_s25 + $0x580] ss:$16 sps:$4 sm:$0xff]  }
 0x1a3   : > { %1288 = vmatprep.subr.bf16.mxu0 %v11377_v51  ;;  %1329 = vmatprep.subr.bf16.mxu1 %v11380_v55  ;;  %v11441_v51 = vld [vmem:[%s13279_s25 + $0x400] ss:$16 sps:$4 sm:$0xff]   ;;  %v1762_v55 = vrot.slane %v13385_v52, 2 }
 0x1a6   : > { %1289 = vmatpush1.bf16.msra.mxu0 %v11375_v57  ;;  %1330 = vmatpush1.bf16.msra.mxu1 %v11378_v58  ;;  %v11449_v57 = vld [vmem:[%s13279_s25 + $0x424] ss:$16 sps:$4 sm:$0xff]   ;;  %v11452_v58 = vld [vmem:[%s13279_s25 + $0x42c] ss:$16 sps:$4 sm:$0xff]  }
 0x1a7   : > { %1627 = vmatprep.subr.bf16.mxu0 %v11383_v62  ;;  %1668 = vmatprep.subr.bf16.mxu1 %v11386_v63  ;;  %v11450_v62 = vld [vmem:[%s13279_s25 + $0x428] ss:$16 sps:$4 sm:$0xff]   ;;  %v1763_v63 = vsel %vm725_vm0, %v1762_v55, %v1761_v47 }
 0x1a9   : > { %1301 = vmatmul.mubr.bf16.vlgmr.msra.gmra.mrb[4].mxu0 %v1042_v0  ;;  %1342 = vmatmul.mubr.bf16.vlgmr.msra.gmra.mrb[4].mxu1 %v1042_v0  ;;  %v11455_v0 = vld [vmem:[%s13279_s25 + $0x444] ss:$16 sps:$4 sm:$0xff]  }
 0x1aa   : > { %1628 = vmatpush1.bf16.msra.mxu0 %v11381_v1  ;;  %1669 = vmatpush1.bf16.msra.mxu1 %v11384_v2  ;;  %v11458_v1 = vld [vmem:[%s13279_s25 + $0x44c] ss:$16 sps:$4 sm:$0xff]   ;;  %v1765_v2 = vpack.c.b16 %v1763_v63, %v1763_v63  ;;  %v11519_v63 = vld [vmem:[%s13279_s25 + $0x5a0] ss:$16 sps:$4 sm:$0xff]  }
 0x1ab   : > { %1629 = vmatprep.subr.bf16.mxu0 %v11389_v4  ;;  %1670 = vmatprep.subr.bf16.mxu1 %v11392_v5  ;;  %v11456_v4 = vld [vmem:[%s13279_s25 + $0x448] ss:$16 sps:$4 sm:$0xff]   ;;  %v11461_v5 = vld [vmem:[%s13279_s25 + $0x464] ss:$16 sps:$4 sm:$0xff]  }
 0x1ac   : > { %9699 = vmatprep.mubr.msk.bf16.mxu0 %vm952_vm1, %v1402_v6  ;;  %9700 = vmatprep.mubr.msk.bf16.mxu1 %vm952_vm1, %v1402_v6  ;;  %v11464_v6 = vld [vmem:[%s13279_s25 + $0x46c] ss:$16 sps:$4 sm:$0xff]  }
 0x1ae   : > { %1630 = vmatpush1.bf16.msra.mxu0 %v11387_v7  ;;  %1671 = vmatpush1.bf16.msra.mxu1 %v11390_v8  ;;  %v11459_v7 = vld [vmem:[%s13279_s25 + $0x460] ss:$16 sps:$4 sm:$0xff]   ;;  %v11462_v8 = vld [vmem:[%s13279_s25 + $0x468] ss:$16 sps:$4 sm:$0xff]  }
 0x1af   : > { %1631 = vmatprep.subr.bf16.mxu0 %v11395_v9  ;;  %1672 = vmatprep.subr.bf16.mxu1 %v11398_v10  ;;  %v11467_v9 = vld [vmem:[%s13279_s25 + $0x484] ss:$16 sps:$4 sm:$0xff]   ;;  %v11470_v10 = vld [vmem:[%s13279_s25 + $0x48c] ss:$16 sps:$4 sm:$0xff]  }
 0x1b2   : > { %1632 = vmatpush1.bf16.msra.mxu0 %v11393_v11  ;;  %1673 = vmatpush1.bf16.msra.mxu1 %v11396_v12  ;;  %v11465_v11 = vld [vmem:[%s13279_s25 + $0x480] ss:$16 sps:$4 sm:$0xff]   ;;  %v11468_v12 = vld [vmem:[%s13279_s25 + $0x488] ss:$16 sps:$4 sm:$0xff]  }
 0x1b3   : > { %1633 = vmatprep.subr.bf16.mxu0 %v11401_v13  ;;  %1674 = vmatprep.subr.bf16.mxu1 %v11404_v14  ;;  %v11473_v13 = vld [vmem:[%s13279_s25 + $0x4a4] ss:$16 sps:$4 sm:$0xff]   ;;  %v11476_v14 = vld [vmem:[%s13279_s25 + $0x4ac] ss:$16 sps:$4 sm:$0xff]  }
 0x1b6   : > { %1634 = vmatpush1.bf16.msra.mxu0 %v11399_v15  ;;  %1675 = vmatpush1.bf16.msra.mxu1 %v11402_v16  ;;  %v11471_v15 = vld [vmem:[%s13279_s25 + $0x4a0] ss:$16 sps:$4 sm:$0xff]   ;;  %v11474_v16 = vld [vmem:[%s13279_s25 + $0x4a8] ss:$16 sps:$4 sm:$0xff]  }
 0x1b7   : > { %1635 = vmatprep.subr.bf16.mxu0 %v11407_v17  ;;  %1676 = vmatprep.subr.bf16.mxu1 %v11410_v18  ;;  %v11479_v17 = vld [vmem:[%s13279_s25 + $0x4c4] ss:$16 sps:$4 sm:$0xff]   ;;  %v11482_v18 = vld [vmem:[%s13279_s25 + $0x4cc] ss:$16 sps:$4 sm:$0xff]  }
 0x1ba   : > { %1636 = vmatpush1.bf16.msra.mxu0 %v11405_v19  ;;  %1677 = vmatpush1.bf16.msra.mxu1 %v11408_v20  ;;  %v11477_v19 = vld [vmem:[%s13279_s25 + $0x4c0] ss:$16 sps:$4 sm:$0xff]   ;;  %v11480_v20 = vld [vmem:[%s13279_s25 + $0x4c8] ss:$16 sps:$4 sm:$0xff]  }
 0x1bb   : > { %1637 = vmatprep.subr.bf16.mxu0 %v11413_v21  ;;  %1678 = vmatprep.subr.bf16.mxu1 %v11416_v22  ;;  %v11485_v21 = vld [vmem:[%s13279_s25 + $0x4e4] ss:$16 sps:$4 sm:$0xff]   ;;  %v11488_v22 = vld [vmem:[%s13279_s25 + $0x4ec] ss:$16 sps:$4 sm:$0xff]  }
 0x1be   : > { %1638 = vmatpush1.bf16.msra.mxu0 %v11411_v23  ;;  %1679 = vmatpush1.bf16.msra.mxu1 %v11414_v24  ;;  %v11483_v23 = vld [vmem:[%s13279_s25 + $0x4e0] ss:$16 sps:$4 sm:$0xff]   ;;  %v11486_v24 = vld [vmem:[%s13279_s25 + $0x4e8] ss:$16 sps:$4 sm:$0xff]  }
 0x1bf   : > { %1639 = vmatprep.subr.bf16.mxu0 %v11419_v25  ;;  %1680 = vmatprep.subr.bf16.mxu1 %v11422_v26  ;;  %v11491_v25 = vld [vmem:[%s13279_s25 + $0x504] ss:$16 sps:$4 sm:$0xff]   ;;  %v11494_v26 = vld [vmem:[%s13279_s25 + $0x50c] ss:$16 sps:$4 sm:$0xff]  }
 0x1c2   : > { %1640 = vmatpush1.bf16.msra.mxu0 %v11417_v27  ;;  %1681 = vmatpush1.bf16.msra.mxu1 %v11420_v28  ;;  %v11489_v27 = vld [vmem:[%s13279_s25 + $0x500] ss:$16 sps:$4 sm:$0xff]   ;;  %v11492_v28 = vld [vmem:[%s13279_s25 + $0x508] ss:$16 sps:$4 sm:$0xff]  }
 0x1c3   : > { %1641 = vmatprep.subr.bf16.mxu0 %v11425_v29  ;;  %1682 = vmatprep.subr.bf16.mxu1 %v11428_v30  ;;  %v11497_v29 = vld [vmem:[%s13279_s25 + $0x524] ss:$16 sps:$4 sm:$0xff]   ;;  %v11500_v30 = vld [vmem:[%s13279_s25 + $0x52c] ss:$16 sps:$4 sm:$0xff]  }
 0x1c6   : > { %1642 = vmatpush1.bf16.msra.mxu0 %v11423_v31  ;;  %1683 = vmatpush1.bf16.msra.mxu1 %v11426_v32  ;;  %v11495_v31 = vld [vmem:[%s13279_s25 + $0x520] ss:$16 sps:$4 sm:$0xff]   ;;  %v11498_v32 = vld [vmem:[%s13279_s25 + $0x528] ss:$16 sps:$4 sm:$0xff]  }
 0x1c7   : > { %1643 = vmatprep.subr.bf16.mxu0 %v11431_v33  ;;  %1684 = vmatprep.subr.bf16.mxu1 %v11434_v34  ;;  %v11503_v33 = vld [vmem:[%s13279_s25 + $0x544] ss:$16 sps:$4 sm:$0xff]   ;;  %v11506_v34 = vld [vmem:[%s13279_s25 + $0x54c] ss:$16 sps:$4 sm:$0xff]  }
 0x1ca   : > { %1644 = vmatpush1.bf16.msra.mxu0 %v11429_v35  ;;  %1685 = vmatpush1.bf16.msra.mxu1 %v11432_v36  ;;  %v11501_v35 = vld [vmem:[%s13279_s25 + $0x540] ss:$16 sps:$4 sm:$0xff]   ;;  %v11504_v36 = vld [vmem:[%s13279_s25 + $0x548] ss:$16 sps:$4 sm:$0xff]  }
 0x1cb   : > { %1645 = vmatprep.subr.bf16.mxu0 %v11437_v37  ;;  %1686 = vmatprep.subr.bf16.mxu1 %v11440_v38  ;;  %v11509_v37 = vld [vmem:[%s13279_s25 + $0x564] ss:$16 sps:$4 sm:$0xff]   ;;  %v1758_v38 = vrot.slane %v13389_v54, 3 }
 0x1ce   : > { %1646 = vmatpush1.bf16.msra.mxu0 %v11435_v39  ;;  %1687 = vmatpush1.bf16.msra.mxu1 %v11438_v40  ;;  %v1759_v39 = vrot.slane %v13397_v59, 2  ;;  %v11512_v40 = vld [vmem:[%s13279_s25 + $0x56c] ss:$16 sps:$4 sm:$0xff]  }
 0x1cf   : > { %1647 = vmatprep.subr.bf16.mxu0 %v11443_v42  ;;  %1688 = vmatprep.subr.bf16.mxu1 %v11446_v46  ;;  %v2124_v42 = vrot.slane %v13377_v48, 4  ;;  %v2125_v46 = vrot.slane %v13385_v52, 3 }
 0x1d0   : > { %v1760_v47 = vsel %vm725_vm0, %v1759_v39, %v1758_v38  ;;  %v11573_v38 = vld [vmem:[%s13279_s25 + $0x6c0] ss:$16 sps:$4 sm:$0xff]   ;;  %v11576_v39 = vld [vmem:[%s13279_s25 + $0x6c8] ss:$16 sps:$4 sm:$0xff]  }
 0x1d1   : > { %v1764_v55 = vpack.c.b16 %v1760_v47, %v1760_v47  ;;  %v11579_v47 = vld [vmem:[%s13279_s25 + $0x6e0] ss:$16 sps:$4 sm:$0xff]  }
 0x1d2   : > { %1648 = vmatpush1.bf16.msra.mxu0 %v11441_v51  ;;  %1689 = vmatpush1.bf16.msra.mxu1 %v11444_v53  ;;  %v11515_v51 = vld [vmem:[%s13279_s25 + $0x584] ss:$16 sps:$4 sm:$0xff]   ;;  %v11518_v53 = vld [vmem:[%s13279_s25 + $0x58c] ss:$16 sps:$4 sm:$0xff]  }
 0x1d3   : > { %1990 = vmatprep.subr.bf16.mxu0 %v11449_v57  ;;  %2031 = vmatprep.subr.bf16.mxu1 %v11452_v58  ;;  %v11516_v57 = vld [vmem:[%s13279_s25 + $0x588] ss:$16 sps:$4 sm:$0xff]   ;;  %v2126_v58 = vsel %vm725_vm0, %v2125_v46, %v2124_v42 }
 0x1d5   : > { %1660 = vmatmul.mubr.bf16.vlgmr.msra.gmra.mrb[8].mxu0 %v1401_v60  ;;  %1701 = vmatmul.mubr.bf16.vlgmr.msra.gmra.mrb[8].mxu1 %v1401_v60  ;;  %v11521_v60 = vld [vmem:[%s13279_s25 + $0x5a4] ss:$16 sps:$4 sm:$0xff]  }
 0x1d6   : > { %1991 = vmatpush1.bf16.msra.mxu0 %v11447_v61  ;;  %2032 = vmatpush1.bf16.msra.mxu1 %v11450_v62  ;;  %v11524_v61 = vld [vmem:[%s13279_s25 + $0x5ac] ss:$16 sps:$4 sm:$0xff]   ;;  %v2128_v62 = vpack.c.b16 %v2126_v58, %v2126_v58  ;;  %v11585_v58 = vld [vmem:[%s13279_s25 + $0x700] ss:$16 sps:$4 sm:$0xff]  }
 0x1d7   : > { %1992 = vmatprep.subr.bf16.mxu0 %v11455_v0  ;;  %2033 = vmatprep.subr.bf16.mxu1 %v11458_v1  ;;  %v11522_v0 = vld [vmem:[%s13279_s25 + $0x5a8] ss:$16 sps:$4 sm:$0xff]   ;;  %v11527_v1 = vld [vmem:[%s13279_s25 + $0x5c4] ss:$16 sps:$4 sm:$0xff]  }
 0x1d8   : > { %9789 = vmatprep.mubr.msk.bf16.mxu0 %vm952_vm1, %v1765_v2  ;;  %9790 = vmatprep.mubr.msk.bf16.mxu1 %vm952_vm1, %v1765_v2  ;;  %v11530_v2 = vld [vmem:[%s13279_s25 + $0x5cc] ss:$16 sps:$4 sm:$0xff]  }
 0x1da   : > { %1993 = vmatpush1.bf16.msra.mxu0 %v11453_v3  ;;  %2034 = vmatpush1.bf16.msra.mxu1 %v11456_v4  ;;  %v11525_v3 = vld [vmem:[%s13279_s25 + $0x5c0] ss:$16 sps:$4 sm:$0xff]   ;;  %v11528_v4 = vld [vmem:[%s13279_s25 + $0x5c8] ss:$16 sps:$4 sm:$0xff]  }
 0x1db   : > { %1994 = vmatprep.subr.bf16.mxu0 %v11461_v5  ;;  %2035 = vmatprep.subr.bf16.mxu1 %v11464_v6  ;;  %v11533_v5 = vld [vmem:[%s13279_s25 + $0x5e4] ss:$16 sps:$4 sm:$0xff]   ;;  %v11536_v6 = vld [vmem:[%s13279_s25 + $0x5ec] ss:$16 sps:$4 sm:$0xff]  }
 0x1de   : > { %1995 = vmatpush1.bf16.msra.mxu0 %v11459_v7  ;;  %2036 = vmatpush1.bf16.msra.mxu1 %v11462_v8  ;;  %v11531_v7 = vld [vmem:[%s13279_s25 + $0x5e0] ss:$16 sps:$4 sm:$0xff]   ;;  %v11534_v8 = vld [vmem:[%s13279_s25 + $0x5e8] ss:$16 sps:$4 sm:$0xff]  }
 0x1df   : > { %1996 = vmatprep.subr.bf16.mxu0 %v11467_v9  ;;  %2037 = vmatprep.subr.bf16.mxu1 %v11470_v10  ;;  %v11539_v9 = vld [vmem:[%s13279_s25 + $0x604] ss:$16 sps:$4 sm:$0xff]   ;;  %v11542_v10 = vld [vmem:[%s13279_s25 + $0x60c] ss:$16 sps:$4 sm:$0xff]  }
 0x1e2   : > { %1997 = vmatpush1.bf16.msra.mxu0 %v11465_v11  ;;  %2038 = vmatpush1.bf16.msra.mxu1 %v11468_v12  ;;  %v11537_v11 = vld [vmem:[%s13279_s25 + $0x600] ss:$16 sps:$4 sm:$0xff]   ;;  %v11540_v12 = vld [vmem:[%s13279_s25 + $0x608] ss:$16 sps:$4 sm:$0xff]  }
 0x1e3   : > { %1998 = vmatprep.subr.bf16.mxu0 %v11473_v13  ;;  %2039 = vmatprep.subr.bf16.mxu1 %v11476_v14  ;;  %v11545_v13 = vld [vmem:[%s13279_s25 + $0x624] ss:$16 sps:$4 sm:$0xff]   ;;  %v11548_v14 = vld [vmem:[%s13279_s25 + $0x62c] ss:$16 sps:$4 sm:$0xff]  }
 0x1e6   : > { %1999 = vmatpush1.bf16.msra.mxu0 %v11471_v15  ;;  %2040 = vmatpush1.bf16.msra.mxu1 %v11474_v16  ;;  %v11543_v15 = vld [vmem:[%s13279_s25 + $0x620] ss:$16 sps:$4 sm:$0xff]   ;;  %v11546_v16 = vld [vmem:[%s13279_s25 + $0x628] ss:$16 sps:$4 sm:$0xff]  }
 0x1e7   : > { %2000 = vmatprep.subr.bf16.mxu0 %v11479_v17  ;;  %2041 = vmatprep.subr.bf16.mxu1 %v11482_v18  ;;  %v11551_v17 = vld [vmem:[%s13279_s25 + $0x644] ss:$16 sps:$4 sm:$0xff]   ;;  %v11554_v18 = vld [vmem:[%s13279_s25 + $0x64c] ss:$16 sps:$4 sm:$0xff]  }
 0x1ea   : > { %2001 = vmatpush1.bf16.msra.mxu0 %v11477_v19  ;;  %2042 = vmatpush1.bf16.msra.mxu1 %v11480_v20  ;;  %v11549_v19 = vld [vmem:[%s13279_s25 + $0x640] ss:$16 sps:$4 sm:$0xff]   ;;  %v11552_v20 = vld [vmem:[%s13279_s25 + $0x648] ss:$16 sps:$4 sm:$0xff]  }
 0x1eb   : > { %2002 = vmatprep.subr.bf16.mxu0 %v11485_v21  ;;  %2043 = vmatprep.subr.bf16.mxu1 %v11488_v22  ;;  %v11557_v21 = vld [vmem:[%s13279_s25 + $0x664] ss:$16 sps:$4 sm:$0xff]   ;;  %v11560_v22 = vld [vmem:[%s13279_s25 + $0x66c] ss:$16 sps:$4 sm:$0xff]  }
 0x1ee   : > { %2003 = vmatpush1.bf16.msra.mxu0 %v11483_v23  ;;  %2044 = vmatpush1.bf16.msra.mxu1 %v11486_v24  ;;  %v11555_v23 = vld [vmem:[%s13279_s25 + $0x660] ss:$16 sps:$4 sm:$0xff]   ;;  %v11558_v24 = vld [vmem:[%s13279_s25 + $0x668] ss:$16 sps:$4 sm:$0xff]  }
 0x1ef   : > { %2004 = vmatprep.subr.bf16.mxu0 %v11491_v25  ;;  %2045 = vmatprep.subr.bf16.mxu1 %v11494_v26  ;;  %v11563_v25 = vld [vmem:[%s13279_s25 + $0x684] ss:$16 sps:$4 sm:$0xff]   ;;  %v11566_v26 = vld [vmem:[%s13279_s25 + $0x68c] ss:$16 sps:$4 sm:$0xff]  }
 0x1f2   : > { %2005 = vmatpush1.bf16.msra.mxu0 %v11489_v27  ;;  %2046 = vmatpush1.bf16.msra.mxu1 %v11492_v28  ;;  %v11561_v27 = vld [vmem:[%s13279_s25 + $0x680] ss:$16 sps:$4 sm:$0xff]   ;;  %v11564_v28 = vld [vmem:[%s13279_s25 + $0x688] ss:$16 sps:$4 sm:$0xff]  }
 0x1f3   : > { %2006 = vmatprep.subr.bf16.mxu0 %v11497_v29  ;;  %2047 = vmatprep.subr.bf16.mxu1 %v11500_v30  ;;  %v11569_v29 = vld [vmem:[%s13279_s25 + $0x6a4] ss:$16 sps:$4 sm:$0xff]   ;;  %v11572_v30 = vld [vmem:[%s13279_s25 + $0x6ac] ss:$16 sps:$4 sm:$0xff]  }
 0x1f6   : > { %2007 = vmatpush1.bf16.msra.mxu0 %v11495_v31  ;;  %2048 = vmatpush1.bf16.msra.mxu1 %v11498_v32  ;;  %v11567_v31 = vld [vmem:[%s13279_s25 + $0x6a0] ss:$16 sps:$4 sm:$0xff]   ;;  %v11570_v32 = vld [vmem:[%s13279_s25 + $0x6a8] ss:$16 sps:$4 sm:$0xff]  }
 0x1f7   : > { %2008 = vmatprep.subr.bf16.mxu0 %v11503_v33  ;;  %2049 = vmatprep.subr.bf16.mxu1 %v11506_v34  ;;  %v11575_v33 = vld [vmem:[%s13279_s25 + $0x6c4] ss:$16 sps:$4 sm:$0xff]   ;;  %v2121_v34 = vrot.slane %v13389_v54, 4 }
 0x1fa   : > { %2009 = vmatpush1.bf16.msra.mxu0 %v11501_v35  ;;  %2050 = vmatpush1.bf16.msra.mxu1 %v11504_v36  ;;  %v2122_v35 = vrot.slane %v13397_v59, 3  ;;  %v11578_v36 = vld [vmem:[%s13279_s25 + $0x6cc] ss:$16 sps:$4 sm:$0xff]  }
 0x1fb   : > { %2010 = vmatprep.subr.bf16.mxu0 %v11509_v37  ;;  %2051 = vmatprep.subr.bf16.mxu1 %v11512_v40  ;;  %v2487_v37 = vrot.slane %v13377_v48, 5  ;;  %v2488_v40 = vrot.slane %v13385_v52, 4 }
 0x1fc   : > { %v2123_v42 = vsel %vm725_vm0, %v2122_v35, %v2121_v34  ;;  %v11639_v34 = vld [vmem:[%s13279_s25 + $0x820] ss:$16 sps:$4 sm:$0xff]  }
 0x1fd   : > { %v2127_v46 = vpack.c.b16 %v2123_v42, %v2123_v42  ;;  %v11642_v42 = vld [vmem:[%s13279_s25 + $0x828] ss:$16 sps:$4 sm:$0xff]  }
 0x1fe   : > { %2011 = vmatpush1.bf16.msra.mxu0 %v11507_v44  ;;  %2052 = vmatpush1.bf16.msra.mxu1 %v11510_v45  ;;  %v11581_v44 = vld [vmem:[%s13279_s25 + $0x6e4] ss:$16 sps:$4 sm:$0xff]   ;;  %v11584_v45 = vld [vmem:[%s13279_s25 + $0x6ec] ss:$16 sps:$4 sm:$0xff]  }
 0x1ff   : > { %2353 = vmatprep.subr.bf16.mxu0 %v11515_v51  ;;  %2394 = vmatprep.subr.bf16.mxu1 %v11518_v53  ;;  %v11582_v51 = vld [vmem:[%s13279_s25 + $0x6e8] ss:$16 sps:$4 sm:$0xff]   ;;  %v2489_v53 = vsel %vm725_vm0, %v2488_v40, %v2487_v37  ;;  %v2850_v37 = vrot.slane %v13377_v48, 6 }
 0x201   : > { %2023 = vmatmul.mubr.bf16.vlgmr.msra.gmra.mrb[12].mxu0 %v1764_v55  ;;  %2064 = vmatmul.mubr.bf16.vlgmr.msra.gmra.mrb[12].mxu1 %v1764_v55  ;;  %v11587_v55 = vld [vmem:[%s13279_s25 + $0x704] ss:$16 sps:$4 sm:$0xff]  }
 0x202   : > { %2354 = vmatpush1.bf16.msra.mxu0 %v11513_v56  ;;  %2395 = vmatpush1.bf16.msra.mxu1 %v11516_v57  ;;  %v11590_v56 = vld [vmem:[%s13279_s25 + $0x70c] ss:$16 sps:$4 sm:$0xff]   ;;  %v2491_v57 = vpack.c.b16 %v2489_v53, %v2489_v53 }
 0x203   : > { %2355 = vmatprep.subr.bf16.mxu0 %v11521_v60  ;;  %2396 = vmatprep.subr.bf16.mxu1 %v11524_v61  ;;  %v11588_v60 = vld [vmem:[%s13279_s25 + $0x708] ss:$16 sps:$4 sm:$0xff]   ;;  %v11593_v61 = vld [vmem:[%s13279_s25 + $0x724] ss:$16 sps:$4 sm:$0xff]  }
 0x204   : > { %9879 = vmatprep.mubr.msk.bf16.mxu0 %vm952_vm1, %v2128_v62  ;;  %9880 = vmatprep.mubr.msk.bf16.mxu1 %vm952_vm1, %v2128_v62  ;;  %v11596_v62 = vld [vmem:[%s13279_s25 + $0x72c] ss:$16 sps:$4 sm:$0xff]  }
 0x206   : > { %2356 = vmatpush1.bf16.msra.mxu0 %v11519_v63  ;;  %2397 = vmatpush1.bf16.msra.mxu1 %v11522_v0  ;;  %v11591_v63 = vld [vmem:[%s13279_s25 + $0x720] ss:$16 sps:$4 sm:$0xff]   ;;  %v11594_v0 = vld [vmem:[%s13279_s25 + $0x728] ss:$16 sps:$4 sm:$0xff]  }
 0x207   : > { %2357 = vmatprep.subr.bf16.mxu0 %v11527_v1  ;;  %2398 = vmatprep.subr.bf16.mxu1 %v11530_v2  ;;  %v11599_v1 = vld [vmem:[%s13279_s25 + $0x744] ss:$16 sps:$4 sm:$0xff]   ;;  %v11602_v2 = vld [vmem:[%s13279_s25 + $0x74c] ss:$16 sps:$4 sm:$0xff]  }
 0x20a   : > { %2358 = vmatpush1.bf16.msra.mxu0 %v11525_v3  ;;  %2399 = vmatpush1.bf16.msra.mxu1 %v11528_v4  ;;  %v11597_v3 = vld [vmem:[%s13279_s25 + $0x740] ss:$16 sps:$4 sm:$0xff]   ;;  %v11600_v4 = vld [vmem:[%s13279_s25 + $0x748] ss:$16 sps:$4 sm:$0xff]  }
 0x20b   : > { %2359 = vmatprep.subr.bf16.mxu0 %v11533_v5  ;;  %2400 = vmatprep.subr.bf16.mxu1 %v11536_v6  ;;  %v11605_v5 = vld [vmem:[%s13279_s25 + $0x764] ss:$16 sps:$4 sm:$0xff]   ;;  %v11608_v6 = vld [vmem:[%s13279_s25 + $0x76c] ss:$16 sps:$4 sm:$0xff]  }
 0x20e   : > { %2360 = vmatpush1.bf16.msra.mxu0 %v11531_v7  ;;  %2401 = vmatpush1.bf16.msra.mxu1 %v11534_v8  ;;  %v11603_v7 = vld [vmem:[%s13279_s25 + $0x760] ss:$16 sps:$4 sm:$0xff]   ;;  %v11606_v8 = vld [vmem:[%s13279_s25 + $0x768] ss:$16 sps:$4 sm:$0xff]  }
 0x20f   : > { %2361 = vmatprep.subr.bf16.mxu0 %v11539_v9  ;;  %2402 = vmatprep.subr.bf16.mxu1 %v11542_v10  ;;  %v11611_v9 = vld [vmem:[%s13279_s25 + $0x784] ss:$16 sps:$4 sm:$0xff]   ;;  %v11614_v10 = vld [vmem:[%s13279_s25 + $0x78c] ss:$16 sps:$4 sm:$0xff]  }
 0x212   : > { %2362 = vmatpush1.bf16.msra.mxu0 %v11537_v11  ;;  %2403 = vmatpush1.bf16.msra.mxu1 %v11540_v12  ;;  %v11609_v11 = vld [vmem:[%s13279_s25 + $0x780] ss:$16 sps:$4 sm:$0xff]   ;;  %v11612_v12 = vld [vmem:[%s13279_s25 + $0x788] ss:$16 sps:$4 sm:$0xff]  }
 0x213   : > { %2363 = vmatprep.subr.bf16.mxu0 %v11545_v13  ;;  %2404 = vmatprep.subr.bf16.mxu1 %v11548_v14  ;;  %v11617_v13 = vld [vmem:[%s13279_s25 + $0x7a4] ss:$16 sps:$4 sm:$0xff]   ;;  %v11620_v14 = vld [vmem:[%s13279_s25 + $0x7ac] ss:$16 sps:$4 sm:$0xff]  }
 0x216   : > { %2364 = vmatpush1.bf16.msra.mxu0 %v11543_v15  ;;  %2405 = vmatpush1.bf16.msra.mxu1 %v11546_v16  ;;  %v11615_v15 = vld [vmem:[%s13279_s25 + $0x7a0] ss:$16 sps:$4 sm:$0xff]   ;;  %v11618_v16 = vld [vmem:[%s13279_s25 + $0x7a8] ss:$16 sps:$4 sm:$0xff]  }
 0x217   : > { %2365 = vmatprep.subr.bf16.mxu0 %v11551_v17  ;;  %2406 = vmatprep.subr.bf16.mxu1 %v11554_v18  ;;  %v11623_v17 = vld [vmem:[%s13279_s25 + $0x7c4] ss:$16 sps:$4 sm:$0xff]   ;;  %v11626_v18 = vld [vmem:[%s13279_s25 + $0x7cc] ss:$16 sps:$4 sm:$0xff]  }
 0x21a   : > { %2366 = vmatpush1.bf16.msra.mxu0 %v11549_v19  ;;  %2407 = vmatpush1.bf16.msra.mxu1 %v11552_v20  ;;  %v11621_v19 = vld [vmem:[%s13279_s25 + $0x7c0] ss:$16 sps:$4 sm:$0xff]   ;;  %v11624_v20 = vld [vmem:[%s13279_s25 + $0x7c8] ss:$16 sps:$4 sm:$0xff]  }
 0x21b   : > { %2367 = vmatprep.subr.bf16.mxu0 %v11557_v21  ;;  %2408 = vmatprep.subr.bf16.mxu1 %v11560_v22  ;;  %v11629_v21 = vld [vmem:[%s13279_s25 + $0x7e4] ss:$16 sps:$4 sm:$0xff]   ;;  %v11632_v22 = vld [vmem:[%s13279_s25 + $0x7ec] ss:$16 sps:$4 sm:$0xff]  }
 0x21e   : > { %2368 = vmatpush1.bf16.msra.mxu0 %v11555_v23  ;;  %2409 = vmatpush1.bf16.msra.mxu1 %v11558_v24  ;;  %v11627_v23 = vld [vmem:[%s13279_s25 + $0x7e0] ss:$16 sps:$4 sm:$0xff]   ;;  %v11630_v24 = vld [vmem:[%s13279_s25 + $0x7e8] ss:$16 sps:$4 sm:$0xff]  }
 0x21f   : > { %2369 = vmatprep.subr.bf16.mxu0 %v11563_v25  ;;  %2410 = vmatprep.subr.bf16.mxu1 %v11566_v26  ;;  %v11635_v25 = vld [vmem:[%s13279_s25 + $0x804] ss:$16 sps:$4 sm:$0xff]   ;;  %v11638_v26 = vld [vmem:[%s13279_s25 + $0x80c] ss:$16 sps:$4 sm:$0xff]  }
 0x222   : > { %2370 = vmatpush1.bf16.msra.mxu0 %v11561_v27  ;;  %2411 = vmatpush1.bf16.msra.mxu1 %v11564_v28  ;;  %v11633_v27 = vld [vmem:[%s13279_s25 + $0x800] ss:$16 sps:$4 sm:$0xff]   ;;  %v11636_v28 = vld [vmem:[%s13279_s25 + $0x808] ss:$16 sps:$4 sm:$0xff]  }
 0x223   : > { %2371 = vmatprep.subr.bf16.mxu0 %v11569_v29  ;;  %2412 = vmatprep.subr.bf16.mxu1 %v11572_v30  ;;  %v11641_v29 = vld [vmem:[%s13279_s25 + $0x824] ss:$16 sps:$4 sm:$0xff]   ;;  %v2484_v30 = vrot.slane %v13389_v54, 5 }
 0x226   : > { %2372 = vmatpush1.bf16.msra.mxu0 %v11567_v31  ;;  %2413 = vmatpush1.bf16.msra.mxu1 %v11570_v32  ;;  %v2485_v31 = vrot.slane %v13397_v59, 4  ;;  %v11644_v32 = vld [vmem:[%s13279_s25 + $0x82c] ss:$16 sps:$4 sm:$0xff]  }
 0x227   : > { %2373 = vmatprep.subr.bf16.mxu0 %v11575_v33  ;;  %2414 = vmatprep.subr.bf16.mxu1 %v11578_v36 }
 0x22a   : > { %2374 = vmatpush1.bf16.msra.mxu0 %v11573_v38  ;;  %2415 = vmatpush1.bf16.msra.mxu1 %v11576_v39  ;;  %v2851_v38 = vrot.slane %v13385_v52, 5 }
 0x22b   : > { %2716 = vmatprep.subr.bf16.mxu0 %v11581_v44  ;;  %2757 = vmatprep.subr.bf16.mxu1 %v11584_v45  ;;  %v2486_v44 = vsel %vm725_vm0, %v2485_v31, %v2484_v30  ;;  %v11704_v30 = vld [vmem:[%s13279_s25 + $0x96c] ss:$16 sps:$4 sm:$0xff]   ;;  %v2847_v31 = vrot.slane %v13389_v54, 6 }
 0x22d   : > { %2386 = vmatmul.mubr.bf16.vlgmr.msra.gmra.mrb[16].mxu0 %v2127_v46  ;;  %2427 = vmatmul.mubr.bf16.vlgmr.msra.gmra.mrb[16].mxu1 %v2127_v46 }
 0x22e   : > { %2717 = vmatpush1.bf16.msra.mxu0 %v11579_v47  ;;  %2758 = vmatpush1.bf16.msra.mxu1 %v11582_v51  ;;  %v11647_v47 = vld [vmem:[%s13279_s25 + $0x844] ss:$16 sps:$4 sm:$0xff]   ;;  %v11650_v51 = vld [vmem:[%s13279_s25 + $0x84c] ss:$16 sps:$4 sm:$0xff]  }
 0x22f   : > { %2718 = vmatprep.subr.bf16.mxu0 %v11587_v55  ;;  %2759 = vmatprep.subr.bf16.mxu1 %v11590_v56  ;;  %v2490_v55 = vpack.c.b16 %v2486_v44, %v2486_v44  ;;  %v2852_v56 = vsel %vm725_vm0, %v2851_v38, %v2850_v37  ;;  %v2848_v37 = vrot.slane %v13397_v59, 5  ;;  %v11707_v38 = vld [vmem:[%s13279_s25 + $0x984] ss:$16 sps:$4 sm:$0xff]   ;;  %v11705_v44 = vld [vmem:[%s13279_s25 + $0x980] ss:$16 sps:$4 sm:$0xff]  }
 0x230   : > { %9969 = vmatprep.mubr.msk.bf16.mxu0 %vm952_vm1, %v2491_v57  ;;  %9970 = vmatprep.mubr.msk.bf16.mxu1 %vm952_vm1, %v2491_v57  ;;  %v11645_v57 = vld [vmem:[%s13279_s25 + $0x840] ss:$16 sps:$4 sm:$0xff]  }
 0x232   : > { %2719 = vmatpush1.bf16.msra.mxu0 %v11585_v58  ;;  %2760 = vmatpush1.bf16.msra.mxu1 %v11588_v60  ;;  %v11648_v58 = vld [vmem:[%s13279_s25 + $0x848] ss:$16 sps:$4 sm:$0xff]   ;;  %v11653_v60 = vld [vmem:[%s13279_s25 + $0x864] ss:$16 sps:$4 sm:$0xff]  }
 0x233   : > { %2720 = vmatprep.subr.bf16.mxu0 %v11593_v61  ;;  %2761 = vmatprep.subr.bf16.mxu1 %v11596_v62  ;;  %v11656_v61 = vld [vmem:[%s13279_s25 + $0x86c] ss:$16 sps:$4 sm:$0xff]   ;;  %v11651_v62 = vld [vmem:[%s13279_s25 + $0x860] ss:$16 sps:$4 sm:$0xff]  }
 0x236   : > { %2721 = vmatpush1.bf16.msra.mxu0 %v11591_v63  ;;  %2762 = vmatpush1.bf16.msra.mxu1 %v11594_v0  ;;  %v2854_v63 = vpack.c.b16 %v2852_v56, %v2852_v56  ;;  %v11654_v0 = vld [vmem:[%s13279_s25 + $0x868] ss:$16 sps:$4 sm:$0xff]  }
 0x237   : > { %2722 = vmatprep.subr.bf16.mxu0 %v11599_v1  ;;  %2763 = vmatprep.subr.bf16.mxu1 %v11602_v2  ;;  %v11659_v1 = vld [vmem:[%s13279_s25 + $0x884] ss:$16 sps:$4 sm:$0xff]   ;;  %v11662_v2 = vld [vmem:[%s13279_s25 + $0x88c] ss:$16 sps:$4 sm:$0xff]  }
 0x23a   : > { %2723 = vmatpush1.bf16.msra.mxu0 %v11597_v3  ;;  %2764 = vmatpush1.bf16.msra.mxu1 %v11600_v4  ;;  %v11657_v3 = vld [vmem:[%s13279_s25 + $0x880] ss:$16 sps:$4 sm:$0xff]   ;;  %v11660_v4 = vld [vmem:[%s13279_s25 + $0x888] ss:$16 sps:$4 sm:$0xff]  }
 0x23b   : > { %2724 = vmatprep.subr.bf16.mxu0 %v11605_v5  ;;  %2765 = vmatprep.subr.bf16.mxu1 %v11608_v6  ;;  %v11665_v5 = vld [vmem:[%s13279_s25 + $0x8a4] ss:$16 sps:$4 sm:$0xff]   ;;  %v11668_v6 = vld [vmem:[%s13279_s25 + $0x8ac] ss:$16 sps:$4 sm:$0xff]  }
 0x23e   : > { %2725 = vmatpush1.bf16.msra.mxu0 %v11603_v7  ;;  %2766 = vmatpush1.bf16.msra.mxu1 %v11606_v8  ;;  %v11663_v7 = vld [vmem:[%s13279_s25 + $0x8a0] ss:$16 sps:$4 sm:$0xff]   ;;  %v11666_v8 = vld [vmem:[%s13279_s25 + $0x8a8] ss:$16 sps:$4 sm:$0xff]  }
 0x23f   : > { %2726 = vmatprep.subr.bf16.mxu0 %v11611_v9  ;;  %2767 = vmatprep.subr.bf16.mxu1 %v11614_v10  ;;  %v11671_v9 = vld [vmem:[%s13279_s25 + $0x8c4] ss:$16 sps:$4 sm:$0xff]   ;;  %v11674_v10 = vld [vmem:[%s13279_s25 + $0x8cc] ss:$16 sps:$4 sm:$0xff]  }
 0x242   : > { %2727 = vmatpush1.bf16.msra.mxu0 %v11609_v11  ;;  %2768 = vmatpush1.bf16.msra.mxu1 %v11612_v12  ;;  %v11669_v11 = vld [vmem:[%s13279_s25 + $0x8c0] ss:$16 sps:$4 sm:$0xff]   ;;  %v11672_v12 = vld [vmem:[%s13279_s25 + $0x8c8] ss:$16 sps:$4 sm:$0xff]  }
 0x243   : > { %2728 = vmatprep.subr.bf16.mxu0 %v11617_v13  ;;  %2769 = vmatprep.subr.bf16.mxu1 %v11620_v14  ;;  %v11677_v13 = vld [vmem:[%s13279_s25 + $0x8e4] ss:$16 sps:$4 sm:$0xff]   ;;  %v11680_v14 = vld [vmem:[%s13279_s25 + $0x8ec] ss:$16 sps:$4 sm:$0xff]  }
 0x246   : > { %2729 = vmatpush1.bf16.msra.mxu0 %v11615_v15  ;;  %2770 = vmatpush1.bf16.msra.mxu1 %v11618_v16  ;;  %v11675_v15 = vld [vmem:[%s13279_s25 + $0x8e0] ss:$16 sps:$4 sm:$0xff]   ;;  %v11678_v16 = vld [vmem:[%s13279_s25 + $0x8e8] ss:$16 sps:$4 sm:$0xff]  }
 0x247   : > { %2730 = vmatprep.subr.bf16.mxu0 %v11623_v17  ;;  %2771 = vmatprep.subr.bf16.mxu1 %v11626_v18  ;;  %v11683_v17 = vld [vmem:[%s13279_s25 + $0x904] ss:$16 sps:$4 sm:$0xff]   ;;  %v11686_v18 = vld [vmem:[%s13279_s25 + $0x90c] ss:$16 sps:$4 sm:$0xff]  }
 0x24a   : > { %2731 = vmatpush1.bf16.msra.mxu0 %v11621_v19  ;;  %2772 = vmatpush1.bf16.msra.mxu1 %v11624_v20  ;;  %v11681_v19 = vld [vmem:[%s13279_s25 + $0x900] ss:$16 sps:$4 sm:$0xff]   ;;  %v11684_v20 = vld [vmem:[%s13279_s25 + $0x908] ss:$16 sps:$4 sm:$0xff]  }
 0x24b   : > { %2732 = vmatprep.subr.bf16.mxu0 %v11629_v21  ;;  %2773 = vmatprep.subr.bf16.mxu1 %v11632_v22  ;;  %v11689_v21 = vld [vmem:[%s13279_s25 + $0x924] ss:$16 sps:$4 sm:$0xff]   ;;  %v11692_v22 = vld [vmem:[%s13279_s25 + $0x92c] ss:$16 sps:$4 sm:$0xff]  }
 0x24e   : > { %2733 = vmatpush1.bf16.msra.mxu0 %v11627_v23  ;;  %2774 = vmatpush1.bf16.msra.mxu1 %v11630_v24  ;;  %v11687_v23 = vld [vmem:[%s13279_s25 + $0x920] ss:$16 sps:$4 sm:$0xff]   ;;  %v11690_v24 = vld [vmem:[%s13279_s25 + $0x928] ss:$16 sps:$4 sm:$0xff]  }
 0x24f   : > { %2734 = vmatprep.subr.bf16.mxu0 %v11635_v25  ;;  %2775 = vmatprep.subr.bf16.mxu1 %v11638_v26  ;;  %v11695_v25 = vld [vmem:[%s13279_s25 + $0x944] ss:$16 sps:$4 sm:$0xff]   ;;  %v11698_v26 = vld [vmem:[%s13279_s25 + $0x94c] ss:$16 sps:$4 sm:$0xff]  }
 0x250   : > { %v13664_v33 = vpop.f32.mrb[0].mxu0  ;;  %v13667_v35 = vpop.f32.mrb[0].mxu1 }
 0x251   : > { %v13669_v36 = vpop.f32.mrb[1].mxu0  ;;  %v13673_v39 = vpop.f32.mrb[1].mxu1 }
 0x252   : > { %v994_v40 = vpop.f32.mrb[2].mxu0  ;;  %2735 = vmatpush1.bf16.msra.mxu0 %v11633_v27  ;;  %2776 = vmatpush1.bf16.msra.mxu1 %v11636_v28  ;;  %v1035_v45 = vpop.f32.mrb[2].mxu1  ;;  %v11693_v27 = vld [vmem:[%s13279_s25 + $0x940] ss:$16 sps:$4 sm:$0xff]   ;;  %v11696_v28 = vld [vmem:[%s13279_s25 + $0x948] ss:$16 sps:$4 sm:$0xff]  }
 0x253   : > { %v995_v46 = vpop.f32.mrb[3].mxu0  ;;  %2736 = vmatprep.subr.bf16.mxu0 %v11641_v29  ;;  %2777 = vmatprep.subr.bf16.mxu1 %v11644_v32  ;;  %v1036_v53 = vpop.f32.mrb[3].mxu1  ;;  %v11701_v29 = vld [vmem:[%s13279_s25 + $0x964] ss:$16 sps:$4 sm:$0xff]   ;;  %v11699_v32 = vld [vmem:[%s13279_s25 + $0x960] ss:$16 sps:$4 sm:$0xff]  }
 0x254   : > { %v11710_v40 = vld [vmem:[%s13279_s25 + $0x98c] ss:$16 sps:$4 sm:$0xff]   ;;  %v11708_v45 = vld [vmem:[%s13279_s25 + $0x988] ss:$16 sps:$4 sm:$0xff]  }
 0x256   : > { %2737 = vmatpush1.bf16.msra.mxu0 %v11639_v34  ;;  %2778 = vmatpush1.bf16.msra.mxu1 %v11642_v42  ;;  %v11702_v34 = vld [vmem:[%s13279_s25 + $0x968] ss:$16 sps:$4 sm:$0xff]  }
 0x257   : > { %3079 = vmatprep.subr.bf16.mxu0 %v11647_v47  ;;  %3120 = vmatprep.subr.bf16.mxu1 %v11650_v51  ;;  %v3213_v47 = vrot.slane %v13377_v48, 7  ;;  %v2849_v48 = vsel %vm725_vm0, %v2848_v37, %v2847_v31  ;;  %v11761_v31 = vld [vmem:[%s13279_s25 + $0xaa4] ss:$16 sps:$4 sm:$0xff]   ;;  %v11762_v37 = vld [vmem:[%s13279_s25 + $0xaa8] ss:$16 sps:$4 sm:$0xff]  }
 0x259   : > { %2749 = vmatmul.mubr.bf16.vlgmr.msra.gmra.mrb[20].mxu0 %v2490_v55  ;;  %2790 = vmatmul.mubr.bf16.vlgmr.msra.gmra.mrb[20].mxu1 %v2490_v55 }
 0x25a   : > { %3080 = vmatpush1.bf16.msra.mxu0 %v11645_v57  ;;  %3121 = vmatpush1.bf16.msra.mxu1 %v11648_v58  ;;  %v3214_v57 = vrot.slane %v13385_v52, 6 }
 0x25b   : > { %3081 = vmatprep.subr.bf16.mxu0 %v11653_v60  ;;  %3122 = vmatprep.subr.bf16.mxu1 %v11656_v61 }
 0x25c   : > { %10059 = vmatprep.mubr.msk.bf16.mxu0 %vm952_vm1, %v2854_v63  ;;  %10060 = vmatprep.mubr.msk.bf16.mxu1 %vm952_vm1, %v2854_v63  ;;  %v11716_v63 = vld [vmem:[%s13279_s25 + $0x9ac] ss:$16 sps:$4 sm:$0xff]  }
 0x25e   : > { %3082 = vmatpush1.bf16.msra.mxu0 %v11651_v62  ;;  %3123 = vmatpush1.bf16.msra.mxu1 %v11654_v0  ;;  %v11713_v62 = vld [vmem:[%s13279_s25 + $0x9a4] ss:$16 sps:$4 sm:$0xff]   ;;  %v11714_v0 = vld [vmem:[%s13279_s25 + $0x9a8] ss:$16 sps:$4 sm:$0xff]  }
 0x25f   : > { %3083 = vmatprep.subr.bf16.mxu0 %v11659_v1  ;;  %3124 = vmatprep.subr.bf16.mxu1 %v11662_v2  ;;  %v2853_v1 = vpack.c.b16 %v2849_v48, %v2849_v48  ;;  %v3215_v2 = vsel %vm725_vm0, %v3214_v57, %v3213_v47  ;;  %v3211_v47 = vrot.slane %v13397_v59, 6 }
 0x262   : > { %3084 = vmatpush1.bf16.msra.mxu0 %v11657_v3  ;;  %3125 = vmatpush1.bf16.msra.mxu1 %v11660_v4  ;;  %v11722_v3 = vld [vmem:[%s13279_s25 + $0x9cc] ss:$16 sps:$4 sm:$0xff]   ;;  %v3217_v4 = vpack.c.b16 %v3215_v2, %v3215_v2 }
 0x263   : > { %3085 = vmatprep.subr.bf16.mxu0 %v11665_v5  ;;  %3126 = vmatprep.subr.bf16.mxu1 %v11668_v6  ;;  %v11717_v5 = vld [vmem:[%s13279_s25 + $0x9c0] ss:$16 sps:$4 sm:$0xff]   ;;  %v11720_v6 = vld [vmem:[%s13279_s25 + $0x9c8] ss:$16 sps:$4 sm:$0xff]  }
 0x266   : > { %3086 = vmatpush1.bf16.msra.mxu0 %v11663_v7  ;;  %3127 = vmatpush1.bf16.msra.mxu1 %v11666_v8  ;;  %v11725_v7 = vld [vmem:[%s13279_s25 + $0x9e4] ss:$16 sps:$4 sm:$0xff]   ;;  %v11728_v8 = vld [vmem:[%s13279_s25 + $0x9ec] ss:$16 sps:$4 sm:$0xff]  }
 0x267   : > { %3087 = vmatprep.subr.bf16.mxu0 %v11671_v9  ;;  %3128 = vmatprep.subr.bf16.mxu1 %v11674_v10  ;;  %v11723_v9 = vld [vmem:[%s13279_s25 + $0x9e0] ss:$16 sps:$4 sm:$0xff]   ;;  %v11726_v10 = vld [vmem:[%s13279_s25 + $0x9e8] ss:$16 sps:$4 sm:$0xff]  }
 0x26a   : > { %3088 = vmatpush1.bf16.msra.mxu0 %v11669_v11  ;;  %3129 = vmatpush1.bf16.msra.mxu1 %v11672_v12  ;;  %v11731_v11 = vld [vmem:[%s13279_s25 + $0xa04] ss:$16 sps:$4 sm:$0xff]   ;;  %v11734_v12 = vld [vmem:[%s13279_s25 + $0xa0c] ss:$16 sps:$4 sm:$0xff]  }
 0x26b   : > { %3089 = vmatprep.subr.bf16.mxu0 %v11677_v13  ;;  %3130 = vmatprep.subr.bf16.mxu1 %v11680_v14  ;;  %v11729_v13 = vld [vmem:[%s13279_s25 + $0xa00] ss:$16 sps:$4 sm:$0xff]   ;;  %v11732_v14 = vld [vmem:[%s13279_s25 + $0xa08] ss:$16 sps:$4 sm:$0xff]  }
 0x26e   : > { %3090 = vmatpush1.bf16.msra.mxu0 %v11675_v15  ;;  %3131 = vmatpush1.bf16.msra.mxu1 %v11678_v16  ;;  %v11737_v15 = vld [vmem:[%s13279_s25 + $0xa24] ss:$16 sps:$4 sm:$0xff]   ;;  %v11740_v16 = vld [vmem:[%s13279_s25 + $0xa2c] ss:$16 sps:$4 sm:$0xff]  }
 0x26f   : > { %3091 = vmatprep.subr.bf16.mxu0 %v11683_v17  ;;  %3132 = vmatprep.subr.bf16.mxu1 %v11686_v18  ;;  %v11735_v17 = vld [vmem:[%s13279_s25 + $0xa20] ss:$16 sps:$4 sm:$0xff]   ;;  %v11738_v18 = vld [vmem:[%s13279_s25 + $0xa28] ss:$16 sps:$4 sm:$0xff]  }
 0x272   : > { %3092 = vmatpush1.bf16.msra.mxu0 %v11681_v19  ;;  %3133 = vmatpush1.bf16.msra.mxu1 %v11684_v20  ;;  %v11743_v19 = vld [vmem:[%s13279_s25 + $0xa44] ss:$16 sps:$4 sm:$0xff]   ;;  %v11746_v20 = vld [vmem:[%s13279_s25 + $0xa4c] ss:$16 sps:$4 sm:$0xff]  }
 0x273   : > { %3093 = vmatprep.subr.bf16.mxu0 %v11689_v21  ;;  %3134 = vmatprep.subr.bf16.mxu1 %v11692_v22  ;;  %v11741_v21 = vld [vmem:[%s13279_s25 + $0xa40] ss:$16 sps:$4 sm:$0xff]   ;;  %v11744_v22 = vld [vmem:[%s13279_s25 + $0xa48] ss:$16 sps:$4 sm:$0xff]  }
 0x276   : > { %3094 = vmatpush1.bf16.msra.mxu0 %v11687_v23  ;;  %3135 = vmatpush1.bf16.msra.mxu1 %v11690_v24  ;;  %v11749_v23 = vld [vmem:[%s13279_s25 + $0xa64] ss:$16 sps:$4 sm:$0xff]   ;;  %v11752_v24 = vld [vmem:[%s13279_s25 + $0xa6c] ss:$16 sps:$4 sm:$0xff]  }
 0x277   : > { %3095 = vmatprep.subr.bf16.mxu0 %v11695_v25  ;;  %3136 = vmatprep.subr.bf16.mxu1 %v11698_v26  ;;  %v11747_v25 = vld [vmem:[%s13279_s25 + $0xa60] ss:$16 sps:$4 sm:$0xff]   ;;  %v11750_v26 = vld [vmem:[%s13279_s25 + $0xa68] ss:$16 sps:$4 sm:$0xff]  }
 0x27a   : > { %3096 = vmatpush1.bf16.msra.mxu0 %v11693_v27  ;;  %3137 = vmatpush1.bf16.msra.mxu1 %v11696_v28  ;;  %v11755_v27 = vld [vmem:[%s13279_s25 + $0xa84] ss:$16 sps:$4 sm:$0xff]   ;;  %v11758_v28 = vld [vmem:[%s13279_s25 + $0xa8c] ss:$16 sps:$4 sm:$0xff]  }
 0x27b   : > { %3097 = vmatprep.subr.bf16.mxu0 %v11701_v29  ;;  %3138 = vmatprep.subr.bf16.mxu1 %v11704_v30  ;;  %v11753_v29 = vld [vmem:[%s13279_s25 + $0xa80] ss:$16 sps:$4 sm:$0xff]   ;;  %v11756_v30 = vld [vmem:[%s13279_s25 + $0xa88] ss:$16 sps:$4 sm:$0xff]  }
 0x27c   : > { %v1302_v42 = vpop.f32.mrb[4].mxu0  ;;  %v1343_v46 = vpop.f32.mrb[4].mxu1 }
 0x27d   : > { %v13728_v51 = vadd.f32 %v1302_v42, %v13664_v33  ;;  %v1304_v53 = vpop.f32.mrb[5].mxu0  ;;  %v13731_v55 = vadd.f32 %v1343_v46, %v13667_v35  ;;  %v1345_v56 = vpop.f32.mrb[5].mxu1  ;;  %v13783_v42 = vunpack.c.h.b16 %v13364_v43  ;;  %v3210_v46 = vrot.slane %v13389_v54, 7 }
 0x27e   : > { %v13735_v58 = vadd.f32 %v1304_v53, %v13669_v36  ;;  %v1306_v60 = vpop.f32.mrb[6].mxu0  ;;  %3098 = vmatpush1.bf16.msra.mxu0 %v11699_v32  ;;  %3139 = vmatpush1.bf16.msra.mxu1 %v11702_v34  ;;  %v13739_v33 = vadd.f32 %v1345_v56, %v13673_v39  ;;  %v1347_v61 = vpop.f32.mrb[6].mxu1  ;;  %v11711_v36 = vld [vmem:[%s13279_s25 + $0x9a0] ss:$16 sps:$4 sm:$0xff]   ;;  %v11719_v39 = vld [vmem:[%s13279_s25 + $0x9c4] ss:$16 sps:$4 sm:$0xff]   ;;  %v13798_v54 = vunpack.c.h.b16 %v13359_v41 }
 0x27f   : > { %v1307_v35 = vpop.f32.mrb[7].mxu0  ;;  %3099 = vmatprep.subr.bf16.mxu0 %v11707_v38  ;;  %3140 = vmatprep.subr.bf16.mxu1 %v11710_v40  ;;  %v1348_v52 = vpop.f32.mrb[7].mxu1  ;;  %v11764_v32 = vld [vmem:[%s13279_s25 + $0xaac] ss:$16 sps:$4 sm:$0xff]   ;;  %v11759_v34 = vld [vmem:[%s13279_s25 + $0xaa0] ss:$16 sps:$4 sm:$0xff]  }
 0x280   : > { %v11767_v38 = vld [vmem:[%s13279_s25 + $0xac4] ss:$16 sps:$4 sm:$0xff]   ;;  %v11770_v40 = vld [vmem:[%s13279_s25 + $0xacc] ss:$16 sps:$4 sm:$0xff]   ;;  %v3579_v59 = vrot.slane %v13783_v42, 7 }
 0x281   : > { %v11773_v53 = vld [vmem:[%s13279_s25 + $0xae4] ss:$16 sps:$4 sm:$0xff]   ;;  %v11776_v56 = vld [vmem:[%s13279_s25 + $0xaec] ss:$16 sps:$4 sm:$0xff]   ;;  %v11774_v52 = vld [vmem:[%s13279_s25 + $0xae8] ss:$16 sps:$4 sm:$0xff]  }
 0x282   : > { %3100 = vmatpush1.bf16.msra.mxu0 %v11705_v44  ;;  %3141 = vmatpush1.bf16.msra.mxu1 %v11708_v45  ;;  %v11765_v44 = vld [vmem:[%s13279_s25 + $0xac0] ss:$16 sps:$4 sm:$0xff]   ;;  %v11768_v45 = vld [vmem:[%s13279_s25 + $0xac8] ss:$16 sps:$4 sm:$0xff]  }
 0x283   : > { %3442 = vmatprep.subr.bf16.mxu0 %v11713_v62  ;;  %3483 = vmatprep.subr.bf16.mxu1 %v11716_v63 }
 0x285   : > { %3112 = vmatmul.mubr.bf16.vlgmr.msra.gmra.mrb[24].mxu0 %v2853_v1  ;;  %3153 = vmatmul.mubr.bf16.vlgmr.msra.gmra.mrb[24].mxu1 %v2853_v1  ;;  %v11782_v1 = vld [vmem:[%s13279_s25 + $0xb0c] ss:$16 sps:$4 sm:$0xff]  }
 0x286   : > { %3443 = vmatpush1.bf16.msra.mxu0 %v11711_v36  ;;  %3484 = vmatpush1.bf16.msra.mxu1 %v11714_v0  ;;  %v3212_v36 = vsel %vm725_vm0, %v3211_v47, %v3210_v46  ;;  %v11833_v46 = vld [vmem:[%s13279_s25 + $0xc24] ss:$16 sps:$4 sm:$0xff]   ;;  %v11836_v47 = vld [vmem:[%s13279_s25 + $0xc2c] ss:$16 sps:$4 sm:$0xff]  }
 0x287   : > { %3444 = vmatprep.subr.bf16.mxu0 %v11719_v39  ;;  %3485 = vmatprep.subr.bf16.mxu1 %v11722_v3  ;;  %v3580_v39 = vsel %vm725_vm0, %v3579_v59, %v13798_v54  ;;  %v11777_v3 = vld [vmem:[%s13279_s25 + $0xb00] ss:$16 sps:$4 sm:$0xff]  }
 0x288   : > { %10149 = vmatprep.mubr.msk.bf16.mxu0 %vm952_vm1, %v3217_v4  ;;  %10150 = vmatprep.mubr.msk.bf16.mxu1 %vm952_vm1, %v3217_v4  ;;  %v11780_v4 = vld [vmem:[%s13279_s25 + $0xb08] ss:$16 sps:$4 sm:$0xff]  }
 0x28a   : > { %3445 = vmatpush1.bf16.msra.mxu0 %v11717_v5  ;;  %3486 = vmatpush1.bf16.msra.mxu1 %v11720_v6  ;;  %v11785_v5 = vld [vmem:[%s13279_s25 + $0xb24] ss:$16 sps:$4 sm:$0xff]   ;;  %v11788_v6 = vld [vmem:[%s13279_s25 + $0xb2c] ss:$16 sps:$4 sm:$0xff]  }
 0x28b   : > { %3446 = vmatprep.subr.bf16.mxu0 %v11725_v7  ;;  %3487 = vmatprep.subr.bf16.mxu1 %v11728_v8  ;;  %v3582_v7 = vpack.c.b16 %v3580_v39, %v3580_v39  ;;  %v11783_v8 = vld [vmem:[%s13279_s25 + $0xb20] ss:$16 sps:$4 sm:$0xff]   ;;  %v11848_v39 = vld [vmem:[%s13279_s25 + $0xc6c] ss:$16 sps:$4 sm:$0xff]  }
 0x28e   : > { %3447 = vmatpush1.bf16.msra.mxu0 %v11723_v9  ;;  %3488 = vmatpush1.bf16.msra.mxu1 %v11726_v10  ;;  %v11786_v9 = vld [vmem:[%s13279_s25 + $0xb28] ss:$16 sps:$4 sm:$0xff]   ;;  %v11791_v10 = vld [vmem:[%s13279_s25 + $0xb44] ss:$16 sps:$4 sm:$0xff]  }
 0x28f   : > { %3448 = vmatprep.subr.bf16.mxu0 %v11731_v11  ;;  %3489 = vmatprep.subr.bf16.mxu1 %v11734_v12  ;;  %v11794_v11 = vld [vmem:[%s13279_s25 + $0xb4c] ss:$16 sps:$4 sm:$0xff]   ;;  %v11789_v12 = vld [vmem:[%s13279_s25 + $0xb40] ss:$16 sps:$4 sm:$0xff]  }
 0x292   : > { %3449 = vmatpush1.bf16.msra.mxu0 %v11729_v13  ;;  %3490 = vmatpush1.bf16.msra.mxu1 %v11732_v14  ;;  %v11792_v13 = vld [vmem:[%s13279_s25 + $0xb48] ss:$16 sps:$4 sm:$0xff]   ;;  %v11797_v14 = vld [vmem:[%s13279_s25 + $0xb64] ss:$16 sps:$4 sm:$0xff]  }
 0x293   : > { %3450 = vmatprep.subr.bf16.mxu0 %v11737_v15  ;;  %3491 = vmatprep.subr.bf16.mxu1 %v11740_v16  ;;  %v11800_v15 = vld [vmem:[%s13279_s25 + $0xb6c] ss:$16 sps:$4 sm:$0xff]   ;;  %v11795_v16 = vld [vmem:[%s13279_s25 + $0xb60] ss:$16 sps:$4 sm:$0xff]  }
 0x296   : > { %3451 = vmatpush1.bf16.msra.mxu0 %v11735_v17  ;;  %3492 = vmatpush1.bf16.msra.mxu1 %v11738_v18  ;;  %v11798_v17 = vld [vmem:[%s13279_s25 + $0xb68] ss:$16 sps:$4 sm:$0xff]   ;;  %v11803_v18 = vld [vmem:[%s13279_s25 + $0xb84] ss:$16 sps:$4 sm:$0xff]  }
 0x297   : > { %3452 = vmatprep.subr.bf16.mxu0 %v11743_v19  ;;  %3493 = vmatprep.subr.bf16.mxu1 %v11746_v20  ;;  %v11806_v19 = vld [vmem:[%s13279_s25 + $0xb8c] ss:$16 sps:$4 sm:$0xff]   ;;  %v11801_v20 = vld [vmem:[%s13279_s25 + $0xb80] ss:$16 sps:$4 sm:$0xff]  }
 0x29a   : > { %3453 = vmatpush1.bf16.msra.mxu0 %v11741_v21  ;;  %3494 = vmatpush1.bf16.msra.mxu1 %v11744_v22  ;;  %v11804_v21 = vld [vmem:[%s13279_s25 + $0xb88] ss:$16 sps:$4 sm:$0xff]   ;;  %v11809_v22 = vld [vmem:[%s13279_s25 + $0xba4] ss:$16 sps:$4 sm:$0xff]  }
 0x29b   : > { %3454 = vmatprep.subr.bf16.mxu0 %v11749_v23  ;;  %3495 = vmatprep.subr.bf16.mxu1 %v11752_v24  ;;  %v11812_v23 = vld [vmem:[%s13279_s25 + $0xbac] ss:$16 sps:$4 sm:$0xff]   ;;  %v11807_v24 = vld [vmem:[%s13279_s25 + $0xba0] ss:$16 sps:$4 sm:$0xff]  }
 0x29e   : > { %3455 = vmatpush1.bf16.msra.mxu0 %v11747_v25  ;;  %3496 = vmatpush1.bf16.msra.mxu1 %v11750_v26  ;;  %v11810_v25 = vld [vmem:[%s13279_s25 + $0xba8] ss:$16 sps:$4 sm:$0xff]   ;;  %v11815_v26 = vld [vmem:[%s13279_s25 + $0xbc4] ss:$16 sps:$4 sm:$0xff]  }
 0x29f   : > { %3456 = vmatprep.subr.bf16.mxu0 %v11755_v27  ;;  %3497 = vmatprep.subr.bf16.mxu1 %v11758_v28  ;;  %v11818_v27 = vld [vmem:[%s13279_s25 + $0xbcc] ss:$16 sps:$4 sm:$0xff]   ;;  %v11813_v28 = vld [vmem:[%s13279_s25 + $0xbc0] ss:$16 sps:$4 sm:$0xff]  }
 0x2a2   : > { %3457 = vmatpush1.bf16.msra.mxu0 %v11753_v29  ;;  %3498 = vmatpush1.bf16.msra.mxu1 %v11756_v30  ;;  %v11816_v29 = vld [vmem:[%s13279_s25 + $0xbc8] ss:$16 sps:$4 sm:$0xff]   ;;  %v11821_v30 = vld [vmem:[%s13279_s25 + $0xbe4] ss:$16 sps:$4 sm:$0xff]  }
 0x2a3   : > { %3458 = vmatprep.subr.bf16.mxu0 %v11761_v31  ;;  %3499 = vmatprep.subr.bf16.mxu1 %v11764_v32  ;;  %v11824_v31 = vld [vmem:[%s13279_s25 + $0xbec] ss:$16 sps:$4 sm:$0xff]   ;;  %v11819_v32 = vld [vmem:[%s13279_s25 + $0xbe0] ss:$16 sps:$4 sm:$0xff]  }
 0x2a6   : > { %3459 = vmatpush1.bf16.msra.mxu0 %v11759_v34  ;;  %3500 = vmatpush1.bf16.msra.mxu1 %v11762_v37  ;;  %v11822_v34 = vld [vmem:[%s13279_s25 + $0xbe8] ss:$16 sps:$4 sm:$0xff]   ;;  %v11827_v37 = vld [vmem:[%s13279_s25 + $0xc04] ss:$16 sps:$4 sm:$0xff]  }
 0x2a7   : > { %3460 = vmatprep.subr.bf16.mxu0 %v11767_v38  ;;  %3501 = vmatprep.subr.bf16.mxu1 %v11770_v40  ;;  %v11830_v38 = vld [vmem:[%s13279_s25 + $0xc0c] ss:$16 sps:$4 sm:$0xff]   ;;  %v11825_v40 = vld [vmem:[%s13279_s25 + $0xc00] ss:$16 sps:$4 sm:$0xff]  }
 0x2a8   : > { %v1661_v57 = vpop.f32.mrb[8].mxu0  ;;  %v1702_v60 = vpop.f32.mrb[8].mxu1 }
 0x2a9   : > { %v13792_v48 = vadd.f32 %v1661_v57, %v13728_v51  ;;  %v13795_v43 = vadd.f32 %v1702_v60, %v13731_v55  ;;  %v1663_v61 = vpop.f32.mrb[9].mxu0  ;;  %v1704_v35 = vpop.f32.mrb[9].mxu1  ;;  %v11771_v55 = vld [vmem:[%s13279_s25 + $0xae0] ss:$16 sps:$4 sm:$0xff]   ;;  %v13858_v57 = vunpack.c.h.b16 %v13379_v49 }
 0x2aa   : > { %v13802_v62 = vadd.f32 %v1663_v61, %v13735_v58  ;;  %v13805_v63 = vadd.f32 %v1704_v35, %v13739_v33  ;;  %v1665_v51 = vpop.f32.mrb[10].mxu0  ;;  %3461 = vmatpush1.bf16.msra.mxu0 %v11765_v44  ;;  %3502 = vmatpush1.bf16.msra.mxu1 %v11768_v45  ;;  %v1706_v41 = vpop.f32.mrb[10].mxu1  ;;  %v11779_v58 = vld [vmem:[%s13279_s25 + $0xb04] ss:$16 sps:$4 sm:$0xff]   ;;  %v3216_v33 = vpack.c.b16 %v3212_v36, %v3212_v36  ;;  %v11828_v44 = vld [vmem:[%s13279_s25 + $0xc08] ss:$16 sps:$4 sm:$0xff]   ;;  %v13851_v45 = vunpack.c.h.b16 %v13381_v50 }
 0x2ab   : > { %v1666_v0 = vpop.f32.mrb[11].mxu0  ;;  %3462 = vmatprep.subr.bf16.mxu0 %v11773_v53  ;;  %3503 = vmatprep.subr.bf16.mxu1 %v11776_v56  ;;  %v1707_v2 = vpop.f32.mrb[11].mxu1  ;;  %v11831_v53 = vld [vmem:[%s13279_s25 + $0xc20] ss:$16 sps:$4 sm:$0xff]   ;;  %v11834_v56 = vld [vmem:[%s13279_s25 + $0xc28] ss:$16 sps:$4 sm:$0xff]  }
 0x2ac   : > { %v3577_v60 = vrot.slane %v13851_v45, 7  ;;  %v11839_v61 = vld [vmem:[%s13279_s25 + $0xc44] ss:$16 sps:$4 sm:$0xff]   ;;  %v11842_v50 = vld [vmem:[%s13279_s25 + $0xc4c] ss:$16 sps:$4 sm:$0xff]   ;;  %v3940_v36 = vrot.slane %v13798_v54, 1 }
 0x2ae   : > { %3463 = vmatpush1.bf16.msra.mxu0 %v11771_v55  ;;  %3504 = vmatpush1.bf16.msra.mxu1 %v11774_v52 }
 0x2af   : > { %3807 = vmatprep.subr.bf16.mxu0 %v11779_v58  ;;  %3848 = vmatprep.subr.bf16.mxu1 %v11782_v1  ;;  %v3578_v1 = vsel %vm725_vm0, %v3577_v60, %v13858_v57  ;;  %v11897_v60 = vld [vmem:[%s13279_s25 + $0xd80] ss:$16 sps:$4 sm:$0xff]  }
 0x2b1   : > { %3475 = vmatmul.mubr.bf16.vlgmr.msra.gmra.mrb[28].mxu0 %v3216_v33  ;;  %3516 = vmatmul.mubr.bf16.vlgmr.msra.gmra.mrb[28].mxu1 %v3216_v33 }
 0x2b2   : > { %3808 = vmatpush1.bf16.msra.mxu0 %v11777_v3  ;;  %3849 = vmatpush1.bf16.msra.mxu1 %v11780_v4  ;;  %v3581_v3 = vpack.c.b16 %v3578_v1, %v3578_v1  ;;  %v3941_v4 = vsel %vm725_vm0, %v13783_v42, %v3940_v36  ;;  %v4302_v1 = vrot.slane %v13798_v54, 2 }
 0x2b3   : > { %3809 = vmatprep.subr.bf16.mxu0 %v11785_v5  ;;  %3850 = vmatprep.subr.bf16.mxu1 %v11788_v6  ;;  %v11843_v5 = vld [vmem:[%s13279_s25 + $0xc60] ss:$16 sps:$4 sm:$0xff]   ;;  %v11846_v6 = vld [vmem:[%s13279_s25 + $0xc68] ss:$16 sps:$4 sm:$0xff]  }
 0x2b4   : > { %10239 = vmatprep.mubr.msk.bf16.mxu0 %vm952_vm1, %v3582_v7  ;;  %10240 = vmatprep.mubr.msk.bf16.mxu1 %vm952_vm1, %v3582_v7  ;;  %v11851_v7 = vld [vmem:[%s13279_s25 + $0xc84] ss:$16 sps:$4 sm:$0xff]  }
 0x2b6   : > { %3810 = vmatpush1.bf16.msra.mxu0 %v11783_v8  ;;  %3851 = vmatpush1.bf16.msra.mxu1 %v11786_v9  ;;  %v11854_v8 = vld [vmem:[%s13279_s25 + $0xc8c] ss:$16 sps:$4 sm:$0xff]   ;;  %v3943_v9 = vpack.c.b16 %v3941_v4, %v3941_v4 }
 0x2b7   : > { %3811 = vmatprep.subr.bf16.mxu0 %v11791_v10  ;;  %3852 = vmatprep.subr.bf16.mxu1 %v11794_v11  ;;  %v11849_v10 = vld [vmem:[%s13279_s25 + $0xc80] ss:$16 sps:$4 sm:$0xff]   ;;  %v11852_v11 = vld [vmem:[%s13279_s25 + $0xc88] ss:$16 sps:$4 sm:$0xff]  }
 0x2ba   : > { %3812 = vmatpush1.bf16.msra.mxu0 %v11789_v12  ;;  %3853 = vmatpush1.bf16.msra.mxu1 %v11792_v13  ;;  %v11857_v12 = vld [vmem:[%s13279_s25 + $0xca4] ss:$16 sps:$4 sm:$0xff]   ;;  %v11860_v13 = vld [vmem:[%s13279_s25 + $0xcac] ss:$16 sps:$4 sm:$0xff]  }
 0x2bb   : > { %3813 = vmatprep.subr.bf16.mxu0 %v11797_v14  ;;  %3854 = vmatprep.subr.bf16.mxu1 %v11800_v15  ;;  %v11855_v14 = vld [vmem:[%s13279_s25 + $0xca0] ss:$16 sps:$4 sm:$0xff]   ;;  %v11858_v15 = vld [vmem:[%s13279_s25 + $0xca8] ss:$16 sps:$4 sm:$0xff]  }
 0x2be   : > { %3814 = vmatpush1.bf16.msra.mxu0 %v11795_v16  ;;  %3855 = vmatpush1.bf16.msra.mxu1 %v11798_v17  ;;  %v11863_v16 = vld [vmem:[%s13279_s25 + $0xcc4] ss:$16 sps:$4 sm:$0xff]   ;;  %v11866_v17 = vld [vmem:[%s13279_s25 + $0xccc] ss:$16 sps:$4 sm:$0xff]  }
 0x2bf   : > { %3815 = vmatprep.subr.bf16.mxu0 %v11803_v18  ;;  %3856 = vmatprep.subr.bf16.mxu1 %v11806_v19  ;;  %v11861_v18 = vld [vmem:[%s13279_s25 + $0xcc0] ss:$16 sps:$4 sm:$0xff]   ;;  %v11864_v19 = vld [vmem:[%s13279_s25 + $0xcc8] ss:$16 sps:$4 sm:$0xff]  }
 0x2c2   : > { %3816 = vmatpush1.bf16.msra.mxu0 %v11801_v20  ;;  %3857 = vmatpush1.bf16.msra.mxu1 %v11804_v21  ;;  %v11869_v20 = vld [vmem:[%s13279_s25 + $0xce4] ss:$16 sps:$4 sm:$0xff]   ;;  %v11872_v21 = vld [vmem:[%s13279_s25 + $0xcec] ss:$16 sps:$4 sm:$0xff]  }
 0x2c3   : > { %3817 = vmatprep.subr.bf16.mxu0 %v11809_v22  ;;  %3858 = vmatprep.subr.bf16.mxu1 %v11812_v23  ;;  %v11867_v22 = vld [vmem:[%s13279_s25 + $0xce0] ss:$16 sps:$4 sm:$0xff]   ;;  %v11870_v23 = vld [vmem:[%s13279_s25 + $0xce8] ss:$16 sps:$4 sm:$0xff]  }
 0x2c6   : > { %3818 = vmatpush1.bf16.msra.mxu0 %v11807_v24  ;;  %3859 = vmatpush1.bf16.msra.mxu1 %v11810_v25  ;;  %v11875_v24 = vld [vmem:[%s13279_s25 + $0xd04] ss:$16 sps:$4 sm:$0xff]   ;;  %v11878_v25 = vld [vmem:[%s13279_s25 + $0xd0c] ss:$16 sps:$4 sm:$0xff]  }
 0x2c7   : > { %3819 = vmatprep.subr.bf16.mxu0 %v11815_v26  ;;  %3860 = vmatprep.subr.bf16.mxu1 %v11818_v27  ;;  %v11873_v26 = vld [vmem:[%s13279_s25 + $0xd00] ss:$16 sps:$4 sm:$0xff]   ;;  %v11876_v27 = vld [vmem:[%s13279_s25 + $0xd08] ss:$16 sps:$4 sm:$0xff]  }
 0x2ca   : > { %3820 = vmatpush1.bf16.msra.mxu0 %v11813_v28  ;;  %3861 = vmatpush1.bf16.msra.mxu1 %v11816_v29  ;;  %v11881_v28 = vld [vmem:[%s13279_s25 + $0xd24] ss:$16 sps:$4 sm:$0xff]   ;;  %v11884_v29 = vld [vmem:[%s13279_s25 + $0xd2c] ss:$16 sps:$4 sm:$0xff]  }
 0x2cb   : > { %3821 = vmatprep.subr.bf16.mxu0 %v11821_v30  ;;  %3862 = vmatprep.subr.bf16.mxu1 %v11824_v31  ;;  %v11879_v30 = vld [vmem:[%s13279_s25 + $0xd20] ss:$16 sps:$4 sm:$0xff]   ;;  %v11882_v31 = vld [vmem:[%s13279_s25 + $0xd28] ss:$16 sps:$4 sm:$0xff]  }
 0x2ce   : > { %3822 = vmatpush1.bf16.msra.mxu0 %v11819_v32  ;;  %3863 = vmatpush1.bf16.msra.mxu1 %v11822_v34  ;;  %v11887_v32 = vld [vmem:[%s13279_s25 + $0xd44] ss:$16 sps:$4 sm:$0xff]   ;;  %v11890_v34 = vld [vmem:[%s13279_s25 + $0xd4c] ss:$16 sps:$4 sm:$0xff]  }
 0x2cf   : > { %3823 = vmatprep.subr.bf16.mxu0 %v11827_v37  ;;  %3864 = vmatprep.subr.bf16.mxu1 %v11830_v38  ;;  %v11885_v37 = vld [vmem:[%s13279_s25 + $0xd40] ss:$16 sps:$4 sm:$0xff]   ;;  %v11888_v38 = vld [vmem:[%s13279_s25 + $0xd48] ss:$16 sps:$4 sm:$0xff]  }
 0x2d2   : > { %3824 = vmatpush1.bf16.msra.mxu0 %v11825_v40  ;;  %3865 = vmatpush1.bf16.msra.mxu1 %v11828_v44  ;;  %v11893_v40 = vld [vmem:[%s13279_s25 + $0xd64] ss:$16 sps:$4 sm:$0xff]   ;;  %v11896_v44 = vld [vmem:[%s13279_s25 + $0xd6c] ss:$16 sps:$4 sm:$0xff]  }
 0x2d3   : > { %3825 = vmatprep.subr.bf16.mxu0 %v11833_v46  ;;  %3866 = vmatprep.subr.bf16.mxu1 %v11836_v47  ;;  %v11891_v46 = vld [vmem:[%s13279_s25 + $0xd60] ss:$16 sps:$4 sm:$0xff]   ;;  %v11894_v47 = vld [vmem:[%s13279_s25 + $0xd68] ss:$16 sps:$4 sm:$0xff]  }
 0x2d4   : > { %v2024_v35 = vpop.f32.mrb[12].mxu0  ;;  %v2065_v59 = vpop.f32.mrb[12].mxu1 }
 0x2d5   : > { %v13864_v51 = vadd.f32 %v2024_v35, %v13792_v48  ;;  %v13867_v55 = vadd.f32 %v2065_v59, %v13795_v43  ;;  %v2026_v52 = vpop.f32.mrb[13].mxu0  ;;  %v2067_v49 = vpop.f32.mrb[13].mxu1  ;;  %v11837_v48 = vld [vmem:[%s13279_s25 + $0xc40] ss:$16 sps:$4 sm:$0xff]   ;;  %v11840_v43 = vld [vmem:[%s13279_s25 + $0xc48] ss:$16 sps:$4 sm:$0xff]  }
 0x2d6   : > { %v13871_v41 = vadd.f32 %v2026_v52, %v13802_v62  ;;  %v13874_v0 = vadd.f32 %v2067_v49, %v13805_v63  ;;  %v2028_v58 = vpop.f32.mrb[14].mxu0  ;;  %3826 = vmatpush1.bf16.msra.mxu0 %v11831_v53  ;;  %3867 = vmatpush1.bf16.msra.mxu1 %v11834_v56  ;;  %v2069_v2 = vpop.f32.mrb[14].mxu1  ;;  %v11845_v62 = vld [vmem:[%s13279_s25 + $0xc64] ss:$16 sps:$4 sm:$0xff]   ;;  %v11902_v56 = vld [vmem:[%s13279_s25 + $0xd8c] ss:$16 sps:$4 sm:$0xff]  }
 0x2d7   : > { %v2029_v33 = vpop.f32.mrb[15].mxu0  ;;  %3827 = vmatprep.subr.bf16.mxu0 %v11839_v61  ;;  %3868 = vmatprep.subr.bf16.mxu1 %v11842_v50  ;;  %v2070_v63 = vpop.f32.mrb[15].mxu1  ;;  %v11899_v53 = vld [vmem:[%s13279_s25 + $0xd84] ss:$16 sps:$4 sm:$0xff]   ;;  %v11900_v61 = vld [vmem:[%s13279_s25 + $0xd88] ss:$16 sps:$4 sm:$0xff]  }
 0x2d8   : > { %v3938_v50 = vrot.slane %v13858_v57, 1  ;;  %v11905_v35 = vld [vmem:[%s13279_s25 + $0xda4] ss:$16 sps:$4 sm:$0xff]   ;;  %v11908_v59 = vld [vmem:[%s13279_s25 + $0xdac] ss:$16 sps:$4 sm:$0xff]   ;;  %v4303_v2 = vrot.slane %v13783_v42, 1 }
 0x2da   : > { %3828 = vmatpush1.bf16.msra.mxu0 %v11837_v48  ;;  %3869 = vmatpush1.bf16.msra.mxu1 %v11840_v43  ;;  %v3939_v63 = vsel %vm725_vm0, %v13851_v45, %v3938_v50  ;;  %v11966_v50 = vld [vmem:[%s13279_s25 + $0xee8] ss:$16 sps:$4 sm:$0xff]  }
 0x2db   : > { %4168 = vmatprep.subr.bf16.mxu0 %v11845_v62  ;;  %4209 = vmatprep.subr.bf16.mxu1 %v11848_v39  ;;  %v3942_v4 = vpack.c.b16 %v3939_v63, %v3939_v63  ;;  %v11969_v63 = vld [vmem:[%s13279_s25 + $0xf00] ss:$16 sps:$4 sm:$0xff]  }
 0x2dd   : > { %3840 = vmatmul.mubr.bf16.vlgmr.msra.gmra.mrb[32].mxu0 %v3581_v3  ;;  %3881 = vmatmul.mubr.bf16.vlgmr.msra.gmra.mrb[32].mxu1 %v3581_v3  ;;  %v11914_v3 = vld [vmem:[%s13279_s25 + $0xdcc] ss:$16 sps:$4 sm:$0xff]  }
 0x2de   : > { %4169 = vmatpush1.bf16.msra.mxu0 %v11843_v5  ;;  %4210 = vmatpush1.bf16.msra.mxu1 %v11846_v6  ;;  %v4304_v5 = vsel %vm725_vm0, %v4303_v2, %v4302_v1  ;;  %v11909_v6 = vld [vmem:[%s13279_s25 + $0xdc0] ss:$16 sps:$4 sm:$0xff]  }
 0x2df   : > { %4170 = vmatprep.subr.bf16.mxu0 %v11851_v7  ;;  %4211 = vmatprep.subr.bf16.mxu1 %v11854_v8  ;;  %v11912_v7 = vld [vmem:[%s13279_s25 + $0xdc8] ss:$16 sps:$4 sm:$0xff]   ;;  %v11917_v8 = vld [vmem:[%s13279_s25 + $0xde4] ss:$16 sps:$4 sm:$0xff]  }
 0x2e0   : > { %10329 = vmatprep.mubr.msk.bf16.mxu0 %vm952_vm1, %v3943_v9  ;;  %10330 = vmatprep.mubr.msk.bf16.mxu1 %vm952_vm1, %v3943_v9  ;;  %v11920_v9 = vld [vmem:[%s13279_s25 + $0xdec] ss:$16 sps:$4 sm:$0xff]  }
 0x2e2   : > { %4171 = vmatpush1.bf16.msra.mxu0 %v11849_v10  ;;  %4212 = vmatpush1.bf16.msra.mxu1 %v11852_v11  ;;  %v4306_v10 = vpack.c.b16 %v4304_v5, %v4304_v5  ;;  %v11915_v11 = vld [vmem:[%s13279_s25 + $0xde0] ss:$16 sps:$4 sm:$0xff]  }
 0x2e3   : > { %4172 = vmatprep.subr.bf16.mxu0 %v11857_v12  ;;  %4213 = vmatprep.subr.bf16.mxu1 %v11860_v13  ;;  %v11918_v12 = vld [vmem:[%s13279_s25 + $0xde8] ss:$16 sps:$4 sm:$0xff]   ;;  %v11923_v13 = vld [vmem:[%s13279_s25 + $0xe04] ss:$16 sps:$4 sm:$0xff]  }
 0x2e6   : > { %4173 = vmatpush1.bf16.msra.mxu0 %v11855_v14  ;;  %4214 = vmatpush1.bf16.msra.mxu1 %v11858_v15  ;;  %v11926_v14 = vld [vmem:[%s13279_s25 + $0xe0c] ss:$16 sps:$4 sm:$0xff]   ;;  %v11921_v15 = vld [vmem:[%s13279_s25 + $0xe00] ss:$16 sps:$4 sm:$0xff]  }
 0x2e7   : > { %4174 = vmatprep.subr.bf16.mxu0 %v11863_v16  ;;  %4215 = vmatprep.subr.bf16.mxu1 %v11866_v17  ;;  %v11924_v16 = vld [vmem:[%s13279_s25 + $0xe08] ss:$16 sps:$4 sm:$0xff]   ;;  %v11929_v17 = vld [vmem:[%s13279_s25 + $0xe24] ss:$16 sps:$4 sm:$0xff]  }
 0x2ea   : > { %4175 = vmatpush1.bf16.msra.mxu0 %v11861_v18  ;;  %4216 = vmatpush1.bf16.msra.mxu1 %v11864_v19  ;;  %v11932_v18 = vld [vmem:[%s13279_s25 + $0xe2c] ss:$16 sps:$4 sm:$0xff]   ;;  %v11927_v19 = vld [vmem:[%s13279_s25 + $0xe20] ss:$16 sps:$4 sm:$0xff]  }
 0x2eb   : > { %4176 = vmatprep.subr.bf16.mxu0 %v11869_v20  ;;  %4217 = vmatprep.subr.bf16.mxu1 %v11872_v21  ;;  %v11930_v20 = vld [vmem:[%s13279_s25 + $0xe28] ss:$16 sps:$4 sm:$0xff]   ;;  %v11935_v21 = vld [vmem:[%s13279_s25 + $0xe44] ss:$16 sps:$4 sm:$0xff]  }
 0x2ee   : > { %4177 = vmatpush1.bf16.msra.mxu0 %v11867_v22  ;;  %4218 = vmatpush1.bf16.msra.mxu1 %v11870_v23  ;;  %v11938_v22 = vld [vmem:[%s13279_s25 + $0xe4c] ss:$16 sps:$4 sm:$0xff]   ;;  %v11933_v23 = vld [vmem:[%s13279_s25 + $0xe40] ss:$16 sps:$4 sm:$0xff]  }
 0x2ef   : > { %4178 = vmatprep.subr.bf16.mxu0 %v11875_v24  ;;  %4219 = vmatprep.subr.bf16.mxu1 %v11878_v25  ;;  %v11936_v24 = vld [vmem:[%s13279_s25 + $0xe48] ss:$16 sps:$4 sm:$0xff]   ;;  %v11941_v25 = vld [vmem:[%s13279_s25 + $0xe64] ss:$16 sps:$4 sm:$0xff]  }
 0x2f2   : > { %4179 = vmatpush1.bf16.msra.mxu0 %v11873_v26  ;;  %4220 = vmatpush1.bf16.msra.mxu1 %v11876_v27  ;;  %v11944_v26 = vld [vmem:[%s13279_s25 + $0xe6c] ss:$16 sps:$4 sm:$0xff]   ;;  %v11939_v27 = vld [vmem:[%s13279_s25 + $0xe60] ss:$16 sps:$4 sm:$0xff]  }
 0x2f3   : > { %4180 = vmatprep.subr.bf16.mxu0 %v11881_v28  ;;  %4221 = vmatprep.subr.bf16.mxu1 %v11884_v29  ;;  %v11942_v28 = vld [vmem:[%s13279_s25 + $0xe68] ss:$16 sps:$4 sm:$0xff]   ;;  %v11947_v29 = vld [vmem:[%s13279_s25 + $0xe84] ss:$16 sps:$4 sm:$0xff]  }
 0x2f6   : > { %4181 = vmatpush1.bf16.msra.mxu0 %v11879_v30  ;;  %4222 = vmatpush1.bf16.msra.mxu1 %v11882_v31  ;;  %v11950_v30 = vld [vmem:[%s13279_s25 + $0xe8c] ss:$16 sps:$4 sm:$0xff]   ;;  %v11945_v31 = vld [vmem:[%s13279_s25 + $0xe80] ss:$16 sps:$4 sm:$0xff]  }
 0x2f7   : > { %4182 = vmatprep.subr.bf16.mxu0 %v11887_v32  ;;  %4223 = vmatprep.subr.bf16.mxu1 %v11890_v34  ;;  %v11948_v32 = vld [vmem:[%s13279_s25 + $0xe88] ss:$16 sps:$4 sm:$0xff]   ;;  %v11953_v34 = vld [vmem:[%s13279_s25 + $0xea4] ss:$16 sps:$4 sm:$0xff]  }
 0x2fa   : > { %4183 = vmatpush1.bf16.msra.mxu0 %v11885_v37  ;;  %4224 = vmatpush1.bf16.msra.mxu1 %v11888_v38  ;;  %v11956_v37 = vld [vmem:[%s13279_s25 + $0xeac] ss:$16 sps:$4 sm:$0xff]   ;;  %v11951_v38 = vld [vmem:[%s13279_s25 + $0xea0] ss:$16 sps:$4 sm:$0xff]  }
 0x2fb   : > { %4184 = vmatprep.subr.bf16.mxu0 %v11893_v40  ;;  %4225 = vmatprep.subr.bf16.mxu1 %v11896_v44  ;;  %v11954_v40 = vld [vmem:[%s13279_s25 + $0xea8] ss:$16 sps:$4 sm:$0xff]   ;;  %v11959_v44 = vld [vmem:[%s13279_s25 + $0xec4] ss:$16 sps:$4 sm:$0xff]  }
 0x2fe   : > { %4185 = vmatpush1.bf16.msra.mxu0 %v11891_v46  ;;  %4226 = vmatpush1.bf16.msra.mxu1 %v11894_v47  ;;  %v11962_v46 = vld [vmem:[%s13279_s25 + $0xecc] ss:$16 sps:$4 sm:$0xff]   ;;  %v11957_v47 = vld [vmem:[%s13279_s25 + $0xec0] ss:$16 sps:$4 sm:$0xff]  }
 0x2ff   : > { %4186 = vmatprep.subr.bf16.mxu0 %v11899_v53  ;;  %4227 = vmatprep.subr.bf16.mxu1 %v11902_v56  ;;  %v11960_v53 = vld [vmem:[%s13279_s25 + $0xec8] ss:$16 sps:$4 sm:$0xff]   ;;  %v11965_v56 = vld [vmem:[%s13279_s25 + $0xee4] ss:$16 sps:$4 sm:$0xff]  }
 0x300   : > { %v2387_v52 = vpop.f32.mrb[16].mxu0  ;;  %v2428_v49 = vpop.f32.mrb[16].mxu1 }
 0x301   : > { %v13928_v36 = vadd.f32 %v2387_v52, %v13864_v51  ;;  %v13931_v58 = vadd.f32 %v2428_v49, %v13867_v55  ;;  %v2389_v48 = vpop.f32.mrb[17].mxu0  ;;  %v2430_v43 = vpop.f32.mrb[17].mxu1  ;;  %v11903_v51 = vld [vmem:[%s13279_s25 + $0xda0] ss:$16 sps:$4 sm:$0xff]   ;;  %v11906_v55 = vld [vmem:[%s13279_s25 + $0xda8] ss:$16 sps:$4 sm:$0xff]  }
 0x302   : > { %v13936_v33 = vadd.f32 %v2389_v48, %v13871_v41  ;;  %v13939_v62 = vadd.f32 %v2430_v43, %v13874_v0  ;;  %v2391_v39 = vpop.f32.mrb[18].mxu0  ;;  %4187 = vmatpush1.bf16.msra.mxu0 %v11897_v60  ;;  %4228 = vmatpush1.bf16.msra.mxu1 %v11900_v61  ;;  %v2432_v54 = vpop.f32.mrb[18].mxu1  ;;  %v11911_v41 = vld [vmem:[%s13279_s25 + $0xdc4] ss:$16 sps:$4 sm:$0xff]   ;;  %v11968_v60 = vld [vmem:[%s13279_s25 + $0xeec] ss:$16 sps:$4 sm:$0xff]  }
 0x303   : > { %v2392_v42 = vpop.f32.mrb[19].mxu0  ;;  %4188 = vmatprep.subr.bf16.mxu0 %v11905_v35  ;;  %4229 = vmatprep.subr.bf16.mxu1 %v11908_v59  ;;  %v2433_v0 = vpop.f32.mrb[19].mxu1  ;;  %v11963_v61 = vld [vmem:[%s13279_s25 + $0xee0] ss:$16 sps:$4 sm:$0xff]   ;;  %v4299_v35 = vrot.slane %v13858_v57, 2  ;;  %v4300_v59 = vrot.slane %v13851_v45, 1 }
 0x304   : > { %v11971_v52 = vld [vmem:[%s13279_s25 + $0xf04] ss:$16 sps:$4 sm:$0xff]   ;;  %v11974_v49 = vld [vmem:[%s13279_s25 + $0xf0c] ss:$16 sps:$4 sm:$0xff]   ;;  %v11972_v54 = vld [vmem:[%s13279_s25 + $0xf08] ss:$16 sps:$4 sm:$0xff]  }
 0x305   : > { %v4654_v0 = vld [vmem:[%s13292_s4 + $0x8] sm:$0xff]  ;;  %s14541_s25 = sld [smem:[#allocation29_spill]] }
 0x306   : > { %4189 = vmatpush1.bf16.msra.mxu0 %v11903_v51  ;;  %4230 = vmatpush1.bf16.msra.mxu1 %v11906_v55 }
 0x307   : > { %4531 = vmatprep.subr.bf16.mxu0 %v11911_v41  ;;  %4572 = vmatprep.subr.bf16.mxu1 %v11914_v3  ;;  %v4657_v3 = vld [vmem:[%s13292_s4 + $0x20] sm:$0xff] }
 0x309   : > { %4201 = vmatmul.mubr.bf16.vlgmr.msra.gmra.mrb[36].mxu0 %v3942_v4  ;;  %4242 = vmatmul.mubr.bf16.vlgmr.msra.gmra.mrb[36].mxu1 %v3942_v4 }
 0x30a   : > { %4532 = vmatpush1.bf16.msra.mxu0 %v11909_v6  ;;  %4573 = vmatpush1.bf16.msra.mxu1 %v11912_v7  ;;  %v4658_v6 = vld [vmem:[%s13292_s4 + $0x28] sm:$0xff]  ;;  %v4661_v7 = vld [vmem:[%s13292_s4 + $0x40] sm:$0xff] }
 0x30b   : > { %4533 = vmatprep.subr.bf16.mxu0 %v11917_v8  ;;  %4574 = vmatprep.subr.bf16.mxu1 %v11920_v9  ;;  %v4665_v8 = vld [vmem:[%s13292_s4 + $0x60] sm:$0xff]  ;;  %v10423_v9 = vcombine.low %v4654_v0, %v4658_v6  ;;  %p10677_p3 = scmp.ne.s32.totalorder %s14541_s25, 3 }
 0x30c   : > { %10419 = vmatprep.mubr.msk.bf16.mxu0 %vm952_vm1, %v4306_v10  ;;  %10420 = vmatprep.mubr.msk.bf16.mxu1 %vm952_vm1, %v4306_v10  ;;  %v10424_v10 = vcombine.high %v4654_v0, %v4658_v6  ;;  %v4709_v0 = vld [vmem:[%s13292_s4 + $0x1c0] sm:$0xff]  ;;  %v4714_v6 = vld [vmem:[%s13292_s4 + $0x1e8] sm:$0xff] }
 0x30e   : > { %4534 = vmatpush1.bf16.msra.mxu0 %v11915_v11  ;;  %4575 = vmatpush1.bf16.msra.mxu1 %v11918_v12  ;;  %v4662_v11 = vld [vmem:[%s13292_s4 + $0x48] sm:$0xff] }
 0x30f   : > { %4535 = vmatprep.subr.bf16.mxu0 %v11923_v13  ;;  %4576 = vmatprep.subr.bf16.mxu1 %v11926_v14  ;;  %v4666_v12 = vld [vmem:[%s13292_s4 + $0x68] sm:$0xff]  ;;  %v4669_v13 = vld [vmem:[%s13292_s4 + $0x80] sm:$0xff]  ;;  %v10430_v14 = vcombine.high %v4661_v7, %v4665_v8 }
 0x312   : > { %4536 = vmatpush1.bf16.msra.mxu0 %v11921_v15  ;;  %4577 = vmatpush1.bf16.msra.mxu1 %v11924_v16  ;;  %v10432_v15 = vcombine.high %v4662_v11, %v4666_v12  ;;  %v4673_v16 = vld [vmem:[%s13292_s4 + $0xa0] sm:$0xff] }
 0x313   : > { %4537 = vmatprep.subr.bf16.mxu0 %v11929_v17  ;;  %4578 = vmatprep.subr.bf16.mxu1 %v11932_v18  ;;  %v4670_v17 = vld [vmem:[%s13292_s4 + $0x88] sm:$0xff] }
 0x314   : > { %v4674_v18 = vld [vmem:[%s13292_s4 + $0xa8] sm:$0xff] }
 0x316   : > { %4538 = vmatpush1.bf16.msra.mxu0 %v11927_v19  ;;  %4579 = vmatpush1.bf16.msra.mxu1 %v11930_v20  ;;  %v10429_v19 = vcombine.low %v4661_v7, %v4665_v8  ;;  %v10431_v20 = vcombine.low %v4662_v11, %v4666_v12  ;;  %v4717_v11 = vld [vmem:[%s13292_s4 + $0x200] sm:$0xff] }
 0x317   : > { %4539 = vmatprep.subr.bf16.mxu0 %v11935_v21  ;;  %4580 = vmatprep.subr.bf16.mxu1 %v11938_v22  ;;  %v10438_v21 = vcombine.high %v4669_v13, %v4673_v16  ;;  %v10440_v22 = vcombine.high %v4670_v17, %v4674_v18  ;;  %v4721_v12 = vld [vmem:[%s13292_s4 + $0x220] sm:$0xff] }
 0x31a   : > { %4540 = vmatpush1.bf16.msra.mxu0 %v11933_v23  ;;  %4581 = vmatpush1.bf16.msra.mxu1 %v11936_v24  ;;  %v10437_v23 = vcombine.low %v4669_v13, %v4673_v16  ;;  %v10439_v24 = vcombine.low %v4670_v17, %v4674_v18  ;;  %v4718_v13 = vld [vmem:[%s13292_s4 + $0x208] sm:$0xff]  ;;  %v10486_v17 = vcombine.high %v4717_v11, %v4721_v12 }
 0x31b   : > { %4541 = vmatprep.subr.bf16.mxu0 %v11941_v25  ;;  %4582 = vmatprep.subr.bf16.mxu1 %v11944_v26 }
 0x31e   : > { %4542 = vmatpush1.bf16.msra.mxu0 %v11939_v27  ;;  %4583 = vmatpush1.bf16.msra.mxu1 %v11942_v28 }
 0x31f   : > { %4543 = vmatprep.subr.bf16.mxu0 %v11947_v29  ;;  %4584 = vmatprep.subr.bf16.mxu1 %v11950_v30 }
 0x322   : > { %4544 = vmatpush1.bf16.msra.mxu0 %v11945_v31  ;;  %4585 = vmatpush1.bf16.msra.mxu1 %v11948_v32 }
 0x323   : > { %4545 = vmatprep.subr.bf16.mxu0 %v11953_v34  ;;  %4586 = vmatprep.subr.bf16.mxu1 %v11956_v37 }
 0x326   : > { %4546 = vmatpush1.bf16.msra.mxu0 %v11951_v38  ;;  %4587 = vmatpush1.bf16.msra.mxu1 %v11954_v40 }
 0x327   : > { %4547 = vmatprep.subr.bf16.mxu0 %v11959_v44  ;;  %4588 = vmatprep.subr.bf16.mxu1 %v11962_v46  ;;  %v4677_v44 = vld [vmem:[%s13292_s4 + $0xc0] sm:$0xff] }
 0x328   : > { %v4681_v46 = vld [vmem:[%s13292_s4 + $0xe0] sm:$0xff] }
 0x32a   : > { %4548 = vmatpush1.bf16.msra.mxu0 %v11957_v47  ;;  %4589 = vmatpush1.bf16.msra.mxu1 %v11960_v53  ;;  %v4678_v47 = vld [vmem:[%s13292_s4 + $0xc8] sm:$0xff]  ;;  %v10446_v53 = vcombine.high %v4677_v44, %v4681_v46 }
 0x32b   : > { %4549 = vmatprep.subr.bf16.mxu0 %v11965_v56  ;;  %4590 = vmatprep.subr.bf16.mxu1 %v11968_v60  ;;  %v4682_v56 = vld [vmem:[%s13292_s4 + $0xe8] sm:$0xff]  ;;  %v10445_v60 = vcombine.low %v4677_v44, %v4681_v46 }
 0x32c   : > { %v2750_v48 = vpop.f32.mrb[20].mxu0  ;;  %v2791_v43 = vpop.f32.mrb[20].mxu1 }
 0x32d   : > { %v2798_v1 = vadd.f32 %v2750_v48, %v13928_v36  ;;  %v2800_v2 = vadd.f32 %v2791_v43, %v13931_v58  ;;  %v2752_v39 = vpop.f32.mrb[21].mxu0  ;;  %v2793_v51 = vpop.f32.mrb[21].mxu1  ;;  %v4301_v36 = vsel %vm725_vm0, %v4300_v59, %v4299_v35  ;;  %v4685_v35 = vld [vmem:[%s13292_s4 + $0x100] sm:$0xff]  ;;  %v4690_v43 = vld [vmem:[%s13292_s4 + $0x128] sm:$0xff] }
 0x32e   : > { %v2799_v55 = vadd.f32 %v2752_v39, %v13936_v33  ;;  %v2801_v57 = vadd.f32 %v2793_v51, %v13939_v62  ;;  %v2754_v45 = vpop.f32.mrb[22].mxu0  ;;  %4550 = vmatpush1.bf16.msra.mxu0 %v11963_v61  ;;  %4591 = vmatpush1.bf16.msra.mxu1 %v11966_v50  ;;  %v2795_v58 = vpop.f32.mrb[22].mxu1  ;;  %v4305_v41 = vpack.c.b16 %v4301_v36, %v4301_v36  ;;  %v4653_v62 = vld [vmem:[%s13292_s4] sm:$0xff] }
 0x32f   : > { %v2755_v42 = vpop.f32.mrb[23].mxu0  ;;  %4551 = vmatprep.subr.bf16.mxu0 %v11971_v52  ;;  %4592 = vmatprep.subr.bf16.mxu1 %v11974_v49  ;;  %v2796_v33 = vpop.f32.mrb[23].mxu1  ;;  %v10421_v4 = vcombine.low %v4653_v62, %v4657_v3  ;;  %v10422_v5 = vcombine.high %v4653_v62, %v4657_v3  ;;  %v10447_v61 = vcombine.low %v4678_v47, %v4682_v56  ;;  %v4689_v59 = vld [vmem:[%s13292_s4 + $0x120] sm:$0xff]  ;;  %v4686_v52 = vld [vmem:[%s13292_s4 + $0x108] sm:$0xff] }
 0x330   : > { %v10448_v50 = vcombine.high %v4678_v47, %v4682_v56  ;;  %v10453_v49 = vcombine.low %v4685_v35, %v4689_v59  ;;  %v10454_v48 = vcombine.high %v4685_v35, %v4689_v59  ;;  %v10455_v39 = vcombine.low %v4686_v52, %v4690_v43  ;;  %v4698_v45 = vld [vmem:[%s13292_s4 + $0x168] sm:$0xff]  ;;  %v4705_v36 = vld [vmem:[%s13292_s4 + $0x1a0] sm:$0xff] }
 0x331   : > { %v10456_v51 = vcombine.high %v4686_v52, %v4690_v43  ;;  %v4702_v58 = vld [vmem:[%s13292_s4 + $0x188] sm:$0xff]  ;;  %v4741_v47 = vld [vmem:[%s13292_s4 + $0x2c0] sm:$0xff] }
 0x332   : > { %4552 = vmatpush1.bf16.msra.mxu0 %v11969_v63  ;;  %4593 = vmatpush1.bf16.msra.mxu1 %v11972_v54  ;;  %v4701_v63 = vld [vmem:[%s13292_s4 + $0x180] sm:$0xff]  ;;  %v4706_v42 = vld [vmem:[%s13292_s4 + $0x1a8] sm:$0xff] }
 0x333   : > { %6189 = vmatprep.subr.bf16.mxu0 %v10422_v5  ;;  %6271 = vmatprep.subr.bf16.mxu1 %v10424_v10  ;;  %v10470_v62 = vcombine.high %v4701_v63, %v4705_v36  ;;  %v10472_v3 = vcombine.high %v4702_v58, %v4706_v42  ;;  %v4710_v5 = vld [vmem:[%s13292_s4 + $0x1c8] sm:$0xff]  ;;  %v10469_v7 = vcombine.low %v4701_v63, %v4705_v36  ;;  %v4749_v52 = vld [vmem:[%s13292_s4 + $0x300] sm:$0xff] }
 0x334   : > { %v10471_v8 = vcombine.low %v4702_v58, %v4706_v42  ;;  %v10480_v10 = vcombine.high %v4710_v5, %v4714_v6  ;;  %v10479_v16 = vcombine.low %v4710_v5, %v4714_v6  ;;  %v4742_v56 = vld [vmem:[%s13292_s4 + $0x2c8] sm:$0xff] }
 0x335   : > { %4564 = vmatmul.mubr.bf16.vlgmr.msra.gmra.mrb[40].mxu0 %v4305_v41  ;;  %4605 = vmatmul.mubr.bf16.vlgmr.msra.gmra.mrb[40].mxu1 %v4305_v41  ;;  %v4754_v43 = vld [vmem:[%s13292_s4 + $0x328] sm:$0xff] }
 0x336   : > { %6190 = vmatpush1.bf16.msra.mxu0 %v10421_v4  ;;  %6272 = vmatpush1.bf16.msra.mxu1 %v10423_v9  ;;  %v4713_v4 = vld [vmem:[%s13292_s4 + $0x1e0] sm:$0xff]  ;;  %v4762_v63 = vld [vmem:[%s13292_s4 + $0x368] sm:$0xff] }
 0x337   : > { %6191 = vmatprep.subr.bf16.mxu0 %v10430_v14  ;;  %6273 = vmatprep.subr.bf16.mxu1 %v10432_v15  ;;  %v10478_v9 = vcombine.high %v4709_v0, %v4713_v4  ;;  %v4722_v14 = vld [vmem:[%s13292_s4 + $0x228] sm:$0xff]  ;;  %v10477_v15 = vcombine.low %v4709_v0, %v4713_v4 }
 0x338   : > { %v10488_v18 = vcombine.high %v4718_v13, %v4722_v14 }
 0x33a   : > { %6192 = vmatpush1.bf16.msra.mxu0 %v10429_v19  ;;  %6274 = vmatpush1.bf16.msra.mxu1 %v10431_v20  ;;  %v4725_v19 = vld [vmem:[%s13292_s4 + $0x240] sm:$0xff] }
 0x33b   : > { %6193 = vmatprep.subr.bf16.mxu0 %v10438_v21  ;;  %6275 = vmatprep.subr.bf16.mxu1 %v10440_v22  ;;  %v4729_v20 = vld [vmem:[%s13292_s4 + $0x260] sm:$0xff]  ;;  %v4726_v21 = vld [vmem:[%s13292_s4 + $0x248] sm:$0xff] }
 0x33c   : > { %v4730_v22 = vld [vmem:[%s13292_s4 + $0x268] sm:$0xff] }
 0x33e   : > { %6194 = vmatpush1.bf16.msra.mxu0 %v10437_v23  ;;  %6276 = vmatpush1.bf16.msra.mxu1 %v10439_v24  ;;  %v10485_v23 = vcombine.low %v4717_v11, %v4721_v12  ;;  %v10487_v24 = vcombine.low %v4718_v13, %v4722_v14  ;;  %v4769_v13 = vld [vmem:[%s13292_s4 + $0x3a0] sm:$0xff]  ;;  %v4766_v14 = vld [vmem:[%s13292_s4 + $0x388] sm:$0xff] }
 0x33f   : > { %6195 = vmatprep.subr.bf16.mxu0 %v10446_v53  ;;  %6277 = vmatprep.subr.bf16.mxu1 %v10448_v50  ;;  %v4745_v53 = vld [vmem:[%s13292_s4 + $0x2e0] sm:$0xff] }
 0x340   : > { %v10510_v35 = vcombine.high %v4741_v47, %v4745_v53 }
 0x342   : > { %6196 = vmatpush1.bf16.msra.mxu0 %v10445_v60  ;;  %6278 = vmatpush1.bf16.msra.mxu1 %v10447_v61  ;;  %v4746_v60 = vld [vmem:[%s13292_s4 + $0x2e8] sm:$0xff] }
 0x343   : > { %6197 = vmatprep.subr.bf16.mxu0 %v10454_v48  ;;  %6279 = vmatprep.subr.bf16.mxu1 %v10456_v51  ;;  %v10512_v59 = vcombine.high %v4742_v56, %v4746_v60  ;;  %v4750_v48 = vld [vmem:[%s13292_s4 + $0x308] sm:$0xff] }
 0x344   : > { %v10520_v51 = vcombine.high %v4750_v48, %v4754_v43  ;;  %v10519_v36 = vcombine.low %v4750_v48, %v4754_v43 }
 0x346   : > { %6198 = vmatpush1.bf16.msra.mxu0 %v10453_v49  ;;  %6280 = vmatpush1.bf16.msra.mxu1 %v10455_v39  ;;  %v4753_v49 = vld [vmem:[%s13292_s4 + $0x320] sm:$0xff] }
 0x347   : > { %v10518_v39 = vcombine.high %v4749_v52, %v4753_v49 }
 0x358   : > { %v3113_v25 = vpop.f32.mrb[24].mxu0  ;;  %v3154_v26 = vpop.f32.mrb[24].mxu1 }
 0x359   : > { %v14011_v27 = vadd.f32 %v3113_v25, %v2798_v1  ;;  %v14013_v28 = vadd.f32 %v3154_v26, %v2800_v2  ;;  %v3115_v29 = vpop.f32.mrb[25].mxu0  ;;  %v3156_v30 = vpop.f32.mrb[25].mxu1  ;;  %v4693_v1 = vld [vmem:[%s13292_s4 + $0x140] sm:$0xff]  ;;  %v10494_v25 = vcombine.high %v4725_v19, %v4729_v20  ;;  %v10496_v26 = vcombine.high %v4726_v21, %v4730_v22 }
 0x35a   : > { %v14015_v31 = vadd.f32 %v3115_v29, %v2799_v55  ;;  %v14017_v32 = vadd.f32 %v3156_v30, %v2801_v57  ;;  %v3117_v34 = vpop.f32.mrb[26].mxu0  ;;  %v3158_v37 = vpop.f32.mrb[26].mxu1  ;;  %v4697_v2 = vld [vmem:[%s13292_s4 + $0x160] sm:$0xff]  ;;  %v4694_v57 = vld [vmem:[%s13292_s4 + $0x148] sm:$0xff] }
 0x35b   : > { %v3118_v38 = vpop.f32.mrb[27].mxu0  ;;  %v3159_v40 = vpop.f32.mrb[27].mxu1  ;;  %v10462_v55 = vcombine.high %v4693_v1, %v4697_v2  ;;  %v10464_v54 = vcombine.high %v4694_v57, %v4698_v45  ;;  %v10461_v33 = vcombine.low %v4693_v1, %v4697_v2  ;;  %v10463_v41 = vcombine.low %v4694_v57, %v4698_v45  ;;  %v4733_v29 = vld [vmem:[%s13292_s4 + $0x280] sm:$0xff]  ;;  %v4734_v34 = vld [vmem:[%s13292_s4 + $0x288] sm:$0xff] }
 0x35c   : > { %v4737_v30 = vld [vmem:[%s13292_s4 + $0x2a0] sm:$0xff]  ;;  %v4738_v37 = vld [vmem:[%s13292_s4 + $0x2a8] sm:$0xff]  ;;  %v10493_v38 = vcombine.low %v4725_v19, %v4729_v20  ;;  %v10495_v40 = vcombine.low %v4726_v21, %v4730_v22  ;;  %v10509_v1 = vcombine.low %v4741_v47, %v4745_v53  ;;  %v10511_v2 = vcombine.low %v4742_v56, %v4746_v60 }
 0x35d   : > { %6199 = vmatprep.subr.bf16.mxu0 %v10462_v55  ;;  %6281 = vmatprep.subr.bf16.mxu1 %v10464_v54  ;;  %v10502_v44 = vcombine.high %v4733_v29, %v4737_v30  ;;  %v10504_v46 = vcombine.high %v4734_v34, %v4738_v37  ;;  %v10501_v61 = vcombine.low %v4733_v29, %v4737_v30  ;;  %v4757_v55 = vld [vmem:[%s13292_s4 + $0x340] sm:$0xff]  ;;  %v4758_v45 = vld [vmem:[%s13292_s4 + $0x348] sm:$0xff] }
 0x35e   : > { %6200 = vmatpush1.bf16.msra.mxu0 %v10461_v33  ;;  %6282 = vmatpush1.bf16.msra.mxu1 %v10463_v41  ;;  %v10503_v50 = vcombine.low %v4734_v34, %v4738_v37  ;;  %v4761_v57 = vld [vmem:[%s13292_s4 + $0x360] sm:$0xff]  ;;  %v10517_v54 = vcombine.low %v4749_v52, %v4753_v49  ;;  %v10528_v42 = vcombine.high %v4758_v45, %v4762_v63  ;;  %v4774_v19 = vld [vmem:[%s13292_s4 + $0x3c8] sm:$0xff] }
 0x35f   : > { %6201 = vmatprep.subr.bf16.mxu0 %v10470_v62  ;;  %6283 = vmatprep.subr.bf16.mxu1 %v10472_v3  ;;  %v10526_v58 = vcombine.high %v4757_v55, %v4761_v57  ;;  %v10525_v33 = vcombine.low %v4757_v55, %v4761_v57  ;;  %v10527_v3 = vcombine.low %v4758_v45, %v4762_v63  ;;  %v4778_v21 = vld [vmem:[%s13292_s4 + $0x3e8] sm:$0xff] }
 0x360   : > { %v14082_v29 = vld [vmem:[%s13292_s4 + $0x408] sm:$0xff] }
 0x361   : > { %v14087_v34 = vld [vmem:[%s13292_s4 + $0x428] sm:$0xff] }
 0x362   : > { %6202 = vmatpush1.bf16.msra.mxu0 %v10469_v7  ;;  %6284 = vmatpush1.bf16.msra.mxu1 %v10471_v8 }
 0x363   : > { %6203 = vmatprep.subr.bf16.mxu0 %v10478_v9  ;;  %6285 = vmatprep.subr.bf16.mxu1 %v10480_v10 }
 0x366   : > { %6204 = vmatpush1.bf16.msra.mxu0 %v10477_v15  ;;  %6286 = vmatpush1.bf16.msra.mxu1 %v10479_v16  ;;  %v4770_v15 = vld [vmem:[%s13292_s4 + $0x3a8] sm:$0xff] }
 0x367   : > { %6205 = vmatprep.subr.bf16.mxu0 %v10486_v17  ;;  %6287 = vmatprep.subr.bf16.mxu1 %v10488_v18  ;;  %v10535_v17 = vcombine.low %v4766_v14, %v4770_v15  ;;  %v4777_v18 = vld [vmem:[%s13292_s4 + $0x3e0] sm:$0xff] }
 0x36a   : > { %6206 = vmatpush1.bf16.msra.mxu0 %v10485_v23  ;;  %6288 = vmatpush1.bf16.msra.mxu1 %v10487_v24  ;;  %v10543_v23 = vcombine.low %v4774_v19, %v4778_v21  ;;  %v10544_v24 = vcombine.high %v4774_v19, %v4778_v21 }
 0x36b   : > { %6207 = vmatprep.subr.bf16.mxu0 %v10494_v25  ;;  %6289 = vmatprep.subr.bf16.mxu1 %v10496_v26  ;;  %v14076_v25 = vld [vmem:[%s13292_s4 + $0x400] sm:$0xff] }
 0x36c   : > { %v14079_v26 = vld [vmem:[%s13292_s4 + $0x420] sm:$0xff] }
 0x36d   : > { %v10550_v30 = vcombine.high %v14076_v25, %v14079_v26  ;;  %v10549_v37 = vcombine.low %v14076_v25, %v14079_v26  ;;  %v4809_v25 = vld [vmem:[%s13292_s4 + $0x4e0] sm:$0xff]  ;;  %v4806_v26 = vld [vmem:[%s13292_s4 + $0x4c8] sm:$0xff] }
 0x36e   : > { %6208 = vmatpush1.bf16.msra.mxu0 %v10493_v38  ;;  %6290 = vmatpush1.bf16.msra.mxu1 %v10495_v40  ;;  %v10551_v38 = vcombine.low %v14082_v29, %v14087_v34  ;;  %v10552_v40 = vcombine.high %v14082_v29, %v14087_v34 }
 0x36f   : > { %6209 = vmatprep.subr.bf16.mxu0 %v10502_v44  ;;  %6291 = vmatprep.subr.bf16.mxu1 %v10504_v46 }
 0x372   : > { %6210 = vmatpush1.bf16.msra.mxu0 %v10501_v61  ;;  %6292 = vmatpush1.bf16.msra.mxu1 %v10503_v50 }
 0x373   : > { %6211 = vmatprep.subr.bf16.mxu0 %v10510_v35  ;;  %6293 = vmatprep.subr.bf16.mxu1 %v10512_v59 }
 0x376   : > { %6212 = vmatpush1.bf16.msra.mxu0 %v10509_v1  ;;  %6294 = vmatpush1.bf16.msra.mxu1 %v10511_v2 }
 0x377   : > { %6213 = vmatprep.subr.bf16.mxu0 %v10518_v39  ;;  %6295 = vmatprep.subr.bf16.mxu1 %v10520_v51 }
 0x37a   : > { %6214 = vmatpush1.bf16.msra.mxu0 %v10517_v54  ;;  %6296 = vmatpush1.bf16.msra.mxu1 %v10519_v36 }
 0x37b   : > { %6215 = vmatprep.subr.bf16.mxu0 %v10526_v58  ;;  %6297 = vmatprep.subr.bf16.mxu1 %v10528_v42  ;;  %v4619_v58 = vlaneseq }
 0x37d   : > { %v14095_v42 = vshrl.u32 %v4619_v58, 7  ;;  %v4825_v58 = vld [vmem:[%s13292_s4 + $0x560] sm:$0xff] }
 0x37e   : > { %6216 = vmatpush1.bf16.msra.mxu0 %v10525_v33  ;;  %6298 = vmatpush1.bf16.msra.mxu1 %v10527_v3 }
 0x37f   : > { %v14098_v33 = vsub.s32 0, %v14095_v42  ;;  %v14105_v3 = vsub.s32 1, %v14095_v42 }
 0x384   : > { %v3476_v41 = vpop.f32.mrb[28].mxu0  ;;  %v3517_v62 = vpop.f32.mrb[28].mxu1 }
 0x385   : > { %v3524_v0 = vadd.f32 %v3476_v41, %v14011_v27  ;;  %v3526_v4 = vadd.f32 %v3517_v62, %v14013_v28  ;;  %v3478_v5 = vpop.f32.mrb[29].mxu0  ;;  %v3519_v6 = vpop.f32.mrb[29].mxu1  ;;  %v4765_v27 = vld [vmem:[%s13292_s4 + $0x380] sm:$0xff]  ;;  %v14101_v41 = vsub.s32 2, %v14095_v42  ;;  %v4617_v62 = vld [vmem:[%s13286_s6] sm:$0xf] }
 0x386   : > { %v3525_v7 = vadd.f32 %v3478_v5, %v14015_v31  ;;  %v3527_v8 = vadd.f32 %v3519_v6, %v14017_v32  ;;  %v3480_v9 = vpop.f32.mrb[30].mxu0  ;;  %v3521_v10 = vpop.f32.mrb[30].mxu1  ;;  %v10534_v28 = vcombine.high %v4765_v27, %v4769_v13  ;;  %v10533_v16 = vcombine.low %v4765_v27, %v4769_v13  ;;  %v4773_v32 = vld [vmem:[%s13292_s4 + $0x3c0] sm:$0xff] }
 0x387   : > { %v3481_v11 = vpop.f32.mrb[31].mxu0  ;;  %v3522_v12 = vpop.f32.mrb[31].mxu1  ;;  %v10536_v31 = vcombine.high %v4766_v14, %v4770_v15  ;;  %v10542_v20 = vcombine.high %v4773_v32, %v4777_v18  ;;  %v10541_v22 = vcombine.low %v4773_v32, %v4777_v18  ;;  %v4630_v5 = vrot.slane %v4617_v62, %v14101_v41 }
 0x388   : > { %6217 = vmatprep.subr.bf16.mxu0 %v10534_v28 }
 0x389   : > { %6218 = vmatpush1.bf16.msra.mxu0 %v10533_v16  ;;  %6299 = vmatprep.subr.bf16.mxu1 %v10536_v31 }
 0x38a   : > { %6300 = vmatpush1.bf16.msra.mxu1 %v10535_v17  ;;  %6219 = vmatprep.subr.bf16.mxu0 %v10542_v20 }
 0x38b   : > { %6301 = vmatprep.subr.bf16.mxu1 %v10544_v24  ;;  %v4793_v24 = vld [vmem:[%s13292_s4 + $0x460] sm:$0xff] }
 0x38d   : > { %6220 = vmatpush1.bf16.msra.mxu0 %v10541_v22  ;;  %v4789_v22 = vld [vmem:[%s13292_s4 + $0x440] sm:$0xff] }
 0x38e   : > { %6302 = vmatpush1.bf16.msra.mxu1 %v10543_v23  ;;  %6230 = vmatprep.subr.bf16.mxu0 %v10550_v30  ;;  %v4790_v30 = vld [vmem:[%s13292_s4 + $0x448] sm:$0xff] }
 0x38f   : > { %6312 = vmatprep.subr.bf16.mxu1 %v10552_v40  ;;  %v4794_v40 = vld [vmem:[%s13292_s4 + $0x468] sm:$0xff] }
 0x3b0   : > { %v3841_v44 = vpop.f32.mrb[32].mxu0  ;;  %v3882_v46 = vpop.f32.mrb[32].mxu1 }
 0x3b1   : > { %v3889_v47 = vadd.f32 %v3841_v44, %v3524_v0  ;;  %v3891_v53 = vadd.f32 %v3882_v46, %v3526_v4  ;;  %v3843_v56 = vpop.f32.mrb[33].mxu0  ;;  %v3884_v60 = vpop.f32.mrb[33].mxu1  ;;  %v14108_v0 = vsub.s32 3, %v14095_v42  ;;  %v4622_v4 = vrot.slane %v4617_v62, %v14098_v33 }
 0x3b2   : > { %v3890_v61 = vadd.f32 %v3843_v56, %v3525_v7  ;;  %v3892_v50 = vadd.f32 %v3884_v60, %v3527_v8  ;;  %v3845_v35 = vpop.f32.mrb[34].mxu0  ;;  %v3886_v59 = vpop.f32.mrb[34].mxu1  ;;  %v4626_v8 = vrot.slane %v4617_v62, %v14105_v3  ;;  %v10560_v56 = vcombine.high %v4790_v30, %v4794_v40  ;;  %v4801_v60 = vld [vmem:[%s13292_s4 + $0x4a0] sm:$0xff] }
 0x3b3   : > { %v3846_v52 = vpop.f32.mrb[35].mxu0  ;;  %v3887_v49 = vpop.f32.mrb[35].mxu1  ;;  %v4634_v9 = vrot.slane %v4617_v62, %v14108_v0  ;;  %v10557_v59 = vcombine.low %v4789_v22, %v4793_v24  ;;  %v4822_v62 = vld [vmem:[%s13292_s4 + $0x548] sm:$0xff] }
 0x3b4   : > { %v10559_v52 = vcombine.low %v4790_v30, %v4794_v40  ;;  %v4850_v30 = vld [vmem:[%s13292_s4 + $0x628] sm:$0xff] }
 0x3dc   : > { %v4202_v48 = vpop.f32.mrb[36].mxu0  ;;  %v4243_v43 = vpop.f32.mrb[36].mxu1 }
 0x3dd   : > { %v4250_v1 = vadd.f32 %v4202_v48, %v3889_v47  ;;  %v4252_v2 = vadd.f32 %v4243_v43, %v3891_v53  ;;  %v4204_v39 = vpop.f32.mrb[37].mxu0  ;;  %v4245_v51 = vpop.f32.mrb[37].mxu1  ;;  %v4797_v47 = vld [vmem:[%s13292_s4 + $0x480] sm:$0xff]  ;;  %v10558_v53 = vcombine.high %v4789_v22, %v4793_v24  ;;  %v4846_v24 = vld [vmem:[%s13292_s4 + $0x608] sm:$0xff] }
 0x3de   : > { %v4251_v55 = vadd.f32 %v4204_v39, %v3890_v61  ;;  %v4253_v57 = vadd.f32 %v4245_v51, %v3892_v50  ;;  %v4206_v45 = vpop.f32.mrb[38].mxu0  ;;  %v4247_v63 = vpop.f32.mrb[38].mxu1  ;;  %v4798_v61 = vld [vmem:[%s13292_s4 + $0x488] sm:$0xff]  ;;  %v10566_v49 = vcombine.high %v4797_v47, %v4801_v60  ;;  %v4805_v43 = vld [vmem:[%s13292_s4 + $0x4c0] sm:$0xff]  ;;  %v10565_v29 = vcombine.low %v4797_v47, %v4801_v60 }
 0x3df   : > { %v4207_v54 = vpop.f32.mrb[39].mxu0  ;;  %v4248_v36 = vpop.f32.mrb[39].mxu1  ;;  %v4802_v50 = vld [vmem:[%s13292_s4 + $0x4a8] sm:$0xff]  ;;  %v4817_v39 = vld [vmem:[%s13292_s4 + $0x520] sm:$0xff] }
 0x3e0   : > { %v10568_v48 = vcombine.high %v4798_v61, %v4802_v50  ;;  %v10567_v34 = vcombine.low %v4798_v61, %v4802_v50  ;;  %v4814_v51 = vld [vmem:[%s13292_s4 + $0x508] sm:$0xff]  ;;  %v4821_v36 = vld [vmem:[%s13292_s4 + $0x540] sm:$0xff] }
 0x3e1   : > { %v4845_v22 = vld [vmem:[%s13292_s4 + $0x600] sm:$0xff]  ;;  %v4854_v50 = vld [vmem:[%s13292_s4 + $0x648] sm:$0xff] }
 0x3e2   : > { %v4853_v60 = vld [vmem:[%s13292_s4 + $0x640] sm:$0xff] }
 0x3e3   : > { %v4857_v61 = vld [vmem:[%s13292_s4 + $0x660] sm:$0xff] }
 0x408   : > { %v4565_v6 = vpop.f32.mrb[40].mxu0  ;;  %v4606_v7 = vpop.f32.mrb[40].mxu1 }
 0x409   : > { %v4613_v10 = vadd.f32 %v4565_v6, %v4250_v1  ;;  %v4615_v11 = vadd.f32 %v4606_v7, %v4252_v2  ;;  %v4567_v12 = vpop.f32.mrb[41].mxu0  ;;  %v4608_v27 = vpop.f32.mrb[41].mxu1  ;;  %v4813_v2 = vld [vmem:[%s13292_s4 + $0x500] sm:$0xff]  ;;  %v10590_v7 = vcombine.high %v4821_v36, %v4825_v58 }
 0x40a   : > { %v4614_v13 = vadd.f32 %v4567_v12, %v4251_v55  ;;  %v4616_v28 = vadd.f32 %v4608_v27, %v4253_v57  ;;  %v4569_v14 = vpop.f32.mrb[42].mxu0  ;;  %v4610_v15 = vpop.f32.mrb[42].mxu1  ;;  %v4818_v55 = vld [vmem:[%s13292_s4 + $0x528] sm:$0xff]  ;;  %v10573_v57 = vcombine.low %v4805_v43, %v4809_v25  ;;  %v10582_v63 = vcombine.high %v4813_v2, %v4817_v39 }
 0x40b   : > { %v4639_v16 = vadd.f32 %v4622_v4, %v4613_v10  ;;  %v14114_v17 = vadd.f32 %v4630_v5, %v4615_v11  ;;  %v4570_v31 = vpop.f32.mrb[43].mxu0  ;;  %v4611_v32 = vpop.f32.mrb[43].mxu1  ;;  %v10584_v54 = vcombine.high %v4814_v51, %v4818_v55  ;;  %v4826_v4 = vld [vmem:[%s13292_s4 + $0x568] sm:$0xff]  ;;  %v10581_v5 = vcombine.low %v4813_v2, %v4817_v39  ;;  %v4833_v10 = vld [vmem:[%s13292_s4 + $0x5a0] sm:$0xff] }
 0x40c   : > { %v4640_v18 = vadd.f32 %v4626_v8, %v4614_v13  ;;  %v4642_v19 = vadd.f32 %v4634_v9, %v4616_v28  ;;  %v10583_v6 = vcombine.low %v4814_v51, %v4818_v55  ;;  %v10592_v8 = vcombine.high %v4822_v62, %v4826_v4  ;;  %v4829_v9 = vld [vmem:[%s13292_s4 + $0x580] sm:$0xff]  ;;  %v4830_v11 = vld [vmem:[%s13292_s4 + $0x588] sm:$0xff] }
 0x40d   : > { %v4643_v20 = vmax.f32 %v4639_v16, 0.0  ;;  %v4834_v12 = vld [vmem:[%s13292_s4 + $0x5a8] sm:$0xff]  ;;  %v10589_v27 = vcombine.low %v4821_v36, %v4825_v58  ;;  %v10591_v13 = vcombine.low %v4822_v62, %v4826_v4  ;;  %v10598_v28 = vcombine.high %v4829_v9, %v4833_v10  ;;  %v4837_v15 = vld [vmem:[%s13292_s4 + $0x5c0] sm:$0xff] }
 0x40e   : > { %v4644_v21 = vmax.f32 %v4640_v18, 0.0  ;;  %v4646_v23 = vmax.f32 %v4642_v19, 0.0  ;;  %v10600_v14 = vcombine.high %v4830_v11, %v4834_v12  ;;  %v4841_v16 = vld [vmem:[%s13292_s4 + $0x5e0] sm:$0xff]  ;;  %v4838_v31 = vld [vmem:[%s13292_s4 + $0x5c8] sm:$0xff]  ;;  %v10597_v18 = vcombine.low %v4829_v9, %v4833_v10 }
 0x40f   : > { %v14122_v46 = vpack.c.bf16 %v4643_v20, %v4643_v20  ;;  %v4842_v32 = vld [vmem:[%s13292_s4 + $0x5e8] sm:$0xff]  ;;  %v10599_v19 = vcombine.low %v4830_v11, %v4834_v12  ;;  %v10606_v20 = vcombine.high %v4837_v15, %v4841_v16  ;;  %v10605_v40 = vcombine.low %v4837_v15, %v4841_v16  ;;  %v4869_v39 = vld [vmem:[%s13292_s4 + $0x6c0] sm:$0xff] }
 0x410   : > { %v14120_v44 = vpack.c.bf16 %v4644_v21, %v4644_v21  ;;  %v14130_v35 = vpack.c.bf16 %v4646_v23, %v4646_v23  ;;  %v10608_v21 = vcombine.high %v4838_v31, %v4842_v32  ;;  %v4849_v23 = vld [vmem:[%s13292_s4 + $0x620] sm:$0xff]  ;;  %v10607_v47 = vcombine.low %v4838_v31, %v4842_v32  ;;  %v4870_v55 = vld [vmem:[%s13292_s4 + $0x6c8] sm:$0xff] }
 0x411   : > { %v4873_v51 = vld [vmem:[%s13292_s4 + $0x6e0] sm:$0xff]  ;;  %v4878_v4 = vld [vmem:[%s13292_s4 + $0x708] sm:$0xff] }
 0x412   : > { %6221 = vmatprep.mubr.bf16.mxu0 %v14120_v44  ;;  %6303 = vmatprep.mubr.bf16.mxu1 %v14120_v44  ;;  %v4877_v58 = vld [vmem:[%s13292_s4 + $0x700] sm:$0xff]  ;;  %v4886_v12 = vld [vmem:[%s13292_s4 + $0x748] sm:$0xff] }
 0x413   : > { %6222 = vmatmul.mubr.bf16.vlgmr.msra.gmra.mrb[44].mxu0 %v14122_v46  ;;  %6304 = vmatmul.mubr.bf16.vlgmr.msra.gmra.mrb[44].mxu1 %v14122_v46  ;;  %v4881_v62 = vld [vmem:[%s13292_s4 + $0x720] sm:$0xff]  ;;  %v4894_v32 = vld [vmem:[%s13292_s4 + $0x788] sm:$0xff] }
 0x414   : > { %6231 = vmatpush1.bf16.msra.mxu0 %v10549_v37  ;;  %6313 = vmatpush1.bf16.msra.mxu1 %v10551_v38  ;;  %v4810_v37 = vld [vmem:[%s13292_s4 + $0x4e8] sm:$0xff]  ;;  %v10574_v38 = vcombine.high %v4805_v43, %v4809_v25  ;;  %v4861_v25 = vld [vmem:[%s13292_s4 + $0x680] sm:$0xff] }
 0x415   : > { %6262 = vmatprep.mubr.bf16.mxu0 %v14130_v35  ;;  %6344 = vmatprep.mubr.bf16.mxu1 %v14130_v35  ;;  %v10576_v1 = vcombine.high %v4806_v26, %v4810_v37  ;;  %v10575_v45 = vcombine.low %v4806_v26, %v4810_v37  ;;  %v4865_v26 = vld [vmem:[%s13292_s4 + $0x6a0] sm:$0xff]  ;;  %v4862_v37 = vld [vmem:[%s13292_s4 + $0x688] sm:$0xff] }
 0x416   : > { %6232 = vmatprep.subr.bf16.mxu0 %v10558_v53  ;;  %6314 = vmatprep.subr.bf16.mxu1 %v10560_v56  ;;  %v10614_v53 = vcombine.high %v4845_v22, %v4849_v23  ;;  %v10616_v56 = vcombine.high %v4846_v24, %v4850_v30  ;;  %v4885_v10 = vld [vmem:[%s13292_s4 + $0x740] sm:$0xff] }
 0x417   : > { %v4889_v11 = vld [vmem:[%s13292_s4 + $0x760] sm:$0xff] }
 0x418   : > { %6233 = vmatpush1.bf16.msra.mxu0 %v10557_v59  ;;  %6315 = vmatpush1.bf16.msra.mxu1 %v10559_v52  ;;  %v4858_v59 = vld [vmem:[%s13292_s4 + $0x668] sm:$0xff]  ;;  %v10613_v52 = vcombine.low %v4845_v22, %v4849_v23  ;;  %v4893_v16 = vld [vmem:[%s13292_s4 + $0x780] sm:$0xff] }
 0x419   : > { %6234 = vmatprep.subr.bf16.mxu0 %v10566_v49  ;;  %6316 = vmatprep.subr.bf16.mxu1 %v10568_v48  ;;  %v10615_v49 = vcombine.low %v4846_v24, %v4850_v30  ;;  %v10622_v48 = vcombine.high %v4853_v60, %v4857_v61  ;;  %v10624_v43 = vcombine.high %v4854_v50, %v4858_v59  ;;  %v4897_v31 = vld [vmem:[%s13292_s4 + $0x7a0] sm:$0xff]  ;;  %v4902_v30 = vld [vmem:[%s13292_s4 + $0x7c8] sm:$0xff] }
 0x41a   : > { %v4901_v23 = vld [vmem:[%s13292_s4 + $0x7c0] sm:$0xff] }
 0x41b   : > { %v4905_v24 = vld [vmem:[%s13292_s4 + $0x7e0] sm:$0xff] }
 0x41c   : > { %6235 = vmatpush1.bf16.msra.mxu0 %v10565_v29  ;;  %6317 = vmatpush1.bf16.msra.mxu1 %v10567_v34  ;;  %v4866_v29 = vld [vmem:[%s13292_s4 + $0x6a8] sm:$0xff]  ;;  %v10621_v34 = vcombine.low %v4853_v60, %v4857_v61  ;;  %v4655_v61 = vld [vmem:[%s13292_s4 + $0x10] sm:$0xff] }
 0x41d   : > { %6236 = vmatprep.subr.bf16.mxu0 %v10574_v38  ;;  %6318 = vmatprep.subr.bf16.mxu1 %v10576_v1  ;;  %v10623_v38 = vcombine.low %v4854_v50, %v4858_v59  ;;  %v10630_v1 = vcombine.high %v4861_v25, %v4865_v26  ;;  %v10632_v2 = vcombine.high %v4862_v37, %v4866_v29  ;;  %v4659_v50 = vld [vmem:[%s13292_s4 + $0x30] sm:$0xff]  ;;  %v4656_v59 = vld [vmem:[%s13292_s4 + $0x18] sm:$0xff] }
 0x420   : > { %6237 = vmatpush1.bf16.msra.mxu0 %v10573_v57  ;;  %6319 = vmatpush1.bf16.msra.mxu1 %v10575_v45  ;;  %v4874_v57 = vld [vmem:[%s13292_s4 + $0x6e8] sm:$0xff]  ;;  %v10629_v45 = vcombine.low %v4861_v25, %v4865_v26  ;;  %v10426_v25 = vcombine.high %v4655_v61, %v4659_v50 }
 0x421   : > { %6238 = vmatprep.subr.bf16.mxu0 %v10582_v63  ;;  %6320 = vmatprep.subr.bf16.mxu1 %v10584_v54  ;;  %v10631_v63 = vcombine.low %v4862_v37, %v4866_v29  ;;  %v10638_v54 = vcombine.high %v4869_v39, %v4873_v51  ;;  %v10640_v36 = vcombine.high %v4870_v55, %v4874_v57  ;;  %v4663_v37 = vld [vmem:[%s13292_s4 + $0x50] sm:$0xff] }
 0x422   : > { %v4667_v29 = vld [vmem:[%s13292_s4 + $0x70] sm:$0xff] }
 0x424   : > { %6239 = vmatpush1.bf16.msra.mxu0 %v10581_v5  ;;  %6321 = vmatpush1.bf16.msra.mxu1 %v10583_v6  ;;  %v4882_v5 = vld [vmem:[%s13292_s4 + $0x728] sm:$0xff]  ;;  %v10637_v6 = vcombine.low %v4869_v39, %v4873_v51 }
 0x425   : > { %6240 = vmatprep.subr.bf16.mxu0 %v10590_v7  ;;  %6322 = vmatprep.subr.bf16.mxu1 %v10592_v8  ;;  %v10639_v7 = vcombine.low %v4870_v55, %v4874_v57  ;;  %v10646_v8 = vcombine.high %v4877_v58, %v4881_v62  ;;  %v10648_v9 = vcombine.high %v4878_v4, %v4882_v5  ;;  %v4671_v55 = vld [vmem:[%s13292_s4 + $0x90] sm:$0xff] }
 0x426   : > { %v4675_v57 = vld [vmem:[%s13292_s4 + $0xb0] sm:$0xff] }
 0x428   : > { %6241 = vmatpush1.bf16.msra.mxu0 %v10589_v27  ;;  %6323 = vmatpush1.bf16.msra.mxu1 %v10591_v13  ;;  %v4890_v27 = vld [vmem:[%s13292_s4 + $0x768] sm:$0xff]  ;;  %v10645_v13 = vcombine.low %v4877_v58, %v4881_v62  ;;  %v10442_v58 = vcombine.high %v4671_v55, %v4675_v57 }
 0x429   : > { %6242 = vmatprep.subr.bf16.mxu0 %v10598_v28  ;;  %6324 = vmatprep.subr.bf16.mxu1 %v10600_v14  ;;  %v10647_v28 = vcombine.low %v4878_v4, %v4882_v5  ;;  %v10654_v14 = vcombine.high %v4885_v10, %v4889_v11  ;;  %v10656_v15 = vcombine.high %v4886_v12, %v4890_v27  ;;  %v4679_v4 = vld [vmem:[%s13292_s4 + $0xd0] sm:$0xff] }
 0x42a   : > { %v4683_v5 = vld [vmem:[%s13292_s4 + $0xf0] sm:$0xff] }
 0x42c   : > { %6243 = vmatpush1.bf16.msra.mxu0 %v10597_v18  ;;  %6325 = vmatpush1.bf16.msra.mxu1 %v10599_v19  ;;  %v4898_v18 = vld [vmem:[%s13292_s4 + $0x7a8] sm:$0xff]  ;;  %v10653_v19 = vcombine.low %v4885_v10, %v4889_v11  ;;  %v4687_v11 = vld [vmem:[%s13292_s4 + $0x110] sm:$0xff] }
 0x42d   : > { %6244 = vmatprep.subr.bf16.mxu0 %v10606_v20  ;;  %6326 = vmatprep.subr.bf16.mxu1 %v10608_v21  ;;  %v10655_v20 = vcombine.low %v4886_v12, %v4890_v27  ;;  %v10662_v21 = vcombine.high %v4893_v16, %v4897_v31  ;;  %v10664_v22 = vcombine.high %v4894_v32, %v4898_v18  ;;  %v4691_v12 = vld [vmem:[%s13292_s4 + $0x130] sm:$0xff]  ;;  %v4688_v27 = vld [vmem:[%s13292_s4 + $0x118] sm:$0xff] }
 0x430   : > { %6245 = vmatpush1.bf16.msra.mxu0 %v10605_v40  ;;  %6327 = vmatpush1.bf16.msra.mxu1 %v10607_v47  ;;  %v4906_v40 = vld [vmem:[%s13292_s4 + $0x7e8] sm:$0xff]  ;;  %v10661_v47 = vcombine.low %v4893_v16, %v4897_v31  ;;  %v4695_v31 = vld [vmem:[%s13292_s4 + $0x150] sm:$0xff] }
 0x431   : > { %6246 = vmatprep.subr.bf16.mxu0 %v10614_v53  ;;  %6328 = vmatprep.subr.bf16.mxu1 %v10616_v56  ;;  %v10663_v53 = vcombine.low %v4894_v32, %v4898_v18  ;;  %v10670_v56 = vcombine.high %v4901_v23, %v4905_v24  ;;  %v10672_v60 = vcombine.high %v4902_v30, %v4906_v40  ;;  %v4699_v32 = vld [vmem:[%s13292_s4 + $0x170] sm:$0xff]  ;;  %v4696_v18 = vld [vmem:[%s13292_s4 + $0x158] sm:$0xff] }
 0x434   : > { %6247 = vmatpush1.bf16.msra.mxu0 %v10613_v52  ;;  %6329 = vmatpush1.bf16.msra.mxu1 %v10615_v49  ;;  %v4660_v52 = vld [vmem:[%s13292_s4 + $0x38] sm:$0xff]  ;;  %v10669_v49 = vcombine.low %v4901_v23, %v4905_v24  ;;  %v4703_v24 = vld [vmem:[%s13292_s4 + $0x190] sm:$0xff] }
 0x435   : > { %6248 = vmatprep.subr.bf16.mxu0 %v10622_v48  ;;  %6330 = vmatprep.subr.bf16.mxu1 %v10624_v43  ;;  %v10671_v48 = vcombine.low %v4902_v30, %v4906_v40  ;;  %v4645_v43 = vmax.f32 %v14114_v17, 0.0  ;;  %v10428_v26 = vcombine.high %v4656_v59, %v4660_v52  ;;  %v10427_v39 = vcombine.low %v4656_v59, %v4660_v52  ;;  %v4707_v30 = vld [vmem:[%s13292_s4 + $0x1b0] sm:$0xff]  ;;  %v4704_v40 = vld [vmem:[%s13292_s4 + $0x198] sm:$0xff] }
 0x436   : > { %v10434_v17 = vcombine.high %v4663_v37, %v4667_v29  ;;  %v4715_v59 = vld [vmem:[%s13292_s4 + $0x1f0] sm:$0xff]  ;;  %v4712_v52 = vld [vmem:[%s13292_s4 + $0x1d8] sm:$0xff] }
 0x438   : > { %6249 = vmatpush1.bf16.msra.mxu0 %v10621_v34  ;;  %6331 = vmatpush1.bf16.msra.mxu1 %v10623_v38  ;;  %v4664_v34 = vld [vmem:[%s13292_s4 + $0x58] sm:$0xff] }
 0x439   : > { %6250 = vmatprep.subr.bf16.mxu0 %v10630_v1  ;;  %6332 = vmatprep.subr.bf16.mxu1 %v10632_v2  ;;  %v4668_v38 = vld [vmem:[%s13292_s4 + $0x78] sm:$0xff]  ;;  %v10425_v1 = vcombine.low %v4655_v61, %v4659_v50  ;;  %v14203_v2 = vpack.c.bf16 %v4645_v43, %v4645_v43  ;;  %v4711_v50 = vld [vmem:[%s13292_s4 + $0x1d0] sm:$0xff] }
 0x43a   : > { %v10436_v51 = vcombine.high %v4664_v34, %v4668_v38 }
 0x43c   : > { %6251 = vmatpush1.bf16.msra.mxu0 %v10629_v45  ;;  %6333 = vmatpush1.bf16.msra.mxu1 %v10631_v63  ;;  %v4672_v45 = vld [vmem:[%s13292_s4 + $0x98] sm:$0xff] }
 0x43d   : > { %6252 = vmatprep.subr.bf16.mxu0 %v10638_v54  ;;  %6334 = vmatprep.subr.bf16.mxu1 %v10640_v36  ;;  %v4676_v63 = vld [vmem:[%s13292_s4 + $0xb8] sm:$0xff]  ;;  %v10433_v54 = vcombine.low %v4663_v37, %v4667_v29  ;;  %v10435_v36 = vcombine.low %v4664_v34, %v4668_v38  ;;  %v4719_v37 = vld [vmem:[%s13292_s4 + $0x210] sm:$0xff] }
 0x43e   : > { %v10444_v62 = vcombine.high %v4672_v45, %v4676_v63  ;;  %v4723_v29 = vld [vmem:[%s13292_s4 + $0x230] sm:$0xff]  ;;  %v4720_v34 = vld [vmem:[%s13292_s4 + $0x218] sm:$0xff] }
 0x43f   : > { %v4724_v38 = vld [vmem:[%s13292_s4 + $0x238] sm:$0xff] }
 0x440   : > { %6253 = vmatpush1.bf16.msra.mxu0 %v10637_v6  ;;  %6335 = vmatpush1.bf16.msra.mxu1 %v10639_v7  ;;  %v4680_v6 = vld [vmem:[%s13292_s4 + $0xd8] sm:$0xff] }
 0x441   : > { %6254 = vmatprep.subr.bf16.mxu0 %v10646_v8  ;;  %6336 = vmatprep.subr.bf16.mxu1 %v10648_v9  ;;  %v4684_v7 = vld [vmem:[%s13292_s4 + $0xf8] sm:$0xff]  ;;  %v10441_v8 = vcombine.low %v4671_v55, %v4675_v57  ;;  %v10443_v9 = vcombine.low %v4672_v45, %v4676_v63  ;;  %v4727_v55 = vld [vmem:[%s13292_s4 + $0x250] sm:$0xff] }
 0x442   : > { %v10452_v10 = vcombine.high %v4680_v6, %v4684_v7  ;;  %v4731_v57 = vld [vmem:[%s13292_s4 + $0x270] sm:$0xff]  ;;  %v4728_v45 = vld [vmem:[%s13292_s4 + $0x258] sm:$0xff] }
 0x443   : > { %v4732_v63 = vld [vmem:[%s13292_s4 + $0x278] sm:$0xff] }
 0x444   : > { %6255 = vmatpush1.bf16.msra.mxu0 %v10645_v13  ;;  %6337 = vmatpush1.bf16.msra.mxu1 %v10647_v28  ;;  %v4692_v13 = vld [vmem:[%s13292_s4 + $0x138] sm:$0xff]  ;;  %v10449_v28 = vcombine.low %v4679_v4, %v4683_v5 }
 0x445   : > { %6256 = vmatprep.subr.bf16.mxu0 %v10654_v14  ;;  %6338 = vmatprep.subr.bf16.mxu1 %v10656_v15  ;;  %v10451_v14 = vcombine.low %v4680_v6, %v4684_v7  ;;  %v10458_v15 = vcombine.high %v4687_v11, %v4691_v12  ;;  %v10460_v16 = vcombine.high %v4688_v27, %v4692_v13  ;;  %v4736_v6 = vld [vmem:[%s13292_s4 + $0x298] sm:$0xff] }
 0x446   : > { %v4740_v7 = vld [vmem:[%s13292_s4 + $0x2b8] sm:$0xff] }
 0x448   : > { %6257 = vmatpush1.bf16.msra.mxu0 %v10653_v19  ;;  %6339 = vmatpush1.bf16.msra.mxu1 %v10655_v20  ;;  %v4700_v19 = vld [vmem:[%s13292_s4 + $0x178] sm:$0xff]  ;;  %v10457_v20 = vcombine.low %v4687_v11, %v4691_v12  ;;  %v4743_v11 = vld [vmem:[%s13292_s4 + $0x2d0] sm:$0xff] }
 0x449   : > { %6258 = vmatprep.subr.bf16.mxu0 %v10662_v21  ;;  %6340 = vmatprep.subr.bf16.mxu1 %v10664_v22  ;;  %v10459_v21 = vcombine.low %v4688_v27, %v4692_v13  ;;  %v10466_v22 = vcombine.high %v4695_v31, %v4699_v32  ;;  %v10468_v23 = vcombine.high %v4696_v18, %v4700_v19  ;;  %v4747_v12 = vld [vmem:[%s13292_s4 + $0x2f0] sm:$0xff]  ;;  %v4744_v27 = vld [vmem:[%s13292_s4 + $0x2d8] sm:$0xff] }
 0x44a   : > { %v4748_v13 = vld [vmem:[%s13292_s4 + $0x2f8] sm:$0xff] }
 0x44c   : > { %6259 = vmatpush1.bf16.msra.mxu0 %v10661_v47  ;;  %6341 = vmatpush1.bf16.msra.mxu1 %v10663_v53  ;;  %v4708_v47 = vld [vmem:[%s13292_s4 + $0x1b8] sm:$0xff]  ;;  %v10465_v53 = vcombine.low %v4695_v31, %v4699_v32  ;;  %v4751_v31 = vld [vmem:[%s13292_s4 + $0x310] sm:$0xff] }
 0x44d   : > { %6260 = vmatprep.subr.bf16.mxu0 %v10670_v56  ;;  %6342 = vmatprep.subr.bf16.mxu1 %v10672_v60  ;;  %v10467_v56 = vcombine.low %v4696_v18, %v4700_v19  ;;  %v10474_v60 = vcombine.high %v4703_v24, %v4707_v30  ;;  %v10476_v61 = vcombine.high %v4704_v40, %v4708_v47  ;;  %v4755_v32 = vld [vmem:[%s13292_s4 + $0x330] sm:$0xff]  ;;  %v4752_v18 = vld [vmem:[%s13292_s4 + $0x318] sm:$0xff] }
 0x44e   : > { %v10475_v43 = vcombine.low %v4704_v40, %v4708_v47  ;;  %v4756_v19 = vld [vmem:[%s13292_s4 + $0x338] sm:$0xff] }
 0x44f   : > { %v4760_v40 = vld [vmem:[%s13292_s4 + $0x358] sm:$0xff] }
 0x450   : > { %6261 = vmatpush1.bf16.msra.mxu0 %v10669_v49  ;;  %6343 = vmatpush1.bf16.msra.mxu1 %v10671_v48  ;;  %v4716_v49 = vld [vmem:[%s13292_s4 + $0x1f8] sm:$0xff]  ;;  %v10473_v48 = vcombine.low %v4703_v24, %v4707_v30  ;;  %v4759_v24 = vld [vmem:[%s13292_s4 + $0x350] sm:$0xff] }
 0x451   : > { %6353 = vmatprep.subr.bf16.mxu0 %v10426_v25  ;;  %6435 = vmatprep.subr.bf16.mxu1 %v10428_v26  ;;  %v10482_v25 = vcombine.high %v4711_v50, %v4715_v59  ;;  %v10484_v26 = vcombine.high %v4712_v52, %v4716_v49  ;;  %v4763_v30 = vld [vmem:[%s13292_s4 + $0x370] sm:$0xff]  ;;  %v4764_v47 = vld [vmem:[%s13292_s4 + $0x378] sm:$0xff] }
 0x453   : > { %6263 = vmatmul.mubr.bf16.vlgmr.msra.gmra.mrb[44].mxu0 %v14203_v2  ;;  %6345 = vmatmul.mubr.bf16.vlgmr.msra.gmra.mrb[44].mxu1 %v14203_v2 }
 0x454   : > { %6354 = vmatpush1.bf16.msra.mxu0 %v10425_v1  ;;  %6385 = vmatprep.mubr.bf16.mxu0 %v14120_v44  ;;  %v10481_v1 = vcombine.low %v4711_v50, %v4715_v59  ;;  %v4767_v50 = vld [vmem:[%s13292_s4 + $0x390] sm:$0xff] }
 0x455   : > { %6436 = vmatpush1.bf16.msra.mxu1 %v10427_v39  ;;  %6467 = vmatprep.mubr.bf16.mxu1 %v14120_v44  ;;  %v10450_v44 = vcombine.high %v4679_v4, %v4683_v5  ;;  %v10483_v39 = vcombine.low %v4712_v52, %v4716_v49  ;;  %v4735_v4 = vld [vmem:[%s13292_s4 + $0x290] sm:$0xff]  ;;  %v4768_v52 = vld [vmem:[%s13292_s4 + $0x398] sm:$0xff] }
 0x456   : > { %6355 = vmatprep.subr.bf16.mxu0 %v10434_v17  ;;  %6437 = vmatprep.subr.bf16.mxu1 %v10436_v51  ;;  %v10490_v17 = vcombine.high %v4719_v37, %v4723_v29  ;;  %v10492_v51 = vcombine.high %v4720_v34, %v4724_v38  ;;  %v4739_v5 = vld [vmem:[%s13292_s4 + $0x2b0] sm:$0xff]  ;;  %v4772_v49 = vld [vmem:[%s13292_s4 + $0x3b8] sm:$0xff] }
 0x457   : > { %v4771_v59 = vld [vmem:[%s13292_s4 + $0x3b0] sm:$0xff] }
 0x458   : > { %6356 = vmatpush1.bf16.msra.mxu0 %v10433_v54  ;;  %v10489_v54 = vcombine.low %v4719_v37, %v4723_v29  ;;  %v4775_v37 = vld [vmem:[%s13292_s4 + $0x3d0] sm:$0xff] }
 0x459   : > { %6438 = vmatpush1.bf16.msra.mxu1 %v10435_v36  ;;  %6357 = vmatprep.subr.bf16.mxu0 %v10442_v58  ;;  %v10491_v36 = vcombine.low %v4720_v34, %v4724_v38  ;;  %v10498_v58 = vcombine.high %v4727_v55, %v4731_v57  ;;  %v4779_v29 = vld [vmem:[%s13292_s4 + $0x3f0] sm:$0xff]  ;;  %v4776_v34 = vld [vmem:[%s13292_s4 + $0x3d8] sm:$0xff] }
 0x45a   : > { %6439 = vmatprep.subr.bf16.mxu1 %v10444_v62  ;;  %v10500_v62 = vcombine.high %v4728_v45, %v4732_v63  ;;  %v4780_v38 = vld [vmem:[%s13292_s4 + $0x3f8] sm:$0xff] }
 0x45c   : > { %6358 = vmatpush1.bf16.msra.mxu0 %v10441_v8  ;;  %v10497_v8 = vcombine.low %v4727_v55, %v4731_v57  ;;  %v4783_v55 = vld [vmem:[%s13292_s4 + $0x410] sm:$0xff] }
 0x45d   : > { %6440 = vmatpush1.bf16.msra.mxu1 %v10443_v9  ;;  %6359 = vmatprep.subr.bf16.mxu0 %v10450_v44  ;;  %v10499_v9 = vcombine.low %v4728_v45, %v4732_v63  ;;  %v10506_v44 = vcombine.high %v4735_v4, %v4739_v5  ;;  %v4787_v57 = vld [vmem:[%s13292_s4 + $0x430] sm:$0xff]  ;;  %v4784_v45 = vld [vmem:[%s13292_s4 + $0x418] sm:$0xff] }
 0x45e   : > { %6441 = vmatprep.subr.bf16.mxu1 %v10452_v10  ;;  %v10508_v10 = vcombine.high %v4736_v6, %v4740_v7  ;;  %v4788_v63 = vld [vmem:[%s13292_s4 + $0x438] sm:$0xff] }
 0x460   : > { %6360 = vmatpush1.bf16.msra.mxu0 %v10449_v28  ;;  %v10505_v28 = vcombine.low %v4735_v4, %v4739_v5  ;;  %v4791_v4 = vld [vmem:[%s13292_s4 + $0x450] sm:$0xff] }
 0x461   : > { %6442 = vmatpush1.bf16.msra.mxu1 %v10451_v14  ;;  %6361 = vmatprep.subr.bf16.mxu0 %v10458_v15  ;;  %v10507_v14 = vcombine.low %v4736_v6, %v4740_v7  ;;  %v10514_v15 = vcombine.high %v4743_v11, %v4747_v12  ;;  %v4795_v5 = vld [vmem:[%s13292_s4 + $0x470] sm:$0xff]  ;;  %v10553_v6 = vcombine.low %v4783_v55, %v4787_v57  ;;  %v4792_v7 = vld [vmem:[%s13292_s4 + $0x458] sm:$0xff] }
 0x462   : > { %6443 = vmatprep.subr.bf16.mxu1 %v10460_v16  ;;  %v10516_v16 = vcombine.high %v4744_v27, %v4748_v13 }
 0x464   : > { %6362 = vmatpush1.bf16.msra.mxu0 %v10457_v20  ;;  %v10513_v20 = vcombine.low %v4743_v11, %v4747_v12  ;;  %v4803_v11 = vld [vmem:[%s13292_s4 + $0x4b0] sm:$0xff] }
 0x465   : > { %6444 = vmatpush1.bf16.msra.mxu1 %v10459_v21  ;;  %6363 = vmatprep.subr.bf16.mxu0 %v10466_v22  ;;  %v10515_v21 = vcombine.low %v4744_v27, %v4748_v13  ;;  %v10522_v22 = vcombine.high %v4751_v31, %v4755_v32  ;;  %v4800_v27 = vld [vmem:[%s13292_s4 + $0x498] sm:$0xff] }
 0x466   : > { %6445 = vmatprep.subr.bf16.mxu1 %v10468_v23  ;;  %v10524_v23 = vcombine.high %v4752_v18, %v4756_v19  ;;  %v4804_v13 = vld [vmem:[%s13292_s4 + $0x4b8] sm:$0xff] }
 0x468   : > { %6364 = vmatpush1.bf16.msra.mxu0 %v10465_v53  ;;  %v10521_v53 = vcombine.low %v4751_v31, %v4755_v32  ;;  %v4807_v31 = vld [vmem:[%s13292_s4 + $0x4d0] sm:$0xff] }
 0x469   : > { %6446 = vmatpush1.bf16.msra.mxu1 %v10467_v56  ;;  %6365 = vmatprep.subr.bf16.mxu0 %v10474_v60  ;;  %v10523_v56 = vcombine.low %v4752_v18, %v4756_v19  ;;  %v10530_v60 = vcombine.high %v4759_v24, %v4763_v30  ;;  %v4811_v32 = vld [vmem:[%s13292_s4 + $0x4f0] sm:$0xff]  ;;  %v4808_v18 = vld [vmem:[%s13292_s4 + $0x4d8] sm:$0xff] }
 0x46a   : > { %6447 = vmatprep.subr.bf16.mxu1 %v10476_v61  ;;  %v10532_v61 = vcombine.high %v4760_v40, %v4764_v47 }
 0x46c   : > { %6366 = vmatpush1.bf16.msra.mxu0 %v10473_v48  ;;  %v10529_v48 = vcombine.low %v4759_v24, %v4763_v30  ;;  %v4816_v24 = vld [vmem:[%s13292_s4 + $0x518] sm:$0xff] }
 0x46d   : > { %6448 = vmatpush1.bf16.msra.mxu1 %v10475_v43  ;;  %6367 = vmatprep.subr.bf16.mxu0 %v10482_v25  ;;  %v10531_v43 = vcombine.low %v4760_v40, %v4764_v47  ;;  %v10538_v25 = vcombine.high %v4767_v50, %v4771_v59  ;;  %v4820_v30 = vld [vmem:[%s13292_s4 + $0x538] sm:$0xff]  ;;  %v10577_v40 = vcombine.low %v4807_v31, %v4811_v32 }
 0x46e   : > { %6449 = vmatprep.subr.bf16.mxu1 %v10484_v26  ;;  %v10540_v26 = vcombine.high %v4768_v52, %v4772_v49 }
 0x470   : > { %6368 = vmatpush1.bf16.msra.mxu0 %v10481_v1  ;;  %v10537_v1 = vcombine.low %v4767_v50, %v4771_v59  ;;  %v4824_v50 = vld [vmem:[%s13292_s4 + $0x558] sm:$0xff] }
 0x471   : > { %6450 = vmatpush1.bf16.msra.mxu1 %v10483_v39  ;;  %6369 = vmatprep.subr.bf16.mxu0 %v10490_v17  ;;  %v10539_v39 = vcombine.low %v4768_v52, %v4772_v49  ;;  %v10546_v17 = vcombine.high %v4775_v37, %v4779_v29  ;;  %v4828_v59 = vld [vmem:[%s13292_s4 + $0x578] sm:$0xff]  ;;  %v10587_v49 = vcombine.low %v4816_v24, %v4820_v30 }
 0x472   : > { %6451 = vmatprep.subr.bf16.mxu1 %v10492_v51  ;;  %v10548_v51 = vcombine.high %v4776_v34, %v4780_v38 }
 0x474   : > { %6370 = vmatpush1.bf16.msra.mxu0 %v10489_v54  ;;  %v10545_v54 = vcombine.low %v4775_v37, %v4779_v29  ;;  %v4832_v37 = vld [vmem:[%s13292_s4 + $0x598] sm:$0xff] }
 0x475   : > { %6452 = vmatpush1.bf16.msra.mxu1 %v10491_v36  ;;  %6371 = vmatprep.subr.bf16.mxu0 %v10498_v58  ;;  %v10547_v36 = vcombine.low %v4776_v34, %v4780_v38  ;;  %v10554_v58 = vcombine.high %v4783_v55, %v4787_v57  ;;  %v4836_v29 = vld [vmem:[%s13292_s4 + $0x5b8] sm:$0xff]  ;;  %v10595_v38 = vcombine.low %v4824_v50, %v4828_v59 }
 0x476   : > { %6453 = vmatprep.subr.bf16.mxu1 %v10500_v62  ;;  %v10556_v62 = vcombine.high %v4784_v45, %v4788_v63  ;;  %v4840_v55 = vld [vmem:[%s13292_s4 + $0x5d8] sm:$0xff] }
 0x477   : > { %v4844_v57 = vld [vmem:[%s13292_s4 + $0x5f8] sm:$0xff] }
 0x478   : > { %6372 = vmatpush1.bf16.msra.mxu0 %v10497_v8  ;;  %v4796_v8 = vld [vmem:[%s13292_s4 + $0x478] sm:$0xff] }
 0x479   : > { %6454 = vmatpush1.bf16.msra.mxu1 %v10499_v9  ;;  %6373 = vmatprep.subr.bf16.mxu0 %v10506_v44  ;;  %v10555_v9 = vcombine.low %v4784_v45, %v4788_v63  ;;  %v10562_v44 = vcombine.high %v4791_v4, %v4795_v5  ;;  %v10564_v12 = vcombine.high %v4792_v7, %v4796_v8 }
 0x47a   : > { %6455 = vmatprep.subr.bf16.mxu1 %v10508_v10  ;;  %v4799_v10 = vld [vmem:[%s13292_s4 + $0x490] sm:$0xff]  ;;  %v10603_v63 = vcombine.low %v4832_v37, %v4836_v29 }
 0x47b   : > { %v10569_v19 = vcombine.low %v4799_v10, %v4803_v11 }
 0x47c   : > { %6374 = vmatpush1.bf16.msra.mxu0 %v10505_v28  ;;  %v10561_v28 = vcombine.low %v4791_v4, %v4795_v5  ;;  %v4848_v4 = vld [vmem:[%s13292_s4 + $0x618] sm:$0xff] }
 0x47d   : > { %6456 = vmatpush1.bf16.msra.mxu1 %v10507_v14  ;;  %6375 = vmatprep.subr.bf16.mxu0 %v10514_v15  ;;  %v10563_v14 = vcombine.low %v4792_v7, %v4796_v8  ;;  %v10570_v15 = vcombine.high %v4799_v10, %v4803_v11  ;;  %v4852_v5 = vld [vmem:[%s13292_s4 + $0x638] sm:$0xff]  ;;  %v10611_v7 = vcombine.low %v4840_v55, %v4844_v57  ;;  %v4859_v10 = vld [vmem:[%s13292_s4 + $0x670] sm:$0xff] }
 0x47e   : > { %6457 = vmatprep.subr.bf16.mxu1 %v10516_v16  ;;  %v10572_v16 = vcombine.high %v4800_v27, %v4804_v13  ;;  %v4856_v11 = vld [vmem:[%s13292_s4 + $0x658] sm:$0xff] }
 0x480   : > { %6376 = vmatpush1.bf16.msra.mxu0 %v10513_v20  ;;  %v10571_v20 = vcombine.low %v4800_v27, %v4804_v13  ;;  %v10619_v13 = vcombine.low %v4848_v4, %v4852_v5 }
 0x481   : > { %6458 = vmatpush1.bf16.msra.mxu1 %v10515_v21  ;;  %6377 = vmatprep.subr.bf16.mxu0 %v10522_v22  ;;  %v10578_v21 = vcombine.high %v4807_v31, %v4811_v32  ;;  %v4815_v22 = vld [vmem:[%s13292_s4 + $0x510] sm:$0xff]  ;;  %v4864_v31 = vld [vmem:[%s13292_s4 + $0x698] sm:$0xff] }
 0x482   : > { %6459 = vmatprep.subr.bf16.mxu1 %v10524_v23  ;;  %v4819_v23 = vld [vmem:[%s13292_s4 + $0x530] sm:$0xff]  ;;  %v4868_v32 = vld [vmem:[%s13292_s4 + $0x6b8] sm:$0xff] }
 0x483   : > { %v10585_v52 = vcombine.low %v4815_v22, %v4819_v23 }
 0x484   : > { %6378 = vmatpush1.bf16.msra.mxu0 %v10521_v53  ;;  %v10586_v53 = vcombine.high %v4815_v22, %v4819_v23  ;;  %v4872_v22 = vld [vmem:[%s13292_s4 + $0x6d8] sm:$0xff] }
 0x485   : > { %6460 = vmatpush1.bf16.msra.mxu1 %v10523_v56  ;;  %6379 = vmatprep.subr.bf16.mxu0 %v10530_v60  ;;  %v10588_v56 = vcombine.high %v4816_v24, %v4820_v30  ;;  %v4823_v60 = vld [vmem:[%s13292_s4 + $0x550] sm:$0xff]  ;;  %v4876_v23 = vld [vmem:[%s13292_s4 + $0x6f8] sm:$0xff]  ;;  %v10635_v30 = vcombine.low %v4864_v31, %v4868_v32 }
 0x486   : > { %6461 = vmatprep.subr.bf16.mxu1 %v10532_v61  ;;  %v4827_v61 = vld [vmem:[%s13292_s4 + $0x570] sm:$0xff] }
 0x487   : > { %v10593_v34 = vcombine.low %v4823_v60, %v4827_v61 }
 0x488   : > { %6380 = vmatpush1.bf16.msra.mxu0 %v10529_v48  ;;  %v10594_v48 = vcombine.high %v4823_v60, %v4827_v61  ;;  %v4880_v60 = vld [vmem:[%s13292_s4 + $0x718] sm:$0xff] }
 0x489   : > { %6462 = vmatpush1.bf16.msra.mxu1 %v10531_v43  ;;  %6381 = vmatprep.subr.bf16.mxu0 %v10538_v25  ;;  %v10596_v43 = vcombine.high %v4824_v50, %v4828_v59  ;;  %v4831_v25 = vld [vmem:[%s13292_s4 + $0x590] sm:$0xff]  ;;  %v4884_v61 = vld [vmem:[%s13292_s4 + $0x738] sm:$0xff]  ;;  %v10643_v59 = vcombine.low %v4872_v22, %v4876_v23 }
 0x48a   : > { %6463 = vmatprep.subr.bf16.mxu1 %v10540_v26  ;;  %v4835_v26 = vld [vmem:[%s13292_s4 + $0x5b0] sm:$0xff] }
 0x48b   : > { %v10601_v45 = vcombine.low %v4831_v25, %v4835_v26 }
 0x48c   : > { %6382 = vmatpush1.bf16.msra.mxu0 %v10537_v1  ;;  %v10602_v1 = vcombine.high %v4831_v25, %v4835_v26  ;;  %v4888_v25 = vld [vmem:[%s13292_s4 + $0x758] sm:$0xff] }
 0x48d   : > { %6464 = vmatpush1.bf16.msra.mxu1 %v10539_v39  ;;  %6383 = vmatprep.subr.bf16.mxu0 %v10546_v17  ;;  %v10604_v39 = vcombine.high %v4832_v37, %v4836_v29  ;;  %v4839_v17 = vld [vmem:[%s13292_s4 + $0x5d0] sm:$0xff]  ;;  %v4892_v26 = vld [vmem:[%s13292_s4 + $0x778] sm:$0xff]  ;;  %v10651_v29 = vcombine.low %v4880_v60, %v4884_v61 }
 0x48e   : > { %6465 = vmatprep.subr.bf16.mxu1 %v10548_v51  ;;  %v4843_v51 = vld [vmem:[%s13292_s4 + $0x5f0] sm:$0xff] }
 0x490   : > { %6384 = vmatpush1.bf16.msra.mxu0 %v10545_v54  ;;  %v10610_v54 = vcombine.high %v4839_v17, %v4843_v51 }
 0x491   : > { %6466 = vmatpush1.bf16.msra.mxu1 %v10547_v36  ;;  %6394 = vmatprep.subr.bf16.mxu0 %v10554_v58  ;;  %v10612_v36 = vcombine.high %v4840_v55, %v4844_v57  ;;  %v4847_v58 = vld [vmem:[%s13292_s4 + $0x610] sm:$0xff]  ;;  %v10659_v57 = vcombine.low %v4888_v25, %v4892_v26 }
 0x492   : > { %6476 = vmatprep.subr.bf16.mxu1 %v10556_v62  ;;  %v4851_v62 = vld [vmem:[%s13292_s4 + $0x630] sm:$0xff] }
 0x493   : > { %6386 = vmatmul.mubr.bf16.vlgmr.msra.gmra.mrb[48].mxu0 %v14122_v46  ;;  %v10618_v8 = vcombine.high %v4847_v58, %v4851_v62  ;;  %v10617_v27 = vcombine.low %v4847_v58, %v4851_v62  ;;  %v4904_v58 = vld [vmem:[%s13292_s4 + $0x7d8] sm:$0xff] }
 0x494   : > { %6468 = vmatmul.mubr.bf16.vlgmr.msra.gmra.mrb[48].mxu1 %v14122_v46  ;;  %6395 = vmatpush1.bf16.msra.mxu0 %v10553_v6  ;;  %v4812_v46 = vld [vmem:[%s13292_s4 + $0x4f8] sm:$0xff]  ;;  %v10609_v6 = vcombine.low %v4839_v17, %v4843_v51 }
 0x495   : > { %6426 = vmatprep.mubr.bf16.mxu0 %v14130_v35  ;;  %6477 = vmatpush1.bf16.msra.mxu1 %v10555_v9  ;;  %v10579_v47 = vcombine.low %v4808_v18, %v4812_v46  ;;  %v10620_v9 = vcombine.high %v4848_v4, %v4852_v5  ;;  %v4896_v17 = vld [vmem:[%s13292_s4 + $0x798] sm:$0xff] }
 0x496   : > { %6508 = vmatprep.mubr.bf16.mxu1 %v14130_v35  ;;  %6396 = vmatprep.subr.bf16.mxu0 %v10562_v44  ;;  %v10580_v35 = vcombine.high %v4808_v18, %v4812_v46  ;;  %v4855_v44 = vld [vmem:[%s13292_s4 + $0x650] sm:$0xff]  ;;  %v4900_v51 = vld [vmem:[%s13292_s4 + $0x7b8] sm:$0xff] }
 0x497   : > { %6478 = vmatprep.subr.bf16.mxu1 %v10564_v12  ;;  %v4860_v12 = vld [vmem:[%s13292_s4 + $0x678] sm:$0xff]  ;;  %v10625_v18 = vcombine.low %v4855_v44, %v4859_v10  ;;  %v10667_v5 = vcombine.low %v4896_v17, %v4900_v51 }
 0x498   : > { %6397 = vmatpush1.bf16.msra.mxu0 %v10561_v28  ;;  %v10626_v28 = vcombine.high %v4855_v44, %v4859_v10  ;;  %v10627_v46 = vcombine.low %v4856_v11, %v4860_v12  ;;  %v4908_v62 = vld [vmem:[%s13292_s4 + $0x7f8] sm:$0xff]  ;;  %v12879_v44 = vmov 1983009808  }
 0x499   : > { %6479 = vmatpush1.bf16.msra.mxu1 %v10563_v14  ;;  %6398 = vmatprep.subr.bf16.mxu0 %v10570_v15  ;;  %v10628_v14 = vcombine.high %v4856_v11, %v4860_v12  ;;  %v4863_v15 = vld [vmem:[%s13292_s4 + $0x690] sm:$0xff]  ;;  %v6528_v10 = vunpack.c.l.s4 %v12879_v44  ;;  %v12013_v44 = vld [vmem:[#allocation11 + $0x2c4] ss:$16 sps:$4 sm:$0xff] (!%p10677_p3)  }
 0x49a   : > { %6480 = vmatprep.subr.bf16.mxu1 %v10572_v16  ;;  %v4867_v16 = vld [vmem:[%s13292_s4 + $0x6b0] sm:$0xff] }
 0x49b   : > { %v10633_v24 = vcombine.low %v4863_v15, %v4867_v16  ;;  %v6529_v11 = vunpack.c.0.s8 %v6528_v10  ;;  %v12015_v10 = vld [vmem:[#allocation11 + $0xc0] ss:$16 sps:$4 sm:$0xff] (!%p10677_p3)  }
 0x49c   : > { %6399 = vmatpush1.bf16.msra.mxu0 %v10569_v19  ;;  %v10634_v19 = vcombine.high %v4863_v15, %v4867_v16 }
 0x49d   : > { %6481 = vmatpush1.bf16.msra.mxu1 %v10571_v20  ;;  %6400 = vmatprep.subr.bf16.mxu0 %v10578_v21  ;;  %v10636_v20 = vcombine.high %v4864_v31, %v4868_v32  ;;  %v4871_v21 = vld [vmem:[%s13292_s4 + $0x6d0] sm:$0xff] }
 0x49e   : > { %6482 = vmatprep.subr.bf16.mxu1 %v10580_v35  ;;  %v4875_v35 = vld [vmem:[%s13292_s4 + $0x6f0] sm:$0xff] }
 0x49f   : > { %v10641_v50 = vcombine.low %v4871_v21, %v4875_v35 }
 0x4a0   : > { %6401 = vmatpush1.bf16.msra.mxu0 %v10577_v40  ;;  %v10642_v40 = vcombine.high %v4871_v21, %v4875_v35 }
 0x4a1   : > { %6483 = vmatpush1.bf16.msra.mxu1 %v10579_v47  ;;  %6402 = vmatprep.subr.bf16.mxu0 %v10586_v53  ;;  %v10644_v47 = vcombine.high %v4872_v22, %v4876_v23  ;;  %v4879_v53 = vld [vmem:[%s13292_s4 + $0x710] sm:$0xff] }
 0x4a2   : > { %6484 = vmatprep.subr.bf16.mxu1 %v10588_v56  ;;  %v4883_v56 = vld [vmem:[%s13292_s4 + $0x730] sm:$0xff] }
 0x4a3   : > { %v10649_v37 = vcombine.low %v4879_v53, %v4883_v56 }
 0x4a4   : > { %6403 = vmatpush1.bf16.msra.mxu0 %v10585_v52  ;;  %v10650_v52 = vcombine.high %v4879_v53, %v4883_v56 }
 0x4a5   : > { %6485 = vmatpush1.bf16.msra.mxu1 %v10587_v49  ;;  %6404 = vmatprep.subr.bf16.mxu0 %v10594_v48  ;;  %v10652_v49 = vcombine.high %v4880_v60, %v4884_v61  ;;  %v4887_v48 = vld [vmem:[%s13292_s4 + $0x750] sm:$0xff] }
 0x4a6   : > { %6486 = vmatprep.subr.bf16.mxu1 %v10596_v43  ;;  %v4891_v43 = vld [vmem:[%s13292_s4 + $0x770] sm:$0xff] }
 0x4a7   : > { %v10657_v55 = vcombine.low %v4887_v48, %v4891_v43 }
 0x4a8   : > { %6405 = vmatpush1.bf16.msra.mxu0 %v10593_v34  ;;  %v10658_v34 = vcombine.high %v4887_v48, %v4891_v43  ;;  %v11975_v43 = vld [vmem:[#allocation11 + $0x4] ss:$16 sps:$4 sm:$0xff] (!%p10677_p3)  }
 0x4a9   : > { %6487 = vmatpush1.bf16.msra.mxu1 %v10595_v38  ;;  %6406 = vmatprep.subr.bf16.mxu0 %v10602_v1  ;;  %v10660_v38 = vcombine.high %v4888_v25, %v4892_v26  ;;  %v4895_v1 = vld [vmem:[%s13292_s4 + $0x790] sm:$0xff]  ;;  %v11977_v25 = vld [vmem:[#allocation11 + $0x204] ss:$16 sps:$4 sm:$0xff] (!%p10677_p3)   ;;  %v11979_v26 = vld [vmem:[#allocation11] ss:$16 sps:$4 sm:$0xff] (!%p10677_p3)  }
 0x4aa   : > { %6488 = vmatprep.subr.bf16.mxu1 %v10604_v39  ;;  %v4899_v39 = vld [vmem:[%s13292_s4 + $0x7b0] sm:$0xff] }
 0x4ab   : > { %v10665_v4 = vcombine.low %v4895_v1, %v4899_v39 }
 0x4ac   : > { %6407 = vmatpush1.bf16.msra.mxu0 %v10601_v45  ;;  %v10666_v45 = vcombine.high %v4895_v1, %v4899_v39  ;;  %v11986_v1 = vld [vmem:[#allocation11 + $0x220] ss:$16 sps:$4 sm:$0xff] (!%p10677_p3)   ;;  %v11987_v39 = vld [vmem:[#allocation11 + $0x44] ss:$16 sps:$4 sm:$0xff] (!%p10677_p3)  }
 0x4ad   : > { %6489 = vmatpush1.bf16.msra.mxu1 %v10603_v63  ;;  %6408 = vmatprep.subr.bf16.mxu0 %v10610_v54  ;;  %v10668_v63 = vcombine.high %v4896_v17, %v4900_v51  ;;  %v4903_v54 = vld [vmem:[%s13292_s4 + $0x7d0] sm:$0xff]  ;;  %v11989_v17 = vld [vmem:[#allocation11 + $0x244] ss:$16 sps:$4 sm:$0xff] (!%p10677_p3)   ;;  %v11991_v51 = vld [vmem:[#allocation11 + $0x40] ss:$16 sps:$4 sm:$0xff] (!%p10677_p3)  }
 0x4ae   : > { %6490 = vmatprep.subr.bf16.mxu1 %v10612_v36  ;;  %v4907_v36 = vld [vmem:[%s13292_s4 + $0x7f0] sm:$0xff] }
 0x4b0   : > { %6409 = vmatpush1.bf16.msra.mxu0 %v10609_v6  ;;  %v10674_v6 = vcombine.high %v4903_v54, %v4907_v36 }
 0x4b1   : > { %6491 = vmatpush1.bf16.msra.mxu1 %v10611_v7  ;;  %6410 = vmatprep.subr.bf16.mxu0 %v10618_v8  ;;  %v10676_v7 = vcombine.high %v4904_v58, %v4908_v62  ;;  %v10673_v8 = vcombine.low %v4903_v54, %v4907_v36  ;;  %v11998_v54 = vld [vmem:[#allocation11 + $0x260] ss:$16 sps:$4 sm:$0xff] (!%p10677_p3)   ;;  %v11999_v36 = vld [vmem:[#allocation11 + $0x84] ss:$16 sps:$4 sm:$0xff] (!%p10677_p3)  }
 0x4b2   : > { %6492 = vmatprep.subr.bf16.mxu1 %v10620_v9  ;;  %v10675_v9 = vcombine.low %v4904_v58, %v4908_v62  ;;  %v12001_v58 = vld [vmem:[#allocation11 + $0x284] ss:$16 sps:$4 sm:$0xff] (!%p10677_p3)   ;;  %v12003_v62 = vld [vmem:[#allocation11 + $0x80] ss:$16 sps:$4 sm:$0xff] (!%p10677_p3)  }
 0x4b4   : > { %6411 = vmatpush1.bf16.msra.mxu0 %v10617_v27 }
 0x4b5   : > { %6493 = vmatpush1.bf16.msra.mxu1 %v10619_v13  ;;  %6412 = vmatprep.subr.bf16.mxu0 %v10626_v28  ;;  %v14336_v13 = vsub.s32 %v6529_v11, %v14095_v42  ;;  %v12016_v11 = vld [vmem:[#allocation11 + $0x2c0] ss:$16 sps:$4 sm:$0xff] (!%p10677_p3)  }
 0x4b6   : > { %6494 = vmatprep.subr.bf16.mxu1 %v10628_v14 }
 0x4b8   : > { %6413 = vmatpush1.bf16.msra.mxu0 %v10625_v18 }
 0x4b9   : > { %6495 = vmatpush1.bf16.msra.mxu1 %v10627_v46  ;;  %6414 = vmatprep.subr.bf16.mxu0 %v10634_v19 }
 0x4ba   : > { %6496 = vmatprep.subr.bf16.mxu1 %v10636_v20  ;;  %v4647_v20 = vld [vmem:[#allocation2] sm:$0xff] }
 0x4bc   : > { %6415 = vmatpush1.bf16.msra.mxu0 %v10633_v24 }
 0x4bd   : > { %6497 = vmatpush1.bf16.msra.mxu1 %v10635_v30  ;;  %6416 = vmatprep.subr.bf16.mxu0 %v10642_v40 }
 0x4be   : > { %6498 = vmatprep.subr.bf16.mxu1 %v10644_v47 }
 0x4c0   : > { %6417 = vmatpush1.bf16.msra.mxu0 %v10641_v50 }
 0x4c1   : > { %6499 = vmatpush1.bf16.msra.mxu1 %v10643_v59  ;;  %6418 = vmatprep.subr.bf16.mxu0 %v10650_v52  ;;  %v4648_v52 = vld [vmem:[#allocation2 + $0x8] sm:$0xff] }
 0x4c2   : > { %6500 = vmatprep.subr.bf16.mxu1 %v10652_v49 }
 0x4c4   : > { %6419 = vmatpush1.bf16.msra.mxu0 %v10649_v37  ;;  %v11980_v37 = vld [vmem:[#allocation11 + $0x200] ss:$16 sps:$4 sm:$0xff] (!%p10677_p3)  }
 0x4c5   : > { %6501 = vmatpush1.bf16.msra.mxu1 %v10651_v29  ;;  %6420 = vmatprep.subr.bf16.mxu0 %v10658_v34  ;;  %v11981_v29 = vld [vmem:[#allocation11 + $0x24] ss:$16 sps:$4 sm:$0xff] (!%p10677_p3)  }
 0x4c6   : > { %6502 = vmatprep.subr.bf16.mxu1 %v10660_v38  ;;  %v11983_v34 = vld [vmem:[#allocation11 + $0x224] ss:$16 sps:$4 sm:$0xff] (!%p10677_p3)   ;;  %v11985_v38 = vld [vmem:[#allocation11 + $0x20] ss:$16 sps:$4 sm:$0xff] (!%p10677_p3)  }
 0x4c8   : > { %6421 = vmatpush1.bf16.msra.mxu0 %v10657_v55  ;;  %v11992_v55 = vld [vmem:[#allocation11 + $0x240] ss:$16 sps:$4 sm:$0xff] (!%p10677_p3)  }
 0x4c9   : > { %6503 = vmatpush1.bf16.msra.mxu1 %v10659_v57  ;;  %6422 = vmatprep.subr.bf16.mxu0 %v10666_v45  ;;  %v11993_v57 = vld [vmem:[#allocation11 + $0x64] ss:$16 sps:$4 sm:$0xff] (!%p10677_p3)  }
 0x4ca   : > { %6504 = vmatprep.subr.bf16.mxu1 %v10668_v63  ;;  %v11995_v45 = vld [vmem:[#allocation11 + $0x264] ss:$16 sps:$4 sm:$0xff] (!%p10677_p3)   ;;  %v11997_v63 = vld [vmem:[#allocation11 + $0x60] ss:$16 sps:$4 sm:$0xff] (!%p10677_p3)  }
 0x4cc   : > { %6423 = vmatpush1.bf16.msra.mxu0 %v10665_v4  ;;  %v12004_v4 = vld [vmem:[#allocation11 + $0x280] ss:$16 sps:$4 sm:$0xff] (!%p10677_p3)  }
 0x4cd   : > { %6505 = vmatpush1.bf16.msra.mxu1 %v10667_v5  ;;  %6424 = vmatprep.subr.bf16.mxu0 %v10674_v6  ;;  %v12005_v5 = vld [vmem:[#allocation11 + $0xa4] ss:$16 sps:$4 sm:$0xff] (!%p10677_p3)  }
 0x4ce   : > { %6506 = vmatprep.subr.bf16.mxu1 %v10676_v7  ;;  %v12007_v6 = vld [vmem:[#allocation11 + $0x2a4] ss:$16 sps:$4 sm:$0xff] (!%p10677_p3)   ;;  %v12009_v7 = vld [vmem:[#allocation11 + $0xa0] ss:$16 sps:$4 sm:$0xff] (!%p10677_p3)  }
 0x4d0   : > { %6425 = vmatpush1.bf16.msra.mxu0 %v10673_v8  ;;  %v12010_v8 = vld [vmem:[#allocation11 + $0x2a0] ss:$16 sps:$4 sm:$0xff] (!%p10677_p3)  }
 0x4d1   : > { %6507 = vmatpush1.bf16.msra.mxu1 %v10675_v9  ;;  %8296 = vmatprep.subr.bf16.mxu0 (!%p10677_p3), %v11977_v25  ;;  %v12011_v9 = vld [vmem:[#allocation11 + $0xc4] ss:$16 sps:$4 sm:$0xff] (!%p10677_p3)  }
 0x4d2   : > { %8255 = vmatprep.subr.bf16.mxu1 (!%p10677_p3), %v11975_v43  ;;  %v12052_v43 = vld [vmem:[#allocation11 + $0x380] ss:$16 sps:$4 sm:$0xff] (!%p10677_p3)  }
 0x4d3   : > { %6427 = vmatmul.mubr.bf16.vlgmr.msra.gmra.mrb[48].mxu0 %v14203_v2 }
 0x4d4   : > { %6509 = vmatmul.mubr.bf16.vlgmr.msra.gmra.mrb[48].mxu1 %v14203_v2  ;;  %8297 = vmatpush1.bf16.msra.mxu0 (!%p10677_p3), %v11980_v37  ;;  %v12055_v37 = vld [vmem:[#allocation11 + $0x3a4] ss:$16 sps:$4 sm:$0xff] (!%p10677_p3)  }
 0x4d5   : > { %8256 = vmatpush1.bf16.msra.mxu1 (!%p10677_p3), %v11979_v26  ;;  %8298 = vmatprep.subr.bf16.mxu0 (!%p10677_p3), %v11983_v34  ;;  %v12053_v26 = vld [vmem:[#allocation11 + $0x1a4] ss:$16 sps:$4 sm:$0xff] (!%p10677_p3)  }
 0x4d6   : > { %8257 = vmatprep.subr.bf16.mxu1 (!%p10677_p3), %v11981_v29 }
 0x4d8   : > { %8299 = vmatpush1.bf16.msra.mxu0 (!%p10677_p3), %v11986_v1  ;;  %v12057_v1 = vld [vmem:[#allocation11 + $0x1a0] ss:$16 sps:$4 sm:$0xff] (!%p10677_p3)  }
 0x4d9   : > { %8258 = vmatpush1.bf16.msra.mxu1 (!%p10677_p3), %v11985_v38  ;;  %8300 = vmatprep.subr.bf16.mxu0 (!%p10677_p3), %v11989_v17  ;;  %v12059_v17 = vld [vmem:[#allocation11 + $0x1c4] ss:$16 sps:$4 sm:$0xff] (!%p10677_p3)  }
 0x4da   : > { %8259 = vmatprep.subr.bf16.mxu1 (!%p10677_p3), %v11987_v39  ;;  %v12058_v39 = vld [vmem:[#allocation11 + $0x3a0] ss:$16 sps:$4 sm:$0xff] (!%p10677_p3)  }
 0x4dc   : > { %8301 = vmatpush1.bf16.msra.mxu0 (!%p10677_p3), %v11992_v55 }
 0x4dd   : > { %8260 = vmatpush1.bf16.msra.mxu1 (!%p10677_p3), %v11991_v51  ;;  %8302 = vmatprep.subr.bf16.mxu0 (!%p10677_p3), %v11995_v45  ;;  %v12061_v51 = vld [vmem:[#allocation11 + $0x3c4] ss:$16 sps:$4 sm:$0xff] (!%p10677_p3)   ;;  %v12063_v45 = vld [vmem:[#allocation11 + $0x1c0] ss:$16 sps:$4 sm:$0xff] (!%p10677_p3)  }
 0x4de   : > { %8261 = vmatprep.subr.bf16.mxu1 (!%p10677_p3), %v11993_v57 }
 0x4e0   : > { %8303 = vmatpush1.bf16.msra.mxu0 (!%p10677_p3), %v11998_v54  ;;  %v12065_v54 = vld [vmem:[#allocation11 + $0x1e4] ss:$16 sps:$4 sm:$0xff] (!%p10677_p3)  }
 0x4e1   : > { %8262 = vmatpush1.bf16.msra.mxu1 (!%p10677_p3), %v11997_v63  ;;  %8304 = vmatprep.subr.bf16.mxu0 (!%p10677_p3), %v12001_v58  ;;  %v12064_v63 = vld [vmem:[#allocation11 + $0x3c0] ss:$16 sps:$4 sm:$0xff] (!%p10677_p3)  }
 0x4e2   : > { %8263 = vmatprep.subr.bf16.mxu1 (!%p10677_p3), %v11999_v36  ;;  %v12067_v36 = vld [vmem:[#allocation11 + $0x3e4] ss:$16 sps:$4 sm:$0xff] (!%p10677_p3)  }
 0x4e4   : > { %8305 = vmatpush1.bf16.msra.mxu0 (!%p10677_p3), %v12004_v4 }
 0x4e5   : > { %8264 = vmatpush1.bf16.msra.mxu1 (!%p10677_p3), %v12003_v62  ;;  %8306 = vmatprep.subr.bf16.mxu0 (!%p10677_p3), %v12007_v6  ;;  %v12069_v6 = vld [vmem:[#allocation11 + $0x1e0] ss:$16 sps:$4 sm:$0xff] (!%p10677_p3)  }
 0x4e6   : > { %8265 = vmatprep.subr.bf16.mxu1 (!%p10677_p3), %v12005_v5 }
 0x4e8   : > { %8307 = vmatpush1.bf16.msra.mxu0 (!%p10677_p3), %v12010_v8 }
 0x4e9   : > { %8266 = vmatpush1.bf16.msra.mxu1 (!%p10677_p3), %v12009_v7  ;;  %8308 = vmatprep.subr.bf16.mxu0 (!%p10677_p3), %v12013_v44  ;;  %v12070_v7 = vld [vmem:[#allocation11 + $0x3e0] ss:$16 sps:$4 sm:$0xff] (!%p10677_p3)   ;;  %v12073_v44 = vld [vmem:[#allocation11 + $0x404] ss:$16 sps:$4 sm:$0xff] (!%p10677_p3)  }
 0x4ea   : > { %8267 = vmatprep.subr.bf16.mxu1 (!%p10677_p3), %v12011_v9 }
 0x4ec   : > { %8309 = vmatpush1.bf16.msra.mxu0 (!%p10677_p3), %v12016_v11 }
 0x4ed   : > { %8268 = vmatpush1.bf16.msra.mxu1 (!%p10677_p3), %v12015_v10  ;;  %v12076_v10 = vld [vmem:[#allocation11 + $0xc] ss:$16 sps:$4 sm:$0xff] (!%p10677_p3)  }
 0x526   : > { %v6264_v12 = vpop.f32.mrb[44].mxu0  ;;  %v6346_v27 = vpop.f32.mrb[44].mxu1 }
 0x527   : > { %v6266_v28 = vpop.f32.mrb[45].mxu0  ;;  %v6348_v14 = vpop.f32.mrb[45].mxu1 }
 0x528   : > { %v6525_v15 = vcombine.low %v6264_v12, %v6266_v28  ;;  %v6526_v16 = vcombine.low %v6346_v27, %v6348_v14  ;;  %v6268_v31 = vpop.f32.mrb[46].mxu0  ;;  %v6350_v32 = vpop.f32.mrb[46].mxu1  ;;  %v12017_v12 = vld [vmem:[#allocation11 + $0xe4] ss:$16 sps:$4 sm:$0xff] (!%p10677_p3)   ;;  %v12021_v28 = vld [vmem:[#allocation11 + $0xe0] ss:$16 sps:$4 sm:$0xff] (!%p10677_p3)  }
 0x529   : > { %v6269_v18 = vpop.f32.mrb[47].mxu0  ;;  %v6351_v46 = vpop.f32.mrb[47].mxu1  ;;  %v12019_v27 = vld [vmem:[#allocation11 + $0x2e4] ss:$16 sps:$4 sm:$0xff] (!%p10677_p3)   ;;  %v12022_v14 = vld [vmem:[#allocation11 + $0x2e0] ss:$16 sps:$4 sm:$0xff] (!%p10677_p3)   ;;  %8269 = vmatprep.subr.bf16.mxu1 (!%p10677_p3), %v12017_v12 }
 0x52a   : > { %v6533_v19 = vrot.slane %v6525_v15, %v14336_v13  ;;  %v6540_v2 = vrot.slane %v6526_v16, %v14336_v13  ;;  %v12023_v15 = vld [vmem:[#allocation11 + $0x104] ss:$16 sps:$4 sm:$0xff] (!%p10677_p3)   ;;  %8310 = vmatprep.subr.bf16.mxu0 (!%p10677_p3), %v12019_v27  ;;  %v12027_v31 = vld [vmem:[#allocation11 + $0x100] ss:$16 sps:$4 sm:$0xff] (!%p10677_p3)   ;;  %8270 = vmatpush1.bf16.msra.mxu1 (!%p10677_p3), %v12021_v28 }
 0x52b   : > { %v12025_v16 = vld [vmem:[#allocation11 + $0x304] ss:$16 sps:$4 sm:$0xff] (!%p10677_p3)   ;;  %v12028_v32 = vld [vmem:[#allocation11 + $0x300] ss:$16 sps:$4 sm:$0xff] (!%p10677_p3)   ;;  %8311 = vmatpush1.bf16.msra.mxu0 (!%p10677_p3), %v12022_v14  ;;  %8271 = vmatprep.subr.bf16.mxu1 (!%p10677_p3), %v12023_v15  ;;  %v12074_v14 = vld [vmem:[#allocation11 + $0x8] ss:$16 sps:$4 sm:$0xff] (!%p10677_p3)  }
 0x52c   : > { %v6541_v21 = vcombine.low %v6533_v19, %v6540_v2  ;;  %v12029_v18 = vld [vmem:[#allocation11 + $0x124] ss:$16 sps:$4 sm:$0xff] (!%p10677_p3)   ;;  %8312 = vmatprep.subr.bf16.mxu0 (!%p10677_p3), %v12025_v16  ;;  %v12033_v19 = vld [vmem:[#allocation11 + $0x120] ss:$16 sps:$4 sm:$0xff] (!%p10677_p3)   ;;  %v12082_v16 = vld [vmem:[#allocation11 + $0x2c] ss:$16 sps:$4 sm:$0xff] (!%p10677_p3)  }
 0x52d   : > { %v12031_v46 = vld [vmem:[#allocation11 + $0x324] ss:$16 sps:$4 sm:$0xff] (!%p10677_p3)   ;;  %v12034_v2 = vld [vmem:[#allocation11 + $0x320] ss:$16 sps:$4 sm:$0xff] (!%p10677_p3)  }
 0x52e   : > { %v6561_v35 = vadd.f32 %v6541_v21, %v4647_v20  ;;  %8272 = vmatpush1.bf16.msra.mxu1 (!%p10677_p3), %v12027_v31  ;;  %v12035_v20 = vld [vmem:[#allocation11 + $0x144] ss:$16 sps:$4 sm:$0xff] (!%p10677_p3)   ;;  %v12071_v28 = vld [vmem:[#allocation11 + $0x400] ss:$16 sps:$4 sm:$0xff] (!%p10677_p3)   ;;  %v6591_v31 = vsub.s32 (!%p10677_p3), 4, %v14095_v42 }
 0x52f   : > { %8313 = vmatpush1.bf16.msra.mxu0 (!%p10677_p3), %v12028_v32  ;;  %8273 = vmatprep.subr.bf16.mxu1 (!%p10677_p3), %v12029_v18  ;;  %v12037_v21 = vld [vmem:[#allocation11 + $0x344] ss:$16 sps:$4 sm:$0xff] (!%p10677_p3)   ;;  %v6595_v32 = vsub.s32 (!%p10677_p3), 5, %v14095_v42  ;;  %v6599_v18 = vsub.s32 (!%p10677_p3), 6, %v14095_v42 }
 0x530   : > { %6563 = vst [vmem:[#allocation2] sm:$0xff] %v6561_v35  ;;  %8314 = vmatprep.subr.bf16.mxu0 (!%p10677_p3), %v12031_v46  ;;  %v12039_v35 = vld [vmem:[#allocation11 + $0x140] ss:$16 sps:$4 sm:$0xff] (!%p10677_p3)   ;;  %v12079_v15 = vld [vmem:[#allocation11 + $0x424] ss:$16 sps:$4 sm:$0xff] (!%p10677_p3)   ;;  %v6603_v46 = vsub.s32 (!%p10677_p3), 7, %v14095_v42 }
 0x531   : > { %v12083_v42 = vld [vmem:[#allocation11 + $0x440] ss:$16 sps:$4 sm:$0xff] (!%p10677_p3)  }
 0x532   : > { %8274 = vmatpush1.bf16.msra.mxu1 (!%p10677_p3), %v12033_v19  ;;  %v12077_v19 = vld [vmem:[#allocation11 + $0x420] ss:$16 sps:$4 sm:$0xff] (!%p10677_p3)  }
 0x533   : > { %8315 = vmatpush1.bf16.msra.mxu0 (!%p10677_p3), %v12034_v2  ;;  %8275 = vmatprep.subr.bf16.mxu1 (!%p10677_p3), %v12035_v20  ;;  %v12080_v2 = vld [vmem:[#allocation11 + $0x28] ss:$16 sps:$4 sm:$0xff] (!%p10677_p3)   ;;  %v12085_v20 = vld [vmem:[#allocation11 + $0x444] ss:$16 sps:$4 sm:$0xff] (!%p10677_p3)  }
 0x534   : > { %8316 = vmatprep.subr.bf16.mxu0 (!%p10677_p3), %v12037_v21  ;;  %v12088_v21 = vld [vmem:[#allocation11 + $0x4c] ss:$16 sps:$4 sm:$0xff] (!%p10677_p3)  }
 0x536   : > { %8276 = vmatpush1.bf16.msra.mxu1 (!%p10677_p3), %v12039_v35 }
 0x537   : > { %v6569_v34 = vld [vmem:[#allocation2] sm:$0xff] (!%p10677_p3) }
 0x5a6   : > { %v6428_v22 = vpop.f32.mrb[48].mxu0 }
 0x5a7   : > { %v6510_v23 = vpop.f32.mrb[48].mxu1  ;;  %v6430_v24 = vpop.f32.mrb[49].mxu0 }
 0x5a8   : > { %v6542_v30 = vcombine.low %v6428_v22, %v6430_v24  ;;  %v6512_v40 = vpop.f32.mrb[49].mxu1  ;;  %v6432_v47 = vpop.f32.mrb[50].mxu0  ;;  %v12040_v22 = vld [vmem:[#allocation11 + $0x340] ss:$16 sps:$4 sm:$0xff] (!%p10677_p3)   ;;  %v12043_v24 = vld [vmem:[#allocation11 + $0x364] ss:$16 sps:$4 sm:$0xff] (!%p10677_p3)  }
 0x5a9   : > { %v6543_v53 = vcombine.low %v6510_v23, %v6512_v40  ;;  %v6514_v56 = vpop.f32.mrb[50].mxu1  ;;  %v6433_v60 = vpop.f32.mrb[51].mxu0  ;;  %v12041_v23 = vld [vmem:[#allocation11 + $0x164] ss:$16 sps:$4 sm:$0xff] (!%p10677_p3)   ;;  %8317 = vmatpush1.bf16.msra.mxu0 (!%p10677_p3), %v12040_v22  ;;  %v12045_v40 = vld [vmem:[#allocation11 + $0x160] ss:$16 sps:$4 sm:$0xff] (!%p10677_p3)  }
 0x5aa   : > { %v6550_v61 = vrot.slane %v6542_v30, %v14336_v13  ;;  %v6515_v50 = vpop.f32.mrb[51].mxu1  ;;  %v14343_v30 = vld [vmem:[#allocation9] sm:$0xff] (!%p10677_p3)  ;;  %v12046_v47 = vld [vmem:[#allocation11 + $0x360] ss:$16 sps:$4 sm:$0xff] (!%p10677_p3)   ;;  %8277 = vmatprep.subr.bf16.mxu1 (!%p10677_p3), %v12041_v23  ;;  %8318 = vmatprep.subr.bf16.mxu0 (!%p10677_p3), %v12043_v24 }
 0x5ab   : > { %v6557_v59 = vrot.slane %v6543_v53, %v14336_v13  ;;  %6568 = sbr.rel (%p10677_p3) target bundleno = 2387 (0x953), region = 112  ;;  %v6576_v53 = vrot.slane (!%p10677_p3), %v14343_v30, %v14098_v33  ;;  %v6580_v56 = vrot.slane (!%p10677_p3), %v14343_v30, %v14105_v3  ;;  %v6584_v60 = vrot.slane (!%p10677_p3), %v14343_v30, %v14101_v41  ;;  %v12049_v50 = vld [vmem:[#allocation11 + $0x384] ss:$16 sps:$4 sm:$0xff] (!%p10677_p3)   ;;  %8278 = vmatpush1.bf16.msra.mxu1 (!%p10677_p3), %v12045_v40  ;;  %v12086_v40 = vld [vmem:[#allocation11 + $0x48] ss:$16 sps:$4 sm:$0xff] (!%p10677_p3)  }
 0x5ac   : > { %v6592_v35 = vrot.slane (!%p10677_p3), %v14343_v30, %v6591_v31  ;;  %v6596_v22 = vrot.slane (!%p10677_p3), %v14343_v30, %v6595_v32  ;;  %v6600_v23 = vrot.slane (!%p10677_p3), %v14343_v30, %v6599_v18  ;;  %v6604_v24 = vrot.slane (!%p10677_p3), %v14343_v30, %v6603_v46  ;;  %v12134_v31 = vld [vmem:[#allocation11 + $0x148] ss:$16 sps:$4 sm:$0xff] (!%p10677_p3)   ;;  %v12139_v32 = vld [vmem:[#allocation11 + $0x564] ss:$16 sps:$4 sm:$0xff] (!%p10677_p3)   ;;  %v12142_v18 = vld [vmem:[#allocation11 + $0x16c] ss:$16 sps:$4 sm:$0xff] (!%p10677_p3)  }
 0x5ad   : > { %v6558_v49 = vcombine.low %v6550_v61, %v6557_v59  ;;  %v12047_v61 = vld [vmem:[#allocation11 + $0x184] ss:$16 sps:$4 sm:$0xff] (!%p10677_p3)   ;;  %v6588_v59 = vrot.slane (!%p10677_p3), %v14343_v30, %v14108_v0  ;;  %8319 = vmatpush1.bf16.msra.mxu0 (!%p10677_p3), %v12046_v47  ;;  %v12137_v46 = vld [vmem:[#allocation11 + $0x560] ss:$16 sps:$4 sm:$0xff] (!%p10677_p3)  }
 0x5ae   : > { %8279 = vmatprep.subr.bf16.mxu1 (!%p10677_p3), %v12047_v61  ;;  %8320 = vmatprep.subr.bf16.mxu0 (!%p10677_p3), %v12049_v50  ;;  %v12091_v47 = vld [vmem:[#allocation11 + $0x464] ss:$16 sps:$4 sm:$0xff] (!%p10677_p3)   ;;  %v12089_v61 = vld [vmem:[#allocation11 + $0x460] ss:$16 sps:$4 sm:$0xff] (!%p10677_p3)   ;;  %v12092_v50 = vld [vmem:[#allocation11 + $0x68] ss:$16 sps:$4 sm:$0xff] (!%p10677_p3)  }
 0x5af   : > { %v6562_v48 = vadd.f32 %v6558_v49, %v4648_v52  ;;  %v6605_v52 = vcombine.low (!%p10677_p3), %v6576_v53, %v6580_v56  ;;  %v6606_v49 = vcombine.low (!%p10677_p3), %v6584_v60, %v6588_v59  ;;  %v12094_v53 = vld [vmem:[#allocation11 + $0x6c] ss:$16 sps:$4 sm:$0xff] (!%p10677_p3)   ;;  %v6622_v56 = vcombine.low (!%p10677_p3), %v6592_v35, %v6596_v22  ;;  %v12097_v59 = vld [vmem:[#allocation11 + $0x484] ss:$16 sps:$4 sm:$0xff] (!%p10677_p3)   ;;  %v12146_v35 = vld [vmem:[#allocation11 + $0x188] ss:$16 sps:$4 sm:$0xff] (!%p10677_p3)  }
 0x5b0   : > { %v6623_v60 = vcombine.low (!%p10677_p3), %v6600_v23, %v6604_v24  ;;  %v12151_v22 = vld [vmem:[#allocation11 + $0x5a4] ss:$16 sps:$4 sm:$0xff] (!%p10677_p3)   ;;  %v12154_v23 = vld [vmem:[#allocation11 + $0x1ac] ss:$16 sps:$4 sm:$0xff] (!%p10677_p3)   ;;  %v12149_v24 = vld [vmem:[#allocation11 + $0x5a0] ss:$16 sps:$4 sm:$0xff] (!%p10677_p3)  }
 0x5b1   : > { %6564 = vst [vmem:[#allocation2 + $0x8] sm:$0xff] %v6562_v48  ;;  %v12051_v48 = vld [vmem:[#allocation11 + $0x180] ss:$16 sps:$4 sm:$0xff] (!%p10677_p3)   ;;  %v6613_v25 = vrot.slane (!%p10677_p3), %v6605_v52, %v14336_v13  ;;  %v6620_v29 = vrot.slane (!%p10677_p3), %v6606_v49, %v14336_v13  ;;  %8321 = vmatpush1.bf16.msra.mxu0 (!%p10677_p3), %v12052_v43  ;;  %v12100_v52 = vld [vmem:[#allocation11 + $0x8c] ss:$16 sps:$4 sm:$0xff] (!%p10677_p3)   ;;  %v6630_v30 = vrot.slane (!%p10677_p3), %v6622_v56, %v14336_v13 }
 0x5b2   : > { %8280 = vmatpush1.bf16.msra.mxu1 %v12051_v48  ;;  %8322 = vmatprep.subr.bf16.mxu0 %v12055_v37  ;;  %v6637_v49 = vrot.slane %v6623_v60, %v14336_v13  ;;  %v12095_v48 = vld [vmem:[#allocation11 + $0x480] ss:$16 sps:$4 sm:$0xff]   ;;  %v12098_v43 = vld [vmem:[#allocation11 + $0x88] ss:$16 sps:$4 sm:$0xff]  }
 0x5b3   : > { %v6621_v38 = vcombine.low %v6613_v25, %v6620_v29  ;;  %8281 = vmatprep.subr.bf16.mxu1 %v12053_v26  ;;  %v12103_v25 = vld [vmem:[#allocation11 + $0x4a4] ss:$16 sps:$4 sm:$0xff]   ;;  %v12106_v26 = vld [vmem:[#allocation11 + $0xac] ss:$16 sps:$4 sm:$0xff]   ;;  %v12101_v29 = vld [vmem:[#allocation11 + $0x4a0] ss:$16 sps:$4 sm:$0xff]  }
 0x5b4   : > { %v6638_v37 = vcombine.low %v6630_v30, %v6637_v49  ;;  %v12155_v56 = vld [vmem:[#allocation11 + $0x5c0] ss:$16 sps:$4 sm:$0xff]   ;;  %v12158_v60 = vld [vmem:[#allocation11 + $0x1c8] ss:$16 sps:$4 sm:$0xff]   ;;  %v12169_v49 = vld [vmem:[#allocation11 + $0x604] ss:$16 sps:$4 sm:$0xff]  }
 0x5b5   : > { %v6641_v55 = vadd.f32 %v6621_v38, %v6569_v34  ;;  %8323 = vmatpush1.bf16.msra.mxu0 %v12058_v39  ;;  %v12104_v34 = vld [vmem:[#allocation11 + $0xa8] ss:$16 sps:$4 sm:$0xff]   ;;  %v12109_v38 = vld [vmem:[#allocation11 + $0x4c4] ss:$16 sps:$4 sm:$0xff]  }
 0x5b6   : > { %8282 = vmatpush1.bf16.msra.mxu1 %v12057_v1  ;;  %8324 = vmatprep.subr.bf16.mxu0 %v12061_v51  ;;  %v12112_v1 = vld [vmem:[#allocation11 + $0xcc] ss:$16 sps:$4 sm:$0xff]   ;;  %v12164_v30 = vld [vmem:[#allocation11 + $0x1e8] ss:$16 sps:$4 sm:$0xff]  }
 0x5b7   : > { %v6643_v57 = vmax.f32 %v6641_v55, 0.0  ;;  %8283 = vmatprep.subr.bf16.mxu1 %v12059_v17  ;;  %v12107_v17 = vld [vmem:[#allocation11 + $0x4c0] ss:$16 sps:$4 sm:$0xff]   ;;  %v12110_v55 = vld [vmem:[#allocation11 + $0xc8] ss:$16 sps:$4 sm:$0xff]  }
 0x5b8   : > { %v6570_v39 = vld [vmem:[#allocation2 + $0x8] sm:$0xff] }
 0x5b9   : > { %v6654_v58 = vrot.slane %v6643_v57, %v14336_v13  ;;  %v6647_v62 = vcombine.high %v6643_v57, %v6643_v57  ;;  %8325 = vmatpush1.bf16.msra.mxu0 %v12064_v63  ;;  %v6642_v51 = vadd.f32 %v6638_v37, %v6570_v39  ;;  %v12115_v57 = vld [vmem:[#allocation11 + $0x4e4] ss:$16 sps:$4 sm:$0xff]  }
 0x5ba   : > { %8284 = vmatpush1.bf16.msra.mxu1 %v12063_v45  ;;  %8326 = vmatprep.subr.bf16.mxu0 %v12067_v36  ;;  %v12118_v45 = vld [vmem:[#allocation11 + $0xec] ss:$16 sps:$4 sm:$0xff]   ;;  %v12175_v37 = vld [vmem:[#allocation11 + $0x624] ss:$16 sps:$4 sm:$0xff]  }
 0x5bb   : > { %v6662_v4 = vcombine.high %v6654_v58, %v6654_v58  ;;  %v6661_v5 = vrot.slane %v6647_v62, %v14336_v13  ;;  %8285 = vmatprep.subr.bf16.mxu1 %v12065_v54  ;;  %v14357_v11 = vpack.c.bf16 %v6654_v58, %v6654_v58  ;;  %v14376_v63 = vmax.f32 %v6642_v51, 0.0  ;;  %v12113_v54 = vld [vmem:[#allocation11 + $0x4e0] ss:$16 sps:$4 sm:$0xff]   ;;  %v12116_v58 = vld [vmem:[#allocation11 + $0xe8] ss:$16 sps:$4 sm:$0xff]  }
 0x5bc   : > { %v12121_v62 = vld [vmem:[#allocation11 + $0x504] ss:$16 sps:$4 sm:$0xff]   ;;  %v12179_v51 = vld [vmem:[#allocation11 + $0x640] ss:$16 sps:$4 sm:$0xff]  }
 0x5bd   : > { %v6690_v8 = vpack.c.bf16 %v6662_v4, %v6662_v4  ;;  %v6663_v9 = vcombine.high %v6661_v5, %v6661_v5  ;;  %v14361_v27 = vpack.c.bf16 %v6661_v5, %v6661_v5  ;;  %8327 = vmatpush1.bf16.msra.mxu0 %v12070_v7  ;;  %v14380_v36 = vrot.slane %v14376_v63, %v14336_v13  ;;  %v12124_v4 = vld [vmem:[#allocation11 + $0x10c] ss:$16 sps:$4 sm:$0xff]   ;;  %v12181_v39 = vld [vmem:[#allocation11 + $0x644] ss:$16 sps:$4 sm:$0xff]  }
 0x5be   : > { %8286 = vmatpush1.bf16.msra.mxu1 %v12069_v6  ;;  %8337 = vmatprep.subr.bf16.mxu0 %v12073_v44  ;;  %v12119_v6 = vld [vmem:[#allocation11 + $0x500] ss:$16 sps:$4 sm:$0xff]   ;;  %v12130_v44 = vld [vmem:[#allocation11 + $0x12c] ss:$16 sps:$4 sm:$0xff]  }
 0x5bf   : > { %8287 = vmatprep.mubr.bf16.mxu1 %v6690_v8  ;;  %v14359_v12 = vpack.c.bf16 %v6663_v9, %v6663_v9  ;;  %8419 = vmatprep.subr.bf16.mxu1 %v12076_v10  ;;  %v6679_v5 = vcombine.high %v14380_v36, %v14380_v36  ;;  %v12127_v9 = vld [vmem:[#allocation11 + $0x524] ss:$16 sps:$4 sm:$0xff]   ;;  %v12125_v10 = vld [vmem:[#allocation11 + $0x520] ss:$16 sps:$4 sm:$0xff]  }
 0x5c1   : > { %8328 = vmatprep.mubr.bf16.mxu0 %v14359_v12  ;;  %8288 = vmatmul.mubr.bf16.vlgmr.msra.gmra.mrb[0].mxu1 %v14357_v11  ;;  %v14384_v7 = vpack.c.bf16 %v6679_v5, %v6679_v5  ;;  %v12197_v5 = vld [vmem:[#allocation11 + $0x6a0] ss:$16 sps:$4 sm:$0xff]  }
 0x5c2   : > { %8329 = vmatmul.mubr.bf16.vlgmr.msra.gmra.mrb[0].mxu0 %v14361_v27  ;;  %8420 = vmatpush1.bf16.msra.mxu1 %v12074_v14  ;;  %v12133_v14 = vld [vmem:[#allocation11 + $0x544] ss:$16 sps:$4 sm:$0xff]  }
 0x5c3   : > { %8338 = vmatpush1.bf16.msra.mxu0 %v12071_v28  ;;  %8421 = vmatprep.subr.bf16.mxu1 %v12082_v16  ;;  %v12128_v28 = vld [vmem:[#allocation11 + $0x128] ss:$16 sps:$4 sm:$0xff]   ;;  %v12131_v16 = vld [vmem:[#allocation11 + $0x540] ss:$16 sps:$4 sm:$0xff]  }
 0x5c4   : > { %8339 = vmatprep.subr.bf16.mxu0 %v12079_v15  ;;  %8451 = vmatprep.mubr.bf16.mxu1 %v6690_v8  ;;  %v12122_v8 = vld [vmem:[#allocation11 + $0x108] ss:$16 sps:$4 sm:$0xff]   ;;  %v12136_v15 = vld [vmem:[#allocation11 + $0x14c] ss:$16 sps:$4 sm:$0xff]  }
 0x5c5   : > { %8369 = vmatprep.mubr.bf16.mxu0 %v14384_v7 }
 0x5c6   : > { %8422 = vmatpush1.bf16.msra.mxu1 %v12080_v2  ;;  %v12145_v2 = vld [vmem:[#allocation11 + $0x584] ss:$16 sps:$4 sm:$0xff]  }
 0x5c7   : > { %8340 = vmatpush1.bf16.msra.mxu0 %v12077_v19  ;;  %8423 = vmatprep.subr.bf16.mxu1 %v12088_v21  ;;  %v12140_v19 = vld [vmem:[#allocation11 + $0x168] ss:$16 sps:$4 sm:$0xff]   ;;  %v12143_v21 = vld [vmem:[#allocation11 + $0x580] ss:$16 sps:$4 sm:$0xff]  }
 0x5c8   : > { %8341 = vmatprep.subr.bf16.mxu0 %v12085_v20  ;;  %v12148_v20 = vld [vmem:[#allocation11 + $0x18c] ss:$16 sps:$4 sm:$0xff]  }
 0x5ca   : > { %8424 = vmatpush1.bf16.msra.mxu1 %v12086_v40  ;;  %v12157_v40 = vld [vmem:[#allocation11 + $0x5c4] ss:$16 sps:$4 sm:$0xff]  }
 0x5cb   : > { %8342 = vmatpush1.bf16.msra.mxu0 %v12083_v42  ;;  %8425 = vmatprep.subr.bf16.mxu1 %v12094_v53  ;;  %v12152_v42 = vld [vmem:[#allocation11 + $0x1a8] ss:$16 sps:$4 sm:$0xff]   ;;  %v6664_v53 = vcombine.high %v14376_v63, %v14376_v63 }
 0x5cc   : > { %8343 = vmatprep.subr.bf16.mxu0 %v12091_v47  ;;  %v12160_v47 = vld [vmem:[#allocation11 + $0x1cc] ss:$16 sps:$4 sm:$0xff]   ;;  %v12188_v63 = vld [vmem:[#allocation11 + $0x268] ss:$16 sps:$4 sm:$0xff]  }
 0x5ce   : > { %8426 = vmatpush1.bf16.msra.mxu1 %v12092_v50  ;;  %v12166_v50 = vld [vmem:[#allocation11 + $0x1ec] ss:$16 sps:$4 sm:$0xff]  }
 0x5cf   : > { %8344 = vmatpush1.bf16.msra.mxu0 %v12089_v61  ;;  %8427 = vmatprep.subr.bf16.mxu1 %v12100_v52  ;;  %v12163_v61 = vld [vmem:[#allocation11 + $0x5e4] ss:$16 sps:$4 sm:$0xff]   ;;  %v12161_v52 = vld [vmem:[#allocation11 + $0x5e0] ss:$16 sps:$4 sm:$0xff]  }
 0x5d0   : > { %8345 = vmatprep.subr.bf16.mxu0 %v12097_v59  ;;  %v14390_v59 = vrot.slane %v6664_v53, %v14336_v13  ;;  %v12170_v13 = vld [vmem:[#allocation11 + $0x208] ss:$16 sps:$4 sm:$0xff]  }
 0x5d1   : > { %v12236_v53 = vld [vmem:[#allocation11 + $0x368] ss:$16 sps:$4 sm:$0xff]  }
 0x5d2   : > { %8428 = vmatpush1.bf16.msra.mxu1 %v12098_v43  ;;  %v6680_v43 = vcombine.high %v14390_v59, %v14390_v59 }
 0x5d3   : > { %8346 = vmatpush1.bf16.msra.mxu0 %v12095_v48  ;;  %8429 = vmatprep.subr.bf16.mxu1 %v12106_v26  ;;  %v12172_v48 = vld [vmem:[#allocation11 + $0x20c] ss:$16 sps:$4 sm:$0xff]   ;;  %v14396_v26 = vpack.c.bf16 %v14380_v36, %v14380_v36 }
 0x5d4   : > { %8347 = vmatprep.subr.bf16.mxu0 %v12103_v25  ;;  %v12167_v25 = vld [vmem:[#allocation11 + $0x600] ss:$16 sps:$4 sm:$0xff]   ;;  %v12196_v36 = vld [vmem:[#allocation11 + $0x28c] ss:$16 sps:$4 sm:$0xff]  }
 0x5d6   : > { %8430 = vmatpush1.bf16.msra.mxu1 %v12104_v34  ;;  %v14398_v34 = vpack.c.bf16 %v6680_v43, %v6680_v43  ;;  %v12253_v43 = vld [vmem:[#allocation11 + $0x7c4] ss:$16 sps:$4 sm:$0xff]  }
 0x5d7   : > { %8348 = vmatpush1.bf16.msra.mxu0 %v12101_v29  ;;  %8431 = vmatprep.subr.bf16.mxu1 %v12112_v1  ;;  %v12178_v29 = vld [vmem:[#allocation11 + $0x22c] ss:$16 sps:$4 sm:$0xff]   ;;  %v12176_v1 = vld [vmem:[#allocation11 + $0x228] ss:$16 sps:$4 sm:$0xff]  }
 0x5d8   : > { %8349 = vmatprep.subr.bf16.mxu0 %v12109_v38  ;;  %v12173_v38 = vld [vmem:[#allocation11 + $0x620] ss:$16 sps:$4 sm:$0xff]  }
 0x5da   : > { %8432 = vmatpush1.bf16.msra.mxu1 %v12110_v55  ;;  %v12182_v55 = vld [vmem:[#allocation11 + $0x248] ss:$16 sps:$4 sm:$0xff]  }
 0x5db   : > { %8350 = vmatpush1.bf16.msra.mxu0 %v12107_v17  ;;  %8433 = vmatprep.subr.bf16.mxu1 %v12118_v45  ;;  %v12184_v17 = vld [vmem:[#allocation11 + $0x24c] ss:$16 sps:$4 sm:$0xff]   ;;  %v12185_v45 = vld [vmem:[#allocation11 + $0x660] ss:$16 sps:$4 sm:$0xff]  }
 0x5dc   : > { %8351 = vmatprep.subr.bf16.mxu0 %v12115_v57  ;;  %v12187_v57 = vld [vmem:[#allocation11 + $0x664] ss:$16 sps:$4 sm:$0xff]  }
 0x5de   : > { %8434 = vmatpush1.bf16.msra.mxu1 %v12116_v58  ;;  %v12191_v58 = vld [vmem:[#allocation11 + $0x680] ss:$16 sps:$4 sm:$0xff]  }
 0x5df   : > { %8352 = vmatpush1.bf16.msra.mxu0 %v12113_v54  ;;  %8435 = vmatprep.subr.bf16.mxu1 %v12124_v4  ;;  %v12193_v54 = vld [vmem:[#allocation11 + $0x684] ss:$16 sps:$4 sm:$0xff]   ;;  %v12202_v4 = vld [vmem:[#allocation11 + $0x2ac] ss:$16 sps:$4 sm:$0xff]  }
 0x5e0   : > { %8353 = vmatprep.subr.bf16.mxu0 %v12121_v62  ;;  %v12199_v62 = vld [vmem:[#allocation11 + $0x6a4] ss:$16 sps:$4 sm:$0xff]  }
 0x5e2   : > { %8436 = vmatpush1.bf16.msra.mxu1 %v12122_v8  ;;  %v12205_v8 = vld [vmem:[#allocation11 + $0x6c4] ss:$16 sps:$4 sm:$0xff]  }
 0x5e3   : > { %8354 = vmatpush1.bf16.msra.mxu0 %v12119_v6  ;;  %8437 = vmatprep.subr.bf16.mxu1 %v12130_v44  ;;  %v12200_v6 = vld [vmem:[#allocation11 + $0x2a8] ss:$16 sps:$4 sm:$0xff]   ;;  %v12203_v44 = vld [vmem:[#allocation11 + $0x6c0] ss:$16 sps:$4 sm:$0xff]  }
 0x5e4   : > { %8355 = vmatprep.subr.bf16.mxu0 %v12127_v9  ;;  %v12208_v9 = vld [vmem:[#allocation11 + $0x2cc] ss:$16 sps:$4 sm:$0xff]  }
 0x5e6   : > { %8438 = vmatpush1.bf16.msra.mxu1 %v12128_v28  ;;  %v12211_v28 = vld [vmem:[#allocation11 + $0x6e4] ss:$16 sps:$4 sm:$0xff]  }
 0x5e7   : > { %8356 = vmatpush1.bf16.msra.mxu0 %v12125_v10  ;;  %8439 = vmatprep.subr.bf16.mxu1 %v12136_v15  ;;  %v12206_v10 = vld [vmem:[#allocation11 + $0x2c8] ss:$16 sps:$4 sm:$0xff]   ;;  %v12209_v15 = vld [vmem:[#allocation11 + $0x6e0] ss:$16 sps:$4 sm:$0xff]  }
 0x5e8   : > { %8357 = vmatprep.subr.bf16.mxu0 %v12133_v14  ;;  %v12214_v14 = vld [vmem:[#allocation11 + $0x2ec] ss:$16 sps:$4 sm:$0xff]  }
 0x5ea   : > { %8440 = vmatpush1.bf16.msra.mxu1 %v12134_v31  ;;  %v12217_v31 = vld [vmem:[#allocation11 + $0x704] ss:$16 sps:$4 sm:$0xff]  }
 0x5eb   : > { %8358 = vmatpush1.bf16.msra.mxu0 %v12131_v16  ;;  %8441 = vmatprep.subr.bf16.mxu1 %v12142_v18  ;;  %v12212_v16 = vld [vmem:[#allocation11 + $0x2e8] ss:$16 sps:$4 sm:$0xff]   ;;  %v12215_v18 = vld [vmem:[#allocation11 + $0x700] ss:$16 sps:$4 sm:$0xff]  }
 0x5ec   : > { %8359 = vmatprep.subr.bf16.mxu0 %v12139_v32  ;;  %v12220_v32 = vld [vmem:[#allocation11 + $0x30c] ss:$16 sps:$4 sm:$0xff]  }
 0x5ee   : > { %8442 = vmatpush1.bf16.msra.mxu1 %v12140_v19  ;;  %v12223_v19 = vld [vmem:[#allocation11 + $0x724] ss:$16 sps:$4 sm:$0xff]  }
 0x5ef   : > { %8360 = vmatpush1.bf16.msra.mxu0 %v12137_v46  ;;  %8443 = vmatprep.subr.bf16.mxu1 %v12148_v20  ;;  %v12218_v46 = vld [vmem:[#allocation11 + $0x308] ss:$16 sps:$4 sm:$0xff]   ;;  %v12221_v20 = vld [vmem:[#allocation11 + $0x720] ss:$16 sps:$4 sm:$0xff]  }
 0x5f0   : > { %8361 = vmatprep.subr.bf16.mxu0 %v12145_v2  ;;  %v12226_v2 = vld [vmem:[#allocation11 + $0x32c] ss:$16 sps:$4 sm:$0xff]  }
 0x5f2   : > { %8444 = vmatpush1.bf16.msra.mxu1 %v12146_v35  ;;  %v12229_v35 = vld [vmem:[#allocation11 + $0x744] ss:$16 sps:$4 sm:$0xff]  }
 0x5f3   : > { %8362 = vmatpush1.bf16.msra.mxu0 %v12143_v21  ;;  %8445 = vmatprep.subr.bf16.mxu1 %v12154_v23  ;;  %v12224_v21 = vld [vmem:[#allocation11 + $0x328] ss:$16 sps:$4 sm:$0xff]   ;;  %v12227_v23 = vld [vmem:[#allocation11 + $0x740] ss:$16 sps:$4 sm:$0xff]  }
 0x5f4   : > { %8363 = vmatprep.subr.bf16.mxu0 %v12151_v22  ;;  %v12232_v22 = vld [vmem:[#allocation11 + $0x34c] ss:$16 sps:$4 sm:$0xff]  }
 0x5f6   : > { %8446 = vmatpush1.bf16.msra.mxu1 %v12152_v42  ;;  %v12235_v42 = vld [vmem:[#allocation11 + $0x764] ss:$16 sps:$4 sm:$0xff]  }
 0x5f7   : > { %8364 = vmatpush1.bf16.msra.mxu0 %v12149_v24  ;;  %8447 = vmatprep.subr.bf16.mxu1 %v12160_v47  ;;  %v12230_v24 = vld [vmem:[#allocation11 + $0x348] ss:$16 sps:$4 sm:$0xff]   ;;  %v12233_v47 = vld [vmem:[#allocation11 + $0x760] ss:$16 sps:$4 sm:$0xff]  }
 0x5f8   : > { %8365 = vmatprep.subr.bf16.mxu0 %v12157_v40  ;;  %v12238_v40 = vld [vmem:[#allocation11 + $0x36c] ss:$16 sps:$4 sm:$0xff]  }
 0x5fa   : > { %8448 = vmatpush1.bf16.msra.mxu1 %v12158_v60  ;;  %v12244_v60 = vld [vmem:[#allocation11 + $0x38c] ss:$16 sps:$4 sm:$0xff]  }
 0x5fb   : > { %8366 = vmatpush1.bf16.msra.mxu0 %v12155_v56  ;;  %8449 = vmatprep.subr.bf16.mxu1 %v12166_v50  ;;  %v12241_v56 = vld [vmem:[#allocation11 + $0x784] ss:$16 sps:$4 sm:$0xff]   ;;  %v12242_v50 = vld [vmem:[#allocation11 + $0x388] ss:$16 sps:$4 sm:$0xff]  }
 0x5fc   : > { %8367 = vmatprep.subr.bf16.mxu0 %v12163_v61  ;;  %v12239_v61 = vld [vmem:[#allocation11 + $0x780] ss:$16 sps:$4 sm:$0xff]  }
 0x5fe   : > { %8450 = vmatpush1.bf16.msra.mxu1 %v12164_v30  ;;  %v12250_v30 = vld [vmem:[#allocation11 + $0x3ac] ss:$16 sps:$4 sm:$0xff]  }
 0x5ff   : > { %8368 = vmatpush1.bf16.msra.mxu0 %v12161_v52  ;;  %8460 = vmatprep.subr.bf16.mxu1 %v12172_v48  ;;  %v12247_v52 = vld [vmem:[#allocation11 + $0x7a4] ss:$16 sps:$4 sm:$0xff]   ;;  %v12248_v48 = vld [vmem:[#allocation11 + $0x3a8] ss:$16 sps:$4 sm:$0xff]  }
 0x600   : > { %8378 = vmatprep.subr.bf16.mxu0 %v12169_v49  ;;  %v12245_v49 = vld [vmem:[#allocation11 + $0x7a0] ss:$16 sps:$4 sm:$0xff]  }
 0x601   : > { %8452 = vmatmul.mubr.bf16.vlgmr.msra.gmra.mrb[4].mxu1 %v14357_v11  ;;  %v12190_v11 = vld [vmem:[#allocation11 + $0x26c] ss:$16 sps:$4 sm:$0xff]  }
 0x602   : > { %8370 = vmatmul.mubr.bf16.vlgmr.msra.gmra.mrb[0].mxu0 %v14396_v26  ;;  %8461 = vmatpush1.bf16.msra.mxu1 %v12170_v13  ;;  %v12251_v13 = vld [vmem:[#allocation11 + $0x7c0] ss:$16 sps:$4 sm:$0xff]  }
 0x603   : > { %8379 = vmatpush1.bf16.msra.mxu0 %v12167_v25  ;;  %8462 = vmatprep.subr.bf16.mxu1 %v12178_v29  ;;  %v12256_v25 = vld [vmem:[#allocation11 + $0x3cc] ss:$16 sps:$4 sm:$0xff]   ;;  %v12259_v29 = vld [vmem:[#allocation11 + $0x7e4] ss:$16 sps:$4 sm:$0xff]  }
 0x604   : > { %8380 = vmatprep.subr.bf16.mxu0 %v12175_v37  ;;  %8410 = vmatprep.mubr.bf16.mxu0 %v14398_v34  ;;  %v12254_v37 = vld [vmem:[#allocation11 + $0x3c8] ss:$16 sps:$4 sm:$0xff]  }
 0x605   : > { %8492 = vmatprep.mubr.bf16.mxu1 %v14359_v12  ;;  %v12194_v12 = vld [vmem:[#allocation11 + $0x288] ss:$16 sps:$4 sm:$0xff]  }
 0x606   : > { %8463 = vmatpush1.bf16.msra.mxu1 %v12176_v1  ;;  %v12257_v1 = vld [vmem:[#allocation11 + $0x7e0] ss:$16 sps:$4 sm:$0xff]  }
 0x607   : > { %8381 = vmatpush1.bf16.msra.mxu0 %v12173_v38  ;;  %8464 = vmatprep.subr.bf16.mxu1 %v12184_v17  ;;  %v12262_v38 = vld [vmem:[#allocation11 + $0x3ec] ss:$16 sps:$4 sm:$0xff]  }
 0x608   : > { %8382 = vmatprep.subr.bf16.mxu0 %v12181_v39  ;;  %v12260_v39 = vld [vmem:[#allocation11 + $0x3e8] ss:$16 sps:$4 sm:$0xff]   ;;  %v12265_v17 = vld [vmem:[#allocation11 + $0x40c] ss:$16 sps:$4 sm:$0xff]  }
 0x60a   : > { %8465 = vmatpush1.bf16.msra.mxu1 %v12182_v55  ;;  %v14406_v55 = vpack.c.bf16 %v14390_v59, %v14390_v59  ;;  %v12362_v59 = vld [vmem:[#allocation14 + $0x10] ss:$8 sps:$4 sm:$0xff]  }
 0x60b   : > { %8383 = vmatpush1.bf16.msra.mxu0 %v12179_v51  ;;  %8466 = vmatprep.subr.bf16.mxu1 %v12190_v11  ;;  %v12263_v51 = vld [vmem:[#allocation11 + $0x408] ss:$16 sps:$4 sm:$0xff]   ;;  %v12359_v11 = vld [vmem:[#allocation14] ss:$8 sps:$4 sm:$0xff]  }
 0x60c   : > { %8384 = vmatprep.subr.bf16.mxu0 %v12187_v57  ;;  %v12268_v57 = vld [vmem:[#allocation11 + $0x42c] ss:$16 sps:$4 sm:$0xff]  }
 0x60e   : > { %8467 = vmatpush1.bf16.msra.mxu1 %v12188_v63  ;;  %v12266_v63 = vld [vmem:[#allocation11 + $0x428] ss:$16 sps:$4 sm:$0xff]  }
 0x60f   : > { %8385 = vmatpush1.bf16.msra.mxu0 %v12185_v45  ;;  %8468 = vmatprep.subr.bf16.mxu1 %v12196_v36  ;;  %v12361_v45 = vld [vmem:[#allocation14 + $0x4] ss:$8 sps:$4 sm:$0xff]   ;;  %v12271_v36 = vld [vmem:[#allocation11 + $0x44c] ss:$16 sps:$4 sm:$0xff]  }
 0x610   : > { %8386 = vmatprep.subr.bf16.mxu0 %v12193_v54  ;;  %v12364_v54 = vld [vmem:[#allocation14 + $0x14] ss:$8 sps:$4 sm:$0xff]  }
 0x612   : > { %8469 = vmatpush1.bf16.msra.mxu1 %v12194_v12  ;;  %v12269_v12 = vld [vmem:[#allocation11 + $0x448] ss:$16 sps:$4 sm:$0xff]  }
 0x613   : > { %8387 = vmatpush1.bf16.msra.mxu0 %v12191_v58  ;;  %8470 = vmatprep.subr.bf16.mxu1 %v12202_v4  ;;  %v12367_v58 = vld [vmem:[#allocation14 + $0x24] ss:$8 sps:$4 sm:$0xff]  }
 0x614   : > { %8388 = vmatprep.subr.bf16.mxu0 %v12199_v62  ;;  %v12274_v62 = vld [vmem:[#allocation11 + $0x46c] ss:$16 sps:$4 sm:$0xff]   ;;  %v12272_v4 = vld [vmem:[#allocation11 + $0x468] ss:$16 sps:$4 sm:$0xff]  }
 0x616   : > { %8471 = vmatpush1.bf16.msra.mxu1 %v12200_v6  ;;  %v12370_v6 = vld [vmem:[#allocation14 + $0x34] ss:$8 sps:$4 sm:$0xff]  }
 0x617   : > { %8389 = vmatpush1.bf16.msra.mxu0 %v12197_v5  ;;  %8472 = vmatprep.subr.bf16.mxu1 %v12208_v9  ;;  %v12277_v5 = vld [vmem:[#allocation11 + $0x48c] ss:$16 sps:$4 sm:$0xff]   ;;  %v12275_v9 = vld [vmem:[#allocation11 + $0x488] ss:$16 sps:$4 sm:$0xff]  }
 0x618   : > { %8390 = vmatprep.subr.bf16.mxu0 %v12205_v8  ;;  %v12373_v8 = vld [vmem:[#allocation14 + $0x44] ss:$8 sps:$4 sm:$0xff]  }
 0x61a   : > { %8473 = vmatpush1.bf16.msra.mxu1 %v12206_v10  ;;  %v12371_v10 = vld [vmem:[#allocation14 + $0x40] ss:$8 sps:$4 sm:$0xff]  }
 0x61b   : > { %8391 = vmatpush1.bf16.msra.mxu0 %v12203_v44  ;;  %8474 = vmatprep.subr.bf16.mxu1 %v12214_v14  ;;  %v12280_v44 = vld [vmem:[#allocation11 + $0x4ac] ss:$16 sps:$4 sm:$0xff]   ;;  %v12278_v14 = vld [vmem:[#allocation11 + $0x4a8] ss:$16 sps:$4 sm:$0xff]  }
 0x61c   : > { %8392 = vmatprep.subr.bf16.mxu0 %v12211_v28  ;;  %v12376_v28 = vld [vmem:[#allocation14 + $0x54] ss:$8 sps:$4 sm:$0xff]  }
 0x61e   : > { %8475 = vmatpush1.bf16.msra.mxu1 %v12212_v16  ;;  %v12374_v16 = vld [vmem:[#allocation14 + $0x50] ss:$8 sps:$4 sm:$0xff]  }
 0x61f   : > { %8393 = vmatpush1.bf16.msra.mxu0 %v12209_v15  ;;  %8476 = vmatprep.subr.bf16.mxu1 %v12220_v32  ;;  %v12283_v15 = vld [vmem:[#allocation11 + $0x4cc] ss:$16 sps:$4 sm:$0xff]   ;;  %v12281_v32 = vld [vmem:[#allocation11 + $0x4c8] ss:$16 sps:$4 sm:$0xff]  }
 0x620   : > { %8394 = vmatprep.subr.bf16.mxu0 %v12217_v31  ;;  %v12379_v31 = vld [vmem:[#allocation14 + $0x64] ss:$8 sps:$4 sm:$0xff]  }
 0x622   : > { %8477 = vmatpush1.bf16.msra.mxu1 %v12218_v46  ;;  %v12377_v46 = vld [vmem:[#allocation14 + $0x60] ss:$8 sps:$4 sm:$0xff]  }
 0x623   : > { %8395 = vmatpush1.bf16.msra.mxu0 %v12215_v18  ;;  %8478 = vmatprep.subr.bf16.mxu1 %v12226_v2  ;;  %v12286_v18 = vld [vmem:[#allocation11 + $0x4ec] ss:$16 sps:$4 sm:$0xff]   ;;  %v12284_v2 = vld [vmem:[#allocation11 + $0x4e8] ss:$16 sps:$4 sm:$0xff]  }
 0x624   : > { %8396 = vmatprep.subr.bf16.mxu0 %v12223_v19  ;;  %v12382_v19 = vld [vmem:[#allocation14 + $0x74] ss:$8 sps:$4 sm:$0xff]  }
 0x626   : > { %8479 = vmatpush1.bf16.msra.mxu1 %v12224_v21  ;;  %v12380_v21 = vld [vmem:[#allocation14 + $0x70] ss:$8 sps:$4 sm:$0xff]  }
 0x627   : > { %8397 = vmatpush1.bf16.msra.mxu0 %v12221_v20  ;;  %8480 = vmatprep.subr.bf16.mxu1 %v12232_v22  ;;  %v12289_v20 = vld [vmem:[#allocation11 + $0x50c] ss:$16 sps:$4 sm:$0xff]   ;;  %v12287_v22 = vld [vmem:[#allocation11 + $0x508] ss:$16 sps:$4 sm:$0xff]  }
 0x628   : > { %8398 = vmatprep.subr.bf16.mxu0 %v12229_v35  ;;  %v12385_v35 = vld [vmem:[#allocation14 + $0x84] ss:$8 sps:$4 sm:$0xff]  }
 0x62a   : > { %8481 = vmatpush1.bf16.msra.mxu1 %v12230_v24  ;;  %v12383_v24 = vld [vmem:[#allocation14 + $0x80] ss:$8 sps:$4 sm:$0xff]  }
 0x62b   : > { %8399 = vmatpush1.bf16.msra.mxu0 %v12227_v23  ;;  %8482 = vmatprep.subr.bf16.mxu1 %v12238_v40  ;;  %v12292_v23 = vld [vmem:[#allocation11 + $0x52c] ss:$16 sps:$4 sm:$0xff]   ;;  %v12290_v40 = vld [vmem:[#allocation11 + $0x528] ss:$16 sps:$4 sm:$0xff]  }
 0x62c   : > { %8400 = vmatprep.subr.bf16.mxu0 %v12235_v42  ;;  %v12388_v42 = vld [vmem:[#allocation14 + $0x94] ss:$8 sps:$4 sm:$0xff]  }
 0x62e   : > { %8483 = vmatpush1.bf16.msra.mxu1 %v12236_v53  ;;  %v12386_v53 = vld [vmem:[#allocation14 + $0x90] ss:$8 sps:$4 sm:$0xff]  }
 0x62f   : > { %8401 = vmatpush1.bf16.msra.mxu0 %v12233_v47  ;;  %8484 = vmatprep.subr.bf16.mxu1 %v12244_v60  ;;  %v12295_v47 = vld [vmem:[#allocation11 + $0x54c] ss:$16 sps:$4 sm:$0xff]   ;;  %v12293_v60 = vld [vmem:[#allocation11 + $0x548] ss:$16 sps:$4 sm:$0xff]  }
 0x630   : > { %8402 = vmatprep.subr.bf16.mxu0 %v12241_v56  ;;  %v12391_v56 = vld [vmem:[#allocation14 + $0xa4] ss:$8 sps:$4 sm:$0xff]  }
 0x632   : > { %8485 = vmatpush1.bf16.msra.mxu1 %v12242_v50  ;;  %v12389_v50 = vld [vmem:[#allocation14 + $0xa0] ss:$8 sps:$4 sm:$0xff]  }
 0x633   : > { %8403 = vmatpush1.bf16.msra.mxu0 %v12239_v61  ;;  %8486 = vmatprep.subr.bf16.mxu1 %v12250_v30  ;;  %v12298_v61 = vld [vmem:[#allocation11 + $0x56c] ss:$16 sps:$4 sm:$0xff]   ;;  %v12296_v30 = vld [vmem:[#allocation11 + $0x568] ss:$16 sps:$4 sm:$0xff]  }
 0x634   : > { %8404 = vmatprep.subr.bf16.mxu0 %v12247_v52  ;;  %v12394_v52 = vld [vmem:[#allocation14 + $0xb4] ss:$8 sps:$4 sm:$0xff]  }
 0x636   : > { %8487 = vmatpush1.bf16.msra.mxu1 %v12248_v48  ;;  %v12392_v48 = vld [vmem:[#allocation14 + $0xb0] ss:$8 sps:$4 sm:$0xff]  }
 0x637   : > { %8405 = vmatpush1.bf16.msra.mxu0 %v12245_v49  ;;  %8488 = vmatprep.subr.bf16.mxu1 %v12256_v25  ;;  %v12301_v49 = vld [vmem:[#allocation11 + $0x58c] ss:$16 sps:$4 sm:$0xff]   ;;  %v12299_v25 = vld [vmem:[#allocation11 + $0x588] ss:$16 sps:$4 sm:$0xff]  }
 0x638   : > { %8406 = vmatprep.subr.bf16.mxu0 %v12253_v43  ;;  %v12397_v43 = vld [vmem:[#allocation14 + $0xc4] ss:$8 sps:$4 sm:$0xff]  }
 0x63a   : > { %8489 = vmatpush1.bf16.msra.mxu1 %v12254_v37  ;;  %v12395_v37 = vld [vmem:[#allocation14 + $0xc0] ss:$8 sps:$4 sm:$0xff]  }
 0x63b   : > { %8407 = vmatpush1.bf16.msra.mxu0 %v12251_v13  ;;  %8490 = vmatprep.subr.bf16.mxu1 %v12262_v38  ;;  %v12304_v13 = vld [vmem:[#allocation11 + $0x5ac] ss:$16 sps:$4 sm:$0xff]   ;;  %v12302_v38 = vld [vmem:[#allocation11 + $0x5a8] ss:$16 sps:$4 sm:$0xff]  }
 0x63c   : > { %8408 = vmatprep.subr.bf16.mxu0 %v12259_v29  ;;  %v12400_v29 = vld [vmem:[#allocation14 + $0xd4] ss:$8 sps:$4 sm:$0xff]  }
 0x63e   : > { %8491 = vmatpush1.bf16.msra.mxu1 %v12260_v39  ;;  %v12398_v39 = vld [vmem:[#allocation14 + $0xd0] ss:$8 sps:$4 sm:$0xff]  }
 0x63f   : > { %8409 = vmatpush1.bf16.msra.mxu0 %v12257_v1  ;;  %8501 = vmatprep.subr.bf16.mxu1 %v12265_v17  ;;  %v12307_v1 = vld [vmem:[#allocation11 + $0x5cc] ss:$16 sps:$4 sm:$0xff]   ;;  %v12305_v17 = vld [vmem:[#allocation11 + $0x5c8] ss:$16 sps:$4 sm:$0xff]  }
 0x640   : > { %8987 = vmatprep.subr.bf16.mxu0 %v12361_v45  ;;  %v12311_v45 = vld [vmem:[#allocation11 + $0x608] ss:$16 sps:$4 sm:$0xff]  }
 0x641   : > { %8493 = vmatmul.mubr.bf16.vlgmr.msra.gmra.mrb[4].mxu1 %v14361_v27  ;;  %v12365_v27 = vld [vmem:[#allocation14 + $0x20] ss:$8 sps:$4 sm:$0xff]  }
 0x642   : > { %8411 = vmatmul.mubr.bf16.vlgmr.msra.gmra.mrb[0].mxu0 %v14406_v55  ;;  %8502 = vmatpush1.bf16.msra.mxu1 %v12263_v51  ;;  %v12310_v51 = vld [vmem:[#allocation11 + $0x5ec] ss:$16 sps:$4 sm:$0xff]  }
 0x643   : > { %8533 = vmatprep.mubr.bf16.mxu1 %v14384_v7  ;;  %8503 = vmatprep.subr.bf16.mxu1 %v12268_v57  ;;  %v12368_v7 = vld [vmem:[#allocation14 + $0x30] ss:$8 sps:$4 sm:$0xff]   ;;  %v12308_v57 = vld [vmem:[#allocation11 + $0x5e8] ss:$16 sps:$4 sm:$0xff]  }
 0x644   : > { %8988 = vmatpush1.bf16.msra.mxu0 %v12359_v11  ;;  %v12313_v11 = vld [vmem:[#allocation11 + $0x60c] ss:$16 sps:$4 sm:$0xff]  }
 0x645   : > { %8989 = vmatprep.subr.bf16.mxu0 %v12364_v54  ;;  %v12314_v54 = vld [vmem:[#allocation11 + $0x628] ss:$16 sps:$4 sm:$0xff]  }
 0x646   : > { %8504 = vmatpush1.bf16.msra.mxu1 %v12266_v63  ;;  %v12316_v63 = vld [vmem:[#allocation11 + $0x62c] ss:$16 sps:$4 sm:$0xff]  }
 0x647   : > { %8505 = vmatprep.subr.bf16.mxu1 %v12271_v36  ;;  %v12319_v36 = vld [vmem:[#allocation11 + $0x64c] ss:$16 sps:$4 sm:$0xff]  }
 0x648   : > { %8990 = vmatpush1.bf16.msra.mxu0 %v12362_v59  ;;  %v12317_v59 = vld [vmem:[#allocation11 + $0x648] ss:$16 sps:$4 sm:$0xff]  }
 0x649   : > { %8991 = vmatprep.subr.bf16.mxu0 %v12367_v58  ;;  %v12322_v58 = vld [vmem:[#allocation11 + $0x66c] ss:$16 sps:$4 sm:$0xff]  }
 0x64a   : > { %8506 = vmatpush1.bf16.msra.mxu1 %v12269_v12  ;;  %v12320_v12 = vld [vmem:[#allocation11 + $0x668] ss:$16 sps:$4 sm:$0xff]  }
 0x64b   : > { %8507 = vmatprep.subr.bf16.mxu1 %v12274_v62  ;;  %v12325_v62 = vld [vmem:[#allocation11 + $0x68c] ss:$16 sps:$4 sm:$0xff]  }
 0x64c   : > { %8992 = vmatpush1.bf16.msra.mxu0 %v12365_v27  ;;  %v12323_v27 = vld [vmem:[#allocation11 + $0x688] ss:$16 sps:$4 sm:$0xff]  }
 0x64d   : > { %8993 = vmatprep.subr.bf16.mxu0 %v12370_v6  ;;  %v12403_v6 = vld [vmem:[#allocation14 + $0xe4] ss:$8 sps:$4 sm:$0xff]  }
 0x64e   : > { %8508 = vmatpush1.bf16.msra.mxu1 %v12272_v4  ;;  %v12328_v4 = vld [vmem:[#allocation11 + $0x6ac] ss:$16 sps:$4 sm:$0xff]  }
 0x64f   : > { %8509 = vmatprep.subr.bf16.mxu1 %v12277_v5  ;;  %v12331_v5 = vld [vmem:[#allocation11 + $0x6cc] ss:$16 sps:$4 sm:$0xff]  }
 0x650   : > { %8994 = vmatpush1.bf16.msra.mxu0 %v12368_v7  ;;  %v12401_v7 = vld [vmem:[#allocation14 + $0xe0] ss:$8 sps:$4 sm:$0xff]  }
 0x651   : > { %8995 = vmatprep.subr.bf16.mxu0 %v12373_v8 }
 0x652   : > { %8510 = vmatpush1.bf16.msra.mxu1 %v12275_v9 }
 0x653   : > { %8511 = vmatprep.subr.bf16.mxu1 %v12280_v44  ;;  %v12329_v44 = vld [vmem:[#allocation11 + $0x6c8] ss:$16 sps:$4 sm:$0xff]  }
 0x654   : > { %8996 = vmatpush1.bf16.msra.mxu0 %v12371_v10 }
 0x655   : > { %8997 = vmatprep.subr.bf16.mxu0 %v12376_v28  ;;  %v12334_v28 = vld [vmem:[#allocation11 + $0x6ec] ss:$16 sps:$4 sm:$0xff]  }
 0x656   : > { %8512 = vmatpush1.bf16.msra.mxu1 %v12278_v14  ;;  %v12406_v14 = vld [vmem:[#allocation14 + $0xf4] ss:$8 sps:$4 sm:$0xff]  }
 0x657   : > { %8513 = vmatprep.subr.bf16.mxu1 %v12283_v15  ;;  %v12404_v15 = vld [vmem:[#allocation14 + $0xf0] ss:$8 sps:$4 sm:$0xff]  }
 0x658   : > { %8998 = vmatpush1.bf16.msra.mxu0 %v12374_v16  ;;  %v12332_v16 = vld [vmem:[#allocation11 + $0x6e8] ss:$16 sps:$4 sm:$0xff]  }
 0x659   : > { %8999 = vmatprep.subr.bf16.mxu0 %v12379_v31  ;;  %v12337_v31 = vld [vmem:[#allocation11 + $0x70c] ss:$16 sps:$4 sm:$0xff]  }
 0x65a   : > { %8514 = vmatpush1.bf16.msra.mxu1 %v12281_v32  ;;  %v12409_v32 = vld [vmem:[#allocation14 + $0x104] ss:$8 sps:$4 sm:$0xff]  }
 0x65b   : > { %8515 = vmatprep.subr.bf16.mxu1 %v12286_v18  ;;  %v12335_v18 = vld [vmem:[#allocation11 + $0x708] ss:$16 sps:$4 sm:$0xff]  }
 0x65c   : > { %9000 = vmatpush1.bf16.msra.mxu0 %v12377_v46  ;;  %v12340_v46 = vld [vmem:[#allocation11 + $0x72c] ss:$16 sps:$4 sm:$0xff]  }
 0x65d   : > { %9001 = vmatprep.subr.bf16.mxu0 %v12382_v19  ;;  %v12338_v19 = vld [vmem:[#allocation11 + $0x728] ss:$16 sps:$4 sm:$0xff]  }
 0x65e   : > { %8516 = vmatpush1.bf16.msra.mxu1 %v12284_v2  ;;  %v12343_v2 = vld [vmem:[#allocation11 + $0x74c] ss:$16 sps:$4 sm:$0xff]  }
 0x65f   : > { %8517 = vmatprep.subr.bf16.mxu1 %v12289_v20  ;;  %v12341_v20 = vld [vmem:[#allocation11 + $0x748] ss:$16 sps:$4 sm:$0xff]  }
 0x660   : > { %9002 = vmatpush1.bf16.msra.mxu0 %v12380_v21  ;;  %v12346_v21 = vld [vmem:[#allocation11 + $0x76c] ss:$16 sps:$4 sm:$0xff]  }
 0x661   : > { %9003 = vmatprep.subr.bf16.mxu0 %v12385_v35  ;;  %v12344_v35 = vld [vmem:[#allocation11 + $0x768] ss:$16 sps:$4 sm:$0xff]  }
 0x662   : > { %8518 = vmatpush1.bf16.msra.mxu1 %v12287_v22  ;;  %v12349_v22 = vld [vmem:[#allocation11 + $0x78c] ss:$16 sps:$4 sm:$0xff]  }
 0x663   : > { %8519 = vmatprep.subr.bf16.mxu1 %v12292_v23  ;;  %v12347_v23 = vld [vmem:[#allocation11 + $0x788] ss:$16 sps:$4 sm:$0xff]  }
 0x664   : > { %9004 = vmatpush1.bf16.msra.mxu0 %v12383_v24  ;;  %v12352_v24 = vld [vmem:[#allocation11 + $0x7ac] ss:$16 sps:$4 sm:$0xff]  }
 0x665   : > { %9005 = vmatprep.subr.bf16.mxu0 %v12388_v42  ;;  %v12350_v42 = vld [vmem:[#allocation11 + $0x7a8] ss:$16 sps:$4 sm:$0xff]  }
 0x666   : > { %8520 = vmatpush1.bf16.msra.mxu1 %v12290_v40  ;;  %v12355_v40 = vld [vmem:[#allocation11 + $0x7cc] ss:$16 sps:$4 sm:$0xff]  }
 0x667   : > { %8521 = vmatprep.subr.bf16.mxu1 %v12295_v47  ;;  %v12353_v47 = vld [vmem:[#allocation11 + $0x7c8] ss:$16 sps:$4 sm:$0xff]  }
 0x668   : > { %9006 = vmatpush1.bf16.msra.mxu0 %v12386_v53  ;;  %v12358_v53 = vld [vmem:[#allocation11 + $0x7ec] ss:$16 sps:$4 sm:$0xff]  }
 0x669   : > { %9007 = vmatprep.subr.bf16.mxu0 %v12391_v56  ;;  %v12356_v56 = vld [vmem:[#allocation11 + $0x7e8] ss:$16 sps:$4 sm:$0xff]  }
 0x66a   : > { %8522 = vmatpush1.bf16.msra.mxu1 %v12293_v60  ;;  %v14414_v60 = vld [vmem:[#allocation12] sm:$0xf] }
 0x66b   : > { %8523 = vmatprep.subr.bf16.mxu1 %v12298_v61  ;;  %v6958_v61 = vrot.slane %v14414_v60, %v14098_v33 }
 0x66c   : > { %9008 = vmatpush1.bf16.msra.mxu0 %v12389_v50  ;;  %v6962_v50 = vrot.slane %v14414_v60, %v14105_v3 }
 0x66d   : > { %9009 = vmatprep.subr.bf16.mxu0 %v12394_v52 }
 0x66e   : > { %8524 = vmatpush1.bf16.msra.mxu1 %v12296_v30 }
 0x66f   : > { %8525 = vmatprep.subr.bf16.mxu1 %v12301_v49 }
 0x670   : > { %9010 = vmatpush1.bf16.msra.mxu0 %v12392_v48 }
 0x671   : > { %9011 = vmatprep.subr.bf16.mxu0 %v12397_v43 }
 0x672   : > { %8526 = vmatpush1.bf16.msra.mxu1 %v12299_v25 }
 0x673   : > { %8527 = vmatprep.subr.bf16.mxu1 %v12304_v13 }
 0x674   : > { %9012 = vmatpush1.bf16.msra.mxu0 %v12395_v37 }
 0x675   : > { %9013 = vmatprep.subr.bf16.mxu0 %v12400_v29 }
 0x676   : > { %8528 = vmatpush1.bf16.msra.mxu1 %v12302_v38 }
 0x677   : > { %8529 = vmatprep.subr.bf16.mxu1 %v12307_v1 }
 0x678   : > { %9014 = vmatpush1.bf16.msra.mxu0 %v12398_v39 }
 0x679   : > { %9015 = vmatprep.subr.bf16.mxu0 %v12403_v6  ;;  %v12419_v6 = vld [vmem:[#allocation14 + $0x140] ss:$8 sps:$4 sm:$0xff]  }
 0x67a   : > { %8530 = vmatpush1.bf16.msra.mxu1 %v12305_v17  ;;  %v12412_v17 = vld [vmem:[#allocation14 + $0x114] ss:$8 sps:$4 sm:$0xff]  }
 0x67b   : > { %8531 = vmatprep.subr.bf16.mxu1 %v12310_v51  ;;  %v12455_v51 = vld [vmem:[#allocation17 + $0x40] sm:$0xff]  }
 0x67c   : > { %9016 = vmatpush1.bf16.msra.mxu0 %v12401_v7  ;;  %v12464_v7 = vld [vmem:[#allocation17 + $0x20] sm:$0xff]  }
 0x67d   : > { %9017 = vmatprep.subr.bf16.mxu0 %v12406_v14  ;;  %v12430_v14 = vld [vmem:[#allocation14 + $0x174] ss:$8 sps:$4 sm:$0xff]  }
 0x67e   : > { %8532 = vmatpush1.bf16.msra.mxu1 %v12308_v57  ;;  %v12456_v57 = vld [vmem:[#allocation17] sm:$0xff]  }
 0x67f   : > { %8542 = vmatprep.subr.bf16.mxu1 %v12313_v11  ;;  %v12457_v11 = vld [vmem:[#allocation17 + $0x48] sm:$0xff]  }
 0x680   : > { %9018 = vmatpush1.bf16.msra.mxu0 %v12404_v15  ;;  %v12428_v15 = vld [vmem:[#allocation14 + $0x170] ss:$8 sps:$4 sm:$0xff]  }
 0x681   : > { %8534 = vmatmul.mubr.bf16.vlgmr.msra.gmra.mrb[4].mxu1 %v14396_v26  ;;  %v12326_v26 = vld [vmem:[#allocation11 + $0x6a8] ss:$16 sps:$4 sm:$0xff]   ;;  %9028 = vmatprep.subr.bf16.mxu0 %v12409_v32 }
 0x682   : > { %8543 = vmatpush1.bf16.msra.mxu1 %v12311_v45  ;;  %8574 = vmatprep.mubr.bf16.mxu1 %v14398_v34  ;;  %v12410_v45 = vld [vmem:[#allocation14 + $0x110] ss:$8 sps:$4 sm:$0xff]   ;;  %v12436_v32 = vld [vmem:[#allocation14 + $0x194] ss:$8 sps:$4 sm:$0xff]  }
 0x683   : > { %8544 = vmatprep.subr.bf16.mxu1 %v12316_v63  ;;  %v12415_v63 = vld [vmem:[#allocation14 + $0x124] ss:$8 sps:$4 sm:$0xff]  }
 0x686   : > { %8545 = vmatpush1.bf16.msra.mxu1 %v12314_v54  ;;  %v12458_v54 = vld [vmem:[#allocation17 + $0x8] sm:$0xff]  }
 0x687   : > { %8546 = vmatprep.subr.bf16.mxu1 %v12319_v36  ;;  %v12459_v36 = vld [vmem:[#allocation17 + $0x50] sm:$0xff]  }
 0x68a   : > { %8547 = vmatpush1.bf16.msra.mxu1 %v12317_v59  ;;  %v12413_v59 = vld [vmem:[#allocation14 + $0x120] ss:$8 sps:$4 sm:$0xff]  }
 0x68b   : > { %8548 = vmatprep.subr.bf16.mxu1 %v12322_v58  ;;  %v12418_v58 = vld [vmem:[#allocation14 + $0x134] ss:$8 sps:$4 sm:$0xff]  }
 0x68e   : > { %8549 = vmatpush1.bf16.msra.mxu1 %v12320_v12  ;;  %v12460_v12 = vld [vmem:[#allocation17 + $0x10] sm:$0xff]  }
 0x68f   : > { %8550 = vmatprep.subr.bf16.mxu1 %v12325_v62  ;;  %v12461_v62 = vld [vmem:[#allocation17 + $0x58] sm:$0xff]  }
 0x692   : > { %8551 = vmatpush1.bf16.msra.mxu1 %v12323_v27  ;;  %v12416_v27 = vld [vmem:[#allocation14 + $0x130] ss:$8 sps:$4 sm:$0xff]  }
 0x693   : > { %8552 = vmatprep.subr.bf16.mxu1 %v12328_v4  ;;  %v12421_v4 = vld [vmem:[#allocation14 + $0x144] ss:$8 sps:$4 sm:$0xff]  }
 0x694   : > { %v8289_v34 = vpop.f32.mrb[0].mxu1 }
 0x695   : > { %v8291_v8 = vpop.f32.mrb[1].mxu1  ;;  %v8290_v52 = vadd.f32 %v8289_v34, %v6958_v61  ;;  %v12424_v34 = vld [vmem:[#allocation14 + $0x154] ss:$8 sps:$4 sm:$0xff]  }
 0x696   : > { %v8293_v9 = vpop.f32.mrb[2].mxu1  ;;  %8553 = vmatpush1.bf16.msra.mxu1 %v12326_v26  ;;  %v8292_v30 = vadd.f32 %v8291_v8, %v6962_v50  ;;  %v12462_v26 = vld [vmem:[#allocation17 + $0x18] sm:$0xff]   ;;  %v12465_v8 = vld [vmem:[#allocation17 + $0x68] sm:$0xff]  }
 0x697   : > { %v8294_v10 = vpop.f32.mrb[3].mxu1  ;;  %8554 = vmatprep.subr.bf16.mxu1 %v12331_v5  ;;  %v12463_v5 = vld [vmem:[#allocation17 + $0x60] sm:$0xff]   ;;  %v12422_v9 = vld [vmem:[#allocation14 + $0x150] ss:$8 sps:$4 sm:$0xff]  }
 0x698   : > { %v12466_v10 = vld [vmem:[#allocation17 + $0x28] sm:$0xff]  }
 0x69a   : > { %8555 = vmatpush1.bf16.msra.mxu1 %v12329_v44  ;;  %v12427_v44 = vld [vmem:[#allocation14 + $0x164] ss:$8 sps:$4 sm:$0xff]  }
 0x69b   : > { %8556 = vmatprep.subr.bf16.mxu1 %v12334_v28  ;;  %v12425_v28 = vld [vmem:[#allocation14 + $0x160] ss:$8 sps:$4 sm:$0xff]  }
 0x69e   : > { %8557 = vmatpush1.bf16.msra.mxu1 %v12332_v16  ;;  %v12433_v16 = vld [vmem:[#allocation14 + $0x184] ss:$8 sps:$4 sm:$0xff]  }
 0x69f   : > { %8558 = vmatprep.subr.bf16.mxu1 %v12337_v31  ;;  %v12431_v31 = vld [vmem:[#allocation14 + $0x180] ss:$8 sps:$4 sm:$0xff]  }
 0x6a2   : > { %8559 = vmatpush1.bf16.msra.mxu1 %v12335_v18  ;;  %v12434_v18 = vld [vmem:[#allocation14 + $0x190] ss:$8 sps:$4 sm:$0xff]  }
 0x6a3   : > { %8560 = vmatprep.subr.bf16.mxu1 %v12340_v46  ;;  %v12439_v46 = vld [vmem:[#allocation14 + $0x1a4] ss:$8 sps:$4 sm:$0xff]  }
 0x6a6   : > { %8561 = vmatpush1.bf16.msra.mxu1 %v12338_v19  ;;  %v12437_v19 = vld [vmem:[#allocation14 + $0x1a0] ss:$8 sps:$4 sm:$0xff]  }
 0x6a7   : > { %8562 = vmatprep.subr.bf16.mxu1 %v12343_v2  ;;  %v12442_v2 = vld [vmem:[#allocation14 + $0x1b4] ss:$8 sps:$4 sm:$0xff]  }
 0x6aa   : > { %8563 = vmatpush1.bf16.msra.mxu1 %v12341_v20  ;;  %v12440_v20 = vld [vmem:[#allocation14 + $0x1b0] ss:$8 sps:$4 sm:$0xff]  }
 0x6ab   : > { %8564 = vmatprep.subr.bf16.mxu1 %v12346_v21  ;;  %v12445_v21 = vld [vmem:[#allocation14 + $0x1c4] ss:$8 sps:$4 sm:$0xff]  }
 0x6ae   : > { %8565 = vmatpush1.bf16.msra.mxu1 %v12344_v35  ;;  %v12443_v35 = vld [vmem:[#allocation14 + $0x1c0] ss:$8 sps:$4 sm:$0xff]  }
 0x6af   : > { %8566 = vmatprep.subr.bf16.mxu1 %v12349_v22  ;;  %v12448_v22 = vld [vmem:[#allocation14 + $0x1d4] ss:$8 sps:$4 sm:$0xff]  }
 0x6b2   : > { %8567 = vmatpush1.bf16.msra.mxu1 %v12347_v23  ;;  %v12446_v23 = vld [vmem:[#allocation14 + $0x1d0] ss:$8 sps:$4 sm:$0xff]  }
 0x6b3   : > { %8568 = vmatprep.subr.bf16.mxu1 %v12352_v24  ;;  %v12451_v24 = vld [vmem:[#allocation14 + $0x1e4] ss:$8 sps:$4 sm:$0xff]  }
 0x6b6   : > { %8569 = vmatpush1.bf16.msra.mxu1 %v12350_v42  ;;  %v12449_v42 = vld [vmem:[#allocation14 + $0x1e0] ss:$8 sps:$4 sm:$0xff]  }
 0x6b7   : > { %8570 = vmatprep.subr.bf16.mxu1 %v12355_v40  ;;  %v12454_v40 = vld [vmem:[#allocation14 + $0x1f4] ss:$8 sps:$4 sm:$0xff]  }
 0x6ba   : > { %8571 = vmatpush1.bf16.msra.mxu1 %v12353_v47  ;;  %v12452_v47 = vld [vmem:[#allocation14 + $0x1f0] ss:$8 sps:$4 sm:$0xff]  }
 0x6bb   : > { %8572 = vmatprep.subr.bf16.mxu1 %v12358_v53  ;;  %v6966_v53 = vrot.slane %v14414_v60, %v14101_v41  ;;  %v12469_v41 = vld [vmem:[#allocation17 + $0x78] sm:$0xff]  }
 0x6be   : > { %8573 = vmatpush1.bf16.msra.mxu1 %v12356_v56  ;;  %v6970_v56 = vrot.slane %v14414_v60, %v14108_v0  ;;  %v8655_v0 = vld [vmem:[#allocation15] sm:$0x3] }
 0x6bf   : > { %11023 = vmatprep.subr.bf16.mxu1 %v12455_v51  ;;  %v8660_v60 = vrot.slane %v8655_v0, %v14098_v33 }
 0x6c1   : > { %8575 = vmatmul.mubr.bf16.vlgmr.msra.gmra.mrb[4].mxu1 %v14406_v55  ;;  %v12407_v55 = vld [vmem:[#allocation14 + $0x100] ss:$8 sps:$4 sm:$0xff]  }
 0x6c2   : > { %11024 = vmatpush3.bf16.msra.mxu1 %v12456_v57 }
 0x6c3   : > { %11025 = vmatprep.subr.bf16.mxu1 %v12457_v11 }
 0x6c6   : > { %11026 = vmatpush3.bf16.msra.mxu1 %v12458_v54 }
 0x6c7   : > { %11027 = vmatprep.subr.bf16.mxu1 %v12459_v36 }
 0x6ca   : > { %11028 = vmatpush3.bf16.msra.mxu1 %v12460_v12  ;;  %v10998_v12 = vld [vmem:[#allocation18] ss:$0 sm:$0xff] }
 0x6cb   : > { %11029 = vmatprep.subr.bf16.mxu1 %v12461_v62 }
 0x6ce   : > { %11030 = vmatpush3.bf16.msra.mxu1 %v12462_v26 }
 0x6cf   : > { %11031 = vmatprep.subr.bf16.mxu1 %v12463_v5 }
 0x6d2   : > { %11032 = vmatpush3.bf16.msra.mxu1 %v12464_v7 }
 0x6d3   : > { %11033 = vmatprep.subr.bf16.mxu1 %v12465_v8 }
 0x6d6   : > { %11034 = vmatpush3.bf16.msra.mxu1 %v12466_v10 }
 0x715   : > { %v8412_v49 = vpop.f32.mrb[0].mxu0 }
 0x716   : > { %v11062_v48 = vadd.f32 %v8412_v49, %v8290_v52  ;;  %v8414_v43 = vpop.f32.mrb[1].mxu0 }
 0x717   : > { %v11064_v25 = vadd.f32 %v8414_v43, %v8292_v30  ;;  %v8416_v13 = vpop.f32.mrb[2].mxu0 }
 0x718   : > { %v8583_v37 = vmax.f32 %v11062_v48, 0.0  ;;  %v8417_v29 = vpop.f32.mrb[3].mxu0 }
 0x719   : > { %v8584_v38 = vmax.f32 %v11064_v25, 0.0  ;;  %v12467_v29 = vld [vmem:[#allocation17 + $0x70] sm:$0xff]  }
 0x71a   : > { %v8587_v39 = vpack.c.bf16 %v8583_v37, %v8583_v37  ;;  %11035 = vmatprep.subr.bf16.mxu1 %v12467_v29 }
 0x71b   : > { %v8588_v1 = vpack.c.bf16 %v8584_v38, %v8584_v38  ;;  %v12468_v38 = vld [vmem:[#allocation17 + $0x30] sm:$0xff]  }
 0x71c   : > { %11036 = vmatpush3.bf16.msra.mxu1 %v12468_v38 }
 0x71d   : > { %9019 = vmatprep.mubr.bf16.mxu0 %v8588_v1  ;;  %v12470_v1 = vld [vmem:[#allocation17 + $0x38] sm:$0xff]   ;;  %11037 = vmatprep.subr.bf16.mxu1 %v12469_v41 }
 0x71e   : > { %9020 = vmatmul.mubr.bf16.vlgmr.msra.gmra.mrb[4].mxu0 %v8587_v39 }
 0x71f   : > { %9029 = vmatpush1.bf16.msra.mxu0 %v12407_v55  ;;  %v8664_v55 = vrot.slane %v8655_v0, %v14105_v3 }
 0x720   : > { %9030 = vmatprep.subr.bf16.mxu0 %v12412_v17  ;;  %11038 = vmatpush3.bf16.msra.mxu1 %v12470_v1 }
 0x723   : > { %9031 = vmatpush1.bf16.msra.mxu0 %v12410_v45 }
 0x724   : > { %9032 = vmatprep.subr.bf16.mxu0 %v12415_v63 }
 0x727   : > { %9033 = vmatpush1.bf16.msra.mxu0 %v12413_v59 }
 0x728   : > { %9034 = vmatprep.subr.bf16.mxu0 %v12418_v58 }
 0x72b   : > { %9035 = vmatpush1.bf16.msra.mxu0 %v12416_v27 }
 0x72c   : > { %9036 = vmatprep.subr.bf16.mxu0 %v12421_v4 }
 0x72f   : > { %9037 = vmatpush1.bf16.msra.mxu0 %v12419_v6 }
 0x730   : > { %9038 = vmatprep.subr.bf16.mxu0 %v12424_v34 }
 0x733   : > { %9039 = vmatpush1.bf16.msra.mxu0 %v12422_v9 }
 0x734   : > { %9040 = vmatprep.subr.bf16.mxu0 %v12427_v44 }
 0x737   : > { %9041 = vmatpush1.bf16.msra.mxu0 %v12425_v28 }
 0x738   : > { %9042 = vmatprep.subr.bf16.mxu0 %v12430_v14 }
 0x73b   : > { %9043 = vmatpush1.bf16.msra.mxu0 %v12428_v15 }
 0x73c   : > { %9044 = vmatprep.subr.bf16.mxu0 %v12433_v16 }
 0x73f   : > { %9045 = vmatpush1.bf16.msra.mxu0 %v12431_v31 }
 0x740   : > { %9046 = vmatprep.subr.bf16.mxu0 %v12436_v32 }
 0x743   : > { %9047 = vmatpush1.bf16.msra.mxu0 %v12434_v18 }
 0x744   : > { %9048 = vmatprep.subr.bf16.mxu0 %v12439_v46 }
 0x747   : > { %9049 = vmatpush1.bf16.msra.mxu0 %v12437_v19 }
 0x748   : > { %9050 = vmatprep.subr.bf16.mxu0 %v12442_v2 }
 0x74b   : > { %9051 = vmatpush1.bf16.msra.mxu0 %v12440_v20 }
 0x74c   : > { %9052 = vmatprep.subr.bf16.mxu0 %v12445_v21 }
 0x74f   : > { %9053 = vmatpush1.bf16.msra.mxu0 %v12443_v35 }
 0x750   : > { %9054 = vmatprep.subr.bf16.mxu0 %v12448_v22 }
 0x753   : > { %9055 = vmatpush1.bf16.msra.mxu0 %v12446_v23 }
 0x754   : > { %9056 = vmatprep.subr.bf16.mxu0 %v12451_v24 }
 0x757   : > { %9057 = vmatpush1.bf16.msra.mxu0 %v12449_v42 }
 0x758   : > { %9058 = vmatprep.subr.bf16.mxu0 %v12454_v40 }
 0x75b   : > { %9059 = vmatpush1.bf16.msra.mxu0 %v12452_v47 }
 0x794   : > { %v8576_v61 = vpop.f32.mrb[4].mxu1 }
 0x795   : > { %v11065_v50 = vadd.f32 %v8576_v61, %v6966_v53  ;;  %v8578_v52 = vpop.f32.mrb[5].mxu1 }
 0x796   : > { %v11066_v30 = vadd.f32 %v8578_v52, %v6970_v56  ;;  %v8580_v49 = vpop.f32.mrb[6].mxu1 }
 0x797   : > { %v8585_v48 = vmax.f32 %v11065_v50, 0.0  ;;  %v8581_v43 = vpop.f32.mrb[7].mxu1 }
 0x798   : > { %v8586_v25 = vmax.f32 %v11066_v30, 0.0 }
 0x799   : > { %v8589_v37 = vpack.c.bf16 %v8585_v48, %v8585_v48 }
 0x79a   : > { %v8590_v13 = vpack.c.bf16 %v8586_v25, %v8586_v25 }
 0x79c   : > { %9060 = vmatprep.mubr.bf16.mxu0 %v8590_v13 }
 0x79d   : > { %9061 = vmatmul.mubr.bf16.vlgmr.msra.gmra.mrb[4].mxu0 %v8589_v37 }
 0x870   : > { %v9062_v39 = vpop.f32.mrb[4].mxu0 }
 0x871   : > { %v11067_v17 = vadd.f32 %v9062_v39, %v8660_v60  ;;  %v9064_v51 = vpop.f32.mrb[5].mxu0 }
 0x872   : > { %v11068_v57 = vadd.f32 %v9064_v51, %v8664_v55  ;;  %v9066_v11 = vpop.f32.mrb[6].mxu0 }
 0x873   : > { %v9069_v45 = vmax.f32 %v11067_v17, 0.0  ;;  %v9067_v63 = vpop.f32.mrb[7].mxu0 }
 0x874   : > { %v9070_v54 = vmax.f32 %v11068_v57, 0.0 }
 0x875   : > { %v9071_v59 = vpack.c.bf16 %v9069_v45, %v9069_v45 }
 0x876   : > { %v9072_v36 = vpack.c.bf16 %v9070_v54, %v9070_v54 }
 0x878   : > { %9240 = vmatprep.mubr.bf16.mxu1 %v9072_v36 }
 0x879   : > { %9241 = vmatmul.mubr.bf16.vlgmr.msra.gmra.mrb[8].mxu1 %v9071_v59 }
 0x94c   : > { %v11039_v58 = vpop.f32.mrb[8].mxu1 }
 0x94d   : > { %v11040_v62 = vpop.f32.mrb[9].mxu1 }
 0x94e   : > { %v11041_v27 = vadd.f32 %v11040_v62, %v11039_v58  ;;  %v11042_v4 = vpop.f32.mrb[10].mxu1 }
 0x94f   : > { %v11043_v33 = vpop.f32.mrb[11].mxu1 }
 0x950   : > { %v9243_v26 = vadd.f32 %v11041_v27, %v10998_v12 }
 0x952   : > { %9248 = vst [vmem:[#allocation20] sm:$0x3] %v9243_v26 }
 0x953 PF: > { %p11180_p11 = scmp.eq.s32.totalorder %s12972_s23, 3  ;;  %s12880_s8 = smov [#allocation20]  }
 0x954   : > { %s9258_s6 = sshll.u32 %s12880_s8, 4  ;;  %s9259_s6 = int_to_ptr.vmem [resolvable:$true] %s9258_s6 }
 0x955   : > { %s12757_s24 = scalar_lea.vmem %s9259_s6, 32  ;;  %p12764_p5 = scmp.lt.s32.totalorder %s9259_s6, %s9259_s6 }
 0x956   : > { %p12758_p12 = scmp.ne.s32.totalorder %s9259_s6, %s12757_s24  ;;  %p12765_p2 = scmp.lt.s32.totalorder %s12757_s24, %s12757_s24 }
 0x958   : > { %p12759_p4 = pnand %p12758_p12, %p11180_p11  ;;  %p12766_p6 = por %p12765_p2, %p12764_p5 }
 0x95a   : > { %p12760_p10 = pneg %p12759_p4 }
 0x95c   : > { %p12767_p9 = pnand %p12766_p6, %p12760_p10 }
 0x95e   : > { %12770 = shalt.err (!%p12767_p9)
}
 0x95f   : > { %s14542_s28 = sld [smem:[#allocation39_spill]] }
 0x965   : > { %s12771_s27 = scalar_lea.hbm %s14542_s28, 32 }
 0x966   : > { %p12772_p1 = scmp.ne.s32.totalorder %s14542_s28, %s12771_s27  ;;  %p12777_p13 = scmp.lt.u32.totalorder %s12771_s27, %s14542_s28 }
 0x968   : > { %p12773_p7 = pnand %p12772_p1, %p11180_p11 }
 0x96a   : > { %p12774_p0 = pneg %p12773_p7 }
 0x96c   : > { %p12779_p8 = pnand %p12777_p13, %p12774_p0 }
 0x96e   : > { %12782 = shalt.err (!%p12779_p8)
}
 0x96f   : > { %11130 = dma.vmem_to_hbm [thread:$0]  (%p11180_p11), %s9259_s6, 32, %s14542_s28, [#allocation5]  }
 0x970   : > { %12832 = dma.done.wait (%p11180_p11), [#allocation5], 32  }
 0x971   : > { %12834 = vsyncadd (%p11180_p11), [#allocation5], 4294967264 }
 0x972 PF: > { %s14543_s0 = sld [smem:[#allocation30_spill]]  ;;  %s14544_s19 = sld [smem:[#allocation28_spill]] }
 0x973   : > { %s14545_s13 = sld [smem:[#allocation32_spill]]  ;;  %s14546_s26 = sld [smem:[#allocation31_spill]] }
 0x974   : > { %s14547_s17 = smov %s12841_s18  ;;  %s14550_s20 = smov %s12853_s21 }
 0x978   : > { %s32_s22 = sadd.s32 1, %s14543_s0   ;;  %s14548_s18 = smov %s14544_s19 }
 0x979   : > { %p29_p3 = scmp.ge.s32.totalorder %s32_s22, 6   ;;  %s14549_s19 = smov %s14545_s13 }
 0x97a   : > { %s14551_s21 = smov %s14546_s26 }
 0x97b   :  { %31 = sbr.rel (!%p29_p3) target bundleno = 19 (0x13), region = 175 }
 0x982   :  { %9271 = vsyncpa [#allocation4], 1 }
 0x983   :  { %9273 = vsyncpa [#allocation4 + $0x1], 1 }
 0x984   :  { %9274 = vsyncpa [#allocation7], 1 }
 0x985   :  { %9276 = vsyncpa [#allocation7 + $0x1], 1 }
 0x986   :  { %9277 = vsyncpa [#allocation10], 1 }
 0x987   :  { %9278 = vsyncpa [#allocation13], 1 }
 0x988   :  { %9279 = vsyncpa [#allocation16], 1 }
 0x989   :  { %9280 = vsyncpa [#allocation19], 1 }
 0x98a   :  { %9281 = vsyncpa [#allocation5], 1 }
 0x98b   :  { %9283 = vsyncpa [#allocation5 + $0x1], 1 }

</bundles_post_ra>
